<compile_context>
chip_gen: v6e
topology: v6e:2x2x1
jax: 0.10.0
libtpu: 0.0.40
codegen_flags: <defaults>
</compile_context>

<pallas_src>
import functools

import jax
import jax.numpy as jnp
from jax.experimental import pallas as pl
from jax.experimental.pallas import tpu as pltpu

ACT_DTYPE = jnp.bfloat16          # activations / folded conv weights in HBM
VMEM_LIMIT = 64 * 1024 * 1024     # explicit scoped-VMEM cap (<= v7x physical 64 MiB)
_ROW_BUDGET = 20 * 1024 * 1024    # VMEM budget for the row-tiled matmul pipelines


def _pick_row_tile(M, row_bytes):
    """Row tile for the 1x1-conv matmuls.

    Mem-bound regime => as large as a double-buffered ~20 MiB VMEM budget allows
    (capped at 1024 rows); additionally split so the grid has >= 2 steps whenever M
    allows, so both v7x TensorCores get work (no effect on single-TC v5e/v6e).
    """
    cap = max(8, (_ROW_BUDGET // max(2 * row_bytes, 1)) // 8 * 8)
    tm = min(1024, cap, M)
    if M > 16 and tm >= M:              # would be a single grid step -> split in two
        half = (M + 1) // 2
        tm = max(8, -(-half // 8) * 8)
    return tm


def _mm_params():
    return pltpu.CompilerParams(dimension_semantics=("parallel",),
                                vmem_limit_bytes=VMEM_LIMIT)


# ------------------------- 1x1 conv (matmul) kernels -------------------------

def _mm_shift_kernel(x_ref, w_ref, shift_ref, o_ref, *, relu):
    acc = jnp.dot(x_ref[...], w_ref[...], preferred_element_type=jnp.float32)
    y = acc + shift_ref[...]
    if relu:
        y = jnp.maximum(y, 0.0)
    o_ref[...] = y.astype(o_ref.dtype)


def _mm_shift_relu_residual_kernel(x_ref, w_ref, shift_ref, r_ref, o_ref):
    # y = relu( relu(x @ w + shift) + residual )
    # == conv3 + bn3 + ReLU followed by the unit's residual add + final ReLU
    # (matches the reference ordering), fused into one epilogue so the conv3 output
    # never makes a separate HBM round trip.
    acc = jnp.dot(x_ref[...], w_ref[...], preferred_element_type=jnp.float32)
    y = jnp.maximum(acc + shift_ref[...], 0.0)
    y = jnp.maximum(y + r_ref[...].astype(jnp.float32), 0.0)
    o_ref[...] = y.astype(o_ref.dtype)


def _mm_dual_kernel(x_ref, w1_ref, s1_ref, w2_ref, o1_ref, o2_ref):
    # Fused conv1(+bn1+ReLU) and 1x1 projection shortcut: both read the same x tile,
    # so x is pulled from HBM once instead of twice per channel-changing unit.
    x = x_ref[...]
    y1 = jnp.dot(x, w1_ref[...], preferred_element_type=jnp.float32) + s1_ref[...]
    o1_ref[...] = jnp.maximum(y1, 0.0).astype(o1_ref.dtype)
    y2 = jnp.dot(x, w2_ref[...], preferred_element_type=jnp.float32)
    o2_ref[...] = y2.astype(o2_ref.dtype)


def matmul_shift(x, w, shift, *, relu, residual=None):
    """(x @ w) + shift (+ ReLU) [+ optionally fused residual add + final ReLU].

    x: (M, K) bf16, w: (K, Cout) bf16, shift: (Cout,) f32, residual: (M, Cout) or None.
    pl.cdiv row tiling; Pallas masks the uneven last tile (no pad/slice glue).
    """
    M, K = x.shape
    Cout = w.shape[1]
    row_bytes = (K + Cout + (Cout if residual is not None else 0)) * x.dtype.itemsize
    tm = _pick_row_tile(M, row_bytes)
    grid = (pl.cdiv(M, tm),)
    x_spec = pl.BlockSpec((tm, K), lambda i: (i, 0))
    w_spec = pl.BlockSpec((K, Cout), lambda i: (0, 0))
    s_spec = pl.BlockSpec((1, Cout), lambda i: (0, 0))
    o_spec = pl.BlockSpec((tm, Cout), lambda i: (i, 0))
    if residual is None:
        return pl.pallas_call(
            functools.partial(_mm_shift_kernel, relu=relu),
            out_shape=jax.ShapeDtypeStruct((M, Cout), x.dtype),
            grid=grid,
            in_specs=[x_spec, w_spec, s_spec],
            out_specs=o_spec,
            compiler_params=_mm_params(),
        )(x, w, shift.reshape(1, Cout))
    r_spec = pl.BlockSpec((tm, Cout), lambda i: (i, 0))
    return pl.pallas_call(
        _mm_shift_relu_residual_kernel,
        out_shape=jax.ShapeDtypeStruct((M, Cout), x.dtype),
        grid=grid,
        in_specs=[x_spec, w_spec, s_spec, r_spec],
        out_specs=o_spec,
        compiler_params=_mm_params(),
    )(x, w, shift.reshape(1, Cout), residual)


def conv1x1(x, w, shift, *, stride=1, relu=True, residual=None):
    """1x1x1 conv (+ optional stride) + folded-BN shift (+ ReLU / fused residual)."""
    if stride > 1:
        # TODO(synk): fold the stride into a BlockSpec index_map over a phase-
        # decomposed view instead of materializing the strided subset (rare path:
        # only channel-changing units with stride > 1 reach this).
        x = x[:, ::stride, ::stride, ::stride, :]
    N, D, H, W, Cin = x.shape
    Cout = w.shape[1]
    res2d = None if residual is None else residual.reshape(-1, Cout)
    y = matmul_shift(x.reshape(-1, Cin), w, shift, relu=relu, residual=res2d)
    return y.reshape(N, D, H, W, Cout)


def conv1x1_with_projection(x, w1, shift1, w2):
    """Fused conv1(+bn1+ReLU) and 1x1 projection shortcut (stride 1): one pass over x.

    Returns (relu(x @ w1 + shift1), x @ w2)."""
    N, D, H, W, Cin = x.shape
    C1, C2 = w1.shape[1], w2.shape[1]
    x2d = x.reshape(-1, Cin)
    M = x2d.shape[0]
    row_bytes = (Cin + C1 + C2) * x.dtype.itemsize
    tm = _pick_row_tile(M, row_bytes)
    grid = (pl.cdiv(M, tm),)
    y1, y2 = pl.pallas_call(
        _mm_dual_kernel,
        out_shape=(jax.ShapeDtypeStruct((M, C1), x.dtype),
                   jax.ShapeDtypeStruct((M, C2), x.dtype)),
        grid=grid,
        in_specs=[pl.BlockSpec((tm, Cin), lambda i: (i, 0)),
                  pl.BlockSpec((Cin, C1), lambda i: (0, 0)),
                  pl.BlockSpec((1, C1), lambda i: (0, 0)),
                  pl.BlockSpec((Cin, C2), lambda i: (0, 0))],
        out_specs=(pl.BlockSpec((tm, C1), lambda i: (i, 0)),
                   pl.BlockSpec((tm, C2), lambda i: (i, 0))),
        compiler_params=_mm_params(),
    )(x2d, w1, shift1.reshape(1, C1), w2)
    return y1.reshape(N, D, H, W, C1), y2.reshape(N, D, H, W, C2)


# ------------------------- 3x3x3 conv (tap-accumulating) -------------------------

def _conv3x3x3_kernel(x_ref, w_ref, shift_ref, o_ref, acc_ref, *, stride, ho, wo, hq):
    kd = pl.program_id(2)
    last = pl.num_programs(2) - 1

    @pl.when(kd == 0)
    def _():
        acc_ref[...] = jnp.zeros_like(acc_ref)

    wk = w_ref[kd]                    # (9, Cin, Cout) slice of the VMEM-resident filter
    acc = acc_ref[...]
    # 9 in-plane taps, unrolled with static, contiguous slices of the phase-decomposed
    # plane (rows are laid out as [(h_phase * s + w_phase) * Hq + hq_index]).
    for kh in range(3):
        bh, ah = kh % stride, kh // stride
        for kw in range(3):
            bw, aw = kw % stride, kw // stride
            row0 = (bh * stride + bw) * hq + ah
            patch = x_ref[0, 0, row0:row0 + ho, aw:aw + wo, :]      # (ho, wo, Cin)
            acc = acc + jnp.dot(patch.reshape(ho * wo, -1),
                                wk[kh * 3 + kw],
                                preferred_element_type=jnp.float32)

    @pl.when(kd < last)
    def _():
        acc_ref[...] = acc            # skip the dead writeback on the final depth tap

    @pl.when(kd == last)
    def _():
        y = jnp.maximum(acc + shift_ref[...], 0.0)
        o_ref[0, 0] = y.reshape(ho, wo, -1).astype(o_ref.dtype)


def conv3x3x3(x, w, shift, *, stride):
    """3x3x3 conv (padding=1, given stride) + folded-BN shift + ReLU.

    A single pallas_call accumulates all 27 taps in a VMEM f32 scratch: the last grid
    axis runs over the 3 depth taps ("arbitrary"), the 9 in-plane taps are unrolled
    inside the body.  The input is phase-decomposed along H/W in the wrapper so that
    strided convs also reduce to static contiguous in-kernel slices (for stride=1 the
    decomposition is a pure reshape, no copy).  No 27x im2col matrix ever hits HBM, and
    the full filter lives in VMEM for the whole call (constant-index BlockSpec).
    """
    N, D, H, W, Cin = x.shape
    Cout = w.shape[-1]
    s = stride
    Do, Ho, Wo = (D - 1) // s + 1, (H - 1) // s + 1, (W - 1) // s + 1
    Dp, Hp, Wp = D + 2, H + 2, W + 2
    Hq, Wq = -(-Hp // s), -(-Wp // s)

    pad_h, pad_w = Hq * s - Hp, Wq * s - Wp
    xp = jnp.pad(x, ((0, 0), (1, 1), (1, 1 + pad_h), (1, 1 + pad_w), (0, 0)))
    if s == 1:
        xph = xp                                          # (N, Dp, Hp, Wp, Cin)
    else:
        xph = (xp.reshape(N, Dp, Hq, s, Wq, s, Cin)
                 .transpose(0, 1, 3, 5, 2, 4, 6)
                 .reshape(N, Dp, s * s * Hq, Wq, Cin))    # one copy, strided layers only
    wr = w.reshape(3, 9, Cin, Cout)

    kern = functools.partial(_conv3x3x3_kernel, stride=s, ho=Ho, wo=Wo, hq=Hq)
    return pl.pallas_call(
        kern,
        out_shape=jax.ShapeDtypeStruct((N, Do, Ho, Wo, Cout), x.dtype),
        grid=(N, Do, 3),
        in_specs=[
            pl.BlockSpec((1, 1, s * s * Hq, Wq, Cin),
                         lambda n, do, kd: (n, do * s + kd, 0, 0, 0)),
            # whole 3x3x3 filter VMEM-resident: constant block index => one HBM fetch
            pl.BlockSpec((3, 9, Cin, Cout), lambda n, do, kd: (0, 0, 0, 0)),
            pl.BlockSpec((1, Cout), lambda n, do, kd: (0, 0)),
        ],
        out_specs=pl.BlockSpec((1, 1, Ho, Wo, Cout),
                               lambda n, do, kd: (n, do, 0, 0, 0)),
        scratch_shapes=[pltpu.VMEM((Ho * Wo, Cout), jnp.float32)],
        compiler_params=pltpu.CompilerParams(
            dimension_semantics=("parallel", "parallel", "arbitrary"),
            vmem_limit_bytes=VMEM_LIMIT),
    )(xph, wr, shift.reshape(1, Cout))


# ------------------------- maxpool shortcut & spatial mean -------------------------

def maxpool3d(x, s):
    """MaxPool3d(kernel=stride=s, padding=0) on NDHWC (non-overlapping aligned windows
    => reshape + reduce that XLA fuses into one pass; a Pallas kernel adds nothing)."""
    N, D, H, W, C = x.shape
    Do, Ho, Wo = D // s, H // s, W // s
    xr = x[:, :Do * s, :Ho * s, :Wo * s, :].reshape(N, Do, s, Ho, s, Wo, s, C)
    return xr.max(axis=(2, 4, 6))


def _mean_kernel(x_ref, o_ref, acc_ref, *, inv_s):
    j = pl.program_id(1)

    @pl.when(j == 0)
    def _():
        acc_ref[...] = jnp.zeros_like(acc_ref)

    acc_ref[...] += jnp.sum(x_ref[0].astype(jnp.float32), axis=0, keepdims=True)

    @pl.when(j == pl.num_programs(1) - 1)
    def _():
        o_ref[0] = (acc_ref[...] * inv_s).astype(o_ref.dtype)


def _mean_tile(s, cap=1024):
    if s <= cap:
        return s
    for t in range(cap, 7, -1):
        if s % t == 0 and t % 8 == 0:
            return t
    return s


def spatial_mean(x):
    """Mean over (D, H, W): (N, D, H, W, C) bf16 -> (N, C) f32, tiled over the spatial
    axis with an f32 VMEM accumulator."""
    N, D, H, W, C = x.shape
    S = D * H * W
    ts = _mean_tile(S)
    xr = x.reshape(N, S, C)
    out = pl.pallas_call(
        functools.partial(_mean_kernel, inv_s=1.0 / S),
        out_shape=jax.ShapeDtypeStruct((N, 1, C), jnp.float32),
        grid=(N, S // ts),
        in_specs=[pl.BlockSpec((1, ts, C), lambda n, j: (n, j, 0))],
        out_specs=pl.BlockSpec((1, 1, C), lambda n, j: (n, 0, 0)),
        scratch_shapes=[pltpu.VMEM((1, C), jnp.float32)],
        compiler_params=pltpu.CompilerParams(
            dimension_semantics=("parallel", "arbitrary"),
            vmem_limit_bytes=VMEM_LIMIT),
    )(xr)
    return out.reshape(N, C)


# ----------------------------- parameters -----------------------------

def xavier_uniform(key, shape, fan_in, fan_out):
    bound = (6.0 / (fan_in + fan_out)) ** 0.5
    return jax.random.uniform(key, shape, jnp.float32, -bound, bound)


def bn_fold(c, eps=1e-5):
    # inference-mode BatchNorm with default running stats / affine params
    gamma = jnp.ones((c,), jnp.float32)
    beta = jnp.zeros((c,), jnp.float32)
    mean = jnp.zeros((c,), jnp.float32)
    var = jnp.ones((c,), jnp.float32)
    scale = gamma / jnp.sqrt(var + eps)
    shift = beta - mean * scale
    return scale, shift


def init_unit_params(key, cin, cout, stride):
    assert cout % 4 == 0
    cb = cout // 4
    k1, k2, k3, k4 = jax.random.split(key, 4)
    s1, b1 = bn_fold(cb)
    s2, b2 = bn_fold(cb)
    s3, b3 = bn_fold(cout)
    p = {
        # BN scale folded into the conv weights at build time; weights stored bf16
        # (MXU-native), kernels only add the f32 shift.
        "conv1_w": (xavier_uniform(k1, (cin, cb), cin, cb) * s1).astype(ACT_DTYPE),
        "conv2_w": (xavier_uniform(k2, (3, 3, 3, cb, cb), cb * 27, cb * 27)
                    * s2).astype(ACT_DTYPE),
        "conv3_w": (xavier_uniform(k3, (cb, cout), cb, cout) * s3).astype(ACT_DTYPE),
        "bn1_shift": b1, "bn2_shift": b2, "bn3_shift": b3,
    }
    if cin != cout:
        p["short_w"] = xavier_uniform(k4, (cin, cout), cin, cout).astype(ACT_DTYPE)
    return p


def build_model(key, last_channel, channels, strides, units):
    cfgs = []
    last_channels = [last_channel] + channels[:-1]
    for lc, ch, st, un in zip(last_channels, channels, strides, units):
        if un == 1:
            triples = [(lc, ch, st)]
        else:
            assert un >= 2
            triples = [(lc, ch, 1)] + [(ch, ch, 1)] * (un - 2) + [(ch, ch, st)]
        cfgs.extend(triples)
    params = []
    for cin, cout, st in cfgs:
        key, sub = jax.random.split(key)
        params.append((init_unit_params(sub, cin, cout, st), st))
    return params


# ------------------------------ forward ------------------------------

def unit_forward(x, p, stride):
    Cin = x.shape[-1]
    Cout = p["conv3_w"].shape[-1]
    if Cin == Cout:
        shortcut = x if stride == 1 else maxpool3d(x, stride)
        h = conv1x1(x, p["conv1_w"], p["bn1_shift"], relu=True)
    elif stride == 1:
        # projection shortcut fused into conv1's pallas_call (x read from HBM once)
        h, shortcut = conv1x1_with_projection(x, p["conv1_w"], p["bn1_shift"],
                                              p["short_w"])
    else:
        shortcut = conv1x1(x, p["short_w"], jnp.zeros((Cout,), jnp.float32),
                           stride=stride, relu=False)
        h = conv1x1(x, p["conv1_w"], p["bn1_shift"], relu=True)
    # main branch: conv1+bn1+relu -> conv2+bn2+relu -> conv3+bn3+relu (+add+relu fused)
    h = conv3x3x3(h, p["conv2_w"], p["bn2_shift"], stride=stride)
    out = conv1x1(h, p["conv3_w"], p["bn3_shift"], relu=True, residual=shortcut)
    return out


def bottleneck_resnet3d_forward(x_ncdhw, params):
    # PyTorch NCDHW -> channels-last NDHWC; activations carried in bf16 between
    # kernels (mem-bound network), all accumulation in f32.
    x = jnp.transpose(x_ncdhw, (0, 2, 3, 4, 1)).astype(ACT_DTYPE)
    for p, stride in params:
        x = unit_forward(x, p, stride)
    return spatial_mean(x)  # == torch.mean(x, dim=(-3, -2, -1)) -> (N, C_last), f32


# -------------------------------- main --------------------------------

if __name__ == "__main__":
    key = jax.random.PRNGKey(0)
    kx, kp = jax.random.split(key)

    # small config: last_channel=8, channels=[16, 32], strides=[1, 2], units=[2, 2]
    # exercises the fused conv1+projection shortcut, identity shortcut, maxpool
    # shortcut and the strided 3x3x3 conv.
    N, C, D, H, W = 2, 8, 8, 8, 8
    x = jax.random.normal(kx, (N, C, D, H, W), jnp.float32)

    params = build_model(kp, last_channel=8, channels=[16, 32],
                         strides=[1, 2], units=[2, 2])

    fwd = jax.jit(lambda inp: bottleneck_resnet3d_forward(inp, params))
    out = jax.block_until_ready(fwd(x))
    assert out.shape == (N, 32), out.shape
    assert out.dtype == jnp.float32, out.dtype
    assert bool(jnp.all(jnp.isfinite(out)))
    print("KERNEL_OK")
</pallas_src>

<mosaic_0001>
module attributes {stable_mosaic.version = 11 : i64} {
  func.func @_mm_dual_kernel(%arg0: i32, %arg1: memref<512x8xbf16, #tpu.memory_space<vmem>>, %arg2: memref<8x4xbf16, #tpu.memory_space<vmem>>, %arg3: memref<1x4xf32, #tpu.memory_space<vmem>>, %arg4: memref<8x16xbf16, #tpu.memory_space<vmem>>, %arg5: memref<512x4xbf16, #tpu.memory_space<vmem>>, %arg6: memref<512x16xbf16, #tpu.memory_space<vmem>>) attributes {dimension_semantics = [#tpu.dimension_semantics<parallel>], iteration_bounds = array<i64: 2>, scalar_prefetch = 0 : i64, scratch_operands = 0 : i64, tpu.core_type = #tpu.core_type<tc>, window_params = [{transform_indices = @transform_0, window_bounds = array<i64: 512, 8>}, {pipeline_mode = #tpu.pipeline_mode<synchronous>, transform_indices = @transform_1, window_bounds = array<i64: 8, 4>}, {pipeline_mode = #tpu.pipeline_mode<synchronous>, transform_indices = @transform_2, window_bounds = array<i64: 1, 4>}, {pipeline_mode = #tpu.pipeline_mode<synchronous>, transform_indices = @transform_3, window_bounds = array<i64: 8, 16>}, {transform_indices = @transform_4, window_bounds = array<i64: 512, 4>}, {transform_indices = @transform_5, window_bounds = array<i64: 512, 16>}]} {
    %c0 = arith.constant 0 : index
    %c0_0 = arith.constant 0 : index
    %0 = vector.load %arg1[%c0, %c0_0] : memref<512x8xbf16, #tpu.memory_space<vmem>>, vector<512x8xbf16>
    %c0_1 = arith.constant 0 : index
    %c0_2 = arith.constant 0 : index
    %1 = vector.load %arg2[%c0_1, %c0_2] : memref<8x4xbf16, #tpu.memory_space<vmem>>, vector<8x4xbf16>
    %cst = arith.constant dense<0.000000e+00> : vector<512x4xf32>
    %2 = tpu.matmul %0, %1, %cst {dimension_numbers = #tpu.dot_dimension_numbers<[1], [0], [0], [1], [0, 0, 1, 1], [], []>} : vector<512x8xbf16>, vector<8x4xbf16>, vector<512x4xf32> -> vector<512x4xf32>
    %c0_3 = arith.constant 0 : index
    %c0_4 = arith.constant 0 : index
    %3 = vector.load %arg3[%c0_3, %c0_4] : memref<1x4xf32, #tpu.memory_space<vmem>>, vector<1x4xf32>
    %4 = vector.broadcast %3 : vector<1x4xf32> to vector<512x4xf32>
    %5 = arith.addf %2, %4 : vector<512x4xf32>
    %cst_5 = arith.constant 0.000000e+00 : f32
    %6 = vector.broadcast %cst_5 : f32 to vector<512x4xf32>
    %7 = arith.maximumf %5, %6 : vector<512x4xf32>
    %8 = arith.truncf %7 : vector<512x4xf32> to vector<512x4xbf16>
    %c0_6 = arith.constant 0 : index
    %c0_7 = arith.constant 0 : index
    %9 = vector.load %arg5[%c0_6, %c0_7] : memref<512x4xbf16, #tpu.memory_space<vmem>>, vector<512x4xbf16>
    tpu.vector_store %arg5[%c0_6, %c0_7], %8 {strides = array<i32>} : memref<512x4xbf16, #tpu.memory_space<vmem>>, vector<512x4xbf16>,
    %c0_8 = arith.constant 0 : index
    %c0_9 = arith.constant 0 : index
    %10 = vector.load %arg4[%c0_8, %c0_9] : memref<8x16xbf16, #tpu.memory_space<vmem>>, vector<8x16xbf16>
    %cst_10 = arith.constant dense<0.000000e+00> : vector<512x16xf32>
    %11 = tpu.matmul %0, %10, %cst_10 {dimension_numbers = #tpu.dot_dimension_numbers<[1], [0], [0], [1], [0, 0, 1, 1], [], []>} : vector<512x8xbf16>, vector<8x16xbf16>, vector<512x16xf32> -> vector<512x16xf32>
    %12 = arith.truncf %11 : vector<512x16xf32> to vector<512x16xbf16>
    %c0_11 = arith.constant 0 : index
    %c0_12 = arith.constant 0 : index
    %13 = vector.load %arg6[%c0_11, %c0_12] : memref<512x16xbf16, #tpu.memory_space<vmem>>, vector<512x16xbf16>
    tpu.vector_store %arg6[%c0_11, %c0_12], %12 {strides = array<i32>} : memref<512x16xbf16, #tpu.memory_space<vmem>>, vector<512x16xbf16>,
    return
  }
  func.func @transform_0(%arg0: i32) -> (i32, i32) {
    %c0_i32 = arith.constant 0 : i32
    %c0_i32_0 = arith.constant 0 : i32
    return %arg0, %c0_i32 : i32, i32
  }
  func.func @transform_1(%arg0: i32) -> (i32, i32) {
    %c0_i32 = arith.constant 0 : i32
    %c0_i32_0 = arith.constant 0 : i32
    %c0_i32_1 = arith.constant 0 : i32
    return %c0_i32, %c0_i32_0 : i32, i32
  }
  func.func @transform_2(%arg0: i32) -> (i32, i32) {
    %c0_i32 = arith.constant 0 : i32
    %c0_i32_0 = arith.constant 0 : i32
    %c0_i32_1 = arith.constant 0 : i32
    return %c0_i32, %c0_i32_0 : i32, i32
  }
  func.func @transform_3(%arg0: i32) -> (i32, i32) {
    %c0_i32 = arith.constant 0 : i32
    %c0_i32_0 = arith.constant 0 : i32
    %c0_i32_1 = arith.constant 0 : i32
    return %c0_i32, %c0_i32_0 : i32, i32
  }
  func.func @transform_4(%arg0: i32) -> (i32, i32) {
    %c0_i32 = arith.constant 0 : i32
    %c0_i32_0 = arith.constant 0 : i32
    return %arg0, %c0_i32 : i32, i32
  }
  func.func @transform_5(%arg0: i32) -> (i32, i32) {
    %c0_i32 = arith.constant 0 : i32
    %c0_i32_0 = arith.constant 0 : i32
    return %arg0, %c0_i32 : i32, i32
  }
}

module attributes {stable_mosaic.version = 11 : i64} {
  func.func @_conv3x3x3_kernel(%arg0: i32, %arg1: i32, %arg2: i32, %arg3: memref<1x1x10x10x4xbf16, #tpu.memory_space<vmem>>, %arg4: memref<3x9x4x4xbf16, #tpu.memory_space<vmem>>, %arg5: memref<1x4xf32, #tpu.memory_space<vmem>>, %arg6: memref<1x1x8x8x4xbf16, #tpu.memory_space<vmem>>, %arg7: memref<64x4xf32, #tpu.memory_space<vmem>>) attributes {dimension_semantics = [#tpu.dimension_semantics<parallel>, #tpu.dimension_semantics<parallel>, #tpu.dimension_semantics<arbitrary>], iteration_bounds = array<i64: 2, 8, 3>, scalar_prefetch = 0 : i64, scratch_operands = 1 : i64, tpu.core_type = #tpu.core_type<tc>, window_params = [{transform_indices = @transform_0, window_bounds = array<i64: 1, 1, 10, 10, 4>}, {pipeline_mode = #tpu.pipeline_mode<synchronous>, transform_indices = @transform_1, window_bounds = array<i64: 3, 9, 4, 4>}, {pipeline_mode = #tpu.pipeline_mode<synchronous>, transform_indices = @transform_2, window_bounds = array<i64: 1, 4>}, {transform_indices = @transform_3, window_bounds = array<i64: 1, 1, 8, 8, 4>}]} {
    %c0_i32 = arith.constant 0 : i32
    %0 = arith.cmpi eq, %arg2, %c0_i32 : i32
    %1 = arith.extui %0 : i1 to i32
    %c0_i32_0 = arith.constant 0 : i32
    %2 = arith.cmpi ne, %1, %c0_i32_0 : i32
    scf.if %2 {
      %cst_59 = arith.constant 0.000000e+00 : f32
      %76 = vector.broadcast %cst_59 : f32 to vector<64x4xf32>
      %c0_60 = arith.constant 0 : index
      %c0_61 = arith.constant 0 : index
      %77 = vector.load %arg7[%c0_60, %c0_61] : memref<64x4xf32, #tpu.memory_space<vmem>>, vector<64x4xf32>
      tpu.vector_store %arg7[%c0_60, %c0_61], %76 {strides = array<i32>} : memref<64x4xf32, #tpu.memory_space<vmem>>, vector<64x4xf32>,
    } else {
    }
    %3 = arith.index_cast %arg2 : i32 to index
    %c0 = arith.constant 0 : index
    %c0_1 = arith.constant 0 : index
    %c0_2 = arith.constant 0 : index
    %4 = vector.load %arg4[%3, %c0, %c0_1, %c0_2] : memref<3x9x4x4xbf16, #tpu.memory_space<vmem>>, vector<1x9x4x4xbf16>
    %5 = vector.shape_cast %4 : vector<1x9x4x4xbf16> to vector<9x4x4xbf16>
    %c0_3 = arith.constant 0 : index
    %c0_4 = arith.constant 0 : index
    %6 = vector.load %arg7[%c0_3, %c0_4] : memref<64x4xf32, #tpu.memory_space<vmem>>, vector<64x4xf32>
    %c0_5 = arith.constant 0 : index
    %c0_6 = arith.constant 0 : index
    %c0_7 = arith.constant 0 : index
    %c0_8 = arith.constant 0 : index
    %c0_9 = arith.constant 0 : index
    %7 = vector.load %arg3[%c0_5, %c0_6, %c0_7, %c0_8, %c0_9] : memref<1x1x10x10x4xbf16, #tpu.memory_space<vmem>>, vector<1x1x8x8x4xbf16>
    %8 = vector.shape_cast %7 : vector<1x1x8x8x4xbf16> to vector<8x8x4xbf16>
    %9 = vector.shape_cast %8 : vector<8x8x4xbf16> to vector<64x4xbf16>
    %10 = vector.extract_strided_slice %5 {offsets = [0, 0, 0], sizes = [1, 4, 4], strides = [1, 1, 1]} : vector<9x4x4xbf16> to vector<1x4x4xbf16>
    %11 = vector.shape_cast %10 : vector<1x4x4xbf16> to vector<4x4xbf16>
    %cst = arith.constant dense<0.000000e+00> : vector<64x4xf32>
    %12 = tpu.matmul %9, %11, %cst {dimension_numbers = #tpu.dot_dimension_numbers<[1], [0], [0], [1], [0, 0, 1, 1], [], []>} : vector<64x4xbf16>, vector<4x4xbf16>, vector<64x4xf32> -> vector<64x4xf32>
    %13 = arith.addf %6, %12 : vector<64x4xf32>
    %c0_10 = arith.constant 0 : index
    %c0_11 = arith.constant 0 : index
    %c0_12 = arith.constant 0 : index
    %c1 = arith.constant 1 : index
    %c0_13 = arith.constant 0 : index
    %14 = vector.load %arg3[%c0_10, %c0_11, %c0_12, %c1, %c0_13] : memref<1x1x10x10x4xbf16, #tpu.memory_space<vmem>>, vector<1x1x8x8x4xbf16>
    %15 = vector.shape_cast %14 : vector<1x1x8x8x4xbf16> to vector<8x8x4xbf16>
    %16 = vector.shape_cast %15 : vector<8x8x4xbf16> to vector<64x4xbf16>
    %17 = vector.extract_strided_slice %5 {offsets = [1, 0, 0], sizes = [1, 4, 4], strides = [1, 1, 1]} : vector<9x4x4xbf16> to vector<1x4x4xbf16>
    %18 = vector.shape_cast %17 : vector<1x4x4xbf16> to vector<4x4xbf16>
    %cst_14 = arith.constant dense<0.000000e+00> : vector<64x4xf32>
    %19 = tpu.matmul %16, %18, %cst_14 {dimension_numbers = #tpu.dot_dimension_numbers<[1], [0], [0], [1], [0, 0, 1, 1], [], []>} : vector<64x4xbf16>, vector<4x4xbf16>, vector<64x4xf32> -> vector<64x4xf32>
    %20 = arith.addf %13, %19 : vector<64x4xf32>
    %c0_15 = arith.constant 0 : index
    %c0_16 = arith.constant 0 : index
    %c0_17 = arith.constant 0 : index
    %c2 = arith.constant 2 : index
    %c0_18 = arith.constant 0 : index
    %21 = vector.load %arg3[%c0_15, %c0_16, %c0_17, %c2, %c0_18] : memref<1x1x10x10x4xbf16, #tpu.memory_space<vmem>>, vector<1x1x8x8x4xbf16>
    %22 = vector.shape_cast %21 : vector<1x1x8x8x4xbf16> to vector<8x8x4xbf16>
    %23 = vector.shape_cast %22 : vector<8x8x4xbf16> to vector<64x4xbf16>
    %24 = vector.extract_strided_slice %5 {offsets = [2, 0, 0], sizes = [1, 4, 4], strides = [1, 1, 1]} : vector<9x4x4xbf16> to vector<1x4x4xbf16>
    %25 = vector.shape_cast %24 : vector<1x4x4xbf16> to vector<4x4xbf16>
    %cst_19 = arith.constant dense<0.000000e+00> : vector<64x4xf32>
    %26 = tpu.matmul %23, %25, %cst_19 {dimension_numbers = #tpu.dot_dimension_numbers<[1], [0], [0], [1], [0, 0, 1, 1], [], []>} : vector<64x4xbf16>, vector<4x4xbf16>, vector<64x4xf32> -> vector<64x4xf32>
    %27 = arith.addf %20, %26 : vector<64x4xf32>
    %c0_20 = arith.constant 0 : index
    %c0_21 = arith.constant 0 : index
    %c1_22 = arith.constant 1 : index
    %c0_23 = arith.constant 0 : index
    %c0_24 = arith.constant 0 : index
    %28 = vector.load %arg3[%c0_20, %c0_21, %c1_22, %c0_23, %c0_24] : memref<1x1x10x10x4xbf16, #tpu.memory_space<vmem>>, vector<1x1x8x8x4xbf16>
    %29 = vector.shape_cast %28 : vector<1x1x8x8x4xbf16> to vector<8x8x4xbf16>
    %30 = vector.shape_cast %29 : vector<8x8x4xbf16> to vector<64x4xbf16>
    %31 = vector.extract_strided_slice %5 {offsets = [3, 0, 0], sizes = [1, 4, 4], strides = [1, 1, 1]} : vector<9x4x4xbf16> to vector<1x4x4xbf16>
    %32 = vector.shape_cast %31 : vector<1x4x4xbf16> to vector<4x4xbf16>
    %cst_25 = arith.constant dense<0.000000e+00> : vector<64x4xf32>
    %33 = tpu.matmul %30, %32, %cst_25 {dimension_numbers = #tpu.dot_dimension_numbers<[1], [0], [0], [1], [0, 0, 1, 1], [], []>} : vector<64x4xbf16>, vector<4x4xbf16>, vector<64x4xf32> -> vector<64x4xf32>
    %34 = arith.addf %27, %33 : vector<64x4xf32>
    %c0_26 = arith.constant 0 : index
    %c0_27 = arith.constant 0 : index
    %c1_28 = arith.constant 1 : index
    %c1_29 = arith.constant 1 : index
    %c0_30 = arith.constant 0 : index
    %35 = vector.load %arg3[%c0_26, %c0_27, %c1_28, %c1_29, %c0_30] : memref<1x1x10x10x4xbf16, #tpu.memory_space<vmem>>, vector<1x1x8x8x4xbf16>
    %36 = vector.shape_cast %35 : vector<1x1x8x8x4xbf16> to vector<8x8x4xbf16>
    %37 = vector.shape_cast %36 : vector<8x8x4xbf16> to vector<64x4xbf16>
    %38 = vector.extract_strided_slice %5 {offsets = [4, 0, 0], sizes = [1, 4, 4], strides = [1, 1, 1]} : vector<9x4x4xbf16> to vector<1x4x4xbf16>
    %39 = vector.shape_cast %38 : vector<1x4x4xbf16> to vector<4x4xbf16>
    %cst_31 = arith.constant dense<0.000000e+00> : vector<64x4xf32>
    %40 = tpu.matmul %37, %39, %cst_31 {dimension_numbers = #tpu.dot_dimension_numbers<[1], [0], [0], [1], [0, 0, 1, 1], [], []>} : vector<64x4xbf16>, vector<4x4xbf16>, vector<64x4xf32> -> vector<64x4xf32>
    %41 = arith.addf %34, %40 : vector<64x4xf32>
    %c0_32 = arith.constant 0 : index
    %c0_33 = arith.constant 0 : index
    %c1_34 = arith.constant 1 : index
    %c2_35 = arith.constant 2 : index
    %c0_36 = arith.constant 0 : index
    %42 = vector.load %arg3[%c0_32, %c0_33, %c1_34, %c2_35, %c0_36] : memref<1x1x10x10x4xbf16, #tpu.memory_space<vmem>>, vector<1x1x8x8x4xbf16>
    %43 = vector.shape_cast %42 : vector<1x1x8x8x4xbf16> to vector<8x8x4xbf16>
    %44 = vector.shape_cast %43 : vector<8x8x4xbf16> to vector<64x4xbf16>
    %45 = vector.extract_strided_slice %5 {offsets = [5, 0, 0], sizes = [1, 4, 4], strides = [1, 1, 1]} : vector<9x4x4xbf16> to vector<1x4x4xbf16>
    %46 = vector.shape_cast %45 : vector<1x4x4xbf16> to vector<4x4xbf16>
    %cst_37 = arith.constant dense<0.000000e+00> : vector<64x4xf32>
    %47 = tpu.matmul %44, %46, %cst_37 {dimension_numbers = #tpu.dot_dimension_numbers<[1], [0], [0], [1], [0, 0, 1, 1], [], []>} : vector<64x4xbf16>, vector<4x4xbf16>, vector<64x4xf32> -> vector<64x4xf32>
    %48 = arith.addf %41, %47 : vector<64x4xf32>
    %c0_38 = arith.constant 0 : index
    %c0_39 = arith.constant 0 : index
    %c2_40 = arith.constant 2 : index
    %c0_41 = arith.constant 0 : index
    %c0_42 = arith.constant 0 : index
    %49 = vector.load %arg3[%c0_38, %c0_39, %c2_40, %c0_41, %c0_42] : memref<1x1x10x10x4xbf16, #tpu.memory_space<vmem>>, vector<1x1x8x8x4xbf16>
    %50 = vector.shape_cast %49 : vector<1x1x8x8x4xbf16> to vector<8x8x4xbf16>
    %51 = vector.shape_cast %50 : vector<8x8x4xbf16> to vector<64x4xbf16>
    %52 = vector.extract_strided_slice %5 {offsets = [6, 0, 0], sizes = [1, 4, 4], strides = [1, 1, 1]} : vector<9x4x4xbf16> to vector<1x4x4xbf16>
    %53 = vector.shape_cast %52 : vector<1x4x4xbf16> to vector<4x4xbf16>
    %cst_43 = arith.constant dense<0.000000e+00> : vector<64x4xf32>
    %54 = tpu.matmul %51, %53, %cst_43 {dimension_numbers = #tpu.dot_dimension_numbers<[1], [0], [0], [1], [0, 0, 1, 1], [], []>} : vector<64x4xbf16>, vector<4x4xbf16>, vector<64x4xf32> -> vector<64x4xf32>
    %55 = arith.addf %48, %54 : vector<64x4xf32>
    %c0_44 = arith.constant 0 : index
    %c0_45 = arith.constant 0 : index
    %c2_46 = arith.constant 2 : index
    %c1_47 = arith.constant 1 : index
    %c0_48 = arith.constant 0 : index
    %56 = vector.load %arg3[%c0_44, %c0_45, %c2_46, %c1_47, %c0_48] : memref<1x1x10x10x4xbf16, #tpu.memory_space<vmem>>, vector<1x1x8x8x4xbf16>
    %57 = vector.shape_cast %56 : vector<1x1x8x8x4xbf16> to vector<8x8x4xbf16>
    %58 = vector.shape_cast %57 : vector<8x8x4xbf16> to vector<64x4xbf16>
    %59 = vector.extract_strided_slice %5 {offsets = [7, 0, 0], sizes = [1, 4, 4], strides = [1, 1, 1]} : vector<9x4x4xbf16> to vector<1x4x4xbf16>
    %60 = vector.shape_cast %59 : vector<1x4x4xbf16> to vector<4x4xbf16>
    %cst_49 = arith.constant dense<0.000000e+00> : vector<64x4xf32>
    %61 = tpu.matmul %58, %60, %cst_49 {dimension_numbers = #tpu.dot_dimension_numbers<[1], [0], [0], [1], [0, 0, 1, 1], [], []>} : vector<64x4xbf16>, vector<4x4xbf16>, vector<64x4xf32> -> vector<64x4xf32>
    %62 = arith.addf %55, %61 : vector<64x4xf32>
    %c0_50 = arith.constant 0 : index
    %c0_51 = arith.constant 0 : index
    %c2_52 = arith.constant 2 : index
    %c2_53 = arith.constant 2 : index
    %c0_54 = arith.constant 0 : index
    %63 = vector.load %arg3[%c0_50, %c0_51, %c2_52, %c2_53, %c0_54] : memref<1x1x10x10x4xbf16, #tpu.memory_space<vmem>>, vector<1x1x8x8x4xbf16>
    %64 = vector.shape_cast %63 : vector<1x1x8x8x4xbf16> to vector<8x8x4xbf16>
    %65 = vector.shape_cast %64 : vector<8x8x4xbf16> to vector<64x4xbf16>
    %66 = vector.extract_strided_slice %5 {offsets = [8, 0, 0], sizes = [1, 4, 4], strides = [1, 1, 1]} : vector<9x4x4xbf16> to vector<1x4x4xbf16>
    %67 = vector.shape_cast %66 : vector<1x4x4xbf16> to vector<4x4xbf16>
    %cst_55 = arith.constant dense<0.000000e+00> : vector<64x4xf32>
    %68 = tpu.matmul %65, %67, %cst_55 {dimension_numbers = #tpu.dot_dimension_numbers<[1], [0], [0], [1], [0, 0, 1, 1], [], []>} : vector<64x4xbf16>, vector<4x4xbf16>, vector<64x4xf32> -> vector<64x4xf32>
    %69 = arith.addf %62, %68 : vector<64x4xf32>
    %c2_i32 = arith.constant 2 : i32
    %70 = arith.cmpi slt, %arg2, %c2_i32 : i32
    %71 = arith.extui %70 : i1 to i32
    %c0_i32_56 = arith.constant 0 : i32
    %72 = arith.cmpi ne, %71, %c0_i32_56 : i32
    scf.if %72 {
      %c0_59 = arith.constant 0 : index
      %c0_60 = arith.constant 0 : index
      %76 = vector.load %arg7[%c0_59, %c0_60] : memref<64x4xf32, #tpu.memory_space<vmem>>, vector<64x4xf32>
      tpu.vector_store %arg7[%c0_59, %c0_60], %69 {strides = array<i32>} : memref<64x4xf32, #tpu.memory_space<vmem>>, vector<64x4xf32>,
    } else {
    }
    %c2_i32_57 = arith.constant 2 : i32
    %73 = arith.cmpi eq, %arg2, %c2_i32_57 : i32
    %74 = arith.extui %73 : i1 to i32
    %c0_i32_58 = arith.constant 0 : i32
    %75 = arith.cmpi ne, %74, %c0_i32_58 : i32
    scf.if %75 {
      %c0_59 = arith.constant 0 : index
      %c0_60 = arith.constant 0 : index
      %76 = vector.load %arg5[%c0_59, %c0_60] : memref<1x4xf32, #tpu.memory_space<vmem>>, vector<1x4xf32>
      %77 = vector.broadcast %76 : vector<1x4xf32> to vector<64x4xf32>
      %78 = arith.addf %69, %77 : vector<64x4xf32>
      %cst_61 = arith.constant 0.000000e+00 : f32
      %79 = vector.broadcast %cst_61 : f32 to vector<64x4xf32>
      %80 = arith.maximumf %78, %79 : vector<64x4xf32>
      %81 = vector.shape_cast %80 : vector<64x4xf32> to vector<8x8x4xf32>
      %82 = arith.truncf %81 : vector<8x8x4xf32> to vector<8x8x4xbf16>
      %c0_62 = arith.constant 0 : index
      %c0_63 = arith.constant 0 : index
      %c0_64 = arith.constant 0 : index
      %c0_65 = arith.constant 0 : index
      %c0_66 = arith.constant 0 : index
      %83 = vector.load %arg6[%c0_62, %c0_63, %c0_64, %c0_65, %c0_66] : memref<1x1x8x8x4xbf16, #tpu.memory_space<vmem>>, vector<1x1x8x8x4xbf16>
      %84 = vector.shape_cast %83 : vector<1x1x8x8x4xbf16> to vector<8x8x4xbf16>
      %85 = vector.shape_cast %82 : vector<8x8x4xbf16> to vector<1x1x8x8x4xbf16>
      tpu.vector_store %arg6[%c0_62, %c0_63, %c0_64, %c0_65, %c0_66], %85 {strides = array<i32>} : memref<1x1x8x8x4xbf16, #tpu.memory_space<vmem>>, vector<1x1x8x8x4xbf16>,
    } else {
    }
    return
  }
  func.func @transform_0(%arg0: i32, %arg1: i32, %arg2: i32) -> (i32, i32, i32, i32, i32) {
    %c1_i32 = arith.constant 1 : i32
    %0 = arith.muli %arg1, %c1_i32 : i32
    %1 = arith.addi %0, %arg2 : i32
    %c0_i32 = arith.constant 0 : i32
    %c0_i32_0 = arith.constant 0 : i32
    %c0_i32_1 = arith.constant 0 : i32
    %c0_i32_2 = arith.constant 0 : i32
    return %arg0, %1, %c0_i32, %c0_i32_0, %c0_i32_1 : i32, i32, i32, i32, i32
  }
  func.func @transform_1(%arg0: i32, %arg1: i32, %arg2: i32) -> (i32, i32, i32, i32) {
    %c0_i32 = arith.constant 0 : i32
    %c0_i32_0 = arith.constant 0 : i32
    %c0_i32_1 = arith.constant 0 : i32
    %c0_i32_2 = arith.constant 0 : i32
    %c0_i32_3 = arith.constant 0 : i32
    return %c0_i32, %c0_i32_0, %c0_i32_1, %c0_i32_2 : i32, i32, i32, i32
  }
  func.func @transform_2(%arg0: i32, %arg1: i32, %arg2: i32) -> (i32, i32) {
    %c0_i32 = arith.constant 0 : i32
    %c0_i32_0 = arith.constant 0 : i32
    %c0_i32_1 = arith.constant 0 : i32
    return %c0_i32, %c0_i32_0 : i32, i32
  }
  func.func @transform_3(%arg0: i32, %arg1: i32, %arg2: i32) -> (i32, i32, i32, i32, i32) {
    %c0_i32 = arith.constant 0 : i32
    %c0_i32_0 = arith.constant 0 : i32
    %c0_i32_1 = arith.constant 0 : i32
    %c0_i32_2 = arith.constant 0 : i32
    return %arg0, %arg1, %c0_i32, %c0_i32_0, %c0_i32_1 : i32, i32, i32, i32, i32
  }
}

module attributes {stable_mosaic.version = 11 : i64} {
  func.func @_mm_shift_relu_residual_kernel(%arg0: i32, %arg1: memref<512x4xbf16, #tpu.memory_space<vmem>>, %arg2: memref<4x16xbf16, #tpu.memory_space<vmem>>, %arg3: memref<1x16xf32, #tpu.memory_space<vmem>>, %arg4: memref<512x16xbf16, #tpu.memory_space<vmem>>, %arg5: memref<512x16xbf16, #tpu.memory_space<vmem>>) attributes {dimension_semantics = [#tpu.dimension_semantics<parallel>], iteration_bounds = array<i64: 2>, scalar_prefetch = 0 : i64, scratch_operands = 0 : i64, tpu.core_type = #tpu.core_type<tc>, window_params = [{transform_indices = @transform_0, window_bounds = array<i64: 512, 4>}, {pipeline_mode = #tpu.pipeline_mode<synchronous>, transform_indices = @transform_1, window_bounds = array<i64: 4, 16>}, {pipeline_mode = #tpu.pipeline_mode<synchronous>, transform_indices = @transform_2, window_bounds = array<i64: 1, 16>}, {transform_indices = @transform_3, window_bounds = array<i64: 512, 16>}, {transform_indices = @transform_4, window_bounds = array<i64: 512, 16>}]} {
    %c0 = arith.constant 0 : index
    %c0_0 = arith.constant 0 : index
    %0 = vector.load %arg1[%c0, %c0_0] : memref<512x4xbf16, #tpu.memory_space<vmem>>, vector<512x4xbf16>
    %c0_1 = arith.constant 0 : index
    %c0_2 = arith.constant 0 : index
    %1 = vector.load %arg2[%c0_1, %c0_2] : memref<4x16xbf16, #tpu.memory_space<vmem>>, vector<4x16xbf16>
    %cst = arith.constant dense<0.000000e+00> : vector<512x16xf32>
    %2 = tpu.matmul %0, %1, %cst {dimension_numbers = #tpu.dot_dimension_numbers<[1], [0], [0], [1], [0, 0, 1, 1], [], []>} : vector<512x4xbf16>, vector<4x16xbf16>, vector<512x16xf32> -> vector<512x16xf32>
    %c0_3 = arith.constant 0 : index
    %c0_4 = arith.constant 0 : index
    %3 = vector.load %arg3[%c0_3, %c0_4] : memref<1x16xf32, #tpu.memory_space<vmem>>, vector<1x16xf32>
    %4 = vector.broadcast %3 : vector<1x16xf32> to vector<512x16xf32>
    %5 = arith.addf %2, %4 : vector<512x16xf32>
    %cst_5 = arith.constant 0.000000e+00 : f32
    %6 = vector.broadcast %cst_5 : f32 to vector<512x16xf32>
    %7 = arith.maximumf %5, %6 : vector<512x16xf32>
    %c0_6 = arith.constant 0 : index
    %c0_7 = arith.constant 0 : index
    %8 = vector.load %arg4[%c0_6, %c0_7] : memref<512x16xbf16, #tpu.memory_space<vmem>>, vector<512x16xbf16>
    %9 = arith.extf %8 : vector<512x16xbf16> to vector<512x16xf32>
    %10 = arith.addf %7, %9 : vector<512x16xf32>
    %cst_8 = arith.constant 0.000000e+00 : f32
    %11 = vector.broadcast %cst_8 : f32 to vector<512x16xf32>
    %12 = arith.maximumf %10, %11 : vector<512x16xf32>
    %13 = arith.truncf %12 : vector<512x16xf32> to vector<512x16xbf16>
    %c0_9 = arith.constant 0 : index
    %c0_10 = arith.constant 0 : index
    %14 = vector.load %arg5[%c0_9, %c0_10] : memref<512x16xbf16, #tpu.memory_space<vmem>>, vector<512x16xbf16>
    tpu.vector_store %arg5[%c0_9, %c0_10], %13 {strides = array<i32>} : memref<512x16xbf16, #tpu.memory_space<vmem>>, vector<512x16xbf16>,
    return
  }
  func.func @transform_0(%arg0: i32) -> (i32, i32) {
    %c0_i32 = arith.constant 0 : i32
    %c0_i32_0 = arith.constant 0 : i32
    return %arg0, %c0_i32 : i32, i32
  }
  func.func @transform_1(%arg0: i32) -> (i32, i32) {
    %c0_i32 = arith.constant 0 : i32
    %c0_i32_0 = arith.constant 0 : i32
    %c0_i32_1 = arith.constant 0 : i32
    return %c0_i32, %c0_i32_0 : i32, i32
  }
  func.func @transform_2(%arg0: i32) -> (i32, i32) {
    %c0_i32 = arith.constant 0 : i32
    %c0_i32_0 = arith.constant 0 : i32
    %c0_i32_1 = arith.constant 0 : i32
    return %c0_i32, %c0_i32_0 : i32, i32
  }
  func.func @transform_3(%arg0: i32) -> (i32, i32) {
    %c0_i32 = arith.constant 0 : i32
    %c0_i32_0 = arith.constant 0 : i32
    return %arg0, %c0_i32 : i32, i32
  }
  func.func @transform_4(%arg0: i32) -> (i32, i32) {
    %c0_i32 = arith.constant 0 : i32
    %c0_i32_0 = arith.constant 0 : i32
    return %arg0, %c0_i32 : i32, i32
  }
}

module attributes {stable_mosaic.version = 11 : i64} {
  func.func @_mm_shift_kernel(%arg0: i32, %arg1: memref<512x16xbf16, #tpu.memory_space<vmem>>, %arg2: memref<16x4xbf16, #tpu.memory_space<vmem>>, %arg3: memref<1x4xf32, #tpu.memory_space<vmem>>, %arg4: memref<512x4xbf16, #tpu.memory_space<vmem>>) attributes {dimension_semantics = [#tpu.dimension_semantics<parallel>], iteration_bounds = array<i64: 2>, scalar_prefetch = 0 : i64, scratch_operands = 0 : i64, tpu.core_type = #tpu.core_type<tc>, window_params = [{transform_indices = @transform_0, window_bounds = array<i64: 512, 16>}, {pipeline_mode = #tpu.pipeline_mode<synchronous>, transform_indices = @transform_1, window_bounds = array<i64: 16, 4>}, {pipeline_mode = #tpu.pipeline_mode<synchronous>, transform_indices = @transform_2, window_bounds = array<i64: 1, 4>}, {transform_indices = @transform_3, window_bounds = array<i64: 512, 4>}]} {
    %c0 = arith.constant 0 : index
    %c0_0 = arith.constant 0 : index
    %0 = vector.load %arg1[%c0, %c0_0] : memref<512x16xbf16, #tpu.memory_space<vmem>>, vector<512x16xbf16>
    %c0_1 = arith.constant 0 : index
    %c0_2 = arith.constant 0 : index
    %1 = vector.load %arg2[%c0_1, %c0_2] : memref<16x4xbf16, #tpu.memory_space<vmem>>, vector<16x4xbf16>
    %cst = arith.constant dense<0.000000e+00> : vector<512x4xf32>
    %2 = tpu.matmul %0, %1, %cst {dimension_numbers = #tpu.dot_dimension_numbers<[1], [0], [0], [1], [0, 0, 1, 1], [], []>} : vector<512x16xbf16>, vector<16x4xbf16>, vector<512x4xf32> -> vector<512x4xf32>
    %c0_3 = arith.constant 0 : index
    %c0_4 = arith.constant 0 : index
    %3 = vector.load %arg3[%c0_3, %c0_4] : memref<1x4xf32, #tpu.memory_space<vmem>>, vector<1x4xf32>
    %4 = vector.broadcast %3 : vector<1x4xf32> to vector<512x4xf32>
    %5 = arith.addf %2, %4 : vector<512x4xf32>
    %cst_5 = arith.constant 0.000000e+00 : f32
    %6 = vector.broadcast %cst_5 : f32 to vector<512x4xf32>
    %7 = arith.maximumf %5, %6 : vector<512x4xf32>
    %8 = arith.truncf %7 : vector<512x4xf32> to vector<512x4xbf16>
    %c0_6 = arith.constant 0 : index
    %c0_7 = arith.constant 0 : index
    %9 = vector.load %arg4[%c0_6, %c0_7] : memref<512x4xbf16, #tpu.memory_space<vmem>>, vector<512x4xbf16>
    tpu.vector_store %arg4[%c0_6, %c0_7], %8 {strides = array<i32>} : memref<512x4xbf16, #tpu.memory_space<vmem>>, vector<512x4xbf16>,
    return
  }
  func.func @transform_0(%arg0: i32) -> (i32, i32) {
    %c0_i32 = arith.constant 0 : i32
    %c0_i32_0 = arith.constant 0 : i32
    return %arg0, %c0_i32 : i32, i32
  }
  func.func @transform_1(%arg0: i32) -> (i32, i32) {
    %c0_i32 = arith.constant 0 : i32
    %c0_i32_0 = arith.constant 0 : i32
    %c0_i32_1 = arith.constant 0 : i32
    return %c0_i32, %c0_i32_0 : i32, i32
  }
  func.func @transform_2(%arg0: i32) -> (i32, i32) {
    %c0_i32 = arith.constant 0 : i32
    %c0_i32_0 = arith.constant 0 : i32
    %c0_i32_1 = arith.constant 0 : i32
    return %c0_i32, %c0_i32_0 : i32, i32
  }
  func.func @transform_3(%arg0: i32) -> (i32, i32) {
    %c0_i32 = arith.constant 0 : i32
    %c0_i32_0 = arith.constant 0 : i32
    return %arg0, %c0_i32 : i32, i32
  }
}

module attributes {stable_mosaic.version = 11 : i64} {
  func.func @_mm_dual_kernel(%arg0: i32, %arg1: memref<512x16xbf16, #tpu.memory_space<vmem>>, %arg2: memref<16x8xbf16, #tpu.memory_space<vmem>>, %arg3: memref<1x8xf32, #tpu.memory_space<vmem>>, %arg4: memref<16x32xbf16, #tpu.memory_space<vmem>>, %arg5: memref<512x8xbf16, #tpu.memory_space<vmem>>, %arg6: memref<512x32xbf16, #tpu.memory_space<vmem>>) attributes {dimension_semantics = [#tpu.dimension_semantics<parallel>], iteration_bounds = array<i64: 2>, scalar_prefetch = 0 : i64, scratch_operands = 0 : i64, tpu.core_type = #tpu.core_type<tc>, window_params = [{transform_indices = @transform_0, window_bounds = array<i64: 512, 16>}, {pipeline_mode = #tpu.pipeline_mode<synchronous>, transform_indices = @transform_1, window_bounds = array<i64: 16, 8>}, {pipeline_mode = #tpu.pipeline_mode<synchronous>, transform_indices = @transform_2, window_bounds = array<i64: 1, 8>}, {pipeline_mode = #tpu.pipeline_mode<synchronous>, transform_indices = @transform_3, window_bounds = array<i64: 16, 32>}, {transform_indices = @transform_4, window_bounds = array<i64: 512, 8>}, {transform_indices = @transform_5, window_bounds = array<i64: 512, 32>}]} {
    %c0 = arith.constant 0 : index
    %c0_0 = arith.constant 0 : index
    %0 = vector.load %arg1[%c0, %c0_0] : memref<512x16xbf16, #tpu.memory_space<vmem>>, vector<512x16xbf16>
    %c0_1 = arith.constant 0 : index
    %c0_2 = arith.constant 0 : index
    %1 = vector.load %arg2[%c0_1, %c0_2] : memref<16x8xbf16, #tpu.memory_space<vmem>>, vector<16x8xbf16>
    %cst = arith.constant dense<0.000000e+00> : vector<512x8xf32>
    %2 = tpu.matmul %0, %1, %cst {dimension_numbers = #tpu.dot_dimension_numbers<[1], [0], [0], [1], [0, 0, 1, 1], [], []>} : vector<512x16xbf16>, vector<16x8xbf16>, vector<512x8xf32> -> vector<512x8xf32>
    %c0_3 = arith.constant 0 : index
    %c0_4 = arith.constant 0 : index
    %3 = vector.load %arg3[%c0_3, %c0_4] : memref<1x8xf32, #tpu.memory_space<vmem>>, vector<1x8xf32>
    %4 = vector.broadcast %3 : vector<1x8xf32> to vector<512x8xf32>
    %5 = arith.addf %2, %4 : vector<512x8xf32>
    %cst_5 = arith.constant 0.000000e+00 : f32
    %6 = vector.broadcast %cst_5 : f32 to vector<512x8xf32>
    %7 = arith.maximumf %5, %6 : vector<512x8xf32>
    %8 = arith.truncf %7 : vector<512x8xf32> to vector<512x8xbf16>
    %c0_6 = arith.constant 0 : index
    %c0_7 = arith.constant 0 : index
    %9 = vector.load %arg5[%c0_6, %c0_7] : memref<512x8xbf16, #tpu.memory_space<vmem>>, vector<512x8xbf16>
    tpu.vector_store %arg5[%c0_6, %c0_7], %8 {strides = array<i32>} : memref<512x8xbf16, #tpu.memory_space<vmem>>, vector<512x8xbf16>,
    %c0_8 = arith.constant 0 : index
    %c0_9 = arith.constant 0 : index
    %10 = vector.load %arg4[%c0_8, %c0_9] : memref<16x32xbf16, #tpu.memory_space<vmem>>, vector<16x32xbf16>
    %cst_10 = arith.constant dense<0.000000e+00> : vector<512x32xf32>
    %11 = tpu.matmul %0, %10, %cst_10 {dimension_numbers = #tpu.dot_dimension_numbers<[1], [0], [0], [1], [0, 0, 1, 1], [], []>} : vector<512x16xbf16>, vector<16x32xbf16>, vector<512x32xf32> -> vector<512x32xf32>
    %12 = arith.truncf %11 : vector<512x32xf32> to vector<512x32xbf16>
    %c0_11 = arith.constant 0 : index
    %c0_12 = arith.constant 0 : index
    %13 = vector.load %arg6[%c0_11, %c0_12] : memref<512x32xbf16, #tpu.memory_space<vmem>>, vector<512x32xbf16>
    tpu.vector_store %arg6[%c0_11, %c0_12], %12 {strides = array<i32>} : memref<512x32xbf16, #tpu.memory_space<vmem>>, vector<512x32xbf16>,
    return
  }
  func.func @transform_0(%arg0: i32) -> (i32, i32) {
    %c0_i32 = arith.constant 0 : i32
    %c0_i32_0 = arith.constant 0 : i32
    return %arg0, %c0_i32 : i32, i32
  }
  func.func @transform_1(%arg0: i32) -> (i32, i32) {
    %c0_i32 = arith.constant 0 : i32
    %c0_i32_0 = arith.constant 0 : i32
    %c0_i32_1 = arith.constant 0 : i32
    return %c0_i32, %c0_i32_0 : i32, i32
  }
  func.func @transform_2(%arg0: i32) -> (i32, i32) {
    %c0_i32 = arith.constant 0 : i32
    %c0_i32_0 = arith.constant 0 : i32
    %c0_i32_1 = arith.constant 0 : i32
    return %c0_i32, %c0_i32_0 : i32, i32
  }
  func.func @transform_3(%arg0: i32) -> (i32, i32) {
    %c0_i32 = arith.constant 0 : i32
    %c0_i32_0 = arith.constant 0 : i32
    %c0_i32_1 = arith.constant 0 : i32
    return %c0_i32, %c0_i32_0 : i32, i32
  }
  func.func @transform_4(%arg0: i32) -> (i32, i32) {
    %c0_i32 = arith.constant 0 : i32
    %c0_i32_0 = arith.constant 0 : i32
    return %arg0, %c0_i32 : i32, i32
  }
  func.func @transform_5(%arg0: i32) -> (i32, i32) {
    %c0_i32 = arith.constant 0 : i32
    %c0_i32_0 = arith.constant 0 : i32
    return %arg0, %c0_i32 : i32, i32
  }
}

module attributes {stable_mosaic.version = 11 : i64} {
  func.func @_conv3x3x3_kernel(%arg0: i32, %arg1: i32, %arg2: i32, %arg3: memref<1x1x10x10x8xbf16, #tpu.memory_space<vmem>>, %arg4: memref<3x9x8x8xbf16, #tpu.memory_space<vmem>>, %arg5: memref<1x8xf32, #tpu.memory_space<vmem>>, %arg6: memref<1x1x8x8x8xbf16, #tpu.memory_space<vmem>>, %arg7: memref<64x8xf32, #tpu.memory_space<vmem>>) attributes {dimension_semantics = [#tpu.dimension_semantics<parallel>, #tpu.dimension_semantics<parallel>, #tpu.dimension_semantics<arbitrary>], iteration_bounds = array<i64: 2, 8, 3>, scalar_prefetch = 0 : i64, scratch_operands = 1 : i64, tpu.core_type = #tpu.core_type<tc>, window_params = [{transform_indices = @transform_0, window_bounds = array<i64: 1, 1, 10, 10, 8>}, {pipeline_mode = #tpu.pipeline_mode<synchronous>, transform_indices = @transform_1, window_bounds = array<i64: 3, 9, 8, 8>}, {pipeline_mode = #tpu.pipeline_mode<synchronous>, transform_indices = @transform_2, window_bounds = array<i64: 1, 8>}, {transform_indices = @transform_3, window_bounds = array<i64: 1, 1, 8, 8, 8>}]} {
    %c0_i32 = arith.constant 0 : i32
    %0 = arith.cmpi eq, %arg2, %c0_i32 : i32
    %1 = arith.extui %0 : i1 to i32
    %c0_i32_0 = arith.constant 0 : i32
    %2 = arith.cmpi ne, %1, %c0_i32_0 : i32
    scf.if %2 {
      %cst_59 = arith.constant 0.000000e+00 : f32
      %76 = vector.broadcast %cst_59 : f32 to vector<64x8xf32>
      %c0_60 = arith.constant 0 : index
      %c0_61 = arith.constant 0 : index
      %77 = vector.load %arg7[%c0_60, %c0_61] : memref<64x8xf32, #tpu.memory_space<vmem>>, vector<64x8xf32>
      tpu.vector_store %arg7[%c0_60, %c0_61], %76 {strides = array<i32>} : memref<64x8xf32, #tpu.memory_space<vmem>>, vector<64x8xf32>,
    } else {
    }
    %3 = arith.index_cast %arg2 : i32 to index
    %c0 = arith.constant 0 : index
    %c0_1 = arith.constant 0 : index
    %c0_2 = arith.constant 0 : index
    %4 = vector.load %arg4[%3, %c0, %c0_1, %c0_2] : memref<3x9x8x8xbf16, #tpu.memory_space<vmem>>, vector<1x9x8x8xbf16>
    %5 = vector.shape_cast %4 : vector<1x9x8x8xbf16> to vector<9x8x8xbf16>
    %c0_3 = arith.constant 0 : index
    %c0_4 = arith.constant 0 : index
    %6 = vector.load %arg7[%c0_3, %c0_4] : memref<64x8xf32, #tpu.memory_space<vmem>>, vector<64x8xf32>
    %c0_5 = arith.constant 0 : index
    %c0_6 = arith.constant 0 : index
    %c0_7 = arith.constant 0 : index
    %c0_8 = arith.constant 0 : index
    %c0_9 = arith.constant 0 : index
    %7 = vector.load %arg3[%c0_5, %c0_6, %c0_7, %c0_8, %c0_9] : memref<1x1x10x10x8xbf16, #tpu.memory_space<vmem>>, vector<1x1x8x8x8xbf16>
    %8 = vector.shape_cast %7 : vector<1x1x8x8x8xbf16> to vector<8x8x8xbf16>
    %9 = vector.shape_cast %8 : vector<8x8x8xbf16> to vector<64x8xbf16>
    %10 = vector.extract_strided_slice %5 {offsets = [0, 0, 0], sizes = [1, 8, 8], strides = [1, 1, 1]} : vector<9x8x8xbf16> to vector<1x8x8xbf16>
    %11 = vector.shape_cast %10 : vector<1x8x8xbf16> to vector<8x8xbf16>
    %cst = arith.constant dense<0.000000e+00> : vector<64x8xf32>
    %12 = tpu.matmul %9, %11, %cst {dimension_numbers = #tpu.dot_dimension_numbers<[1], [0], [0], [1], [0, 0, 1, 1], [], []>} : vector<64x8xbf16>, vector<8x8xbf16>, vector<64x8xf32> -> vector<64x8xf32>
    %13 = arith.addf %6, %12 : vector<64x8xf32>
    %c0_10 = arith.constant 0 : index
    %c0_11 = arith.constant 0 : index
    %c0_12 = arith.constant 0 : index
    %c1 = arith.constant 1 : index
    %c0_13 = arith.constant 0 : index
    %14 = vector.load %arg3[%c0_10, %c0_11, %c0_12, %c1, %c0_13] : memref<1x1x10x10x8xbf16, #tpu.memory_space<vmem>>, vector<1x1x8x8x8xbf16>
    %15 = vector.shape_cast %14 : vector<1x1x8x8x8xbf16> to vector<8x8x8xbf16>
    %16 = vector.shape_cast %15 : vector<8x8x8xbf16> to vector<64x8xbf16>
    %17 = vector.extract_strided_slice %5 {offsets = [1, 0, 0], sizes = [1, 8, 8], strides = [1, 1, 1]} : vector<9x8x8xbf16> to vector<1x8x8xbf16>
    %18 = vector.shape_cast %17 : vector<1x8x8xbf16> to vector<8x8xbf16>
    %cst_14 = arith.constant dense<0.000000e+00> : vector<64x8xf32>
    %19 = tpu.matmul %16, %18, %cst_14 {dimension_numbers = #tpu.dot_dimension_numbers<[1], [0], [0], [1], [0, 0, 1, 1], [], []>} : vector<64x8xbf16>, vector<8x8xbf16>, vector<64x8xf32> -> vector<64x8xf32>
    %20 = arith.addf %13, %19 : vector<64x8xf32>
    %c0_15 = arith.constant 0 : index
    %c0_16 = arith.constant 0 : index
    %c0_17 = arith.constant 0 : index
    %c2 = arith.constant 2 : index
    %c0_18 = arith.constant 0 : index
    %21 = vector.load %arg3[%c0_15, %c0_16, %c0_17, %c2, %c0_18] : memref<1x1x10x10x8xbf16, #tpu.memory_space<vmem>>, vector<1x1x8x8x8xbf16>
    %22 = vector.shape_cast %21 : vector<1x1x8x8x8xbf16> to vector<8x8x8xbf16>
    %23 = vector.shape_cast %22 : vector<8x8x8xbf16> to vector<64x8xbf16>
    %24 = vector.extract_strided_slice %5 {offsets = [2, 0, 0], sizes = [1, 8, 8], strides = [1, 1, 1]} : vector<9x8x8xbf16> to vector<1x8x8xbf16>
    %25 = vector.shape_cast %24 : vector<1x8x8xbf16> to vector<8x8xbf16>
    %cst_19 = arith.constant dense<0.000000e+00> : vector<64x8xf32>
    %26 = tpu.matmul %23, %25, %cst_19 {dimension_numbers = #tpu.dot_dimension_numbers<[1], [0], [0], [1], [0, 0, 1, 1], [], []>} : vector<64x8xbf16>, vector<8x8xbf16>, vector<64x8xf32> -> vector<64x8xf32>
    %27 = arith.addf %20, %26 : vector<64x8xf32>
    %c0_20 = arith.constant 0 : index
    %c0_21 = arith.constant 0 : index
    %c1_22 = arith.constant 1 : index
    %c0_23 = arith.constant 0 : index
    %c0_24 = arith.constant 0 : index
    %28 = vector.load %arg3[%c0_20, %c0_21, %c1_22, %c0_23, %c0_24] : memref<1x1x10x10x8xbf16, #tpu.memory_space<vmem>>, vector<1x1x8x8x8xbf16>
    %29 = vector.shape_cast %28 : vector<1x1x8x8x8xbf16> to vector<8x8x8xbf16>
    %30 = vector.shape_cast %29 : vector<8x8x8xbf16> to vector<64x8xbf16>
    %31 = vector.extract_strided_slice %5 {offsets = [3, 0, 0], sizes = [1, 8, 8], strides = [1, 1, 1]} : vector<9x8x8xbf16> to vector<1x8x8xbf16>
    %32 = vector.shape_cast %31 : vector<1x8x8xbf16> to vector<8x8xbf16>
    %cst_25 = arith.constant dense<0.000000e+00> : vector<64x8xf32>
    %33 = tpu.matmul %30, %32, %cst_25 {dimension_numbers = #tpu.dot_dimension_numbers<[1], [0], [0], [1], [0, 0, 1, 1], [], []>} : vector<64x8xbf16>, vector<8x8xbf16>, vector<64x8xf32> -> vector<64x8xf32>
    %34 = arith.addf %27, %33 : vector<64x8xf32>
    %c0_26 = arith.constant 0 : index
    %c0_27 = arith.constant 0 : index
    %c1_28 = arith.constant 1 : index
    %c1_29 = arith.constant 1 : index
    %c0_30 = arith.constant 0 : index
    %35 = vector.load %arg3[%c0_26, %c0_27, %c1_28, %c1_29, %c0_30] : memref<1x1x10x10x8xbf16, #tpu.memory_space<vmem>>, vector<1x1x8x8x8xbf16>
    %36 = vector.shape_cast %35 : vector<1x1x8x8x8xbf16> to vector<8x8x8xbf16>
    %37 = vector.shape_cast %36 : vector<8x8x8xbf16> to vector<64x8xbf16>
    %38 = vector.extract_strided_slice %5 {offsets = [4, 0, 0], sizes = [1, 8, 8], strides = [1, 1, 1]} : vector<9x8x8xbf16> to vector<1x8x8xbf16>
    %39 = vector.shape_cast %38 : vector<1x8x8xbf16> to vector<8x8xbf16>
    %cst_31 = arith.constant dense<0.000000e+00> : vector<64x8xf32>
    %40 = tpu.matmul %37, %39, %cst_31 {dimension_numbers = #tpu.dot_dimension_numbers<[1], [0], [0], [1], [0, 0, 1, 1], [], []>} : vector<64x8xbf16>, vector<8x8xbf16>, vector<64x8xf32> -> vector<64x8xf32>
    %41 = arith.addf %34, %40 : vector<64x8xf32>
    %c0_32 = arith.constant 0 : index
    %c0_33 = arith.constant 0 : index
    %c1_34 = arith.constant 1 : index
    %c2_35 = arith.constant 2 : index
    %c0_36 = arith.constant 0 : index
    %42 = vector.load %arg3[%c0_32, %c0_33, %c1_34, %c2_35, %c0_36] : memref<1x1x10x10x8xbf16, #tpu.memory_space<vmem>>, vector<1x1x8x8x8xbf16>
    %43 = vector.shape_cast %42 : vector<1x1x8x8x8xbf16> to vector<8x8x8xbf16>
    %44 = vector.shape_cast %43 : vector<8x8x8xbf16> to vector<64x8xbf16>
    %45 = vector.extract_strided_slice %5 {offsets = [5, 0, 0], sizes = [1, 8, 8], strides = [1, 1, 1]} : vector<9x8x8xbf16> to vector<1x8x8xbf16>
    %46 = vector.shape_cast %45 : vector<1x8x8xbf16> to vector<8x8xbf16>
    %cst_37 = arith.constant dense<0.000000e+00> : vector<64x8xf32>
    %47 = tpu.matmul %44, %46, %cst_37 {dimension_numbers = #tpu.dot_dimension_numbers<[1], [0], [0], [1], [0, 0, 1, 1], [], []>} : vector<64x8xbf16>, vector<8x8xbf16>, vector<64x8xf32> -> vector<64x8xf32>
    %48 = arith.addf %41, %47 : vector<64x8xf32>
    %c0_38 = arith.constant 0 : index
    %c0_39 = arith.constant 0 : index
    %c2_40 = arith.constant 2 : index
    %c0_41 = arith.constant 0 : index
    %c0_42 = arith.constant 0 : index
    %49 = vector.load %arg3[%c0_38, %c0_39, %c2_40, %c0_41, %c0_42] : memref<1x1x10x10x8xbf16, #tpu.memory_space<vmem>>, vector<1x1x8x8x8xbf16>
    %50 = vector.shape_cast %49 : vector<1x1x8x8x8xbf16> to vector<8x8x8xbf16>
    %51 = vector.shape_cast %50 : vector<8x8x8xbf16> to vector<64x8xbf16>
    %52 = vector.extract_strided_slice %5 {offsets = [6, 0, 0], sizes = [1, 8, 8], strides = [1, 1, 1]} : vector<9x8x8xbf16> to vector<1x8x8xbf16>
    %53 = vector.shape_cast %52 : vector<1x8x8xbf16> to vector<8x8xbf16>
    %cst_43 = arith.constant dense<0.000000e+00> : vector<64x8xf32>
    %54 = tpu.matmul %51, %53, %cst_43 {dimension_numbers = #tpu.dot_dimension_numbers<[1], [0], [0], [1], [0, 0, 1, 1], [], []>} : vector<64x8xbf16>, vector<8x8xbf16>, vector<64x8xf32> -> vector<64x8xf32>
    %55 = arith.addf %48, %54 : vector<64x8xf32>
    %c0_44 = arith.constant 0 : index
    %c0_45 = arith.constant 0 : index
    %c2_46 = arith.constant 2 : index
    %c1_47 = arith.constant 1 : index
    %c0_48 = arith.constant 0 : index
    %56 = vector.load %arg3[%c0_44, %c0_45, %c2_46, %c1_47, %c0_48] : memref<1x1x10x10x8xbf16, #tpu.memory_space<vmem>>, vector<1x1x8x8x8xbf16>
    %57 = vector.shape_cast %56 : vector<1x1x8x8x8xbf16> to vector<8x8x8xbf16>
    %58 = vector.shape_cast %57 : vector<8x8x8xbf16> to vector<64x8xbf16>
    %59 = vector.extract_strided_slice %5 {offsets = [7, 0, 0], sizes = [1, 8, 8], strides = [1, 1, 1]} : vector<9x8x8xbf16> to vector<1x8x8xbf16>
    %60 = vector.shape_cast %59 : vector<1x8x8xbf16> to vector<8x8xbf16>
    %cst_49 = arith.constant dense<0.000000e+00> : vector<64x8xf32>
    %61 = tpu.matmul %58, %60, %cst_49 {dimension_numbers = #tpu.dot_dimension_numbers<[1], [0], [0], [1], [0, 0, 1, 1], [], []>} : vector<64x8xbf16>, vector<8x8xbf16>, vector<64x8xf32> -> vector<64x8xf32>
    %62 = arith.addf %55, %61 : vector<64x8xf32>
    %c0_50 = arith.constant 0 : index
    %c0_51 = arith.constant 0 : index
    %c2_52 = arith.constant 2 : index
    %c2_53 = arith.constant 2 : index
    %c0_54 = arith.constant 0 : index
    %63 = vector.load %arg3[%c0_50, %c0_51, %c2_52, %c2_53, %c0_54] : memref<1x1x10x10x8xbf16, #tpu.memory_space<vmem>>, vector<1x1x8x8x8xbf16>
    %64 = vector.shape_cast %63 : vector<1x1x8x8x8xbf16> to vector<8x8x8xbf16>
    %65 = vector.shape_cast %64 : vector<8x8x8xbf16> to vector<64x8xbf16>
    %66 = vector.extract_strided_slice %5 {offsets = [8, 0, 0], sizes = [1, 8, 8], strides = [1, 1, 1]} : vector<9x8x8xbf16> to vector<1x8x8xbf16>
    %67 = vector.shape_cast %66 : vector<1x8x8xbf16> to vector<8x8xbf16>
    %cst_55 = arith.constant dense<0.000000e+00> : vector<64x8xf32>
    %68 = tpu.matmul %65, %67, %cst_55 {dimension_numbers = #tpu.dot_dimension_numbers<[1], [0], [0], [1], [0, 0, 1, 1], [], []>} : vector<64x8xbf16>, vector<8x8xbf16>, vector<64x8xf32> -> vector<64x8xf32>
    %69 = arith.addf %62, %68 : vector<64x8xf32>
    %c2_i32 = arith.constant 2 : i32
    %70 = arith.cmpi slt, %arg2, %c2_i32 : i32
    %71 = arith.extui %70 : i1 to i32
    %c0_i32_56 = arith.constant 0 : i32
    %72 = arith.cmpi ne, %71, %c0_i32_56 : i32
    scf.if %72 {
      %c0_59 = arith.constant 0 : index
      %c0_60 = arith.constant 0 : index
      %76 = vector.load %arg7[%c0_59, %c0_60] : memref<64x8xf32, #tpu.memory_space<vmem>>, vector<64x8xf32>
      tpu.vector_store %arg7[%c0_59, %c0_60], %69 {strides = array<i32>} : memref<64x8xf32, #tpu.memory_space<vmem>>, vector<64x8xf32>,
    } else {
    }
    %c2_i32_57 = arith.constant 2 : i32
    %73 = arith.cmpi eq, %arg2, %c2_i32_57 : i32
    %74 = arith.extui %73 : i1 to i32
    %c0_i32_58 = arith.constant 0 : i32
    %75 = arith.cmpi ne, %74, %c0_i32_58 : i32
    scf.if %75 {
      %c0_59 = arith.constant 0 : index
      %c0_60 = arith.constant 0 : index
      %76 = vector.load %arg5[%c0_59, %c0_60] : memref<1x8xf32, #tpu.memory_space<vmem>>, vector<1x8xf32>
      %77 = vector.broadcast %76 : vector<1x8xf32> to vector<64x8xf32>
      %78 = arith.addf %69, %77 : vector<64x8xf32>
      %cst_61 = arith.constant 0.000000e+00 : f32
      %79 = vector.broadcast %cst_61 : f32 to vector<64x8xf32>
      %80 = arith.maximumf %78, %79 : vector<64x8xf32>
      %81 = vector.shape_cast %80 : vector<64x8xf32> to vector<8x8x8xf32>
      %82 = arith.truncf %81 : vector<8x8x8xf32> to vector<8x8x8xbf16>
      %c0_62 = arith.constant 0 : index
      %c0_63 = arith.constant 0 : index
      %c0_64 = arith.constant 0 : index
      %c0_65 = arith.constant 0 : index
      %c0_66 = arith.constant 0 : index
      %83 = vector.load %arg6[%c0_62, %c0_63, %c0_64, %c0_65, %c0_66] : memref<1x1x8x8x8xbf16, #tpu.memory_space<vmem>>, vector<1x1x8x8x8xbf16>
      %84 = vector.shape_cast %83 : vector<1x1x8x8x8xbf16> to vector<8x8x8xbf16>
      %85 = vector.shape_cast %82 : vector<8x8x8xbf16> to vector<1x1x8x8x8xbf16>
      tpu.vector_store %arg6[%c0_62, %c0_63, %c0_64, %c0_65, %c0_66], %85 {strides = array<i32>} : memref<1x1x8x8x8xbf16, #tpu.memory_space<vmem>>, vector<1x1x8x8x8xbf16>,
    } else {
    }
    return
  }
  func.func @transform_0(%arg0: i32, %arg1: i32, %arg2: i32) -> (i32, i32, i32, i32, i32) {
    %c1_i32 = arith.constant 1 : i32
    %0 = arith.muli %arg1, %c1_i32 : i32
    %1 = arith.addi %0, %arg2 : i32
    %c0_i32 = arith.constant 0 : i32
    %c0_i32_0 = arith.constant 0 : i32
    %c0_i32_1 = arith.constant 0 : i32
    %c0_i32_2 = arith.constant 0 : i32
    return %arg0, %1, %c0_i32, %c0_i32_0, %c0_i32_1 : i32, i32, i32, i32, i32
  }
  func.func @transform_1(%arg0: i32, %arg1: i32, %arg2: i32) -> (i32, i32, i32, i32) {
    %c0_i32 = arith.constant 0 : i32
    %c0_i32_0 = arith.constant 0 : i32
    %c0_i32_1 = arith.constant 0 : i32
    %c0_i32_2 = arith.constant 0 : i32
    %c0_i32_3 = arith.constant 0 : i32
    return %c0_i32, %c0_i32_0, %c0_i32_1, %c0_i32_2 : i32, i32, i32, i32
  }
  func.func @transform_2(%arg0: i32, %arg1: i32, %arg2: i32) -> (i32, i32) {
    %c0_i32 = arith.constant 0 : i32
    %c0_i32_0 = arith.constant 0 : i32
    %c0_i32_1 = arith.constant 0 : i32
    return %c0_i32, %c0_i32_0 : i32, i32
  }
  func.func @transform_3(%arg0: i32, %arg1: i32, %arg2: i32) -> (i32, i32, i32, i32, i32) {
    %c0_i32 = arith.constant 0 : i32
    %c0_i32_0 = arith.constant 0 : i32
    %c0_i32_1 = arith.constant 0 : i32
    %c0_i32_2 = arith.constant 0 : i32
    return %arg0, %arg1, %c0_i32, %c0_i32_0, %c0_i32_1 : i32, i32, i32, i32, i32
  }
}

module attributes {stable_mosaic.version = 11 : i64} {
  func.func @_mm_shift_relu_residual_kernel(%arg0: i32, %arg1: memref<512x8xbf16, #tpu.memory_space<vmem>>, %arg2: memref<8x32xbf16, #tpu.memory_space<vmem>>, %arg3: memref<1x32xf32, #tpu.memory_space<vmem>>, %arg4: memref<512x32xbf16, #tpu.memory_space<vmem>>, %arg5: memref<512x32xbf16, #tpu.memory_space<vmem>>) attributes {dimension_semantics = [#tpu.dimension_semantics<parallel>], iteration_bounds = array<i64: 2>, scalar_prefetch = 0 : i64, scratch_operands = 0 : i64, tpu.core_type = #tpu.core_type<tc>, window_params = [{transform_indices = @transform_0, window_bounds = array<i64: 512, 8>}, {pipeline_mode = #tpu.pipeline_mode<synchronous>, transform_indices = @transform_1, window_bounds = array<i64: 8, 32>}, {pipeline_mode = #tpu.pipeline_mode<synchronous>, transform_indices = @transform_2, window_bounds = array<i64: 1, 32>}, {transform_indices = @transform_3, window_bounds = array<i64: 512, 32>}, {transform_indices = @transform_4, window_bounds = array<i64: 512, 32>}]} {
    %c0 = arith.constant 0 : index
    %c0_0 = arith.constant 0 : index
    %0 = vector.load %arg1[%c0, %c0_0] : memref<512x8xbf16, #tpu.memory_space<vmem>>, vector<512x8xbf16>
    %c0_1 = arith.constant 0 : index
    %c0_2 = arith.constant 0 : index
    %1 = vector.load %arg2[%c0_1, %c0_2] : memref<8x32xbf16, #tpu.memory_space<vmem>>, vector<8x32xbf16>
    %cst = arith.constant dense<0.000000e+00> : vector<512x32xf32>
    %2 = tpu.matmul %0, %1, %cst {dimension_numbers = #tpu.dot_dimension_numbers<[1], [0], [0], [1], [0, 0, 1, 1], [], []>} : vector<512x8xbf16>, vector<8x32xbf16>, vector<512x32xf32> -> vector<512x32xf32>
    %c0_3 = arith.constant 0 : index
    %c0_4 = arith.constant 0 : index
    %3 = vector.load %arg3[%c0_3, %c0_4] : memref<1x32xf32, #tpu.memory_space<vmem>>, vector<1x32xf32>
    %4 = vector.broadcast %3 : vector<1x32xf32> to vector<512x32xf32>
    %5 = arith.addf %2, %4 : vector<512x32xf32>
    %cst_5 = arith.constant 0.000000e+00 : f32
    %6 = vector.broadcast %cst_5 : f32 to vector<512x32xf32>
    %7 = arith.maximumf %5, %6 : vector<512x32xf32>
    %c0_6 = arith.constant 0 : index
    %c0_7 = arith.constant 0 : index
    %8 = vector.load %arg4[%c0_6, %c0_7] : memref<512x32xbf16, #tpu.memory_space<vmem>>, vector<512x32xbf16>
    %9 = arith.extf %8 : vector<512x32xbf16> to vector<512x32xf32>
    %10 = arith.addf %7, %9 : vector<512x32xf32>
    %cst_8 = arith.constant 0.000000e+00 : f32
    %11 = vector.broadcast %cst_8 : f32 to vector<512x32xf32>
    %12 = arith.maximumf %10, %11 : vector<512x32xf32>
    %13 = arith.truncf %12 : vector<512x32xf32> to vector<512x32xbf16>
    %c0_9 = arith.constant 0 : index
    %c0_10 = arith.constant 0 : index
    %14 = vector.load %arg5[%c0_9, %c0_10] : memref<512x32xbf16, #tpu.memory_space<vmem>>, vector<512x32xbf16>
    tpu.vector_store %arg5[%c0_9, %c0_10], %13 {strides = array<i32>} : memref<512x32xbf16, #tpu.memory_space<vmem>>, vector<512x32xbf16>,
    return
  }
  func.func @transform_0(%arg0: i32) -> (i32, i32) {
    %c0_i32 = arith.constant 0 : i32
    %c0_i32_0 = arith.constant 0 : i32
    return %arg0, %c0_i32 : i32, i32
  }
  func.func @transform_1(%arg0: i32) -> (i32, i32) {
    %c0_i32 = arith.constant 0 : i32
    %c0_i32_0 = arith.constant 0 : i32
    %c0_i32_1 = arith.constant 0 : i32
    return %c0_i32, %c0_i32_0 : i32, i32
  }
  func.func @transform_2(%arg0: i32) -> (i32, i32) {
    %c0_i32 = arith.constant 0 : i32
    %c0_i32_0 = arith.constant 0 : i32
    %c0_i32_1 = arith.constant 0 : i32
    return %c0_i32, %c0_i32_0 : i32, i32
  }
  func.func @transform_3(%arg0: i32) -> (i32, i32) {
    %c0_i32 = arith.constant 0 : i32
    %c0_i32_0 = arith.constant 0 : i32
    return %arg0, %c0_i32 : i32, i32
  }
  func.func @transform_4(%arg0: i32) -> (i32, i32) {
    %c0_i32 = arith.constant 0 : i32
    %c0_i32_0 = arith.constant 0 : i32
    return %arg0, %c0_i32 : i32, i32
  }
}

module attributes {stable_mosaic.version = 11 : i64} {
  func.func @_mm_shift_kernel(%arg0: i32, %arg1: memref<512x32xbf16, #tpu.memory_space<vmem>>, %arg2: memref<32x8xbf16, #tpu.memory_space<vmem>>, %arg3: memref<1x8xf32, #tpu.memory_space<vmem>>, %arg4: memref<512x8xbf16, #tpu.memory_space<vmem>>) attributes {dimension_semantics = [#tpu.dimension_semantics<parallel>], iteration_bounds = array<i64: 2>, scalar_prefetch = 0 : i64, scratch_operands = 0 : i64, tpu.core_type = #tpu.core_type<tc>, window_params = [{transform_indices = @transform_0, window_bounds = array<i64: 512, 32>}, {pipeline_mode = #tpu.pipeline_mode<synchronous>, transform_indices = @transform_1, window_bounds = array<i64: 32, 8>}, {pipeline_mode = #tpu.pipeline_mode<synchronous>, transform_indices = @transform_2, window_bounds = array<i64: 1, 8>}, {transform_indices = @transform_3, window_bounds = array<i64: 512, 8>}]} {
    %c0 = arith.constant 0 : index
    %c0_0 = arith.constant 0 : index
    %0 = vector.load %arg1[%c0, %c0_0] : memref<512x32xbf16, #tpu.memory_space<vmem>>, vector<512x32xbf16>
    %c0_1 = arith.constant 0 : index
    %c0_2 = arith.constant 0 : index
    %1 = vector.load %arg2[%c0_1, %c0_2] : memref<32x8xbf16, #tpu.memory_space<vmem>>, vector<32x8xbf16>
    %cst = arith.constant dense<0.000000e+00> : vector<512x8xf32>
    %2 = tpu.matmul %0, %1, %cst {dimension_numbers = #tpu.dot_dimension_numbers<[1], [0], [0], [1], [0, 0, 1, 1], [], []>} : vector<512x32xbf16>, vector<32x8xbf16>, vector<512x8xf32> -> vector<512x8xf32>
    %c0_3 = arith.constant 0 : index
    %c0_4 = arith.constant 0 : index
    %3 = vector.load %arg3[%c0_3, %c0_4] : memref<1x8xf32, #tpu.memory_space<vmem>>, vector<1x8xf32>
    %4 = vector.broadcast %3 : vector<1x8xf32> to vector<512x8xf32>
    %5 = arith.addf %2, %4 : vector<512x8xf32>
    %cst_5 = arith.constant 0.000000e+00 : f32
    %6 = vector.broadcast %cst_5 : f32 to vector<512x8xf32>
    %7 = arith.maximumf %5, %6 : vector<512x8xf32>
    %8 = arith.truncf %7 : vector<512x8xf32> to vector<512x8xbf16>
    %c0_6 = arith.constant 0 : index
    %c0_7 = arith.constant 0 : index
    %9 = vector.load %arg4[%c0_6, %c0_7] : memref<512x8xbf16, #tpu.memory_space<vmem>>, vector<512x8xbf16>
    tpu.vector_store %arg4[%c0_6, %c0_7], %8 {strides = array<i32>} : memref<512x8xbf16, #tpu.memory_space<vmem>>, vector<512x8xbf16>,
    return
  }
  func.func @transform_0(%arg0: i32) -> (i32, i32) {
    %c0_i32 = arith.constant 0 : i32
    %c0_i32_0 = arith.constant 0 : i32
    return %arg0, %c0_i32 : i32, i32
  }
  func.func @transform_1(%arg0: i32) -> (i32, i32) {
    %c0_i32 = arith.constant 0 : i32
    %c0_i32_0 = arith.constant 0 : i32
    %c0_i32_1 = arith.constant 0 : i32
    return %c0_i32, %c0_i32_0 : i32, i32
  }
  func.func @transform_2(%arg0: i32) -> (i32, i32) {
    %c0_i32 = arith.constant 0 : i32
    %c0_i32_0 = arith.constant 0 : i32
    %c0_i32_1 = arith.constant 0 : i32
    return %c0_i32, %c0_i32_0 : i32, i32
  }
  func.func @transform_3(%arg0: i32) -> (i32, i32) {
    %c0_i32 = arith.constant 0 : i32
    %c0_i32_0 = arith.constant 0 : i32
    return %arg0, %c0_i32 : i32, i32
  }
}

module attributes {stable_mosaic.version = 11 : i64} {
  func.func @_conv3x3x3_kernel(%arg0: i32, %arg1: i32, %arg2: i32, %arg3: memref<1x1x20x5x8xbf16, #tpu.memory_space<vmem>>, %arg4: memref<3x9x8x8xbf16, #tpu.memory_space<vmem>>, %arg5: memref<1x8xf32, #tpu.memory_space<vmem>>, %arg6: memref<1x1x4x4x8xbf16, #tpu.memory_space<vmem>>, %arg7: memref<16x8xf32, #tpu.memory_space<vmem>>) attributes {dimension_semantics = [#tpu.dimension_semantics<parallel>, #tpu.dimension_semantics<parallel>, #tpu.dimension_semantics<arbitrary>], iteration_bounds = array<i64: 2, 4, 3>, scalar_prefetch = 0 : i64, scratch_operands = 1 : i64, tpu.core_type = #tpu.core_type<tc>, window_params = [{transform_indices = @transform_0, window_bounds = array<i64: 1, 1, 20, 5, 8>}, {pipeline_mode = #tpu.pipeline_mode<synchronous>, transform_indices = @transform_1, window_bounds = array<i64: 3, 9, 8, 8>}, {pipeline_mode = #tpu.pipeline_mode<synchronous>, transform_indices = @transform_2, window_bounds = array<i64: 1, 8>}, {transform_indices = @transform_3, window_bounds = array<i64: 1, 1, 4, 4, 8>}]} {
    %c0_i32 = arith.constant 0 : i32
    %0 = arith.cmpi eq, %arg2, %c0_i32 : i32
    %1 = arith.extui %0 : i1 to i32
    %c0_i32_0 = arith.constant 0 : i32
    %2 = arith.cmpi ne, %1, %c0_i32_0 : i32
    scf.if %2 {
      %cst_56 = arith.constant 0.000000e+00 : f32
      %76 = vector.broadcast %cst_56 : f32 to vector<16x8xf32>
      %c0_57 = arith.constant 0 : index
      %c0_58 = arith.constant 0 : index
      %77 = vector.load %arg7[%c0_57, %c0_58] : memref<16x8xf32, #tpu.memory_space<vmem>>, vector<16x8xf32>
      tpu.vector_store %arg7[%c0_57, %c0_58], %76 {strides = array<i32>} : memref<16x8xf32, #tpu.memory_space<vmem>>, vector<16x8xf32>,
    } else {
    }
    %3 = arith.index_cast %arg2 : i32 to index
    %c0 = arith.constant 0 : index
    %c0_1 = arith.constant 0 : index
    %c0_2 = arith.constant 0 : index
    %4 = vector.load %arg4[%3, %c0, %c0_1, %c0_2] : memref<3x9x8x8xbf16, #tpu.memory_space<vmem>>, vector<1x9x8x8xbf16>
    %5 = vector.shape_cast %4 : vector<1x9x8x8xbf16> to vector<9x8x8xbf16>
    %c0_3 = arith.constant 0 : index
    %c0_4 = arith.constant 0 : index
    %6 = vector.load %arg7[%c0_3, %c0_4] : memref<16x8xf32, #tpu.memory_space<vmem>>, vector<16x8xf32>
    %c0_5 = arith.constant 0 : index
    %c0_6 = arith.constant 0 : index
    %c0_7 = arith.constant 0 : index
    %c0_8 = arith.constant 0 : index
    %c0_9 = arith.constant 0 : index
    %7 = vector.load %arg3[%c0_5, %c0_6, %c0_7, %c0_8, %c0_9] : memref<1x1x20x5x8xbf16, #tpu.memory_space<vmem>>, vector<1x1x4x4x8xbf16>
    %8 = vector.shape_cast %7 : vector<1x1x4x4x8xbf16> to vector<4x4x8xbf16>
    %9 = vector.shape_cast %8 : vector<4x4x8xbf16> to vector<16x8xbf16>
    %10 = vector.extract_strided_slice %5 {offsets = [0, 0, 0], sizes = [1, 8, 8], strides = [1, 1, 1]} : vector<9x8x8xbf16> to vector<1x8x8xbf16>
    %11 = vector.shape_cast %10 : vector<1x8x8xbf16> to vector<8x8xbf16>
    %cst = arith.constant dense<0.000000e+00> : vector<16x8xf32>
    %12 = tpu.matmul %9, %11, %cst {dimension_numbers = #tpu.dot_dimension_numbers<[1], [0], [0], [1], [0, 0, 1, 1], [], []>} : vector<16x8xbf16>, vector<8x8xbf16>, vector<16x8xf32> -> vector<16x8xf32>
    %13 = arith.addf %6, %12 : vector<16x8xf32>
    %c0_10 = arith.constant 0 : index
    %c0_11 = arith.constant 0 : index
    %c5 = arith.constant 5 : index
    %c0_12 = arith.constant 0 : index
    %c0_13 = arith.constant 0 : index
    %14 = vector.load %arg3[%c0_10, %c0_11, %c5, %c0_12, %c0_13] : memref<1x1x20x5x8xbf16, #tpu.memory_space<vmem>>, vector<1x1x4x4x8xbf16>
    %15 = vector.shape_cast %14 : vector<1x1x4x4x8xbf16> to vector<4x4x8xbf16>
    %16 = vector.shape_cast %15 : vector<4x4x8xbf16> to vector<16x8xbf16>
    %17 = vector.extract_strided_slice %5 {offsets = [1, 0, 0], sizes = [1, 8, 8], strides = [1, 1, 1]} : vector<9x8x8xbf16> to vector<1x8x8xbf16>
    %18 = vector.shape_cast %17 : vector<1x8x8xbf16> to vector<8x8xbf16>
    %cst_14 = arith.constant dense<0.000000e+00> : vector<16x8xf32>
    %19 = tpu.matmul %16, %18, %cst_14 {dimension_numbers = #tpu.dot_dimension_numbers<[1], [0], [0], [1], [0, 0, 1, 1], [], []>} : vector<16x8xbf16>, vector<8x8xbf16>, vector<16x8xf32> -> vector<16x8xf32>
    %20 = arith.addf %13, %19 : vector<16x8xf32>
    %c0_15 = arith.constant 0 : index
    %c0_16 = arith.constant 0 : index
    %c0_17 = arith.constant 0 : index
    %c1 = arith.constant 1 : index
    %c0_18 = arith.constant 0 : index
    %21 = vector.load %arg3[%c0_15, %c0_16, %c0_17, %c1, %c0_18] : memref<1x1x20x5x8xbf16, #tpu.memory_space<vmem>>, vector<1x1x4x4x8xbf16>
    %22 = vector.shape_cast %21 : vector<1x1x4x4x8xbf16> to vector<4x4x8xbf16>
    %23 = vector.shape_cast %22 : vector<4x4x8xbf16> to vector<16x8xbf16>
    %24 = vector.extract_strided_slice %5 {offsets = [2, 0, 0], sizes = [1, 8, 8], strides = [1, 1, 1]} : vector<9x8x8xbf16> to vector<1x8x8xbf16>
    %25 = vector.shape_cast %24 : vector<1x8x8xbf16> to vector<8x8xbf16>
    %cst_19 = arith.constant dense<0.000000e+00> : vector<16x8xf32>
    %26 = tpu.matmul %23, %25, %cst_19 {dimension_numbers = #tpu.dot_dimension_numbers<[1], [0], [0], [1], [0, 0, 1, 1], [], []>} : vector<16x8xbf16>, vector<8x8xbf16>, vector<16x8xf32> -> vector<16x8xf32>
    %27 = arith.addf %20, %26 : vector<16x8xf32>
    %c0_20 = arith.constant 0 : index
    %c0_21 = arith.constant 0 : index
    %c10 = arith.constant 10 : index
    %c0_22 = arith.constant 0 : index
    %c0_23 = arith.constant 0 : index
    %28 = vector.load %arg3[%c0_20, %c0_21, %c10, %c0_22, %c0_23] : memref<1x1x20x5x8xbf16, #tpu.memory_space<vmem>>, vector<1x1x4x4x8xbf16>
    %29 = vector.shape_cast %28 : vector<1x1x4x4x8xbf16> to vector<4x4x8xbf16>
    %30 = vector.shape_cast %29 : vector<4x4x8xbf16> to vector<16x8xbf16>
    %31 = vector.extract_strided_slice %5 {offsets = [3, 0, 0], sizes = [1, 8, 8], strides = [1, 1, 1]} : vector<9x8x8xbf16> to vector<1x8x8xbf16>
    %32 = vector.shape_cast %31 : vector<1x8x8xbf16> to vector<8x8xbf16>
    %cst_24 = arith.constant dense<0.000000e+00> : vector<16x8xf32>
    %33 = tpu.matmul %30, %32, %cst_24 {dimension_numbers = #tpu.dot_dimension_numbers<[1], [0], [0], [1], [0, 0, 1, 1], [], []>} : vector<16x8xbf16>, vector<8x8xbf16>, vector<16x8xf32> -> vector<16x8xf32>
    %34 = arith.addf %27, %33 : vector<16x8xf32>
    %c0_25 = arith.constant 0 : index
    %c0_26 = arith.constant 0 : index
    %c15 = arith.constant 15 : index
    %c0_27 = arith.constant 0 : index
    %c0_28 = arith.constant 0 : index
    %35 = vector.load %arg3[%c0_25, %c0_26, %c15, %c0_27, %c0_28] : memref<1x1x20x5x8xbf16, #tpu.memory_space<vmem>>, vector<1x1x4x4x8xbf16>
    %36 = vector.shape_cast %35 : vector<1x1x4x4x8xbf16> to vector<4x4x8xbf16>
    %37 = vector.shape_cast %36 : vector<4x4x8xbf16> to vector<16x8xbf16>
    %38 = vector.extract_strided_slice %5 {offsets = [4, 0, 0], sizes = [1, 8, 8], strides = [1, 1, 1]} : vector<9x8x8xbf16> to vector<1x8x8xbf16>
    %39 = vector.shape_cast %38 : vector<1x8x8xbf16> to vector<8x8xbf16>
    %cst_29 = arith.constant dense<0.000000e+00> : vector<16x8xf32>
    %40 = tpu.matmul %37, %39, %cst_29 {dimension_numbers = #tpu.dot_dimension_numbers<[1], [0], [0], [1], [0, 0, 1, 1], [], []>} : vector<16x8xbf16>, vector<8x8xbf16>, vector<16x8xf32> -> vector<16x8xf32>
    %41 = arith.addf %34, %40 : vector<16x8xf32>
    %c0_30 = arith.constant 0 : index
    %c0_31 = arith.constant 0 : index
    %c10_32 = arith.constant 10 : index
    %c1_33 = arith.constant 1 : index
    %c0_34 = arith.constant 0 : index
    %42 = vector.load %arg3[%c0_30, %c0_31, %c10_32, %c1_33, %c0_34] : memref<1x1x20x5x8xbf16, #tpu.memory_space<vmem>>, vector<1x1x4x4x8xbf16>
    %43 = vector.shape_cast %42 : vector<1x1x4x4x8xbf16> to vector<4x4x8xbf16>
    %44 = vector.shape_cast %43 : vector<4x4x8xbf16> to vector<16x8xbf16>
    %45 = vector.extract_strided_slice %5 {offsets = [5, 0, 0], sizes = [1, 8, 8], strides = [1, 1, 1]} : vector<9x8x8xbf16> to vector<1x8x8xbf16>
    %46 = vector.shape_cast %45 : vector<1x8x8xbf16> to vector<8x8xbf16>
    %cst_35 = arith.constant dense<0.000000e+00> : vector<16x8xf32>
    %47 = tpu.matmul %44, %46, %cst_35 {dimension_numbers = #tpu.dot_dimension_numbers<[1], [0], [0], [1], [0, 0, 1, 1], [], []>} : vector<16x8xbf16>, vector<8x8xbf16>, vector<16x8xf32> -> vector<16x8xf32>
    %48 = arith.addf %41, %47 : vector<16x8xf32>
    %c0_36 = arith.constant 0 : index
    %c0_37 = arith.constant 0 : index
    %c1_38 = arith.constant 1 : index
    %c0_39 = arith.constant 0 : index
    %c0_40 = arith.constant 0 : index
    %49 = vector.load %arg3[%c0_36, %c0_37, %c1_38, %c0_39, %c0_40] : memref<1x1x20x5x8xbf16, #tpu.memory_space<vmem>>, vector<1x1x4x4x8xbf16>
    %50 = vector.shape_cast %49 : vector<1x1x4x4x8xbf16> to vector<4x4x8xbf16>
    %51 = vector.shape_cast %50 : vector<4x4x8xbf16> to vector<16x8xbf16>
    %52 = vector.extract_strided_slice %5 {offsets = [6, 0, 0], sizes = [1, 8, 8], strides = [1, 1, 1]} : vector<9x8x8xbf16> to vector<1x8x8xbf16>
    %53 = vector.shape_cast %52 : vector<1x8x8xbf16> to vector<8x8xbf16>
    %cst_41 = arith.constant dense<0.000000e+00> : vector<16x8xf32>
    %54 = tpu.matmul %51, %53, %cst_41 {dimension_numbers = #tpu.dot_dimension_numbers<[1], [0], [0], [1], [0, 0, 1, 1], [], []>} : vector<16x8xbf16>, vector<8x8xbf16>, vector<16x8xf32> -> vector<16x8xf32>
    %55 = arith.addf %48, %54 : vector<16x8xf32>
    %c0_42 = arith.constant 0 : index
    %c0_43 = arith.constant 0 : index
    %c6 = arith.constant 6 : index
    %c0_44 = arith.constant 0 : index
    %c0_45 = arith.constant 0 : index
    %56 = vector.load %arg3[%c0_42, %c0_43, %c6, %c0_44, %c0_45] : memref<1x1x20x5x8xbf16, #tpu.memory_space<vmem>>, vector<1x1x4x4x8xbf16>
    %57 = vector.shape_cast %56 : vector<1x1x4x4x8xbf16> to vector<4x4x8xbf16>
    %58 = vector.shape_cast %57 : vector<4x4x8xbf16> to vector<16x8xbf16>
    %59 = vector.extract_strided_slice %5 {offsets = [7, 0, 0], sizes = [1, 8, 8], strides = [1, 1, 1]} : vector<9x8x8xbf16> to vector<1x8x8xbf16>
    %60 = vector.shape_cast %59 : vector<1x8x8xbf16> to vector<8x8xbf16>
    %cst_46 = arith.constant dense<0.000000e+00> : vector<16x8xf32>
    %61 = tpu.matmul %58, %60, %cst_46 {dimension_numbers = #tpu.dot_dimension_numbers<[1], [0], [0], [1], [0, 0, 1, 1], [], []>} : vector<16x8xbf16>, vector<8x8xbf16>, vector<16x8xf32> -> vector<16x8xf32>
    %62 = arith.addf %55, %61 : vector<16x8xf32>
    %c0_47 = arith.constant 0 : index
    %c0_48 = arith.constant 0 : index
    %c1_49 = arith.constant 1 : index
    %c1_50 = arith.constant 1 : index
    %c0_51 = arith.constant 0 : index
    %63 = vector.load %arg3[%c0_47, %c0_48, %c1_49, %c1_50, %c0_51] : memref<1x1x20x5x8xbf16, #tpu.memory_space<vmem>>, vector<1x1x4x4x8xbf16>
    %64 = vector.shape_cast %63 : vector<1x1x4x4x8xbf16> to vector<4x4x8xbf16>
    %65 = vector.shape_cast %64 : vector<4x4x8xbf16> to vector<16x8xbf16>
    %66 = vector.extract_strided_slice %5 {offsets = [8, 0, 0], sizes = [1, 8, 8], strides = [1, 1, 1]} : vector<9x8x8xbf16> to vector<1x8x8xbf16>
    %67 = vector.shape_cast %66 : vector<1x8x8xbf16> to vector<8x8xbf16>
    %cst_52 = arith.constant dense<0.000000e+00> : vector<16x8xf32>
    %68 = tpu.matmul %65, %67, %cst_52 {dimension_numbers = #tpu.dot_dimension_numbers<[1], [0], [0], [1], [0, 0, 1, 1], [], []>} : vector<16x8xbf16>, vector<8x8xbf16>, vector<16x8xf32> -> vector<16x8xf32>
    %69 = arith.addf %62, %68 : vector<16x8xf32>
    %c2_i32 = arith.constant 2 : i32
    %70 = arith.cmpi slt, %arg2, %c2_i32 : i32
    %71 = arith.extui %70 : i1 to i32
    %c0_i32_53 = arith.constant 0 : i32
    %72 = arith.cmpi ne, %71, %c0_i32_53 : i32
    scf.if %72 {
      %c0_56 = arith.constant 0 : index
      %c0_57 = arith.constant 0 : index
      %76 = vector.load %arg7[%c0_56, %c0_57] : memref<16x8xf32, #tpu.memory_space<vmem>>, vector<16x8xf32>
      tpu.vector_store %arg7[%c0_56, %c0_57], %69 {strides = array<i32>} : memref<16x8xf32, #tpu.memory_space<vmem>>, vector<16x8xf32>,
    } else {
    }
    %c2_i32_54 = arith.constant 2 : i32
    %73 = arith.cmpi eq, %arg2, %c2_i32_54 : i32
    %74 = arith.extui %73 : i1 to i32
    %c0_i32_55 = arith.constant 0 : i32
    %75 = arith.cmpi ne, %74, %c0_i32_55 : i32
    scf.if %75 {
      %c0_56 = arith.constant 0 : index
      %c0_57 = arith.constant 0 : index
      %76 = vector.load %arg5[%c0_56, %c0_57] : memref<1x8xf32, #tpu.memory_space<vmem>>, vector<1x8xf32>
      %77 = vector.broadcast %76 : vector<1x8xf32> to vector<16x8xf32>
      %78 = arith.addf %69, %77 : vector<16x8xf32>
      %cst_58 = arith.constant 0.000000e+00 : f32
      %79 = vector.broadcast %cst_58 : f32 to vector<16x8xf32>
      %80 = arith.maximumf %78, %79 : vector<16x8xf32>
      %81 = vector.shape_cast %80 : vector<16x8xf32> to vector<4x4x8xf32>
      %82 = arith.truncf %81 : vector<4x4x8xf32> to vector<4x4x8xbf16>
      %c0_59 = arith.constant 0 : index
      %c0_60 = arith.constant 0 : index
      %c0_61 = arith.constant 0 : index
      %c0_62 = arith.constant 0 : index
      %c0_63 = arith.constant 0 : index
      %83 = vector.load %arg6[%c0_59, %c0_60, %c0_61, %c0_62, %c0_63] : memref<1x1x4x4x8xbf16, #tpu.memory_space<vmem>>, vector<1x1x4x4x8xbf16>
      %84 = vector.shape_cast %83 : vector<1x1x4x4x8xbf16> to vector<4x4x8xbf16>
      %85 = vector.shape_cast %82 : vector<4x4x8xbf16> to vector<1x1x4x4x8xbf16>
      tpu.vector_store %arg6[%c0_59, %c0_60, %c0_61, %c0_62, %c0_63], %85 {strides = array<i32>} : memref<1x1x4x4x8xbf16, #tpu.memory_space<vmem>>, vector<1x1x4x4x8xbf16>,
    } else {
    }
    return
  }
  func.func @transform_0(%arg0: i32, %arg1: i32, %arg2: i32) -> (i32, i32, i32, i32, i32) {
    %c2_i32 = arith.constant 2 : i32
    %0 = arith.muli %arg1, %c2_i32 : i32
    %1 = arith.addi %0, %arg2 : i32
    %c0_i32 = arith.constant 0 : i32
    %c0_i32_0 = arith.constant 0 : i32
    %c0_i32_1 = arith.constant 0 : i32
    %c0_i32_2 = arith.constant 0 : i32
    return %arg0, %1, %c0_i32, %c0_i32_0, %c0_i32_1 : i32, i32, i32, i32, i32
  }
  func.func @transform_1(%arg0: i32, %arg1: i32, %arg2: i32) -> (i32, i32, i32, i32) {
    %c0_i32 = arith.constant 0 : i32
    %c0_i32_0 = arith.constant 0 : i32
    %c0_i32_1 = arith.constant 0 : i32
    %c0_i32_2 = arith.constant 0 : i32
    %c0_i32_3 = arith.constant 0 : i32
    return %c0_i32, %c0_i32_0, %c0_i32_1, %c0_i32_2 : i32, i32, i32, i32
  }
  func.func @transform_2(%arg0: i32, %arg1: i32, %arg2: i32) -> (i32, i32) {
    %c0_i32 = arith.constant 0 : i32
    %c0_i32_0 = arith.constant 0 : i32
    %c0_i32_1 = arith.constant 0 : i32
    return %c0_i32, %c0_i32_0 : i32, i32
  }
  func.func @transform_3(%arg0: i32, %arg1: i32, %arg2: i32) -> (i32, i32, i32, i32, i32) {
    %c0_i32 = arith.constant 0 : i32
    %c0_i32_0 = arith.constant 0 : i32
    %c0_i32_1 = arith.constant 0 : i32
    %c0_i32_2 = arith.constant 0 : i32
    return %arg0, %arg1, %c0_i32, %c0_i32_0, %c0_i32_1 : i32, i32, i32, i32, i32
  }
}

module attributes {stable_mosaic.version = 11 : i64} {
  func.func @_mm_shift_relu_residual_kernel(%arg0: i32, %arg1: memref<64x8xbf16, #tpu.memory_space<vmem>>, %arg2: memref<8x32xbf16, #tpu.memory_space<vmem>>, %arg3: memref<1x32xf32, #tpu.memory_space<vmem>>, %arg4: memref<64x32xbf16, #tpu.memory_space<vmem>>, %arg5: memref<64x32xbf16, #tpu.memory_space<vmem>>) attributes {dimension_semantics = [#tpu.dimension_semantics<parallel>], iteration_bounds = array<i64: 2>, scalar_prefetch = 0 : i64, scratch_operands = 0 : i64, tpu.core_type = #tpu.core_type<tc>, window_params = [{transform_indices = @transform_0, window_bounds = array<i64: 64, 8>}, {pipeline_mode = #tpu.pipeline_mode<synchronous>, transform_indices = @transform_1, window_bounds = array<i64: 8, 32>}, {pipeline_mode = #tpu.pipeline_mode<synchronous>, transform_indices = @transform_2, window_bounds = array<i64: 1, 32>}, {transform_indices = @transform_3, window_bounds = array<i64: 64, 32>}, {transform_indices = @transform_4, window_bounds = array<i64: 64, 32>}]} {
    %c0 = arith.constant 0 : index
    %c0_0 = arith.constant 0 : index
    %0 = vector.load %arg1[%c0, %c0_0] : memref<64x8xbf16, #tpu.memory_space<vmem>>, vector<64x8xbf16>
    %c0_1 = arith.constant 0 : index
    %c0_2 = arith.constant 0 : index
    %1 = vector.load %arg2[%c0_1, %c0_2] : memref<8x32xbf16, #tpu.memory_space<vmem>>, vector<8x32xbf16>
    %cst = arith.constant dense<0.000000e+00> : vector<64x32xf32>
    %2 = tpu.matmul %0, %1, %cst {dimension_numbers = #tpu.dot_dimension_numbers<[1], [0], [0], [1], [0, 0, 1, 1], [], []>} : vector<64x8xbf16>, vector<8x32xbf16>, vector<64x32xf32> -> vector<64x32xf32>
    %c0_3 = arith.constant 0 : index
    %c0_4 = arith.constant 0 : index
    %3 = vector.load %arg3[%c0_3, %c0_4] : memref<1x32xf32, #tpu.memory_space<vmem>>, vector<1x32xf32>
    %4 = vector.broadcast %3 : vector<1x32xf32> to vector<64x32xf32>
    %5 = arith.addf %2, %4 : vector<64x32xf32>
    %cst_5 = arith.constant 0.000000e+00 : f32
    %6 = vector.broadcast %cst_5 : f32 to vector<64x32xf32>
    %7 = arith.maximumf %5, %6 : vector<64x32xf32>
    %c0_6 = arith.constant 0 : index
    %c0_7 = arith.constant 0 : index
    %8 = vector.load %arg4[%c0_6, %c0_7] : memref<64x32xbf16, #tpu.memory_space<vmem>>, vector<64x32xbf16>
    %9 = arith.extf %8 : vector<64x32xbf16> to vector<64x32xf32>
    %10 = arith.addf %7, %9 : vector<64x32xf32>
    %cst_8 = arith.constant 0.000000e+00 : f32
    %11 = vector.broadcast %cst_8 : f32 to vector<64x32xf32>
    %12 = arith.maximumf %10, %11 : vector<64x32xf32>
    %13 = arith.truncf %12 : vector<64x32xf32> to vector<64x32xbf16>
    %c0_9 = arith.constant 0 : index
    %c0_10 = arith.constant 0 : index
    %14 = vector.load %arg5[%c0_9, %c0_10] : memref<64x32xbf16, #tpu.memory_space<vmem>>, vector<64x32xbf16>
    tpu.vector_store %arg5[%c0_9, %c0_10], %13 {strides = array<i32>} : memref<64x32xbf16, #tpu.memory_space<vmem>>, vector<64x32xbf16>,
    return
  }
  func.func @transform_0(%arg0: i32) -> (i32, i32) {
    %c0_i32 = arith.constant 0 : i32
    %c0_i32_0 = arith.constant 0 : i32
    return %arg0, %c0_i32 : i32, i32
  }
  func.func @transform_1(%arg0: i32) -> (i32, i32) {
    %c0_i32 = arith.constant 0 : i32
    %c0_i32_0 = arith.constant 0 : i32
    %c0_i32_1 = arith.constant 0 : i32
    return %c0_i32, %c0_i32_0 : i32, i32
  }
  func.func @transform_2(%arg0: i32) -> (i32, i32) {
    %c0_i32 = arith.constant 0 : i32
    %c0_i32_0 = arith.constant 0 : i32
    %c0_i32_1 = arith.constant 0 : i32
    return %c0_i32, %c0_i32_0 : i32, i32
  }
  func.func @transform_3(%arg0: i32) -> (i32, i32) {
    %c0_i32 = arith.constant 0 : i32
    %c0_i32_0 = arith.constant 0 : i32
    return %arg0, %c0_i32 : i32, i32
  }
  func.func @transform_4(%arg0: i32) -> (i32, i32) {
    %c0_i32 = arith.constant 0 : i32
    %c0_i32_0 = arith.constant 0 : i32
    return %arg0, %c0_i32 : i32, i32
  }
}

module attributes {stable_mosaic.version = 11 : i64} {
  func.func @_mean_kernel(%arg0: i32, %arg1: i32, %arg2: memref<1x64x32xbf16, #tpu.memory_space<vmem>>, %arg3: memref<1x1x32xf32, #tpu.memory_space<vmem>>, %arg4: memref<1x32xf32, #tpu.memory_space<vmem>>) attributes {dimension_semantics = [#tpu.dimension_semantics<parallel>, #tpu.dimension_semantics<arbitrary>], iteration_bounds = array<i64: 2, 1>, scalar_prefetch = 0 : i64, scratch_operands = 1 : i64, tpu.core_type = #tpu.core_type<tc>, window_params = [{transform_indices = @transform_0, window_bounds = array<i64: 1, 64, 32>}, {transform_indices = @transform_1, window_bounds = array<i64: 1, 1, 32>}]} {
    %c0_i32 = arith.constant 0 : i32
    %0 = arith.cmpi eq, %arg1, %c0_i32 : i32
    %1 = arith.extui %0 : i1 to i32
    %c0_i32_0 = arith.constant 0 : i32
    %2 = arith.cmpi ne, %1, %c0_i32_0 : i32
    scf.if %2 {
      %cst_9 = arith.constant 0.000000e+00 : f32
      %14 = vector.broadcast %cst_9 : f32 to vector<1x32xf32>
      %c0_10 = arith.constant 0 : index
      %c0_11 = arith.constant 0 : index
      %15 = vector.load %arg4[%c0_10, %c0_11] : memref<1x32xf32, #tpu.memory_space<vmem>>, vector<1x32xf32>
      tpu.vector_store %arg4[%c0_10, %c0_11], %14 {strides = array<i32>} : memref<1x32xf32, #tpu.memory_space<vmem>>, vector<1x32xf32>,
    } else {
    }
    %c0 = arith.constant 0 : index
    %c0_1 = arith.constant 0 : index
    %3 = vector.load %arg4[%c0, %c0_1] : memref<1x32xf32, #tpu.memory_space<vmem>>, vector<1x32xf32>
    %c0_2 = arith.constant 0 : index
    %c0_3 = arith.constant 0 : index
    %c0_4 = arith.constant 0 : index
    %4 = vector.load %arg2[%c0_2, %c0_3, %c0_4] : memref<1x64x32xbf16, #tpu.memory_space<vmem>>, vector<1x64x32xbf16>
    %5 = vector.shape_cast %4 : vector<1x64x32xbf16> to vector<64x32xbf16>
    %6 = arith.extf %5 : vector<64x32xbf16> to vector<64x32xf32>
    %cst = arith.constant dense<0.000000e+00> : vector<32xf32>
    %7 = vector.multi_reduction <add>, %6, %cst [0] : vector<64x32xf32> to vector<32xf32>
    %8 = vector.shape_cast %7 : vector<32xf32> to vector<1x32xf32>
    %9 = arith.addf %3, %8 : vector<1x32xf32>
    %c0_5 = arith.constant 0 : index
    %c0_6 = arith.constant 0 : index
    %10 = vector.load %arg4[%c0_5, %c0_6] : memref<1x32xf32, #tpu.memory_space<vmem>>, vector<1x32xf32>
    tpu.vector_store %arg4[%c0_5, %c0_6], %9 {strides = array<i32>} : memref<1x32xf32, #tpu.memory_space<vmem>>, vector<1x32xf32>,
    %c0_i32_7 = arith.constant 0 : i32
    %11 = arith.cmpi eq, %arg1, %c0_i32_7 : i32
    %12 = arith.extui %11 : i1 to i32
    %c0_i32_8 = arith.constant 0 : i32
    %13 = arith.cmpi ne, %12, %c0_i32_8 : i32
    scf.if %13 {
      %c0_9 = arith.constant 0 : index
      %c0_10 = arith.constant 0 : index
      %14 = vector.load %arg4[%c0_9, %c0_10] : memref<1x32xf32, #tpu.memory_space<vmem>>, vector<1x32xf32>
      %cst_11 = arith.constant 1.562500e-02 : f32
      %15 = vector.broadcast %cst_11 : f32 to vector<1x32xf32>
      %16 = arith.mulf %14, %15 : vector<1x32xf32>
      %c0_12 = arith.constant 0 : index
      %c0_13 = arith.constant 0 : index
      %c0_14 = arith.constant 0 : index
      %17 = vector.load %arg3[%c0_12, %c0_13, %c0_14] : memref<1x1x32xf32, #tpu.memory_space<vmem>>, vector<1x1x32xf32>
      %18 = vector.shape_cast %17 : vector<1x1x32xf32> to vector<1x32xf32>
      %19 = vector.shape_cast %16 : vector<1x32xf32> to vector<1x1x32xf32>
      tpu.vector_store %arg3[%c0_12, %c0_13, %c0_14], %19 {strides = array<i32>} : memref<1x1x32xf32, #tpu.memory_space<vmem>>, vector<1x1x32xf32>,
    } else {
    }
    return
  }
  func.func @transform_0(%arg0: i32, %arg1: i32) -> (i32, i32, i32) {
    %c0_i32 = arith.constant 0 : i32
    %c0_i32_0 = arith.constant 0 : i32
    return %arg0, %arg1, %c0_i32 : i32, i32, i32
  }
  func.func @transform_1(%arg0: i32, %arg1: i32) -> (i32, i32, i32) {
    %c0_i32 = arith.constant 0 : i32
    %c0_i32_0 = arith.constant 0 : i32
    %c0_i32_1 = arith.constant 0 : i32
    return %arg0, %c0_i32, %c0_i32_0 : i32, i32, i32
  }
}

</mosaic_0001>

<bundles_post_ra>
// kernel: _lambda_.13
= control target key start
LH: loop header
LB: loop body
LE: loop exit
PB: predicated region body
PF: predicated region fallthrough
CT: control target
= control target key end

     0   :  { %s2598_s18 = smov 0   ;;  %s3056_s0 = inlined_call_operand.vmem [shape: bf16[1024,8], index: 0, kind: input, shape index: {}]   ;;  %s3057_s1 = inlined_call_operand.vmem [shape: bf16[8,4], index: 1, kind: input, shape index: {}]   ;;  %s3058_s2 = inlined_call_operand.vmem [shape: f32[1,4], index: 2, kind: input, shape index: {}]   ;;  %s3059_s3 = inlined_call_operand.vmem [shape: bf16[8,16], index: 3, kind: input, shape index: {}]   ;;  %s3060_s4 = inlined_call_operand.vmem [shape: bf16[1024,4], index: 4, kind: output, shape index: {0}]   ;;  %s3061_s5 = inlined_call_operand.vmem [shape: bf16[1024,16], index: 5, kind: output, shape index: {1}]  }
   0x1 LB: > { %s1954_s19 = sadd.s32 4294967295, %s2566_s18   ;;  %p1958_p0 = scmp.ge.s32.totalorder %s2566_s18, 1  ;;  %s2566_s18 = sphi %s2598_s18, %s16_s18  }
   0x2   : > { %p191_p1 = scmp.lt.s32.totalorder %s2566_s18, 3 }
   0x4   : > { %p192_p2 = pnand %p1958_p0, %p191_p1 }
   0x5   : > { %s1959_s24 = sshll.u32 (!%p192_p2), %s1954_s19, 6 }
   0x6   : > { %195 = sbr.rel (%p192_p2) target bundleno = 342 (0x156), region = 36  ;;  %p225_p3 = scmp.lt.s32.totalorder (!%p192_p2), %s1959_s24, 127 }
   0xb   : > { %v307_v0 = vld [vmem:[%s3057_s1] sm:$0xf]  ;;  %vm572_vm0 = vcmask 1043456   ;;  %s3063_s24 = smov (!%p225_p3, %s1959_s24), 127  ;;  %vm475_vm1 = vcmask 64512   ;;  %vm1799_vm2 = vcmask 125952  }
   0xc   : > { %v1250_v1 = vld [vmem:[%s3059_s3] sm:$0xf]  ;;  %2518 = vmatprep.subr.msk.bf16.mxu0 %vm572_vm0, %v307_v0  ;;  %v574_v2 = vsel %vm572_vm0, %v307_v0, 0  ;;  %s2612_s25 = sshll.u32 %s3063_s24, 2  ;;  %vm1185_vm3 = vcmask 27648  }
   0xd   : > { %2519 = vmatprep.subr.msk.bf16.mxu1 %vm572_vm0, %v1250_v1  ;;  %v1252_v3 = vsel %vm572_vm0, %v1250_v1, 0  ;;  %2387 = vmatpush3.bf16.msra.mxu0 %v574_v2  ;;  %s2618_s28 = scalar_lea.vmem %s3056_s0, %s2612_s25  ;;  %v2719_v36 = vld [vmem:[%s3058_s2] ss:$0 sm:$0xff]  ;;  %s2725_s8 = scalar_lea.vmem %s3061_s5, %s2612_s25 }
   0xe   : > { %2453 = vmatpush3.bf16.msra.mxu1 %v1252_v3  ;;  %v2528_v4 = vld [vmem:[%s2618_s28] sm:$0xff]   ;;  %v2529_v5 = vld [vmem:[%s2618_s28 + $0x8] sm:$0xff]   ;;  %v2530_v6 = vld [vmem:[%s2618_s28 + $0x10] sm:$0xff]   ;;  %s2735_s11 = scalar_lea.vmem %s3060_s4, %s2612_s25 }
   0xf   : > { %2388 = vmatprep.mubr.msk.bf16.mxu0 %vm475_vm1, %v2528_v4  ;;  %2454 = vmatprep.mubr.msk.bf16.mxu1 %vm475_vm1, %v2528_v4  ;;  %v2531_v7 = vld [vmem:[%s2618_s28 + $0x18] sm:$0xff]   ;;  %v2532_v8 = vld [vmem:[%s2618_s28 + $0x20] sm:$0xff]   ;;  %v2533_v9 = vld [vmem:[%s2618_s28 + $0x28] sm:$0xff]  }
  0x10   : > { %2389 = vmatmul.mubr.msk.bf16.vlgmr.msra.gmra.mxu0 %vm475_vm1, %v2529_v5  ;;  %v2534_v10 = vld [vmem:[%s2618_s28 + $0x30] sm:$0xff]   ;;  %v2535_v11 = vld [vmem:[%s2618_s28 + $0x38] sm:$0xff]   ;;  %v2536_v12 = vld [vmem:[%s2618_s28 + $0x40] sm:$0xff]  }
  0x11   : > { %2455 = vmatmul.mubr.msk.bf16.vlgmr.msra.gmra.mxu1 %vm475_vm1, %v2529_v5  ;;  %2392 = vmatprep.mubr.msk.bf16.mxu0 %vm475_vm1, %v2530_v6  ;;  %v2537_v13 = vld [vmem:[%s2618_s28 + $0x48] sm:$0xff]   ;;  %v2538_v14 = vld [vmem:[%s2618_s28 + $0x50] sm:$0xff]   ;;  %v2539_v15 = vld [vmem:[%s2618_s28 + $0x58] sm:$0xff]  }
  0x12   : > { %2458 = vmatprep.mubr.msk.bf16.mxu1 %vm475_vm1, %v2530_v6  ;;  %v2540_v16 = vld [vmem:[%s2618_s28 + $0x60] sm:$0xff]   ;;  %v2541_v17 = vld [vmem:[%s2618_s28 + $0x68] sm:$0xff]   ;;  %v2542_v18 = vld [vmem:[%s2618_s28 + $0x70] sm:$0xff]  }
  0x13   : > { %v2543_v19 = vld [vmem:[%s2618_s28 + $0x78] sm:$0xff]   ;;  %v2544_v20 = vld [vmem:[%s2618_s28 + $0x80] sm:$0xff]   ;;  %v2545_v21 = vld [vmem:[%s2618_s28 + $0x88] sm:$0xff]  }
  0x14   : > { %v2546_v22 = vld [vmem:[%s2618_s28 + $0x90] sm:$0xff]   ;;  %v2547_v23 = vld [vmem:[%s2618_s28 + $0x98] sm:$0xff]   ;;  %v2548_v24 = vld [vmem:[%s2618_s28 + $0xa0] sm:$0xff]  }
  0x15   : > { %v2549_v25 = vld [vmem:[%s2618_s28 + $0xa8] sm:$0xff]   ;;  %v2550_v26 = vld [vmem:[%s2618_s28 + $0xb0] sm:$0xff]   ;;  %v2551_v27 = vld [vmem:[%s2618_s28 + $0xb8] sm:$0xff]  }
  0x16   : > { %v2552_v28 = vld [vmem:[%s2618_s28 + $0xc0] sm:$0xff]   ;;  %v2553_v29 = vld [vmem:[%s2618_s28 + $0xc8] sm:$0xff]   ;;  %v2554_v30 = vld [vmem:[%s2618_s28 + $0xd0] sm:$0xff]  }
  0x17   : > { %v2555_v31 = vld [vmem:[%s2618_s28 + $0xd8] sm:$0xff]   ;;  %v2556_v32 = vld [vmem:[%s2618_s28 + $0xe0] sm:$0xff]   ;;  %v2557_v33 = vld [vmem:[%s2618_s28 + $0xe8] sm:$0xff]  }
  0x18   : > { %2393 = vmatmul.mubr.msk.bf16.gmra.mxu0 %vm475_vm1, %v2531_v7  ;;  %v2558_v34 = vld [vmem:[%s2618_s28 + $0xf0] sm:$0xff]   ;;  %v2559_v35 = vld [vmem:[%s2618_s28 + $0xf8] sm:$0xff]  }
  0x19   : > { %2459 = vmatmul.mubr.msk.bf16.gmra.mxu1 %vm475_vm1, %v2531_v7  ;;  %2396 = vmatprep.mubr.msk.bf16.mxu0 %vm475_vm1, %v2532_v8 }
  0x1a   : > { %2462 = vmatprep.mubr.msk.bf16.mxu1 %vm475_vm1, %v2532_v8 }
  0x20   : > { %2397 = vmatmul.mubr.msk.bf16.gmra.mxu0 %vm475_vm1, %v2533_v9 }
  0x21   : > { %2463 = vmatmul.mubr.msk.bf16.gmra.mxu1 %vm475_vm1, %v2533_v9  ;;  %2400 = vmatprep.mubr.msk.bf16.mxu0 %vm475_vm1, %v2534_v10 }
  0x22   : > { %2466 = vmatprep.mubr.msk.bf16.mxu1 %vm475_vm1, %v2534_v10 }
  0x28   : > { %2401 = vmatmul.mubr.msk.bf16.gmra.mxu0 %vm475_vm1, %v2535_v11 }
  0x29   : > { %2467 = vmatmul.mubr.msk.bf16.gmra.mxu1 %vm475_vm1, %v2535_v11  ;;  %2404 = vmatprep.mubr.msk.bf16.mxu0 %vm475_vm1, %v2536_v12 }
  0x2a   : > { %2470 = vmatprep.mubr.msk.bf16.mxu1 %vm475_vm1, %v2536_v12 }
  0x30   : > { %2405 = vmatmul.mubr.msk.bf16.gmra.mxu0 %vm475_vm1, %v2537_v13 }
  0x31   : > { %2471 = vmatmul.mubr.msk.bf16.gmra.mxu1 %vm475_vm1, %v2537_v13  ;;  %2408 = vmatprep.mubr.msk.bf16.mxu0 %vm475_vm1, %v2538_v14 }
  0x32   : > { %2474 = vmatprep.mubr.msk.bf16.mxu1 %vm475_vm1, %v2538_v14 }
  0x38   : > { %2409 = vmatmul.mubr.msk.bf16.gmra.mxu0 %vm475_vm1, %v2539_v15 }
  0x39   : > { %2475 = vmatmul.mubr.msk.bf16.gmra.mxu1 %vm475_vm1, %v2539_v15  ;;  %2412 = vmatprep.mubr.msk.bf16.mxu0 %vm475_vm1, %v2540_v16 }
  0x3a   : > { %2478 = vmatprep.mubr.msk.bf16.mxu1 %vm475_vm1, %v2540_v16 }
  0x40   : > { %2413 = vmatmul.mubr.msk.bf16.gmra.mxu0 %vm475_vm1, %v2541_v17 }
  0x41   : > { %2479 = vmatmul.mubr.msk.bf16.gmra.mxu1 %vm475_vm1, %v2541_v17  ;;  %2416 = vmatprep.mubr.msk.bf16.mxu0 %vm475_vm1, %v2542_v18 }
  0x42   : > { %2482 = vmatprep.mubr.msk.bf16.mxu1 %vm475_vm1, %v2542_v18 }
  0x48   : > { %2417 = vmatmul.mubr.msk.bf16.gmra.mxu0 %vm475_vm1, %v2543_v19 }
  0x49   : > { %2483 = vmatmul.mubr.msk.bf16.gmra.mxu1 %vm475_vm1, %v2543_v19  ;;  %2420 = vmatprep.mubr.msk.bf16.mxu0 %vm475_vm1, %v2544_v20 }
  0x4a   : > { %2486 = vmatprep.mubr.msk.bf16.mxu1 %vm475_vm1, %v2544_v20 }
  0x50   : > { %2421 = vmatmul.mubr.msk.bf16.gmra.mxu0 %vm475_vm1, %v2545_v21 }
  0x51   : > { %2487 = vmatmul.mubr.msk.bf16.gmra.mxu1 %vm475_vm1, %v2545_v21  ;;  %2424 = vmatprep.mubr.msk.bf16.mxu0 %vm475_vm1, %v2546_v22 }
  0x52   : > { %2490 = vmatprep.mubr.msk.bf16.mxu1 %vm475_vm1, %v2546_v22 }
  0x58   : > { %2425 = vmatmul.mubr.msk.bf16.gmra.mxu0 %vm475_vm1, %v2547_v23 }
  0x59   : > { %2491 = vmatmul.mubr.msk.bf16.gmra.mxu1 %vm475_vm1, %v2547_v23  ;;  %2428 = vmatprep.mubr.msk.bf16.mxu0 %vm475_vm1, %v2548_v24 }
  0x5a   : > { %2494 = vmatprep.mubr.msk.bf16.mxu1 %vm475_vm1, %v2548_v24 }
  0x60   : > { %2429 = vmatmul.mubr.msk.bf16.gmra.mxu0 %vm475_vm1, %v2549_v25 }
  0x61   : > { %2495 = vmatmul.mubr.msk.bf16.gmra.mxu1 %vm475_vm1, %v2549_v25  ;;  %2432 = vmatprep.mubr.msk.bf16.mxu0 %vm475_vm1, %v2550_v26 }
  0x62   : > { %2498 = vmatprep.mubr.msk.bf16.mxu1 %vm475_vm1, %v2550_v26 }
  0x68   : > { %2433 = vmatmul.mubr.msk.bf16.gmra.mxu0 %vm475_vm1, %v2551_v27 }
  0x69   : > { %2499 = vmatmul.mubr.msk.bf16.gmra.mxu1 %vm475_vm1, %v2551_v27  ;;  %2436 = vmatprep.mubr.msk.bf16.mxu0 %vm475_vm1, %v2552_v28 }
  0x6a   : > { %2502 = vmatprep.mubr.msk.bf16.mxu1 %vm475_vm1, %v2552_v28 }
  0x70   : > { %2437 = vmatmul.mubr.msk.bf16.gmra.mxu0 %vm475_vm1, %v2553_v29 }
  0x71   : > { %2503 = vmatmul.mubr.msk.bf16.gmra.mxu1 %vm475_vm1, %v2553_v29  ;;  %2440 = vmatprep.mubr.msk.bf16.mxu0 %vm475_vm1, %v2554_v30 }
  0x72   : > { %2506 = vmatprep.mubr.msk.bf16.mxu1 %vm475_vm1, %v2554_v30 }
  0x78   : > { %2441 = vmatmul.mubr.msk.bf16.gmra.mxu0 %vm475_vm1, %v2555_v31 }
  0x79   : > { %2507 = vmatmul.mubr.msk.bf16.gmra.mxu1 %vm475_vm1, %v2555_v31  ;;  %2444 = vmatprep.mubr.msk.bf16.mxu0 %vm475_vm1, %v2556_v32 }
  0x7a   : > { %2510 = vmatprep.mubr.msk.bf16.mxu1 %vm475_vm1, %v2556_v32 }
  0x80   : > { %2445 = vmatmul.mubr.msk.bf16.gmra.mxu0 %vm475_vm1, %v2557_v33 }
  0x81   : > { %2511 = vmatmul.mubr.msk.bf16.gmra.mxu1 %vm475_vm1, %v2557_v33  ;;  %2448 = vmatprep.mubr.msk.bf16.mxu0 %vm475_vm1, %v2558_v34 }
  0x82   : > { %2514 = vmatprep.mubr.msk.bf16.mxu1 %vm475_vm1, %v2558_v34 }
  0x88   : > { %2449 = vmatmul.mubr.msk.bf16.gmra.mxu0 %vm475_vm1, %v2559_v35 }
  0x89   : > { %2515 = vmatmul.mubr.msk.bf16.gmra.mxu1 %vm475_vm1, %v2559_v35 }
  0xd0   : > { %v2390_v37 = vpop.f32.mrf.mxu0 }
  0xd1   : > { %v2456_v38 = vpop.f32.mrf.mxu1  ;;  %v619_v39 = vadd.f32 %v2390_v37, %v2719_v36 }
  0xd2   : > { %v2258_v40 = vpack.c.bf16 %v2456_v38, %v2456_v38  ;;  %v610_v41 = vpop.f32.mrf.mxu0 }
  0xd3   : > { %v1288_v42 = vpop.f32.mrf.mxu1  ;;  %v867_v43 = vmax.f32 %v619_v39, 0.0  ;;  %v611_v44 = vadd.f32 %v2719_v36, %v610_v41 }
  0xd4   : > { %1802 = vst.msk [vmem:[%s2725_s8 + $0x8] sm:$0xf] %vm1799_vm2, %v2258_v40  ;;  %v2256_v45 = vpack.c.bf16 %v1288_v42, %v1288_v42  ;;  %v2391_v46 = vpop.f32.mrf.mxu0 }
  0xd5   : > { %v2457_v47 = vpop.f32.mrf.mxu1  ;;  %v2194_v48 = vpack.c.bf16 %v867_v43, %v867_v43  ;;  %v865_v49 = vmax.f32 %v611_v44, 0.0  ;;  %v622_v50 = vadd.f32 %v2391_v46, %v2719_v36 }
  0xd6   : > { %1800 = vst.msk [vmem:[%s2725_s8] sm:$0xf] %vm1799_vm2, %v2256_v45  ;;  %v2259_v51 = vpack.c.bf16 %v2457_v47, %v2457_v47  ;;  %v613_v52 = vpop.f32.mrf.mxu0 }
  0xd7   : > { %v1291_v53 = vpop.f32.mrf.mxu1  ;;  %1188 = vst.msk [vmem:[%s2735_s11 + $0x8] sm:$0xf] %vm1185_vm3, %v2194_v48  ;;  %v2192_v54 = vpack.c.bf16 %v865_v49, %v865_v49  ;;  %v868_v55 = vmax.f32 %v622_v50, 0.0  ;;  %v614_v56 = vadd.f32 %v2719_v36, %v613_v52 }
  0xd8   : > { %1803 = vst.msk [vmem:[%s2725_s8 + $0xc] sm:$0xf] %vm1799_vm2, %v2259_v51  ;;  %v2257_v57 = vpack.c.bf16 %v1291_v53, %v1291_v53  ;;  %v2394_v58 = vpop.f32.mrf.mxu0 }
  0xd9   : > { %v2460_v59 = vpop.f32.mrf.mxu1  ;;  %1186 = vst.msk [vmem:[%s2735_s11] sm:$0xf] %vm1185_vm3, %v2192_v54  ;;  %v2195_v60 = vpack.c.bf16 %v868_v55, %v868_v55  ;;  %v866_v61 = vmax.f32 %v614_v56, 0.0  ;;  %v635_v62 = vadd.f32 %v2394_v58, %v2719_v36 }
  0xda   : > { %1801 = vst.msk [vmem:[%s2725_s8 + $0x4] sm:$0xf] %vm1799_vm2, %v2257_v57  ;;  %v2262_v63 = vpack.c.bf16 %v2460_v59, %v2460_v59  ;;  %v626_v0 = vpop.f32.mrf.mxu0 }
  0xdb   : > { %v1304_v1 = vpop.f32.mrf.mxu1  ;;  %1189 = vst.msk [vmem:[%s2735_s11 + $0xc] sm:$0xf] %vm1185_vm3, %v2195_v60  ;;  %v2193_v2 = vpack.c.bf16 %v866_v61, %v866_v61  ;;  %v871_v3 = vmax.f32 %v635_v62, 0.0  ;;  %v627_v4 = vadd.f32 %v2719_v36, %v626_v0 }
  0xdc   : > { %1806 = vst.msk [vmem:[%s2725_s8 + $0x18] sm:$0xf] %vm1799_vm2, %v2262_v63  ;;  %v2260_v5 = vpack.c.bf16 %v1304_v1, %v1304_v1  ;;  %v2395_v6 = vpop.f32.mrf.mxu0 }
  0xdd   : > { %v2461_v7 = vpop.f32.mrf.mxu1  ;;  %1187 = vst.msk [vmem:[%s2735_s11 + $0x4] sm:$0xf] %vm1185_vm3, %v2193_v2  ;;  %v2198_v8 = vpack.c.bf16 %v871_v3, %v871_v3  ;;  %v869_v9 = vmax.f32 %v627_v4, 0.0  ;;  %v638_v10 = vadd.f32 %v2395_v6, %v2719_v36 }
  0xde   : > { %1804 = vst.msk [vmem:[%s2725_s8 + $0x10] sm:$0xf] %vm1799_vm2, %v2260_v5  ;;  %v2263_v11 = vpack.c.bf16 %v2461_v7, %v2461_v7  ;;  %v629_v12 = vpop.f32.mrf.mxu0 }
  0xdf   : > { %v1307_v13 = vpop.f32.mrf.mxu1  ;;  %1192 = vst.msk [vmem:[%s2735_s11 + $0x18] sm:$0xf] %vm1185_vm3, %v2198_v8  ;;  %v2196_v14 = vpack.c.bf16 %v869_v9, %v869_v9  ;;  %v872_v15 = vmax.f32 %v638_v10, 0.0  ;;  %v630_v16 = vadd.f32 %v2719_v36, %v629_v12 }
  0xe0   : > { %1807 = vst.msk [vmem:[%s2725_s8 + $0x1c] sm:$0xf] %vm1799_vm2, %v2263_v11  ;;  %v2261_v17 = vpack.c.bf16 %v1307_v13, %v1307_v13  ;;  %v2398_v18 = vpop.f32.mrf.mxu0 }
  0xe1   : > { %v2464_v19 = vpop.f32.mrf.mxu1  ;;  %1190 = vst.msk [vmem:[%s2735_s11 + $0x10] sm:$0xf] %vm1185_vm3, %v2196_v14  ;;  %v2199_v20 = vpack.c.bf16 %v872_v15, %v872_v15  ;;  %v870_v21 = vmax.f32 %v630_v16, 0.0  ;;  %v651_v22 = vadd.f32 %v2398_v18, %v2719_v36 }
  0xe2   : > { %1805 = vst.msk [vmem:[%s2725_s8 + $0x14] sm:$0xf] %vm1799_vm2, %v2261_v17  ;;  %v2266_v23 = vpack.c.bf16 %v2464_v19, %v2464_v19  ;;  %v642_v24 = vpop.f32.mrf.mxu0 }
  0xe3   : > { %v1320_v25 = vpop.f32.mrf.mxu1  ;;  %1193 = vst.msk [vmem:[%s2735_s11 + $0x1c] sm:$0xf] %vm1185_vm3, %v2199_v20  ;;  %v2197_v26 = vpack.c.bf16 %v870_v21, %v870_v21  ;;  %v875_v27 = vmax.f32 %v651_v22, 0.0  ;;  %v643_v28 = vadd.f32 %v2719_v36, %v642_v24 }
  0xe4   : > { %1810 = vst.msk [vmem:[%s2725_s8 + $0x28] sm:$0xf] %vm1799_vm2, %v2266_v23  ;;  %v2264_v29 = vpack.c.bf16 %v1320_v25, %v1320_v25  ;;  %v2399_v30 = vpop.f32.mrf.mxu0 }
  0xe5   : > { %v2465_v31 = vpop.f32.mrf.mxu1  ;;  %1191 = vst.msk [vmem:[%s2735_s11 + $0x14] sm:$0xf] %vm1185_vm3, %v2197_v26  ;;  %v2202_v32 = vpack.c.bf16 %v875_v27, %v875_v27  ;;  %v873_v33 = vmax.f32 %v643_v28, 0.0  ;;  %v654_v34 = vadd.f32 %v2399_v30, %v2719_v36 }
  0xe6   : > { %1808 = vst.msk [vmem:[%s2725_s8 + $0x20] sm:$0xf] %vm1799_vm2, %v2264_v29  ;;  %v2267_v35 = vpack.c.bf16 %v2465_v31, %v2465_v31  ;;  %v645_v37 = vpop.f32.mrf.mxu0 }
  0xe7   : > { %v1323_v38 = vpop.f32.mrf.mxu1  ;;  %1196 = vst.msk [vmem:[%s2735_s11 + $0x28] sm:$0xf] %vm1185_vm3, %v2202_v32  ;;  %v2200_v39 = vpack.c.bf16 %v873_v33, %v873_v33  ;;  %v876_v40 = vmax.f32 %v654_v34, 0.0  ;;  %v646_v41 = vadd.f32 %v2719_v36, %v645_v37 }
  0xe8   : > { %1811 = vst.msk [vmem:[%s2725_s8 + $0x2c] sm:$0xf] %vm1799_vm2, %v2267_v35  ;;  %v2265_v42 = vpack.c.bf16 %v1323_v38, %v1323_v38  ;;  %v2402_v43 = vpop.f32.mrf.mxu0 }
  0xe9   : > { %v2468_v44 = vpop.f32.mrf.mxu1  ;;  %1194 = vst.msk [vmem:[%s2735_s11 + $0x20] sm:$0xf] %vm1185_vm3, %v2200_v39  ;;  %v2203_v45 = vpack.c.bf16 %v876_v40, %v876_v40  ;;  %v874_v46 = vmax.f32 %v646_v41, 0.0  ;;  %v667_v47 = vadd.f32 %v2402_v43, %v2719_v36 }
  0xea   : > { %1809 = vst.msk [vmem:[%s2725_s8 + $0x24] sm:$0xf] %vm1799_vm2, %v2265_v42  ;;  %v2270_v48 = vpack.c.bf16 %v2468_v44, %v2468_v44  ;;  %v658_v49 = vpop.f32.mrf.mxu0 }
  0xeb   : > { %v1336_v50 = vpop.f32.mrf.mxu1  ;;  %1197 = vst.msk [vmem:[%s2735_s11 + $0x2c] sm:$0xf] %vm1185_vm3, %v2203_v45  ;;  %v2201_v51 = vpack.c.bf16 %v874_v46, %v874_v46  ;;  %v879_v52 = vmax.f32 %v667_v47, 0.0  ;;  %v659_v53 = vadd.f32 %v2719_v36, %v658_v49 }
  0xec   : > { %1814 = vst.msk [vmem:[%s2725_s8 + $0x38] sm:$0xf] %vm1799_vm2, %v2270_v48  ;;  %v2268_v54 = vpack.c.bf16 %v1336_v50, %v1336_v50  ;;  %v2403_v55 = vpop.f32.mrf.mxu0 }
  0xed   : > { %v2469_v56 = vpop.f32.mrf.mxu1  ;;  %1195 = vst.msk [vmem:[%s2735_s11 + $0x24] sm:$0xf] %vm1185_vm3, %v2201_v51  ;;  %v2206_v57 = vpack.c.bf16 %v879_v52, %v879_v52  ;;  %v877_v58 = vmax.f32 %v659_v53, 0.0  ;;  %v670_v59 = vadd.f32 %v2403_v55, %v2719_v36 }
  0xee   : > { %1812 = vst.msk [vmem:[%s2725_s8 + $0x30] sm:$0xf] %vm1799_vm2, %v2268_v54  ;;  %v2271_v60 = vpack.c.bf16 %v2469_v56, %v2469_v56  ;;  %v661_v61 = vpop.f32.mrf.mxu0 }
  0xef   : > { %v1339_v62 = vpop.f32.mrf.mxu1  ;;  %1200 = vst.msk [vmem:[%s2735_s11 + $0x38] sm:$0xf] %vm1185_vm3, %v2206_v57  ;;  %v2204_v63 = vpack.c.bf16 %v877_v58, %v877_v58  ;;  %v880_v0 = vmax.f32 %v670_v59, 0.0  ;;  %v662_v1 = vadd.f32 %v2719_v36, %v661_v61 }
  0xf0   : > { %1815 = vst.msk [vmem:[%s2725_s8 + $0x3c] sm:$0xf] %vm1799_vm2, %v2271_v60  ;;  %v2269_v2 = vpack.c.bf16 %v1339_v62, %v1339_v62  ;;  %v2406_v3 = vpop.f32.mrf.mxu0 }
  0xf1   : > { %v2472_v4 = vpop.f32.mrf.mxu1  ;;  %1198 = vst.msk [vmem:[%s2735_s11 + $0x30] sm:$0xf] %vm1185_vm3, %v2204_v63  ;;  %v2207_v5 = vpack.c.bf16 %v880_v0, %v880_v0  ;;  %v878_v6 = vmax.f32 %v662_v1, 0.0  ;;  %v683_v7 = vadd.f32 %v2406_v3, %v2719_v36 }
  0xf2   : > { %1813 = vst.msk [vmem:[%s2725_s8 + $0x34] sm:$0xf] %vm1799_vm2, %v2269_v2  ;;  %v2274_v8 = vpack.c.bf16 %v2472_v4, %v2472_v4  ;;  %v674_v9 = vpop.f32.mrf.mxu0 }
  0xf3   : > { %v1352_v10 = vpop.f32.mrf.mxu1  ;;  %1201 = vst.msk [vmem:[%s2735_s11 + $0x3c] sm:$0xf] %vm1185_vm3, %v2207_v5  ;;  %v2205_v11 = vpack.c.bf16 %v878_v6, %v878_v6  ;;  %v883_v12 = vmax.f32 %v683_v7, 0.0  ;;  %v675_v13 = vadd.f32 %v2719_v36, %v674_v9 }
  0xf4   : > { %1818 = vst.msk [vmem:[%s2725_s8 + $0x48] sm:$0xf] %vm1799_vm2, %v2274_v8  ;;  %v2272_v14 = vpack.c.bf16 %v1352_v10, %v1352_v10  ;;  %v2407_v15 = vpop.f32.mrf.mxu0 }
  0xf5   : > { %v2473_v16 = vpop.f32.mrf.mxu1  ;;  %1199 = vst.msk [vmem:[%s2735_s11 + $0x34] sm:$0xf] %vm1185_vm3, %v2205_v11  ;;  %v2210_v17 = vpack.c.bf16 %v883_v12, %v883_v12  ;;  %v881_v18 = vmax.f32 %v675_v13, 0.0  ;;  %v686_v19 = vadd.f32 %v2407_v15, %v2719_v36 }
  0xf6   : > { %1816 = vst.msk [vmem:[%s2725_s8 + $0x40] sm:$0xf] %vm1799_vm2, %v2272_v14  ;;  %v2275_v20 = vpack.c.bf16 %v2473_v16, %v2473_v16  ;;  %v677_v21 = vpop.f32.mrf.mxu0 }
  0xf7   : > { %v1355_v22 = vpop.f32.mrf.mxu1  ;;  %1204 = vst.msk [vmem:[%s2735_s11 + $0x48] sm:$0xf] %vm1185_vm3, %v2210_v17  ;;  %v2208_v23 = vpack.c.bf16 %v881_v18, %v881_v18  ;;  %v884_v24 = vmax.f32 %v686_v19, 0.0  ;;  %v678_v25 = vadd.f32 %v2719_v36, %v677_v21 }
  0xf8   : > { %1819 = vst.msk [vmem:[%s2725_s8 + $0x4c] sm:$0xf] %vm1799_vm2, %v2275_v20  ;;  %v2273_v26 = vpack.c.bf16 %v1355_v22, %v1355_v22  ;;  %v2410_v27 = vpop.f32.mrf.mxu0 }
  0xf9   : > { %v2476_v28 = vpop.f32.mrf.mxu1  ;;  %1202 = vst.msk [vmem:[%s2735_s11 + $0x40] sm:$0xf] %vm1185_vm3, %v2208_v23  ;;  %v2211_v29 = vpack.c.bf16 %v884_v24, %v884_v24  ;;  %v882_v30 = vmax.f32 %v678_v25, 0.0  ;;  %v699_v31 = vadd.f32 %v2410_v27, %v2719_v36 }
  0xfa   : > { %1817 = vst.msk [vmem:[%s2725_s8 + $0x44] sm:$0xf] %vm1799_vm2, %v2273_v26  ;;  %v2278_v32 = vpack.c.bf16 %v2476_v28, %v2476_v28  ;;  %v690_v33 = vpop.f32.mrf.mxu0 }
  0xfb   : > { %v1368_v34 = vpop.f32.mrf.mxu1  ;;  %1205 = vst.msk [vmem:[%s2735_s11 + $0x4c] sm:$0xf] %vm1185_vm3, %v2211_v29  ;;  %v2209_v35 = vpack.c.bf16 %v882_v30, %v882_v30  ;;  %v887_v37 = vmax.f32 %v699_v31, 0.0  ;;  %v691_v38 = vadd.f32 %v2719_v36, %v690_v33 }
  0xfc   : > { %1822 = vst.msk [vmem:[%s2725_s8 + $0x58] sm:$0xf] %vm1799_vm2, %v2278_v32  ;;  %v2276_v39 = vpack.c.bf16 %v1368_v34, %v1368_v34  ;;  %v2411_v40 = vpop.f32.mrf.mxu0 }
  0xfd   : > { %v2477_v41 = vpop.f32.mrf.mxu1  ;;  %1203 = vst.msk [vmem:[%s2735_s11 + $0x44] sm:$0xf] %vm1185_vm3, %v2209_v35  ;;  %v2214_v42 = vpack.c.bf16 %v887_v37, %v887_v37  ;;  %v885_v43 = vmax.f32 %v691_v38, 0.0  ;;  %v702_v44 = vadd.f32 %v2411_v40, %v2719_v36 }
  0xfe   : > { %1820 = vst.msk [vmem:[%s2725_s8 + $0x50] sm:$0xf] %vm1799_vm2, %v2276_v39  ;;  %v2279_v45 = vpack.c.bf16 %v2477_v41, %v2477_v41  ;;  %v693_v46 = vpop.f32.mrf.mxu0 }
  0xff   : > { %v1371_v47 = vpop.f32.mrf.mxu1  ;;  %1208 = vst.msk [vmem:[%s2735_s11 + $0x58] sm:$0xf] %vm1185_vm3, %v2214_v42  ;;  %v2212_v48 = vpack.c.bf16 %v885_v43, %v885_v43  ;;  %v888_v49 = vmax.f32 %v702_v44, 0.0  ;;  %v694_v50 = vadd.f32 %v2719_v36, %v693_v46 }
 0x100   : > { %1823 = vst.msk [vmem:[%s2725_s8 + $0x5c] sm:$0xf] %vm1799_vm2, %v2279_v45  ;;  %v2277_v51 = vpack.c.bf16 %v1371_v47, %v1371_v47  ;;  %v2414_v52 = vpop.f32.mrf.mxu0 }
 0x101   : > { %v2480_v53 = vpop.f32.mrf.mxu1  ;;  %1206 = vst.msk [vmem:[%s2735_s11 + $0x50] sm:$0xf] %vm1185_vm3, %v2212_v48  ;;  %v2215_v54 = vpack.c.bf16 %v888_v49, %v888_v49  ;;  %v886_v55 = vmax.f32 %v694_v50, 0.0  ;;  %v715_v56 = vadd.f32 %v2414_v52, %v2719_v36 }
 0x102   : > { %1821 = vst.msk [vmem:[%s2725_s8 + $0x54] sm:$0xf] %vm1799_vm2, %v2277_v51  ;;  %v2282_v57 = vpack.c.bf16 %v2480_v53, %v2480_v53  ;;  %v706_v58 = vpop.f32.mrf.mxu0 }
 0x103   : > { %v1384_v59 = vpop.f32.mrf.mxu1  ;;  %1209 = vst.msk [vmem:[%s2735_s11 + $0x5c] sm:$0xf] %vm1185_vm3, %v2215_v54  ;;  %v2213_v60 = vpack.c.bf16 %v886_v55, %v886_v55  ;;  %v891_v61 = vmax.f32 %v715_v56, 0.0  ;;  %v707_v62 = vadd.f32 %v2719_v36, %v706_v58 }
 0x104   : > { %1826 = vst.msk [vmem:[%s2725_s8 + $0x68] sm:$0xf] %vm1799_vm2, %v2282_v57  ;;  %v2280_v63 = vpack.c.bf16 %v1384_v59, %v1384_v59  ;;  %v2415_v0 = vpop.f32.mrf.mxu0 }
 0x105   : > { %v2481_v1 = vpop.f32.mrf.mxu1  ;;  %1207 = vst.msk [vmem:[%s2735_s11 + $0x54] sm:$0xf] %vm1185_vm3, %v2213_v60  ;;  %v2218_v2 = vpack.c.bf16 %v891_v61, %v891_v61  ;;  %v889_v3 = vmax.f32 %v707_v62, 0.0  ;;  %v718_v4 = vadd.f32 %v2415_v0, %v2719_v36 }
 0x106   : > { %1824 = vst.msk [vmem:[%s2725_s8 + $0x60] sm:$0xf] %vm1799_vm2, %v2280_v63  ;;  %v2283_v5 = vpack.c.bf16 %v2481_v1, %v2481_v1  ;;  %v709_v6 = vpop.f32.mrf.mxu0 }
 0x107   : > { %v1387_v7 = vpop.f32.mrf.mxu1  ;;  %1212 = vst.msk [vmem:[%s2735_s11 + $0x68] sm:$0xf] %vm1185_vm3, %v2218_v2  ;;  %v2216_v8 = vpack.c.bf16 %v889_v3, %v889_v3  ;;  %v892_v9 = vmax.f32 %v718_v4, 0.0  ;;  %v710_v10 = vadd.f32 %v2719_v36, %v709_v6 }
 0x108   : > { %1827 = vst.msk [vmem:[%s2725_s8 + $0x6c] sm:$0xf] %vm1799_vm2, %v2283_v5  ;;  %v2281_v11 = vpack.c.bf16 %v1387_v7, %v1387_v7  ;;  %v2418_v12 = vpop.f32.mrf.mxu0 }
 0x109   : > { %v2484_v13 = vpop.f32.mrf.mxu1  ;;  %1210 = vst.msk [vmem:[%s2735_s11 + $0x60] sm:$0xf] %vm1185_vm3, %v2216_v8  ;;  %v2219_v14 = vpack.c.bf16 %v892_v9, %v892_v9  ;;  %v890_v15 = vmax.f32 %v710_v10, 0.0  ;;  %v731_v16 = vadd.f32 %v2418_v12, %v2719_v36 }
 0x10a   : > { %1825 = vst.msk [vmem:[%s2725_s8 + $0x64] sm:$0xf] %vm1799_vm2, %v2281_v11  ;;  %v2286_v17 = vpack.c.bf16 %v2484_v13, %v2484_v13  ;;  %v722_v18 = vpop.f32.mrf.mxu0 }
 0x10b   : > { %v1400_v19 = vpop.f32.mrf.mxu1  ;;  %1213 = vst.msk [vmem:[%s2735_s11 + $0x6c] sm:$0xf] %vm1185_vm3, %v2219_v14  ;;  %v2217_v20 = vpack.c.bf16 %v890_v15, %v890_v15  ;;  %v895_v21 = vmax.f32 %v731_v16, 0.0  ;;  %v723_v22 = vadd.f32 %v2719_v36, %v722_v18 }
 0x10c   : > { %1830 = vst.msk [vmem:[%s2725_s8 + $0x78] sm:$0xf] %vm1799_vm2, %v2286_v17  ;;  %v2284_v23 = vpack.c.bf16 %v1400_v19, %v1400_v19  ;;  %v2419_v24 = vpop.f32.mrf.mxu0 }
 0x10d   : > { %v2485_v25 = vpop.f32.mrf.mxu1  ;;  %1211 = vst.msk [vmem:[%s2735_s11 + $0x64] sm:$0xf] %vm1185_vm3, %v2217_v20  ;;  %v2222_v26 = vpack.c.bf16 %v895_v21, %v895_v21  ;;  %v893_v27 = vmax.f32 %v723_v22, 0.0  ;;  %v734_v28 = vadd.f32 %v2419_v24, %v2719_v36 }
 0x10e   : > { %1828 = vst.msk [vmem:[%s2725_s8 + $0x70] sm:$0xf] %vm1799_vm2, %v2284_v23  ;;  %v2287_v29 = vpack.c.bf16 %v2485_v25, %v2485_v25  ;;  %v725_v30 = vpop.f32.mrf.mxu0 }
 0x10f   : > { %v1403_v31 = vpop.f32.mrf.mxu1  ;;  %1216 = vst.msk [vmem:[%s2735_s11 + $0x78] sm:$0xf] %vm1185_vm3, %v2222_v26  ;;  %v2220_v32 = vpack.c.bf16 %v893_v27, %v893_v27  ;;  %v896_v33 = vmax.f32 %v734_v28, 0.0  ;;  %v726_v34 = vadd.f32 %v2719_v36, %v725_v30 }
 0x110   : > { %1831 = vst.msk [vmem:[%s2725_s8 + $0x7c] sm:$0xf] %vm1799_vm2, %v2287_v29  ;;  %v2285_v35 = vpack.c.bf16 %v1403_v31, %v1403_v31  ;;  %v2422_v37 = vpop.f32.mrf.mxu0 }
 0x111   : > { %v2488_v38 = vpop.f32.mrf.mxu1  ;;  %1214 = vst.msk [vmem:[%s2735_s11 + $0x70] sm:$0xf] %vm1185_vm3, %v2220_v32  ;;  %v2223_v39 = vpack.c.bf16 %v896_v33, %v896_v33  ;;  %v894_v40 = vmax.f32 %v726_v34, 0.0  ;;  %v747_v41 = vadd.f32 %v2422_v37, %v2719_v36 }
 0x112   : > { %1829 = vst.msk [vmem:[%s2725_s8 + $0x74] sm:$0xf] %vm1799_vm2, %v2285_v35  ;;  %v2290_v42 = vpack.c.bf16 %v2488_v38, %v2488_v38  ;;  %v738_v43 = vpop.f32.mrf.mxu0 }
 0x113   : > { %v1416_v44 = vpop.f32.mrf.mxu1  ;;  %1217 = vst.msk [vmem:[%s2735_s11 + $0x7c] sm:$0xf] %vm1185_vm3, %v2223_v39  ;;  %v2221_v45 = vpack.c.bf16 %v894_v40, %v894_v40  ;;  %v899_v46 = vmax.f32 %v747_v41, 0.0  ;;  %v739_v47 = vadd.f32 %v2719_v36, %v738_v43 }
 0x114   : > { %1834 = vst.msk [vmem:[%s2725_s8 + $0x88] sm:$0xf] %vm1799_vm2, %v2290_v42  ;;  %v2288_v48 = vpack.c.bf16 %v1416_v44, %v1416_v44  ;;  %v2423_v49 = vpop.f32.mrf.mxu0 }
 0x115   : > { %v2489_v50 = vpop.f32.mrf.mxu1  ;;  %1215 = vst.msk [vmem:[%s2735_s11 + $0x74] sm:$0xf] %vm1185_vm3, %v2221_v45  ;;  %v2226_v51 = vpack.c.bf16 %v899_v46, %v899_v46  ;;  %v897_v52 = vmax.f32 %v739_v47, 0.0  ;;  %v750_v53 = vadd.f32 %v2423_v49, %v2719_v36 }
 0x116   : > { %1832 = vst.msk [vmem:[%s2725_s8 + $0x80] sm:$0xf] %vm1799_vm2, %v2288_v48  ;;  %v2291_v54 = vpack.c.bf16 %v2489_v50, %v2489_v50  ;;  %v741_v55 = vpop.f32.mrf.mxu0 }
 0x117   : > { %v1419_v56 = vpop.f32.mrf.mxu1  ;;  %1220 = vst.msk [vmem:[%s2735_s11 + $0x88] sm:$0xf] %vm1185_vm3, %v2226_v51  ;;  %v2224_v57 = vpack.c.bf16 %v897_v52, %v897_v52  ;;  %v900_v58 = vmax.f32 %v750_v53, 0.0  ;;  %v742_v59 = vadd.f32 %v2719_v36, %v741_v55 }
 0x118   : > { %1835 = vst.msk [vmem:[%s2725_s8 + $0x8c] sm:$0xf] %vm1799_vm2, %v2291_v54  ;;  %v2289_v60 = vpack.c.bf16 %v1419_v56, %v1419_v56  ;;  %v2426_v61 = vpop.f32.mrf.mxu0 }
 0x119   : > { %v2492_v62 = vpop.f32.mrf.mxu1  ;;  %1218 = vst.msk [vmem:[%s2735_s11 + $0x80] sm:$0xf] %vm1185_vm3, %v2224_v57  ;;  %v2227_v63 = vpack.c.bf16 %v900_v58, %v900_v58  ;;  %v898_v0 = vmax.f32 %v742_v59, 0.0  ;;  %v763_v1 = vadd.f32 %v2426_v61, %v2719_v36 }
 0x11a   : > { %1833 = vst.msk [vmem:[%s2725_s8 + $0x84] sm:$0xf] %vm1799_vm2, %v2289_v60  ;;  %v2294_v2 = vpack.c.bf16 %v2492_v62, %v2492_v62  ;;  %v754_v3 = vpop.f32.mrf.mxu0 }
 0x11b   : > { %v1432_v4 = vpop.f32.mrf.mxu1  ;;  %1221 = vst.msk [vmem:[%s2735_s11 + $0x8c] sm:$0xf] %vm1185_vm3, %v2227_v63  ;;  %v2225_v5 = vpack.c.bf16 %v898_v0, %v898_v0  ;;  %v903_v6 = vmax.f32 %v763_v1, 0.0  ;;  %v755_v7 = vadd.f32 %v2719_v36, %v754_v3 }
 0x11c   : > { %1838 = vst.msk [vmem:[%s2725_s8 + $0x98] sm:$0xf] %vm1799_vm2, %v2294_v2  ;;  %v2292_v8 = vpack.c.bf16 %v1432_v4, %v1432_v4  ;;  %v2427_v9 = vpop.f32.mrf.mxu0 }
 0x11d   : > { %v2493_v10 = vpop.f32.mrf.mxu1  ;;  %1219 = vst.msk [vmem:[%s2735_s11 + $0x84] sm:$0xf] %vm1185_vm3, %v2225_v5  ;;  %v2230_v11 = vpack.c.bf16 %v903_v6, %v903_v6  ;;  %v901_v12 = vmax.f32 %v755_v7, 0.0  ;;  %v766_v13 = vadd.f32 %v2427_v9, %v2719_v36 }
 0x11e   : > { %1836 = vst.msk [vmem:[%s2725_s8 + $0x90] sm:$0xf] %vm1799_vm2, %v2292_v8  ;;  %v2295_v14 = vpack.c.bf16 %v2493_v10, %v2493_v10  ;;  %v757_v15 = vpop.f32.mrf.mxu0 }
 0x11f   : > { %v1435_v16 = vpop.f32.mrf.mxu1  ;;  %1224 = vst.msk [vmem:[%s2735_s11 + $0x98] sm:$0xf] %vm1185_vm3, %v2230_v11  ;;  %v2228_v17 = vpack.c.bf16 %v901_v12, %v901_v12  ;;  %v904_v18 = vmax.f32 %v766_v13, 0.0  ;;  %v758_v19 = vadd.f32 %v2719_v36, %v757_v15 }
 0x120   : > { %1839 = vst.msk [vmem:[%s2725_s8 + $0x9c] sm:$0xf] %vm1799_vm2, %v2295_v14  ;;  %v2293_v20 = vpack.c.bf16 %v1435_v16, %v1435_v16  ;;  %v2430_v21 = vpop.f32.mrf.mxu0 }
 0x121   : > { %v2496_v22 = vpop.f32.mrf.mxu1  ;;  %1222 = vst.msk [vmem:[%s2735_s11 + $0x90] sm:$0xf] %vm1185_vm3, %v2228_v17  ;;  %v2231_v23 = vpack.c.bf16 %v904_v18, %v904_v18  ;;  %v902_v24 = vmax.f32 %v758_v19, 0.0  ;;  %v779_v25 = vadd.f32 %v2430_v21, %v2719_v36 }
 0x122   : > { %1837 = vst.msk [vmem:[%s2725_s8 + $0x94] sm:$0xf] %vm1799_vm2, %v2293_v20  ;;  %v2298_v26 = vpack.c.bf16 %v2496_v22, %v2496_v22  ;;  %v770_v27 = vpop.f32.mrf.mxu0 }
 0x123   : > { %v1448_v28 = vpop.f32.mrf.mxu1  ;;  %1225 = vst.msk [vmem:[%s2735_s11 + $0x9c] sm:$0xf] %vm1185_vm3, %v2231_v23  ;;  %v2229_v29 = vpack.c.bf16 %v902_v24, %v902_v24  ;;  %v907_v30 = vmax.f32 %v779_v25, 0.0  ;;  %v771_v31 = vadd.f32 %v2719_v36, %v770_v27 }
 0x124   : > { %1842 = vst.msk [vmem:[%s2725_s8 + $0xa8] sm:$0xf] %vm1799_vm2, %v2298_v26  ;;  %v2296_v32 = vpack.c.bf16 %v1448_v28, %v1448_v28  ;;  %v2431_v33 = vpop.f32.mrf.mxu0 }
 0x125   : > { %v2497_v34 = vpop.f32.mrf.mxu1  ;;  %1223 = vst.msk [vmem:[%s2735_s11 + $0x94] sm:$0xf] %vm1185_vm3, %v2229_v29  ;;  %v2234_v35 = vpack.c.bf16 %v907_v30, %v907_v30  ;;  %v905_v37 = vmax.f32 %v771_v31, 0.0  ;;  %v782_v38 = vadd.f32 %v2431_v33, %v2719_v36 }
 0x126   : > { %1840 = vst.msk [vmem:[%s2725_s8 + $0xa0] sm:$0xf] %vm1799_vm2, %v2296_v32  ;;  %v2299_v39 = vpack.c.bf16 %v2497_v34, %v2497_v34  ;;  %v773_v40 = vpop.f32.mrf.mxu0 }
 0x127   : > { %v1451_v41 = vpop.f32.mrf.mxu1  ;;  %1228 = vst.msk [vmem:[%s2735_s11 + $0xa8] sm:$0xf] %vm1185_vm3, %v2234_v35  ;;  %v2232_v42 = vpack.c.bf16 %v905_v37, %v905_v37  ;;  %v908_v43 = vmax.f32 %v782_v38, 0.0  ;;  %v774_v44 = vadd.f32 %v2719_v36, %v773_v40 }
 0x128   : > { %1843 = vst.msk [vmem:[%s2725_s8 + $0xac] sm:$0xf] %vm1799_vm2, %v2299_v39  ;;  %v2297_v45 = vpack.c.bf16 %v1451_v41, %v1451_v41  ;;  %v2434_v46 = vpop.f32.mrf.mxu0 }
 0x129   : > { %v2500_v47 = vpop.f32.mrf.mxu1  ;;  %1226 = vst.msk [vmem:[%s2735_s11 + $0xa0] sm:$0xf] %vm1185_vm3, %v2232_v42  ;;  %v2235_v48 = vpack.c.bf16 %v908_v43, %v908_v43  ;;  %v906_v49 = vmax.f32 %v774_v44, 0.0  ;;  %v795_v50 = vadd.f32 %v2434_v46, %v2719_v36 }
 0x12a   : > { %1841 = vst.msk [vmem:[%s2725_s8 + $0xa4] sm:$0xf] %vm1799_vm2, %v2297_v45  ;;  %v2302_v51 = vpack.c.bf16 %v2500_v47, %v2500_v47  ;;  %v786_v52 = vpop.f32.mrf.mxu0 }
 0x12b   : > { %v1464_v53 = vpop.f32.mrf.mxu1  ;;  %1229 = vst.msk [vmem:[%s2735_s11 + $0xac] sm:$0xf] %vm1185_vm3, %v2235_v48  ;;  %v2233_v54 = vpack.c.bf16 %v906_v49, %v906_v49  ;;  %v911_v55 = vmax.f32 %v795_v50, 0.0  ;;  %v787_v56 = vadd.f32 %v2719_v36, %v786_v52 }
 0x12c   : > { %1846 = vst.msk [vmem:[%s2725_s8 + $0xb8] sm:$0xf] %vm1799_vm2, %v2302_v51  ;;  %v2300_v57 = vpack.c.bf16 %v1464_v53, %v1464_v53  ;;  %v2435_v58 = vpop.f32.mrf.mxu0 }
 0x12d   : > { %v2501_v59 = vpop.f32.mrf.mxu1  ;;  %1227 = vst.msk [vmem:[%s2735_s11 + $0xa4] sm:$0xf] %vm1185_vm3, %v2233_v54  ;;  %v2238_v60 = vpack.c.bf16 %v911_v55, %v911_v55  ;;  %v909_v61 = vmax.f32 %v787_v56, 0.0  ;;  %v798_v62 = vadd.f32 %v2435_v58, %v2719_v36 }
 0x12e   : > { %1844 = vst.msk [vmem:[%s2725_s8 + $0xb0] sm:$0xf] %vm1799_vm2, %v2300_v57  ;;  %v2303_v63 = vpack.c.bf16 %v2501_v59, %v2501_v59  ;;  %v789_v0 = vpop.f32.mrf.mxu0 }
 0x12f   : > { %v1467_v1 = vpop.f32.mrf.mxu1  ;;  %1232 = vst.msk [vmem:[%s2735_s11 + $0xb8] sm:$0xf] %vm1185_vm3, %v2238_v60  ;;  %v2236_v2 = vpack.c.bf16 %v909_v61, %v909_v61  ;;  %v912_v3 = vmax.f32 %v798_v62, 0.0  ;;  %v790_v4 = vadd.f32 %v2719_v36, %v789_v0 }
 0x130   : > { %1847 = vst.msk [vmem:[%s2725_s8 + $0xbc] sm:$0xf] %vm1799_vm2, %v2303_v63  ;;  %v2301_v5 = vpack.c.bf16 %v1467_v1, %v1467_v1  ;;  %v2438_v6 = vpop.f32.mrf.mxu0 }
 0x131   : > { %v2504_v7 = vpop.f32.mrf.mxu1  ;;  %1230 = vst.msk [vmem:[%s2735_s11 + $0xb0] sm:$0xf] %vm1185_vm3, %v2236_v2  ;;  %v2239_v8 = vpack.c.bf16 %v912_v3, %v912_v3  ;;  %v910_v9 = vmax.f32 %v790_v4, 0.0  ;;  %v811_v10 = vadd.f32 %v2438_v6, %v2719_v36 }
 0x132   : > { %1845 = vst.msk [vmem:[%s2725_s8 + $0xb4] sm:$0xf] %vm1799_vm2, %v2301_v5  ;;  %v2306_v11 = vpack.c.bf16 %v2504_v7, %v2504_v7  ;;  %v802_v12 = vpop.f32.mrf.mxu0 }
 0x133   : > { %v1480_v13 = vpop.f32.mrf.mxu1  ;;  %1233 = vst.msk [vmem:[%s2735_s11 + $0xbc] sm:$0xf] %vm1185_vm3, %v2239_v8  ;;  %v2237_v14 = vpack.c.bf16 %v910_v9, %v910_v9  ;;  %v915_v15 = vmax.f32 %v811_v10, 0.0  ;;  %v803_v16 = vadd.f32 %v2719_v36, %v802_v12 }
 0x134   : > { %1850 = vst.msk [vmem:[%s2725_s8 + $0xc8] sm:$0xf] %vm1799_vm2, %v2306_v11  ;;  %v2304_v17 = vpack.c.bf16 %v1480_v13, %v1480_v13  ;;  %v2439_v18 = vpop.f32.mrf.mxu0 }
 0x135   : > { %v2505_v19 = vpop.f32.mrf.mxu1  ;;  %1231 = vst.msk [vmem:[%s2735_s11 + $0xb4] sm:$0xf] %vm1185_vm3, %v2237_v14  ;;  %v2242_v20 = vpack.c.bf16 %v915_v15, %v915_v15  ;;  %v913_v21 = vmax.f32 %v803_v16, 0.0  ;;  %v814_v22 = vadd.f32 %v2439_v18, %v2719_v36 }
 0x136   : > { %1848 = vst.msk [vmem:[%s2725_s8 + $0xc0] sm:$0xf] %vm1799_vm2, %v2304_v17  ;;  %v2307_v23 = vpack.c.bf16 %v2505_v19, %v2505_v19  ;;  %v805_v24 = vpop.f32.mrf.mxu0 }
 0x137   : > { %v1483_v25 = vpop.f32.mrf.mxu1  ;;  %1236 = vst.msk [vmem:[%s2735_s11 + $0xc8] sm:$0xf] %vm1185_vm3, %v2242_v20  ;;  %v2240_v26 = vpack.c.bf16 %v913_v21, %v913_v21  ;;  %v916_v27 = vmax.f32 %v814_v22, 0.0  ;;  %v806_v28 = vadd.f32 %v2719_v36, %v805_v24 }
 0x138   : > { %1851 = vst.msk [vmem:[%s2725_s8 + $0xcc] sm:$0xf] %vm1799_vm2, %v2307_v23  ;;  %v2305_v29 = vpack.c.bf16 %v1483_v25, %v1483_v25  ;;  %v2442_v30 = vpop.f32.mrf.mxu0 }
 0x139   : > { %v2508_v31 = vpop.f32.mrf.mxu1  ;;  %1234 = vst.msk [vmem:[%s2735_s11 + $0xc0] sm:$0xf] %vm1185_vm3, %v2240_v26  ;;  %v2243_v32 = vpack.c.bf16 %v916_v27, %v916_v27  ;;  %v914_v33 = vmax.f32 %v806_v28, 0.0  ;;  %v827_v34 = vadd.f32 %v2442_v30, %v2719_v36 }
 0x13a   : > { %1849 = vst.msk [vmem:[%s2725_s8 + $0xc4] sm:$0xf] %vm1799_vm2, %v2305_v29  ;;  %v2310_v35 = vpack.c.bf16 %v2508_v31, %v2508_v31  ;;  %v818_v37 = vpop.f32.mrf.mxu0 }
 0x13b   : > { %v1496_v38 = vpop.f32.mrf.mxu1  ;;  %1237 = vst.msk [vmem:[%s2735_s11 + $0xcc] sm:$0xf] %vm1185_vm3, %v2243_v32  ;;  %v2241_v39 = vpack.c.bf16 %v914_v33, %v914_v33  ;;  %v919_v40 = vmax.f32 %v827_v34, 0.0  ;;  %v819_v41 = vadd.f32 %v2719_v36, %v818_v37 }
 0x13c   : > { %1854 = vst.msk [vmem:[%s2725_s8 + $0xd8] sm:$0xf] %vm1799_vm2, %v2310_v35  ;;  %v2308_v42 = vpack.c.bf16 %v1496_v38, %v1496_v38  ;;  %v2443_v43 = vpop.f32.mrf.mxu0 }
 0x13d   : > { %v2509_v44 = vpop.f32.mrf.mxu1  ;;  %1235 = vst.msk [vmem:[%s2735_s11 + $0xc4] sm:$0xf] %vm1185_vm3, %v2241_v39  ;;  %v2246_v45 = vpack.c.bf16 %v919_v40, %v919_v40  ;;  %v917_v46 = vmax.f32 %v819_v41, 0.0  ;;  %v830_v47 = vadd.f32 %v2443_v43, %v2719_v36 }
 0x13e   : > { %1852 = vst.msk [vmem:[%s2725_s8 + $0xd0] sm:$0xf] %vm1799_vm2, %v2308_v42  ;;  %v2311_v48 = vpack.c.bf16 %v2509_v44, %v2509_v44  ;;  %v821_v49 = vpop.f32.mrf.mxu0 }
 0x13f   : > { %v1499_v50 = vpop.f32.mrf.mxu1  ;;  %1240 = vst.msk [vmem:[%s2735_s11 + $0xd8] sm:$0xf] %vm1185_vm3, %v2246_v45  ;;  %v2244_v51 = vpack.c.bf16 %v917_v46, %v917_v46  ;;  %v920_v52 = vmax.f32 %v830_v47, 0.0  ;;  %v822_v53 = vadd.f32 %v2719_v36, %v821_v49 }
 0x140   : > { %1855 = vst.msk [vmem:[%s2725_s8 + $0xdc] sm:$0xf] %vm1799_vm2, %v2311_v48  ;;  %v2309_v54 = vpack.c.bf16 %v1499_v50, %v1499_v50  ;;  %v2446_v55 = vpop.f32.mrf.mxu0 }
 0x141   : > { %v2512_v56 = vpop.f32.mrf.mxu1  ;;  %1238 = vst.msk [vmem:[%s2735_s11 + $0xd0] sm:$0xf] %vm1185_vm3, %v2244_v51  ;;  %v2247_v57 = vpack.c.bf16 %v920_v52, %v920_v52  ;;  %v918_v58 = vmax.f32 %v822_v53, 0.0  ;;  %v843_v59 = vadd.f32 %v2446_v55, %v2719_v36 }
 0x142   : > { %1853 = vst.msk [vmem:[%s2725_s8 + $0xd4] sm:$0xf] %vm1799_vm2, %v2309_v54  ;;  %v2314_v60 = vpack.c.bf16 %v2512_v56, %v2512_v56  ;;  %v834_v61 = vpop.f32.mrf.mxu0 }
 0x143   : > { %v1512_v62 = vpop.f32.mrf.mxu1  ;;  %1241 = vst.msk [vmem:[%s2735_s11 + $0xdc] sm:$0xf] %vm1185_vm3, %v2247_v57  ;;  %v2245_v63 = vpack.c.bf16 %v918_v58, %v918_v58  ;;  %v923_v0 = vmax.f32 %v843_v59, 0.0  ;;  %v835_v1 = vadd.f32 %v2719_v36, %v834_v61 }
 0x144   : > { %1858 = vst.msk [vmem:[%s2725_s8 + $0xe8] sm:$0xf] %vm1799_vm2, %v2314_v60  ;;  %v2312_v2 = vpack.c.bf16 %v1512_v62, %v1512_v62  ;;  %v2447_v3 = vpop.f32.mrf.mxu0 }
 0x145   : > { %v2513_v4 = vpop.f32.mrf.mxu1  ;;  %1239 = vst.msk [vmem:[%s2735_s11 + $0xd4] sm:$0xf] %vm1185_vm3, %v2245_v63  ;;  %v2250_v5 = vpack.c.bf16 %v923_v0, %v923_v0  ;;  %v921_v6 = vmax.f32 %v835_v1, 0.0  ;;  %v846_v7 = vadd.f32 %v2447_v3, %v2719_v36 }
 0x146   : > { %1856 = vst.msk [vmem:[%s2725_s8 + $0xe0] sm:$0xf] %vm1799_vm2, %v2312_v2  ;;  %v2315_v8 = vpack.c.bf16 %v2513_v4, %v2513_v4  ;;  %v837_v9 = vpop.f32.mrf.mxu0 }
 0x147   : > { %v1515_v10 = vpop.f32.mrf.mxu1  ;;  %1244 = vst.msk [vmem:[%s2735_s11 + $0xe8] sm:$0xf] %vm1185_vm3, %v2250_v5  ;;  %v2248_v11 = vpack.c.bf16 %v921_v6, %v921_v6  ;;  %v924_v12 = vmax.f32 %v846_v7, 0.0  ;;  %v838_v13 = vadd.f32 %v2719_v36, %v837_v9 }
 0x148   : > { %1859 = vst.msk [vmem:[%s2725_s8 + $0xec] sm:$0xf] %vm1799_vm2, %v2315_v8  ;;  %v2313_v14 = vpack.c.bf16 %v1515_v10, %v1515_v10  ;;  %v2450_v15 = vpop.f32.mrf.mxu0 }
 0x149   : > { %v2516_v16 = vpop.f32.mrf.mxu1  ;;  %1242 = vst.msk [vmem:[%s2735_s11 + $0xe0] sm:$0xf] %vm1185_vm3, %v2248_v11  ;;  %v2251_v17 = vpack.c.bf16 %v924_v12, %v924_v12  ;;  %v922_v18 = vmax.f32 %v838_v13, 0.0  ;;  %v859_v19 = vadd.f32 %v2450_v15, %v2719_v36 }
 0x14a   : > { %1857 = vst.msk [vmem:[%s2725_s8 + $0xe4] sm:$0xf] %vm1799_vm2, %v2313_v14  ;;  %v2318_v20 = vpack.c.bf16 %v2516_v16, %v2516_v16  ;;  %v850_v21 = vpop.f32.mrf.mxu0 }
 0x14b   : > { %v1528_v22 = vpop.f32.mrf.mxu1  ;;  %1245 = vst.msk [vmem:[%s2735_s11 + $0xec] sm:$0xf] %vm1185_vm3, %v2251_v17  ;;  %v2249_v23 = vpack.c.bf16 %v922_v18, %v922_v18  ;;  %v927_v24 = vmax.f32 %v859_v19, 0.0  ;;  %v851_v25 = vadd.f32 %v2719_v36, %v850_v21 }
 0x14c   : > { %1862 = vst.msk [vmem:[%s2725_s8 + $0xf8] sm:$0xf] %vm1799_vm2, %v2318_v20  ;;  %v2316_v26 = vpack.c.bf16 %v1528_v22, %v1528_v22  ;;  %v2451_v27 = vpop.f32.mrf.mxu0 }
 0x14d   : > { %v2517_v28 = vpop.f32.mrf.mxu1  ;;  %1243 = vst.msk [vmem:[%s2735_s11 + $0xe4] sm:$0xf] %vm1185_vm3, %v2249_v23  ;;  %v2254_v29 = vpack.c.bf16 %v927_v24, %v927_v24  ;;  %v925_v30 = vmax.f32 %v851_v25, 0.0  ;;  %v862_v31 = vadd.f32 %v2451_v27, %v2719_v36 }
 0x14e   : > { %1860 = vst.msk [vmem:[%s2725_s8 + $0xf0] sm:$0xf] %vm1799_vm2, %v2316_v26  ;;  %v2319_v32 = vpack.c.bf16 %v2517_v28, %v2517_v28  ;;  %v853_v33 = vpop.f32.mrf.mxu0 }
 0x14f   : > { %v1531_v34 = vpop.f32.mrf.mxu1  ;;  %1248 = vst.msk [vmem:[%s2735_s11 + $0xf8] sm:$0xf] %vm1185_vm3, %v2254_v29  ;;  %v2252_v35 = vpack.c.bf16 %v925_v30, %v925_v30  ;;  %v928_v37 = vmax.f32 %v862_v31, 0.0  ;;  %v854_v38 = vadd.f32 %v2719_v36, %v853_v33 }
 0x150   : > { %1863 = vst.msk [vmem:[%s2725_s8 + $0xfc] sm:$0xf] %vm1799_vm2, %v2319_v32  ;;  %v2317_v39 = vpack.c.bf16 %v1531_v34, %v1531_v34 }
 0x151   : > { %1246 = vst.msk [vmem:[%s2735_s11 + $0xf0] sm:$0xf] %vm1185_vm3, %v2252_v35  ;;  %v2255_v40 = vpack.c.bf16 %v928_v37, %v928_v37  ;;  %v926_v41 = vmax.f32 %v854_v38, 0.0 }
 0x152   : > { %1861 = vst.msk [vmem:[%s2725_s8 + $0xf4] sm:$0xf] %vm1799_vm2, %v2317_v39 }
 0x153   : > { %1249 = vst.msk [vmem:[%s2735_s11 + $0xfc] sm:$0xf] %vm1185_vm3, %v2255_v40  ;;  %v2253_v42 = vpack.c.bf16 %v926_v41, %v926_v41 }
 0x155   : > { %1247 = vst.msk [vmem:[%s2735_s11 + $0xf4] sm:$0xf] %vm1185_vm3, %v2253_v42 }
 0x156 PF: > { %s16_s18 = sadd.s32 1, %s2566_s18  }
 0x157   : > { %p13_p4 = scmp.ge.s32.totalorder %s16_s18, 4  }
 0x159   :  { %15 = sbr.rel (!%p13_p4) target bundleno = 1 (0x1), region = 78 }

// kernel: _lambda_.14
= control target key start
LH: loop header
LB: loop body
LE: loop exit
PB: predicated region body
PF: predicated region fallthrough
CT: control target
= control target key end

     0   :  { %s2396_s12 = smov 0   ;;  %s2398_s13 = smov 0   ;;  %s2861_s0 = inlined_call_operand.vmem [shape: bf16[2,10,10,10,4], index: 0, kind: input, shape index: {}]   ;;  %s2862_s1 = inlined_call_operand.vmem [shape: bf16[3,9,4,4], index: 1, kind: input, shape index: {}]   ;;  %s2863_s2 = inlined_call_operand.vmem [shape: f32[1,4], index: 2, kind: input, shape index: {}]   ;;  %s2864_s3 = inlined_call_operand.vmem [shape: bf16[2,8,8,8,4], index: 3, kind: output, shape index: {}]  }
   0x1   :  { %s2400_s14 = smov 0   ;;  %s2402_s15 = smov 0  }
   0x2   :  { %s2404_s16 = smov 0   ;;  %s2406_s17 = smov 0  }
   0x3   :  { %s2408_s18 = smov 0  }
   0x4 LB: > { %s25_s19 = sadd.s32 1, %s2361_s15  ;;  %s28_s20 = sadd.s32 1, %s2365_s16  ;;  %s2373_s18 = sphi %s2408_s18, %s13_s18   ;;  %s2369_s17 = sphi %s2406_s17, %s2874_s17   ;;  %s2365_s16 = sphi %s2404_s16, %s2873_s16   ;;  %s2361_s15 = sphi %s2402_s15, %s2872_s15   ;;  %s2357_s14 = sphi %s2400_s14, %s2871_s14   ;;  %s2353_s13 = sphi %s2398_s13, %s2870_s13   ;;  %s2349_s12 = sphi %s2396_s12, %s2869_s12  }
   0x5   : > { %p26_p0 = scmp.ge.s32.totalorder %s25_s19, 3  ;;  %p1928_p1 = scmp.ge.s32.totalorder %s2373_s18, 1 }
   0x6   : > { %p168_p2 = scmp.lt.s32.totalorder %s2373_s18, 49  ;;  %s32_s21 = sadd.s32 1, %s2369_s17 }
   0x7   : > { %s2876_s19 = smov (%p26_p0, %s25_s19), 0  ;;  %s2878_s20 = smov (!%p26_p0, %s28_s20), %s2365_s16 }
   0x8   : > { %p169_p3 = pnand %p1928_p1, %p168_p2  ;;  %p30_p4 = scmp.ge.s32.totalorder %s2878_s20, 8 }
   0x9   : > { %s201_s22 = sadd.s32 (!%p169_p3), %s2349_s12, %s2353_s13  ;;  %p202_p6 = scmp.lt.s32.totalorder (!%p169_p3), %s2357_s14, 1 }
   0xa   : > { %s2880_s20 = smov (%p30_p4, %s2878_s20), 0  ;;  %s2882_s21 = smov (!%p30_p4, %s32_s21), %s2369_s17 }
   0xb   : > { %p34_p5 = scmp.ge.s32.totalorder %s2882_s21, 2  ;;  %172 = sbr.rel (%p169_p3) target bundleno = 344 (0x158), region = 32 }
   0xc   : > { %p204_p7 = scmp.lt.s32.totalorder (!%p169_p3), %s201_s22, 9  ;;  %p214_p8 = scmp.lt.s32.totalorder (!%p169_p3), %s2353_s13, 7 }
   0xd   : > { %s2884_s21 = smov (%p34_p5, %s2882_s21), 0  ;;  %p1933_p9 = scmp.ne.s32.totalorder (!%p169_p3), %s2349_s12, 0 }
  0x10   : > { %s2886_s14 = smov (!%p202_p6, %s2357_s14), 1  ;;  %s2888_s22 = smov (!%p204_p7, %s201_s22), 9 }
  0x11   : > { %s2249_s23 = smul.u32 200, %s2886_s14  ;;  %s1931_s25 = sshll.u32 %s2886_s14, 6 }
  0x12   : > { %s2248_s24 = smul.u32 20, %s2888_s22  ;;  %s2890_s13 = smov (!%p214_p8, %s2353_s13), 7 }
  0x13   : > { %s1930_s28 = sshll.u32 %s2890_s13, 3  ;;  %225 = sbr.rel (%p1933_p9) target bundleno = 29 (0x1d), region = 36 }
  0x14   : > { %s208_s26 = sadd.s32 %s2249_s23, %s2248_s24  ;;  %s218_s5 = sadd.s32 %s1931_s25, %s1930_s28 }
  0x15   : > { %s1929_s27 = sshll.u32 %s208_s26, 2  ;;  %s1932_s6 = sshll.u32 %s218_s5, 2 }
  0x16   : > { %s2449_s4 = scalar_lea.vmem %s2861_s0, %s1929_s27  ;;  %s2454_s9 = scalar_lea.vmem %s2864_s3, %s1932_s6 }
  0x18   : > { %vm226_vm0 = vcmask 31744   ;;  %v2375_v0 = vmov 0.0  }
  0x19   : > { %227 = vst.msk [vmem:[#allocation2] sm:$0xff] %vm226_vm0, %v2375_v0  ;;  %228 = vst.msk [vmem:[#allocation2 + $0x8] sm:$0xff] %vm226_vm0, %v2375_v0 }
  0x1a   : > { %229 = vst.msk [vmem:[#allocation2 + $0x10] sm:$0xff] %vm226_vm0, %v2375_v0  ;;  %230 = vst.msk [vmem:[#allocation2 + $0x18] sm:$0xff] %vm226_vm0, %v2375_v0 }
  0x1b   : > { %231 = vst.msk [vmem:[#allocation2 + $0x20] sm:$0xff] %vm226_vm0, %v2375_v0  ;;  %232 = vst.msk [vmem:[#allocation2 + $0x28] sm:$0xff] %vm226_vm0, %v2375_v0 }
  0x1c   : > { %233 = vst.msk [vmem:[#allocation2 + $0x30] sm:$0xff] %vm226_vm0, %v2375_v0  ;;  %234 = vst.msk [vmem:[#allocation2 + $0x38] sm:$0xff] %vm226_vm0, %v2375_v0 }
  0x1d PF: > { %s2100_s10 = smul.u32 18, %s2349_s12  ;;  %vm296_vm1 = vcmask 1041408   ;;  %v2307_v1 = vld [vmem:[%s2449_s4] ss:$8 sps:$4 sm:$0xff]   ;;  %vm283_vm2 = vcmask 31744   ;;  %vm628_vm3 = vcmask 1042432  }
  0x1e   : > { %v2308_v2 = vld [vmem:[%s2449_s4 + $0x20] ss:$8 sps:$4 sm:$0xff]   ;;  %2148 = vmatprep.mubr.msk.bf16.mxu0 %vm283_vm2, %v2307_v1  ;;  %v2309_v4 = vld [vmem:[%s2449_s4 + $0x10] ss:$8 sps:$4 sm:$0xff]   ;;  %vm629_vm4 = vcmask 1046532   ;;  %p2095_p10 = scmp.ge.s32.totalorder %s2349_s12, 2 }
  0x1f   : > { %s2462_s14 = scalar_lea.vmem %s2862_s1, %s2100_s10  ;;  %v2310_v6 = vld [vmem:[%s2449_s4 + $0x30] ss:$8 sps:$4 sm:$0xff]   ;;  %2152 = vmatprep.mubr.msk.bf16.mxu1 %vm283_vm2, %v2308_v2  ;;  %v373_v11 = vld [vmem:[%s2449_s4] sm:$0xf]  ;;  %v374_v12 = vld [vmem:[%s2449_s4 + $0x4] sm:$0x1] }
  0x20   : > { %v238_v3 = vld [vmem:[%s2462_s14] sm:$0x3]  ;;  %v239_v7 = vld [vmem:[%s2462_s14 + $0x2] sm:$0x3]  ;;  %v240_v8 = vld [vmem:[%s2462_s14 + $0x4] sm:$0x3] }
  0x21   : > { %2238 = vmatprep.subr.msk.bf16.mxu0 %vm296_vm1, %v238_v3  ;;  %2239 = vmatprep.subr.msk.bf16.mxu1 %vm296_vm1, %v238_v3  ;;  %v298_v5 = vsel %vm296_vm1, %v238_v3, 0  ;;  %v529_v9 = vsel %vm296_vm1, %v239_v7, 0  ;;  %v688_v10 = vsel %vm296_vm1, %v240_v8, 0  ;;  %v375_v13 = vld [vmem:[%s2449_s4 + $0x8] sm:$0xf]  ;;  %v393_v15 = vshrl.u32 %v373_v11, 16  ;;  %vm2488_vm7 = vmor %vm628_vm3, %vm629_vm4 }
  0x22   : > { %2147 = vmatpush3.bf16.msra.mxu0 %v298_v5  ;;  %2237 = vmatpush3.bf16.msra.mxu1 %v298_v5  ;;  %v376_v14 = vld [vmem:[%s2449_s4 + $0xc] sm:$0x1]  ;;  %vm389_vm5 = vsmask.f32 3328  ;;  %vm390_vm6 = vsmask.f32 7440 }
  0x23   : > { %2240 = vmatprep.subr.msk.bf16.mxu1 %vm296_vm1, %v239_v7  ;;  %2241 = vmatprep.subr.msk.bf16.mxu0 %vm296_vm1, %v240_v8  ;;  %v396_v16 = vshll.u32 %v373_v11, 16  ;;  %v402_v17 = vshll.u32 %v374_v12, 16  ;;  %v407_v18 = vshrl.u32 %v375_v13, 16  ;;  %v410_v19 = vshll.u32 %v375_v13, 16  ;;  %v604_v21 = vld [vmem:[%s2449_s4] sm:$0xe]  ;;  %vm2500_vm8 = vmor %vm389_vm5, %vm390_vm6 }
  0x24   : > { %v416_v20 = vshll.u32 %v376_v14, 16  ;;  %v633_v23 = vrot.slane %v374_v12, 5  ;;  %v395_v24 = vrot.slane %v393_v15, 4  ;;  %v605_v27 = vld [vmem:[%s2449_s4 + $0x8] sm:$0xe]  ;;  %v1951_v28 = vrot.slane %v604_v21, 9 }
  0x25   : > { %2149 = vmatmul.mubr.msk.bf16.vlgmr.msra.gmra.mxu0 %vm283_vm2, %v2309_v4  ;;  %2153 = vmatmul.mubr.msk.bf16.vlgmr.msra.gmra.mxu1 %vm283_vm2, %v2310_v6  ;;  %v398_v25 = vrot.slane %v396_v16, 5  ;;  %v404_v26 = vrot.slane %v402_v17, 5  ;;  %v409_v29 = vrot.slane %v407_v18, 4  ;;  %v412_v30 = vrot.slane %v410_v19, 5  ;;  %v377_v33 = vld [vmem:[%s2449_s4 + $0x10] sm:$0xf] }
  0x26   : > { %2157 = vmatpush3.bf16.msra.mxu1 %v529_v9  ;;  %2167 = vmatpush3.bf16.msra.mxu0 %v688_v10  ;;  %v418_v31 = vrot.slane %v416_v20, 5  ;;  %v1952_v32 = vrot.slane %v605_v27, 9  ;;  %v634_v35 = vsel %vm2488_vm7, %v1951_v28, %v633_v23  ;;  %v637_v36 = vrot.slane %v376_v14, 5  ;;  %v378_v37 = vld [vmem:[%s2449_s4 + $0x14] sm:$0x1] }
  0x27   : > { %v399_v34 = vor.u32 %v398_v25, %v395_v24  ;;  %v379_v38 = vld [vmem:[%s2449_s4 + $0x18] sm:$0xf]  ;;  %v421_v39 = vshrl.u32 %v377_v33, 16  ;;  %v413_v41 = vor.u32 %v412_v30, %v409_v29  ;;  %v380_v42 = vld [vmem:[%s2449_s4 + $0x1c] sm:$0x1]  ;;  %v424_v43 = vshll.u32 %v377_v33, 16 }
  0x28   : > { %v430_v44 = vshll.u32 %v378_v37, 16  ;;  %v435_v45 = vshrl.u32 %v379_v38, 16  ;;  %v638_v47 = vsel %vm2488_vm7, %v1952_v32, %v637_v36  ;;  %v438_v49 = vshll.u32 %v379_v38, 16  ;;  %v606_v50 = vld [vmem:[%s2449_s4 + $0x10] sm:$0xe] }
  0x29   : > { %v400_v46 = vrot.slane %v399_v34, 4  ;;  %v423_v48 = vrot.slane %v421_v39, 4  ;;  %v414_v51 = vrot.slane %v413_v41, 4  ;;  %v1959_v52 = vcombine.low %v634_v35, %v638_v47  ;;  %v607_v55 = vld [vmem:[%s2449_s4 + $0x18] sm:$0xe] }
  0x2a   : > { %v426_v53 = vrot.slane %v424_v43, 5  ;;  %v432_v54 = vrot.slane %v430_v44, 5  ;;  %v437_v57 = vrot.slane %v435_v45, 4  ;;  %v440_v58 = vrot.slane %v438_v49, 5  ;;  %v241_v60 = vld [vmem:[%s2462_s14 + $0x6] sm:$0x3] }
  0x2b   : > { %v405_v56 = vsel %vm2500_vm8, %v400_v46, %v404_v26  ;;  %v444_v59 = vshll.u32 %v380_v42, 16  ;;  %v419_v61 = vsel %vm2500_vm8, %v414_v51, %v418_v31  ;;  %2168 = vmatprep.mubr.msk.bf16.mxu0 %vm283_vm2, %v1959_v52  ;;  %v1953_v63 = vrot.slane %v606_v50, 9  ;;  %2242 = vmatprep.subr.msk.bf16.mxu1 %vm296_vm1, %v241_v60  ;;  %v242_v1 = vld [vmem:[%s2462_s14 + $0x8] sm:$0x3]  ;;  %v381_v2 = vld [vmem:[%s2449_s4 + $0x20] sm:$0xf] }
  0x2c   : > { %v427_v62 = vor.u32 %v426_v53, %v423_v48  ;;  %v641_v0 = vrot.slane %v378_v37, 5  ;;  %v1943_v3 = vcombine.low %v405_v56, %v419_v61  ;;  %v441_v4 = vor.u32 %v440_v58, %v437_v57  ;;  %2243 = vmatprep.subr.msk.bf16.mxu0 %vm296_vm1, %v242_v1  ;;  %v382_v7 = vld [vmem:[%s2449_s4 + $0x24] sm:$0x1]  ;;  %v383_v8 = vld [vmem:[%s2449_s4 + $0x28] sm:$0xf] }
  0x2d   : > { %v446_v5 = vrot.slane %v444_v59, 5  ;;  %v1954_v6 = vrot.slane %v607_v55, 9  ;;  %v645_v11 = vrot.slane %v380_v42, 5  ;;  %v805_v12 = vsel %vm296_vm1, %v241_v60, 0  ;;  %v384_v19 = vld [vmem:[%s2449_s4 + $0x2c] sm:$0x1] }
  0x2e   : > { %v428_v9 = vrot.slane %v427_v62, 4  ;;  %v642_v10 = vsel %vm2488_vm7, %v1953_v63, %v641_v0  ;;  %2158 = vmatprep.mubr.msk.bf16.mxu1 %vm283_vm2, %v1943_v3  ;;  %v442_v13 = vrot.slane %v441_v4, 4  ;;  %v1033_v14 = vsel %vm296_vm1, %v242_v1, 0  ;;  %v608_v23 = vld [vmem:[%s2449_s4 + $0x20] sm:$0xe] }
  0x2f   : > { %v449_v15 = vshrl.u32 %v381_v2, 16  ;;  %v452_v16 = vshll.u32 %v381_v2, 16  ;;  %v646_v18 = vsel %vm2488_vm7, %v1954_v6, %v645_v11  ;;  %v458_v20 = vshll.u32 %v382_v7, 16  ;;  %v609_v28 = vld [vmem:[%s2449_s4 + $0x28] sm:$0xe] }
  0x30   : > { %v433_v17 = vsel %vm2500_vm8, %v428_v9, %v432_v54  ;;  %v463_v21 = vshrl.u32 %v383_v8, 16  ;;  %v447_v24 = vsel %vm2500_vm8, %v442_v13, %v446_v5  ;;  %v1960_v25 = vcombine.low %v642_v10, %v646_v18  ;;  %v385_v29 = vld [vmem:[%s2449_s4 + $0x30] sm:$0xf]  ;;  %v386_v34 = vld [vmem:[%s2449_s4 + $0x34] sm:$0x1] }
  0x31   : > { %v451_v26 = vrot.slane %v449_v15, 4  ;;  %v454_v27 = vrot.slane %v452_v16, 5  ;;  %v1944_v30 = vcombine.low %v433_v17, %v447_v24  ;;  %v460_v31 = vrot.slane %v458_v20, 5  ;;  %v387_v39 = vld [vmem:[%s2449_s4 + $0x38] sm:$0xf] }
  0x32   : > { %v465_v32 = vrot.slane %v463_v21, 4  ;;  %v466_v33 = vshll.u32 %v383_v8, 16  ;;  %2169 = vmatmul.mubr.msk.bf16.vlgmr.msra.gmra.mxu0 %vm283_vm2, %v1960_v25  ;;  %v472_v36 = vshll.u32 %v384_v19, 16  ;;  %v1955_v37 = vrot.slane %v608_v23, 9  ;;  %v388_v44 = vld [vmem:[%s2449_s4 + $0x3c] sm:$0x1] }
  0x33   : > { %v455_v35 = vor.u32 %v454_v27, %v451_v26  ;;  %v649_v38 = vrot.slane %v382_v7, 5  ;;  %2159 = vmatmul.mubr.msk.bf16.vlgmr.msra.gmra.mxu1 %vm283_vm2, %v1944_v30  ;;  %2187 = vmatpush3.bf16.msra.mxu0 %v1033_v14  ;;  %v1956_v42 = vrot.slane %v609_v28, 9  ;;  %v653_v43 = vrot.slane %v384_v19, 5  ;;  %v610_v54 = vld [vmem:[%s2449_s4 + $0x30] sm:$0xe] }
  0x34   : > { %v468_v41 = vrot.slane %v466_v33, 5  ;;  %v477_v45 = vshrl.u32 %v385_v29, 16  ;;  %2177 = vmatpush3.bf16.msra.mxu1 %v805_v12  ;;  %v474_v47 = vrot.slane %v472_v36, 5  ;;  %v480_v49 = vshll.u32 %v385_v29, 16  ;;  %v611_v59 = vld [vmem:[%s2449_s4 + $0x38] sm:$0xe] }
  0x35   : > { %v456_v46 = vrot.slane %v455_v35, 4  ;;  %v650_v48 = vsel %vm2488_vm7, %v1955_v37, %v649_v38  ;;  %v654_v51 = vsel %vm2488_vm7, %v1956_v42, %v653_v43  ;;  %v486_v53 = vshll.u32 %v386_v34, 16  ;;  %v1983_v60 = vld [vmem:[%s2449_s4 + $0x8] sm:$0xf]  ;;  %v2551_v1 = vld [vmem:[%s2449_s4 + $0xc] sm:$0x1] }
  0x36   : > { %v469_v50 = vor.u32 %v468_v41, %v465_v32  ;;  %v479_v52 = vrot.slane %v477_v45, 4  ;;  %v1961_v56 = vcombine.low %v650_v48, %v654_v51  ;;  %v482_v57 = vrot.slane %v480_v49, 5  ;;  %v1985_v6 = vld [vmem:[%s2449_s4 + $0x10] sm:$0xf]  ;;  %v2560_v15 = vld [vmem:[%s2449_s4 + $0x14] sm:$0x1] }
  0x37   : > { %v461_v55 = vsel %vm2500_vm8, %v456_v46, %v460_v31  ;;  %v491_v58 = vshrl.u32 %v387_v39, 16  ;;  %v488_v62 = vrot.slane %v486_v53, 5  ;;  %v494_v63 = vshll.u32 %v387_v39, 16  ;;  %v1987_v20 = vld [vmem:[%s2449_s4 + $0x18] sm:$0xf] }
  0x38   : > { %v470_v61 = vrot.slane %v469_v50, 4  ;;  %v500_v0 = vshll.u32 %v388_v44, 16  ;;  %2172 = vmatprep.mubr.msk.bf16.mxu0 %vm283_vm2, %v1961_v56  ;;  %v483_v2 = vor.u32 %v482_v57, %v479_v52  ;;  %v1957_v4 = vrot.slane %v610_v54, 9  ;;  %v2570_v26 = vld [vmem:[%s2449_s4 + $0x1c] sm:$0x1] }
  0x39   : > { %v493_v3 = vrot.slane %v491_v58, 4  ;;  %v657_v5 = vrot.slane %v386_v34, 5  ;;  %v496_v8 = vrot.slane %v494_v63, 5  ;;  %v1958_v10 = vrot.slane %v611_v59, 9  ;;  %v1989_v27 = vld [vmem:[%s2449_s4 + $0x20] sm:$0xf] }
  0x3a   : > { %v475_v7 = vsel %vm2500_vm8, %v470_v61, %v474_v47  ;;  %v502_v9 = vrot.slane %v500_v0, 5  ;;  %v484_v12 = vrot.slane %v483_v2, 4  ;;  %v661_v14 = vrot.slane %v388_v44, 5  ;;  %v2311_v30 = vld [vmem:[%s2449_s4 + $0x8] ss:$8 sps:$4 sm:$0xff]  }
  0x3b   : > { %v1945_v11 = vcombine.low %v461_v55, %v475_v7  ;;  %v658_v13 = vsel %vm2488_vm7, %v1957_v4, %v657_v5  ;;  %v497_v16 = vor.u32 %v496_v8, %v493_v3  ;;  %v897_v17 = vshrl.u32 %v1983_v60, 16  ;;  %v2575_v33 = vld [vmem:[%s2449_s4 + $0x24] sm:$0x1]  ;;  %v243_v38 = vld [vmem:[%s2462_s14 + $0xa] sm:$0x3] }
  0x3c   : > { %v900_v18 = vshll.u32 %v1983_v60, 16  ;;  %v906_v19 = vshll.u32 %v2551_v1, 16  ;;  %v489_v21 = vsel %vm2500_vm8, %v484_v12, %v488_v62  ;;  %v662_v23 = vsel %vm2488_vm7, %v1958_v10, %v661_v14  ;;  %2244 = vmatprep.subr.msk.bf16.mxu1 %vm296_vm1, %v243_v38  ;;  %v244_v44 = vld [vmem:[%s2462_s14 + $0xc] sm:$0x3]  ;;  %v1991_v53 = vld [vmem:[%s2449_s4 + $0x28] sm:$0xf] }
  0x3d   : > { %2162 = vmatprep.mubr.msk.bf16.mxu1 %vm283_vm2, %v1945_v11  ;;  %v911_v24 = vshrl.u32 %v1985_v6, 16  ;;  %v914_v25 = vshll.u32 %v1985_v6, 16  ;;  %v498_v28 = vrot.slane %v497_v16, 4  ;;  %v1962_v29 = vcombine.low %v658_v13, %v662_v23  ;;  %2245 = vmatprep.subr.msk.bf16.mxu0 %vm296_vm1, %v244_v44  ;;  %v2590_v58 = vld [vmem:[%s2449_s4 + $0x2c] sm:$0x1] }
  0x3e   : > { %v899_v31 = vrot.slane %v897_v17, 4  ;;  %v902_v32 = vrot.slane %v900_v18, 5  ;;  %v908_v34 = vrot.slane %v906_v19, 5  ;;  %v920_v37 = vshll.u32 %v2560_v15, 16  ;;  %v1993_v63 = vld [vmem:[%s2449_s4 + $0x30] sm:$0xf] }
  0x3f   : > { %v913_v35 = vrot.slane %v911_v24, 4  ;;  %v916_v36 = vrot.slane %v914_v25, 5  ;;  %v503_v39 = vsel %vm2500_vm8, %v498_v28, %v502_v9  ;;  %2173 = vmatmul.mubr.msk.bf16.gmra.mxu0 %vm283_vm2, %v1962_v29  ;;  %v925_v42 = vshrl.u32 %v1987_v20, 16  ;;  %v2598_v0 = vld [vmem:[%s2449_s4 + $0x34] sm:$0x1] }
  0x40   : > { %v903_v41 = vor.u32 %v902_v32, %v899_v31  ;;  %v928_v43 = vshll.u32 %v1987_v20, 16  ;;  %v1946_v45 = vcombine.low %v489_v21, %v503_v39  ;;  %v922_v47 = vrot.slane %v920_v37, 5  ;;  %v2312_v3 = vld [vmem:[%s2449_s4 + $0x18] ss:$8 sps:$4 sm:$0xff]   ;;  %v2313_v12 = vld [vmem:[%s2449_s4 + $0x28] ss:$8 sps:$4 sm:$0xff]  }
  0x41   : > { %v917_v46 = vor.u32 %v916_v36, %v913_v35  ;;  %v934_v48 = vshll.u32 %v2570_v26, 16  ;;  %v927_v50 = vrot.slane %v925_v42, 4  ;;  %v939_v52 = vshrl.u32 %v1989_v27, 16  ;;  %v1995_v21 = vld [vmem:[%s2449_s4 + $0x38] sm:$0xf] }
  0x42   : > { %v904_v49 = vrot.slane %v903_v41, 4  ;;  %v930_v51 = vrot.slane %v928_v43, 5  ;;  %2163 = vmatmul.mubr.msk.bf16.gmra.mxu1 %vm283_vm2, %v1946_v45  ;;  %v942_v56 = vshll.u32 %v1989_v27, 16  ;;  %v948_v57 = vshll.u32 %v2575_v33, 16  ;;  %v2612_v28 = vld [vmem:[%s2449_s4 + $0x3c] sm:$0x1] }
  0x43   : > { %v918_v54 = vrot.slane %v917_v46, 4  ;;  %v936_v55 = vrot.slane %v934_v48, 5  ;;  %2178 = vmatprep.mubr.msk.bf16.mxu1 %vm283_vm2, %v2311_v30  ;;  %v941_v61 = vrot.slane %v939_v52, 4  ;;  %v1189_v62 = vsel %vm296_vm1, %v243_v38, 0  ;;  %v1997_v31 = vld [vmem:[%s2449_s4 + $0x40] sm:$0xf] }
  0x44   : > { %v909_v59 = vsel %vm2500_vm8, %v904_v49, %v908_v34  ;;  %v931_v60 = vor.u32 %v930_v51, %v927_v50  ;;  %v944_v4 = vrot.slane %v942_v56, 5  ;;  %v950_v5 = vrot.slane %v948_v57, 5  ;;  %v2616_v32 = vld [vmem:[%s2449_s4 + $0x44] sm:$0x1]  ;;  %v2007_v39 = vld [vmem:[%s2449_s4 + $0x8] sm:$0xe] }
  0x45   : > { %v923_v2 = vsel %vm2500_vm8, %v918_v54, %v922_v47  ;;  %v1306_v6 = vsel %vm296_vm1, %v244_v44, 0  ;;  %v953_v9 = vshrl.u32 %v1991_v53, 16  ;;  %v956_v10 = vshll.u32 %v1991_v53, 16  ;;  %v2008_v41 = vld [vmem:[%s2449_s4 + $0x10] sm:$0xe] }
  0x46   : > { %v1999_v7 = vcombine.low %v909_v59, %v923_v2  ;;  %v932_v8 = vrot.slane %v931_v60, 4  ;;  %v945_v11 = vor.u32 %v944_v4, %v941_v61  ;;  %v962_v13 = vshll.u32 %v2590_v58, 16  ;;  %v2314_v51 = vld [vmem:[%s2449_s4 + $0x38] ss:$8 sps:$4 sm:$0xff]  }
  0x47   : > { %v967_v14 = vshrl.u32 %v1993_v63, 16  ;;  %v970_v16 = vshll.u32 %v1993_v63, 16  ;;  %v955_v18 = vrot.slane %v953_v9, 4  ;;  %v958_v19 = vrot.slane %v956_v10, 5  ;;  %v2009_v60 = vld [vmem:[%s2449_s4 + $0x18] sm:$0xe] }
  0x48   : > { %2188 = vmatprep.mubr.msk.bf16.mxu0 %vm283_vm2, %v1999_v7  ;;  %v937_v17 = vsel %vm2500_vm8, %v932_v8, %v936_v55  ;;  %v976_v20 = vshll.u32 %v2598_v0, 16  ;;  %v946_v23 = vrot.slane %v945_v11, 4  ;;  %v964_v24 = vrot.slane %v962_v13, 5  ;;  %v2010_v61 = vld [vmem:[%s2449_s4 + $0x20] sm:$0xe] }
  0x49   : > { %v969_v25 = vrot.slane %v967_v14, 4  ;;  %v972_v27 = vrot.slane %v970_v16, 5  ;;  %v959_v29 = vor.u32 %v958_v19, %v955_v18  ;;  %v981_v34 = vshrl.u32 %v1995_v21, 16  ;;  %v246_v14 = vld [vmem:[%s2462_s14 + $0x10] sm:$0x3] }
  0x4a   : > { %v978_v30 = vrot.slane %v976_v20, 5  ;;  %2179 = vmatmul.mubr.msk.bf16.vlgmr.msra.gmra.mxu1 %vm283_vm2, %v2312_v3  ;;  %v951_v35 = vsel %vm2500_vm8, %v946_v23, %v950_v5  ;;  %v984_v37 = vshll.u32 %v1995_v21, 16  ;;  %v990_v38 = vshll.u32 %v2612_v28, 16  ;;  %v2011_v16 = vld [vmem:[%s2449_s4 + $0x28] sm:$0xe] }
  0x4b   : > { %v973_v36 = vor.u32 %v972_v27, %v969_v25  ;;  %v2000_v42 = vcombine.low %v937_v17, %v951_v35  ;;  %2197 = vmatpush3.bf16.msra.mxu1 %v1189_v62  ;;  %2182 = vmatprep.mubr.msk.bf16.mxu1 %vm283_vm2, %v2313_v12  ;;  %v960_v43 = vrot.slane %v959_v29, 4  ;;  %v983_v44 = vrot.slane %v981_v34, 4  ;;  %v2012_v17 = vld [vmem:[%s2449_s4 + $0x30] sm:$0xe]  ;;  %v2013_v29 = vld [vmem:[%s2449_s4 + $0x38] sm:$0xe] }
  0x4c   : > { %v995_v45 = vshrl.u32 %v1997_v31, 16  ;;  %v986_v47 = vrot.slane %v984_v37, 5  ;;  %v992_v48 = vrot.slane %v990_v38, 5  ;;  %v998_v49 = vshll.u32 %v1997_v31, 16  ;;  %v2315_v20 = vld [vmem:[%s2449_s4 + $0x10] ss:$8 sps:$4 sm:$0xff]  }
  0x4d   : > { %v974_v46 = vrot.slane %v973_v36, 4  ;;  %2189 = vmatmul.mubr.msk.bf16.vlgmr.msra.gmra.mxu0 %vm283_vm2, %v2000_v42  ;;  %v965_v50 = vsel %vm2500_vm8, %v960_v43, %v964_v24  ;;  %v1004_v53 = vshll.u32 %v2616_v32, 16  ;;  %v2015_v54 = vrot.slane %v2007_v39, 9  ;;  %v2048_v42 = vld [vmem:[%s2449_s4 + $0x14] sm:$0x1] }
  0x4e   : > { %v997_v52 = vrot.slane %v995_v45, 4  ;;  %2207 = vmatpush3.bf16.msra.mxu0 %v1306_v6  ;;  %v987_v56 = vor.u32 %v986_v47, %v983_v44  ;;  %v1000_v57 = vrot.slane %v998_v49, 5  ;;  %v1134_v59 = vrot.slane %v2551_v1, 5  ;;  %v2049_v43 = vld [vmem:[%s2449_s4 + $0x18] sm:$0xf] }
  0x4f   : > { %v979_v55 = vsel %vm2500_vm8, %v974_v46, %v978_v30  ;;  %v1006_v63 = vrot.slane %v1004_v53, 5  ;;  %v2016_v2 = vrot.slane %v2008_v41, 9  ;;  %v1138_v3 = vrot.slane %v2560_v15, 5  ;;  %v245_v15 = vld [vmem:[%s2462_s14 + $0xe] sm:$0x3]  ;;  %2247 = vmatprep.subr.msk.bf16.mxu0 %vm296_vm1, %v246_v14 }
  0x50   : > { %v2001_v62 = vcombine.low %v965_v50, %v979_v55  ;;  %v988_v4 = vrot.slane %v987_v56, 4  ;;  %v1001_v5 = vor.u32 %v1000_v57, %v997_v52  ;;  %v1135_v6 = vsel %vm2488_vm7, %v2015_v54, %v1134_v59  ;;  %2246 = vmatprep.subr.msk.bf16.mxu1 %vm296_vm1, %v245_v15  ;;  %v2014_v30 = vld [vmem:[%s2449_s4 + $0x40] sm:$0xe]  ;;  %v2050_v44 = vld [vmem:[%s2449_s4 + $0x1c] sm:$0x1] }
  0x51   : > { %v2017_v7 = vrot.slane %v2009_v60, 9  ;;  %v1139_v1 = vsel %vm2488_vm7, %v2016_v2, %v1138_v3  ;;  %v1142_v8 = vrot.slane %v2570_v26, 5  ;;  %v2018_v9 = vrot.slane %v2010_v61, 9  ;;  %v2316_v45 = vld [vmem:[%s2449_s4 + $0x20] ss:$8 sps:$4 sm:$0xff]  }
  0x52   : > { %2192 = vmatprep.mubr.msk.bf16.mxu0 %vm283_vm2, %v2001_v62  ;;  %v1146_v10 = vrot.slane %v2575_v33, 5  ;;  %2183 = vmatmul.mubr.msk.bf16.gmra.mxu1 %vm283_vm2, %v2314_v51  ;;  %v993_v11 = vsel %vm2500_vm8, %v988_v4, %v992_v48  ;;  %v1002_v12 = vrot.slane %v1001_v5, 4  ;;  %v2023_v13 = vcombine.low %v1135_v6, %v1139_v1  ;;  %v2071_v50 = vld [vmem:[%s2449_s4 + $0x10] sm:$0xe]  ;;  %v2072_v55 = vld [vmem:[%s2449_s4 + $0x18] sm:$0xe] }
  0x53   : > { %v1143_v26 = vsel %vm2488_vm7, %v2017_v7, %v1142_v8  ;;  %v2019_v18 = vrot.slane %v2011_v16, 9  ;;  %v1150_v21 = vrot.slane %v2590_v58, 5  ;;  %v2020_v23 = vrot.slane %v2012_v17, 9  ;;  %v2317_v51 = vld [vmem:[%s2449_s4 + $0x30] ss:$8 sps:$4 sm:$0xff]  }
  0x54   : > { %v1147_v33 = vsel %vm2488_vm7, %v2018_v9, %v1146_v10  ;;  %v1007_v19 = vsel %vm2500_vm8, %v1002_v12, %v1006_v63  ;;  %2198 = vmatprep.mubr.msk.bf16.mxu1 %vm283_vm2, %v2023_v13  ;;  %v1154_v27 = vrot.slane %v2598_v0, 5  ;;  %v1158_v31 = vrot.slane %v2612_v28, 5  ;;  %v2047_v28 = vld [vmem:[%s2449_s4 + $0x10] sm:$0xf]  ;;  %v2051_v62 = vld [vmem:[%s2449_s4 + $0x20] sm:$0xf] }
  0x55   : > { %v2002_v24 = vcombine.low %v993_v11, %v1007_v19  ;;  %v2024_v25 = vcombine.low %v1143_v26, %v1147_v33  ;;  %v1151_v34 = vsel %vm2488_vm7, %v2019_v18, %v1150_v21  ;;  %v2021_v35 = vrot.slane %v2013_v29, 9  ;;  %v2052_v5 = vld [vmem:[%s2449_s4 + $0x24] sm:$0x1]  ;;  %v2053_v8 = vld [vmem:[%s2449_s4 + $0x28] sm:$0xf] }
  0x56   : > { %v2022_v36 = vrot.slane %v2014_v30, 9  ;;  %v1162_v58 = vrot.slane %v2616_v32, 5  ;;  %v1534_v37 = vsel %vm296_vm1, %v245_v15, 0  ;;  %v1690_v0 = vsel %vm296_vm1, %v246_v14, 0  ;;  %v2054_v15 = vld [vmem:[%s2449_s4 + $0x2c] sm:$0x1] }
  0x57   : > { %2193 = vmatmul.mubr.msk.bf16.gmra.mxu0 %vm283_vm2, %v2002_v24  ;;  %v1155_v38 = vsel %vm2488_vm7, %v2020_v23, %v1154_v27  ;;  %v1159_v41 = vsel %vm2488_vm7, %v2021_v35, %v1158_v31  ;;  %v1398_v47 = vshrl.u32 %v2047_v28, 16  ;;  %v1401_v48 = vshll.u32 %v2047_v28, 16  ;;  %v2073_v17 = vld [vmem:[%s2449_s4 + $0x20] sm:$0xe]  ;;  %v2074_v23 = vld [vmem:[%s2449_s4 + $0x28] sm:$0xe] }
  0x58   : > { %2208 = vmatprep.mubr.msk.bf16.mxu0 %vm283_vm2, %v2315_v20  ;;  %v2025_v39 = vcombine.low %v1151_v34, %v1155_v38  ;;  %v1163_v32 = vsel %vm2488_vm7, %v2022_v36, %v1162_v58  ;;  %v1407_v49 = vshll.u32 %v2048_v42, 16  ;;  %v1412_v52 = vshrl.u32 %v2049_v43, 16  ;;  %v2055_v30 = vld [vmem:[%s2449_s4 + $0x30] sm:$0xf]  ;;  %v2056_v58 = vld [vmem:[%s2449_s4 + $0x34] sm:$0x1] }
  0x59   : > { %v2026_v46 = vcombine.low %v1159_v41, %v1163_v32  ;;  %v1415_v53 = vshll.u32 %v2049_v43, 16  ;;  %v1421_v54 = vshll.u32 %v2050_v44, 16  ;;  %v2079_v56 = vrot.slane %v2071_v50, 9 }
  0x5a   : > { %2199 = vmatmul.mubr.msk.bf16.vlgmr.msra.gmra.mxu1 %vm283_vm2, %v2024_v25  ;;  %v1400_v57 = vrot.slane %v1398_v47, 4  ;;  %v1403_v59 = vrot.slane %v1401_v48, 5  ;;  %v1409_v60 = vrot.slane %v1407_v49, 5  ;;  %v1635_v61 = vrot.slane %v2048_v42, 5 }
  0x5b   : > { %2217 = vmatpush3.bf16.msra.mxu1 %v1534_v37  ;;  %2202 = vmatprep.mubr.msk.bf16.mxu1 %vm283_vm2, %v2025_v39  ;;  %v1414_v63 = vrot.slane %v1412_v52, 4  ;;  %v1417_v2 = vrot.slane %v1415_v53, 5  ;;  %v1423_v3 = vrot.slane %v1421_v54, 5  ;;  %v2080_v4 = vrot.slane %v2072_v55, 9  ;;  %v2057_v37 = vld [vmem:[%s2449_s4 + $0x38] sm:$0xf] }
  0x5c   : > { %v1404_v6 = vor.u32 %v1403_v59, %v1400_v57  ;;  %v1636_v7 = vsel %vm2488_vm7, %v2079_v56, %v1635_v61  ;;  %v1639_v1 = vrot.slane %v2050_v44, 5  ;;  %v1426_v9 = vshrl.u32 %v2051_v62, 16  ;;  %v2075_v54 = vld [vmem:[%s2449_s4 + $0x30] sm:$0xe]  ;;  %v2076_v55 = vld [vmem:[%s2449_s4 + $0x38] sm:$0xe] }
  0x5d   : > { %v1418_v10 = vor.u32 %v1417_v2, %v1414_v63  ;;  %v1429_v11 = vshll.u32 %v2051_v62, 16  ;;  %v1435_v12 = vshll.u32 %v2052_v5, 16  ;;  %v1440_v13 = vshrl.u32 %v2053_v8, 16  ;;  %v2059_v61 = vld [vmem:[%s2449_s4 + $0x40] sm:$0xf] }
  0x5e   : > { %v1405_v14 = vrot.slane %v1404_v6, 4  ;;  %v1640_v16 = vsel %vm2488_vm7, %v2080_v4, %v1639_v1  ;;  %v1428_v26 = vrot.slane %v1426_v9, 4  ;;  %v1443_v33 = vshll.u32 %v2053_v8, 16  ;;  %v2060_v4 = vld [vmem:[%s2449_s4 + $0x44] sm:$0x1] }
  0x5f   : > { %2209 = vmatmul.mubr.msk.bf16.vlgmr.msra.gmra.mxu0 %vm283_vm2, %v2316_v45  ;;  %v1419_v18 = vrot.slane %v1418_v10, 4  ;;  %v2087_v19 = vcombine.low %v1636_v7, %v1640_v16  ;;  %v1431_v20 = vrot.slane %v1429_v11, 5  ;;  %v1437_v21 = vrot.slane %v1435_v12, 5  ;;  %v2061_v8 = vld [vmem:[%s2449_s4 + $0x48] sm:$0xf] }
  0x60   : > { %2227 = vmatpush3.bf16.msra.mxu0 %v1690_v0  ;;  %2212 = vmatprep.mubr.msk.bf16.mxu0 %vm283_vm2, %v2317_v51  ;;  %v1410_v24 = vsel %vm2500_vm8, %v1405_v14, %v1409_v60  ;;  %v1442_v25 = vrot.slane %v1440_v13, 4  ;;  %v1445_v27 = vrot.slane %v1443_v33, 5  ;;  %v1449_v29 = vshll.u32 %v2054_v15, 16  ;;  %v2318_v0 = vld [vmem:[%s2449_s4 + $0x40] ss:$8 sps:$4 sm:$0xff]  }
  0x61   : > { %v1424_v31 = vsel %vm2500_vm8, %v1419_v18, %v1423_v3  ;;  %v1432_v34 = vor.u32 %v1431_v20, %v1428_v26  ;;  %v2081_v35 = vrot.slane %v2073_v17, 9  ;;  %v1643_v36 = vrot.slane %v2052_v5, 5  ;;  %v2062_v14 = vld [vmem:[%s2449_s4 + $0x4c] sm:$0x1]  ;;  %v2077_v20 = vld [vmem:[%s2449_s4 + $0x40] sm:$0xe] }
  0x62   : > { %2203 = vmatmul.mubr.msk.bf16.gmra.mxu1 %vm283_vm2, %v2026_v46  ;;  %v2063_v38 = vcombine.low %v1410_v24, %v1424_v31  ;;  %v1446_v28 = vor.u32 %v1445_v27, %v1442_v25  ;;  %v1451_v39 = vrot.slane %v1449_v29, 5  ;;  %v2082_v41 = vrot.slane %v2074_v23, 9  ;;  %v2058_v46 = vld [vmem:[%s2449_s4 + $0x3c] sm:$0x1]  ;;  %v2078_v25 = vld [vmem:[%s2449_s4 + $0x48] sm:$0xe] }
  0x63   : > { %v1433_v32 = vrot.slane %v1432_v34, 4  ;;  %v1644_v42 = vsel %vm2488_vm7, %v2081_v35, %v1643_v36  ;;  %v1647_v43 = vrot.slane %v2054_v15, 5  ;;  %v1454_v44 = vshrl.u32 %v2055_v30, 16 }
  0x64   : > { %2218 = vmatprep.mubr.msk.bf16.mxu1 %vm283_vm2, %v2063_v38  ;;  %v1447_v45 = vrot.slane %v1446_v28, 4  ;;  %v1457_v47 = vshll.u32 %v2055_v30, 16  ;;  %v1463_v48 = vshll.u32 %v2056_v58, 16  ;;  %v1468_v49 = vshrl.u32 %v2057_v37, 16 }
  0x65   : > { %v1438_v50 = vsel %vm2500_vm8, %v1433_v32, %v1437_v21  ;;  %v1648_v51 = vsel %vm2488_vm7, %v2082_v41, %v1647_v43  ;;  %v1456_v52 = vrot.slane %v1454_v44, 4  ;;  %v1471_v53 = vshll.u32 %v2057_v37, 16 }
  0x66   : > { %v1452_v56 = vsel %vm2500_vm8, %v1447_v45, %v1451_v39  ;;  %v2088_v57 = vcombine.low %v1644_v42, %v1648_v51  ;;  %v1459_v59 = vrot.slane %v1457_v47, 5  ;;  %v1465_v60 = vrot.slane %v1463_v48, 5 }
  0x67   : > { %2213 = vmatmul.mubr.msk.bf16.gmra.mxu0 %vm283_vm2, %v2318_v0  ;;  %v2064_v62 = vcombine.low %v1438_v50, %v1452_v56  ;;  %v1470_v63 = vrot.slane %v1468_v49, 4  ;;  %v1473_v2 = vrot.slane %v1471_v53, 5  ;;  %v1477_v3 = vshll.u32 %v2058_v46, 16 }
  0x68   : > { %2228 = vmatprep.mubr.msk.bf16.mxu0 %vm283_vm2, %v2087_v19  ;;  %v1460_v5 = vor.u32 %v1459_v59, %v1456_v52  ;;  %v2083_v6 = vrot.slane %v2075_v54, 9  ;;  %v1651_v7 = vrot.slane %v2056_v58, 5  ;;  %v2084_v1 = vrot.slane %v2076_v55, 9 }
  0x69   : > { %v1474_v9 = vor.u32 %v1473_v2, %v1470_v63  ;;  %v1479_v10 = vrot.slane %v1477_v3, 5  ;;  %v1655_v15 = vrot.slane %v2058_v46, 5  ;;  %v1482_v11 = vshrl.u32 %v2059_v61, 16 }
  0x6a   : > { %2219 = vmatmul.mubr.msk.bf16.vlgmr.msra.gmra.mxu1 %vm283_vm2, %v2064_v62  ;;  %v1461_v12 = vrot.slane %v1460_v5, 4  ;;  %v1652_v13 = vsel %vm2488_vm7, %v2083_v6, %v1651_v7  ;;  %v1485_v16 = vshll.u32 %v2059_v61, 16  ;;  %v1491_v26 = vshll.u32 %v2060_v4, 16 }
  0x6b   : > { %v1475_v33 = vrot.slane %v1474_v9, 4  ;;  %v1656_v17 = vsel %vm2488_vm7, %v2084_v1, %v1655_v15  ;;  %v1484_v18 = vrot.slane %v1482_v11, 4  ;;  %v1496_v19 = vshrl.u32 %v2061_v8, 16 }
  0x6c   : > { %v1466_v21 = vsel %vm2500_vm8, %v1461_v12, %v1465_v60  ;;  %v2089_v23 = vcombine.low %v1652_v13, %v1656_v17  ;;  %v1487_v24 = vrot.slane %v1485_v16, 5  ;;  %v1499_v30 = vshll.u32 %v2061_v8, 16  ;;  %v249_v17 = vld [vmem:[#allocation2 + $0x10] sm:$0xff] }
  0x6d   : > { %v1480_v27 = vsel %vm2500_vm8, %v1475_v33, %v1479_v10  ;;  %v1498_v29 = vrot.slane %v1496_v19, 4  ;;  %v1505_v31 = vshll.u32 %v2062_v14, 16  ;;  %v2085_v36 = vrot.slane %v2077_v20, 9  ;;  %v247_v19 = vld [vmem:[#allocation2] sm:$0xff] }
  0x6e   : > { %v2065_v34 = vcombine.low %v1466_v21, %v1480_v27  ;;  %v1488_v35 = vor.u32 %v1487_v24, %v1484_v18  ;;  %v1659_v58 = vrot.slane %v2060_v4, 5  ;;  %v1493_v37 = vrot.slane %v1491_v26, 5  ;;  %v250_v24 = vld [vmem:[#allocation2 + $0x18] sm:$0xff] }
  0x6f   : > { %2229 = vmatmul.mubr.msk.bf16.vlgmr.msra.gmra.mxu0 %vm283_vm2, %v2088_v57  ;;  %v1501_v0 = vrot.slane %v1499_v30, 5  ;;  %v2086_v38 = vrot.slane %v2078_v25, 9  ;;  %v1663_v28 = vrot.slane %v2062_v14, 5  ;;  %v1507_v42 = vrot.slane %v1505_v31, 5  ;;  %v248_v31 = vld [vmem:[#allocation2 + $0x8] sm:$0xff] }
  0x70   : > { %2232 = vmatprep.mubr.msk.bf16.mxu0 %vm283_vm2, %v2089_v23  ;;  %2222 = vmatprep.mubr.msk.bf16.mxu1 %vm283_vm2, %v2065_v34  ;;  %v1489_v39 = vrot.slane %v1488_v35, 4  ;;  %v1660_v41 = vsel %vm2488_vm7, %v2085_v36, %v1659_v58 }
  0x71   : > { %v1502_v32 = vor.u32 %v1501_v0, %v1498_v29  ;;  %v1664_v43 = vsel %vm2488_vm7, %v2086_v38, %v1663_v28 }
  0x72   : > { %v2090_v44 = vcombine.low %v1660_v41, %v1664_v43  ;;  %v1494_v45 = vsel %vm2500_vm8, %v1489_v39, %v1493_v37 }
  0x73   : > { %v1503_v46 = vrot.slane %v1502_v32, 4 }
  0x75   : > { %v1508_v47 = vsel %vm2500_vm8, %v1503_v46, %v1507_v42 }
  0x76   : > { %v2066_v48 = vcombine.low %v1494_v45, %v1508_v47 }
  0x77   : > { %2233 = vmatmul.mubr.msk.bf16.gmra.mxu0 %vm283_vm2, %v2090_v44 }
  0x78   : > { %2223 = vmatmul.mubr.msk.bf16.gmra.mxu1 %vm283_vm2, %v2066_v48 }
  0xe5   : > { %v2150_v49 = vpop.f32.mrf.mxu0  ;;  %v2751_v50 = vpop.f32.mrf.mxu1 }
  0xe6   : > { %v367_v21 = vadd.f32 %v2150_v49, %v249_v17  ;;  %v253_v49 = vld [vmem:[#allocation2 + $0x30] sm:$0xff] }
  0xe7   : > { %v334_v51 = vpop.f32.mrf.mxu0  ;;  %v2753_v52 = vpop.f32.mrf.mxu1 }
  0xe8   : > { %v365_v27 = vadd.f32 %v334_v51, %v247_v19  ;;  %v251_v19 = vld [vmem:[#allocation2 + $0x20] sm:$0xff] }
  0xe9   : > { %v2151_v22 = vpop.f32.mrf.mxu0  ;;  %v2755_v53 = vpop.f32.mrf.mxu1 }
  0xea   : > { %v368_v35 = vadd.f32 %v2151_v22, %v250_v24 }
  0xeb   : > { %v337_v54 = vpop.f32.mrf.mxu0  ;;  %v2757_v55 = vpop.f32.mrf.mxu1 }
  0xec   : > { %v366_v0 = vadd.f32 %v337_v54, %v248_v31 }
  0xf2   : > { %v2170_v56 = vpop.f32.mrf.mxu0 }
  0xf3   : > { %v2160_v40 = vpop.f32.mrf.mxu1 }
  0xf4   : > { %v724_v57 = vpop.f32.mrf.mxu0  ;;  %v598_v29 = vadd.f32 %v2160_v40, %v367_v21 }
  0xf5   : > { %v565_v59 = vpop.f32.mrf.mxu1 }
  0xf6   : > { %v2171_v60 = vpop.f32.mrf.mxu0  ;;  %v596_v36 = vadd.f32 %v565_v59, %v365_v27  ;;  %v757_v38 = vadd.f32 %v2170_v56, %v598_v29  ;;  %v371_v56 = vadd.f32 %v2751_v50, %v253_v49 }
  0xf7   : > { %v2161_v61 = vpop.f32.mrf.mxu1 }
  0xf8   : > { %v727_v62 = vpop.f32.mrf.mxu0  ;;  %v599_v28 = vadd.f32 %v2161_v61, %v368_v35  ;;  %v755_v32 = vadd.f32 %v724_v57, %v596_v36  ;;  %v254_v61 = vld [vmem:[#allocation2 + $0x38] sm:$0xff] }
  0xf9   : > { %v568_v63 = vpop.f32.mrf.mxu1 }
  0xfa   : > { %v597_v42 = vadd.f32 %v568_v63, %v366_v0  ;;  %v758_v46 = vadd.f32 %v2171_v60, %v599_v28  ;;  %v369_v60 = vadd.f32 %v2753_v52, %v251_v19 }
  0xfc   : > { %v756_v22 = vadd.f32 %v727_v62, %v597_v42 }
  0xff   : > { %v2759_v2 = vpop.f32.mrf.mxu0 }
 0x101   : > { %v2761_v3 = vpop.f32.mrf.mxu0 }
 0x102   : > { %v2763_v4 = vpop.f32.mrf.mxu1 }
 0x103   : > { %v2767_v6 = vpop.f32.mrf.mxu0  ;;  %v602_v27 = vadd.f32 %v2763_v4, %v371_v56 }
 0x104   : > { %v2765_v5 = vpop.f32.mrf.mxu1 }
 0x105   : > { %v2773_v8 = vpop.f32.mrf.mxu0  ;;  %v600_v35 = vadd.f32 %v2765_v5, %v369_v60 }
 0x106   : > { %v2769_v7 = vpop.f32.mrf.mxu1 }
 0x107   : > { %v759_v5 = vadd.f32 %v2761_v3, %v600_v35 }
 0x108   : > { %v2771_v1 = vpop.f32.mrf.mxu1 }
 0x10a   : > { %v2180_v9 = vpop.f32.mrf.mxu1 }
 0x10b   : > { %v874_v43 = vadd.f32 %v2180_v9, %v757_v38  ;;  %v761_v38 = vadd.f32 %v2759_v2, %v602_v27 }
 0x10c   : > { %v841_v10 = vpop.f32.mrf.mxu1 }
 0x10d   : > { %v2190_v15 = vpop.f32.mrf.mxu0  ;;  %v872_v47 = vadd.f32 %v841_v10, %v755_v32  ;;  %v252_v10 = vld [vmem:[#allocation2 + $0x28] sm:$0xff] }
 0x10e   : > { %v2181_v11 = vpop.f32.mrf.mxu1  ;;  %v1102_v40 = vadd.f32 %v2190_v15, %v874_v43 }
 0x10f   : > { %v1069_v12 = vpop.f32.mrf.mxu0  ;;  %v875_v59 = vadd.f32 %v2181_v11, %v758_v46  ;;  %v372_v11 = vadd.f32 %v2755_v53, %v254_v61 }
 0x110   : > { %v844_v13 = vpop.f32.mrf.mxu1  ;;  %v1100_v21 = vadd.f32 %v1069_v12, %v872_v47 }
 0x111   : > { %v2191_v14 = vpop.f32.mrf.mxu0  ;;  %v873_v57 = vadd.f32 %v844_v13, %v756_v22  ;;  %v603_v0 = vadd.f32 %v2769_v7, %v372_v11 }
 0x112   : > { %v2775_v16 = vpop.f32.mrf.mxu1  ;;  %v1103_v29 = vadd.f32 %v2191_v14, %v875_v59 }
 0x113   : > { %v1072_v26 = vpop.f32.mrf.mxu0 }
 0x114   : > { %v2777_v33 = vpop.f32.mrf.mxu1  ;;  %v1101_v50 = vadd.f32 %v1072_v26, %v873_v57  ;;  %v878_v26 = vadd.f32 %v2775_v16, %v761_v38 }
 0x115   : > { %v876_v43 = vadd.f32 %v2777_v33, %v759_v5 }
 0x116   : > { %v2779_v18 = vpop.f32.mrf.mxu1 }
 0x117   : > { %v2781_v20 = vpop.f32.mrf.mxu0 }
 0x118   : > { %v2783_v23 = vpop.f32.mrf.mxu1  ;;  %v1106_v49 = vadd.f32 %v2781_v20, %v878_v26 }
 0x119   : > { %v2785_v25 = vpop.f32.mrf.mxu0 }
 0x11a   : > { %v2200_v30 = vpop.f32.mrf.mxu1 }
 0x11b   : > { %v2787_v34 = vpop.f32.mrf.mxu0  ;;  %v1258_v63 = vadd.f32 %v2200_v30, %v1102_v40  ;;  %v370_v30 = vadd.f32 %v2757_v55, %v252_v10  ;;  %v762_v55 = vadd.f32 %v2767_v6, %v603_v0  ;;  %v1104_v40 = vadd.f32 %v2785_v25, %v876_v43 }
 0x11c   : > { %v1225_v58 = vpop.f32.mrf.mxu1 }
 0x11d   : > { %v2789_v37 = vpop.f32.mrf.mxu0  ;;  %v1256_v62 = vadd.f32 %v1225_v58, %v1100_v21  ;;  %v601_v53 = vadd.f32 %v2771_v1, %v370_v30  ;;  %v879_v3 = vadd.f32 %v2779_v18, %v762_v55 }
 0x11e   : > { %v2201_v39 = vpop.f32.mrf.mxu1 }
 0x11f   : > { %v2210_v41 = vpop.f32.mrf.mxu0  ;;  %v1259_v12 = vadd.f32 %v2201_v39, %v1103_v29  ;;  %v760_v47 = vadd.f32 %v2773_v8, %v601_v53 }
 0x120   : > { %v1228_v44 = vpop.f32.mrf.mxu1  ;;  %v1375_v36 = vadd.f32 %v2210_v41, %v1258_v63 }
 0x121   : > { %v1342_v45 = vpop.f32.mrf.mxu0  ;;  %v1257_v14 = vadd.f32 %v1228_v44, %v1101_v50  ;;  %v877_v6 = vadd.f32 %v2783_v23, %v760_v47 }
 0x122   : > { %v2204_v48 = vpop.f32.mrf.mxu1  ;;  %v1373_v4 = vadd.f32 %v1342_v45, %v1256_v62 }
 0x123   : > { %v2211_v51 = vpop.f32.mrf.mxu0  ;;  %v1262_v59 = vadd.f32 %v2204_v48, %v1106_v49  ;;  %v1105_v21 = vadd.f32 %v2789_v37, %v877_v6 }
 0x124   : > { %v1241_v17 = vpop.f32.mrf.mxu1  ;;  %v1376_v39 = vadd.f32 %v2211_v51, %v1259_v12 }
 0x125   : > { %v1345_v54 = vpop.f32.mrf.mxu0  ;;  %v1260_v56 = vadd.f32 %v1241_v17, %v1104_v40 }
 0x126   : > { %v2205_v9 = vpop.f32.mrf.mxu1  ;;  %v1374_v2 = vadd.f32 %v1345_v54, %v1257_v14  ;;  %v1107_v54 = vadd.f32 %v2787_v34, %v879_v3 }
 0x127   : > { %v2214_v24 = vpop.f32.mrf.mxu0 }
 0x128   : > { %v1244_v15 = vpop.f32.mrf.mxu1  ;;  %v1379_v20 = vadd.f32 %v2214_v24, %v1262_v59  ;;  %v1263_v57 = vadd.f32 %v2205_v9, %v1107_v54 }
 0x129   : > { %v1358_v31 = vpop.f32.mrf.mxu0  ;;  %v1261_v10 = vadd.f32 %v1244_v15, %v1105_v21 }
 0x12a   : > { %v2220_v13 = vpop.f32.mrf.mxu1  ;;  %v1377_v60 = vadd.f32 %v1358_v31, %v1260_v56 }
 0x12b   : > { %v2215_v52 = vpop.f32.mrf.mxu0  ;;  %v1603_v58 = vadd.f32 %v2220_v13, %v1375_v36 }
 0x12c   : > { %v1570_v28 = vpop.f32.mrf.mxu1  ;;  %v1380_v29 = vadd.f32 %v2215_v52, %v1263_v57 }
 0x12d   : > { %v1361_v32 = vpop.f32.mrf.mxu0  ;;  %v1601_v41 = vadd.f32 %v1570_v28, %v1373_v4 }
 0x12e   : > { %v2221_v42 = vpop.f32.mrf.mxu1  ;;  %v1378_v35 = vadd.f32 %v1361_v32, %v1261_v10 }
 0x12f   : > { %v2230_v7 = vpop.f32.mrf.mxu0  ;;  %v1604_v44 = vadd.f32 %v2221_v42, %v1376_v39 }
 0x130   : > { %v1759_v45 = vadd.f32 %v2230_v7, %v1603_v58  ;;  %v1573_v46 = vpop.f32.mrf.mxu1 }
 0x131   : > { %v1726_v1 = vpop.f32.mrf.mxu0  ;;  %v1602_v51 = vadd.f32 %v1573_v46, %v1374_v2 }
 0x132   : > { %v1757_v16 = vadd.f32 %v1726_v1, %v1601_v41 }
 0x133   : > { %v2231_v22 = vpop.f32.mrf.mxu0 }
 0x134   : > { %v1760_v33 = vadd.f32 %v2231_v22, %v1604_v44 }
 0x135   : > { %v1729_v19 = vpop.f32.mrf.mxu0 }
 0x136   : > { %v1758_v61 = vadd.f32 %v1729_v19, %v1602_v51 }
 0x137   : > { %v2234_v8 = vpop.f32.mrf.mxu0 }
 0x138   : > { %v2224_v18 = vpop.f32.mrf.mxu1 }
 0x139   : > { %v1742_v63 = vpop.f32.mrf.mxu0  ;;  %v1607_v27 = vadd.f32 %v2224_v18, %v1379_v20 }
 0x13a   : > { %v1586_v25 = vpop.f32.mrf.mxu1 }
 0x13b   : > { %v1763_v23 = vadd.f32 %v2234_v8, %v1607_v27  ;;  %v1605_v48 = vadd.f32 %v1586_v25, %v1377_v60  ;;  %v2235_v11 = vpop.f32.mrf.mxu0 }
 0x13c   : > { %v2225_v62 = vpop.f32.mrf.mxu1 }
 0x13d   : > { %v1761_v34 = vadd.f32 %v1742_v63, %v1605_v48  ;;  %v1608_v17 = vadd.f32 %v2225_v62, %v1380_v29  ;;  %v1745_v37 = vpop.f32.mrf.mxu0  ;;  %1768 = sbr.rel (%p2095_p10) target bundleno = 326 (0x146), region = 40 }
 0x13e   : > { %v1589_v50 = vpop.f32.mrf.mxu1 }
 0x13f   : > { %v1764_v36 = vadd.f32 %v2235_v11, %v1608_v17  ;;  %v1606_v12 = vadd.f32 %v1589_v50, %v1378_v35 }
 0x141   : > { %v1762_v24 = vadd.f32 %v1745_v37, %v1606_v12 }
 0x142   : > { %1769 = vst.msk [vmem:[#allocation2] sm:$0xff] %vm283_vm2, %v1757_v16  ;;  %1770 = vst.msk [vmem:[#allocation2 + $0x8] sm:$0xff] %vm283_vm2, %v1758_v61 }
 0x143   : > { %1771 = vst.msk [vmem:[#allocation2 + $0x10] sm:$0xff] %vm283_vm2, %v1759_v45  ;;  %1772 = vst.msk [vmem:[#allocation2 + $0x18] sm:$0xff] %vm283_vm2, %v1760_v33 }
 0x144   : > { %1773 = vst.msk [vmem:[#allocation2 + $0x20] sm:$0xff] %vm283_vm2, %v1761_v34  ;;  %1774 = vst.msk [vmem:[#allocation2 + $0x28] sm:$0xff] %vm283_vm2, %v1762_v24 }
 0x145   : > { %1775 = vst.msk [vmem:[#allocation2 + $0x30] sm:$0xff] %vm283_vm2, %v1763_v23  ;;  %1776 = vst.msk [vmem:[#allocation2 + $0x38] sm:$0xff] %vm283_vm2, %v1764_v36 }
 0x146 PF: > { %p2096_p11 = scmp.ne.s32.totalorder %s2349_s12, 2 }
 0x148   : > { %1780 = sbr.rel (%p2096_p11) target bundleno = 344 (0x158), region = 44 }
 0x14d   : > { %v2097_v9 = vld [vmem:[%s2863_s2] ss:$0 sm:$0xff]  ;;  %vm1812_vm9 = vcmask 27648  }
 0x14e   : > { %v1788_v15 = vadd.f32 %v2097_v9, %v1757_v16  ;;  %v1789_v31 = vadd.f32 %v2097_v9, %v1758_v61  ;;  %v1790_v13 = vadd.f32 %v2097_v9, %v1759_v45  ;;  %v1791_v30 = vadd.f32 %v2097_v9, %v1760_v33 }
 0x14f   : > { %v1792_v0 = vadd.f32 %v2097_v9, %v1761_v34  ;;  %v1793_v52 = vadd.f32 %v2097_v9, %v1762_v24  ;;  %v1794_v38 = vadd.f32 %v2097_v9, %v1763_v23  ;;  %v1795_v4 = vadd.f32 %v2097_v9, %v1764_v36 }
 0x150   : > { %v1796_v14 = vmax.f32 %v1788_v15, 0.0  ;;  %v1797_v58 = vmax.f32 %v1789_v31, 0.0  ;;  %v1798_v28 = vmax.f32 %v1790_v13, 0.0  ;;  %v1799_v53 = vmax.f32 %v1791_v30, 0.0 }
 0x151   : > { %v1800_v32 = vmax.f32 %v1792_v0, 0.0  ;;  %v1801_v5 = vmax.f32 %v1793_v52, 0.0  ;;  %v1802_v26 = vmax.f32 %v1794_v38, 0.0  ;;  %v1803_v39 = vmax.f32 %v1795_v4, 0.0 }
 0x152   : > { %v1804_v41 = vpack.c.bf16 %v1796_v14, %v1796_v14  ;;  %v1805_v42 = vpack.c.bf16 %v1797_v58, %v1797_v58  ;;  %v1806_v55 = vpack.c.bf16 %v1798_v28, %v1798_v28  ;;  %v1807_v7 = vpack.c.bf16 %v1799_v53, %v1799_v53 }
 0x153   : > { %v1808_v43 = vpack.c.bf16 %v1800_v32, %v1800_v32  ;;  %v1809_v2 = vpack.c.bf16 %v1801_v5, %v1801_v5  ;;  %v1810_v45 = vpack.c.bf16 %v1802_v26, %v1802_v26  ;;  %v1811_v44 = vpack.c.bf16 %v1803_v39, %v1803_v39 }
 0x154   : > { %1813 = vst.msk [vmem:[%s2454_s9] sm:$0xf] %vm1812_vm9, %v1804_v41  ;;  %1814 = vst.msk [vmem:[%s2454_s9 + $0x4] sm:$0xf] %vm1812_vm9, %v1805_v42 }
 0x155   : > { %1815 = vst.msk [vmem:[%s2454_s9 + $0x8] sm:$0xf] %vm1812_vm9, %v1806_v55  ;;  %1816 = vst.msk [vmem:[%s2454_s9 + $0xc] sm:$0xf] %vm1812_vm9, %v1807_v7 }
 0x156   : > { %1817 = vst.msk [vmem:[%s2454_s9 + $0x10] sm:$0xf] %vm1812_vm9, %v1808_v43  ;;  %1818 = vst.msk [vmem:[%s2454_s9 + $0x14] sm:$0xf] %vm1812_vm9, %v1809_v2 }
 0x157   : > { %1819 = vst.msk [vmem:[%s2454_s9 + $0x18] sm:$0xf] %vm1812_vm9, %v1810_v45  ;;  %1820 = vst.msk [vmem:[%s2454_s9 + $0x1c] sm:$0xf] %vm1812_vm9, %v1811_v44 }
 0x158 PF: > { %s13_s18 = sadd.s32 1, %s2373_s18   ;;  %s2869_s12 = smov %s2361_s15 }
 0x159   : > { %p10_p12 = scmp.ge.s32.totalorder %s13_s18, 50   ;;  %s2870_s13 = smov %s2365_s16 }
 0x15a   : > { %s2871_s14 = smov %s2369_s17  ;;  %s2872_s15 = smov %s2876_s19 }
 0x15b   : > { %s2873_s16 = smov %s2880_s20  ;;  %s2874_s17 = smov %s2884_s21 }
 0x15c   :  { %12 = sbr.rel (!%p10_p12) target bundleno = 4 (0x4), region = 77 }

// kernel: _lambda_.16
= control target key start
LH: loop header
LB: loop body
LE: loop exit
PB: predicated region body
PF: predicated region fallthrough
CT: control target
= control target key end

     0   :  { %s1616_s12 = smov 0   ;;  %s1908_s0 = inlined_call_operand.vmem [shape: bf16[1024,16], index: 0, kind: input, shape index: {}]   ;;  %s1909_s1 = inlined_call_operand.vmem [shape: bf16[16,4], index: 1, kind: input, shape index: {}]   ;;  %s1910_s2 = inlined_call_operand.vmem [shape: f32[1,4], index: 2, kind: input, shape index: {}]   ;;  %s1911_s3 = inlined_call_operand.vmem [shape: bf16[1024,4], index: 3, kind: output, shape index: {}]  }
   0x1 LB: > { %s1241_s13 = sadd.s32 4294967295, %s1594_s12   ;;  %p1245_p0 = scmp.ge.s32.totalorder %s1594_s12, 1  ;;  %s1594_s12 = sphi %s1616_s12, %s13_s12  }
   0x2   : > { %p138_p1 = scmp.lt.s32.totalorder %s1594_s12, 3 }
   0x4   : > { %p139_p2 = pnand %p1245_p0, %p138_p1 }
   0x5   : > { %s1246_s16 = sshll.u32 (!%p139_p2), %s1241_s13, 6 }
   0x6   : > { %142 = sbr.rel (%p139_p2) target bundleno = 279 (0x117), region = 32  ;;  %p163_p3 = scmp.lt.s32.totalorder (!%p139_p2), %s1246_s16, 127 }
   0xb   : > { %v1555_v0 = vld [vmem:[%s1909_s1] sm:$0xff]   ;;  %s1913_s16 = smov (!%p163_p3, %s1246_s16), 127  ;;  %vm414_vm0 = vcmask 130048   ;;  %vm1120_vm1 = vcmask 27648  }
   0xc   : > { %1479 = vmatprep.subr.bf16.mxu0 %v1555_v0  ;;  %1545 = vmatprep.subr.bf16.mxu1 %v1555_v0  ;;  %s1247_s17 = sshll.u32 %s1913_s16, 2  ;;  %v1704_v33 = vld [vmem:[%s1910_s2] ss:$0 sm:$0xff] }
   0xd   : > { %1480 = vmatpush3.bf16.msra.mxu0 %v1555_v0  ;;  %1546 = vmatpush3.bf16.msra.mxu1 %v1555_v0  ;;  %s1635_s20 = scalar_lea.vmem %s1908_s0, %s1247_s17  ;;  %s1714_s25 = scalar_lea.vmem %s1911_s3, %s1247_s17 }
   0xe   : > { %v1556_v1 = vld [vmem:[%s1635_s20] sm:$0xff]   ;;  %v1558_v3 = vld [vmem:[%s1635_s20 + $0x8] sm:$0xff]   ;;  %v1560_v5 = vld [vmem:[%s1635_s20 + $0x10] sm:$0xff]  }
   0xf   : > { %v1557_v2 = vld [vmem:[%s1635_s20 + $0x80] sm:$0xff]   ;;  %1481 = vmatprep.mubr.msk.bf16.mxu0 %vm414_vm0, %v1556_v1  ;;  %v1559_v4 = vld [vmem:[%s1635_s20 + $0x88] sm:$0xff]   ;;  %v1561_v6 = vld [vmem:[%s1635_s20 + $0x90] sm:$0xff]  }
  0x10   : > { %1513 = vmatprep.mubr.msk.bf16.mxu1 %vm414_vm0, %v1557_v2  ;;  %1482 = vmatmul.mubr.msk.bf16.vlgmr.msra.gmra.mxu0 %vm414_vm0, %v1558_v3  ;;  %v1562_v7 = vld [vmem:[%s1635_s20 + $0x18] sm:$0xff]   ;;  %v1564_v9 = vld [vmem:[%s1635_s20 + $0x20] sm:$0xff]   ;;  %v1566_v11 = vld [vmem:[%s1635_s20 + $0x28] sm:$0xff]  }
  0x11   : > { %1514 = vmatmul.mubr.msk.bf16.vlgmr.msra.gmra.mxu1 %vm414_vm0, %v1559_v4  ;;  %1485 = vmatprep.mubr.msk.bf16.mxu0 %vm414_vm0, %v1560_v5  ;;  %v1563_v8 = vld [vmem:[%s1635_s20 + $0x98] sm:$0xff]   ;;  %v1565_v10 = vld [vmem:[%s1635_s20 + $0xa0] sm:$0xff]   ;;  %v1567_v12 = vld [vmem:[%s1635_s20 + $0xa8] sm:$0xff]  }
  0x12   : > { %1517 = vmatprep.mubr.msk.bf16.mxu1 %vm414_vm0, %v1561_v6  ;;  %v1568_v13 = vld [vmem:[%s1635_s20 + $0x30] sm:$0xff]   ;;  %v1570_v15 = vld [vmem:[%s1635_s20 + $0x38] sm:$0xff]   ;;  %v1572_v17 = vld [vmem:[%s1635_s20 + $0x40] sm:$0xff]  }
  0x13   : > { %v1569_v14 = vld [vmem:[%s1635_s20 + $0xb0] sm:$0xff]   ;;  %v1571_v16 = vld [vmem:[%s1635_s20 + $0xb8] sm:$0xff]   ;;  %v1573_v18 = vld [vmem:[%s1635_s20 + $0xc0] sm:$0xff]  }
  0x14   : > { %v1574_v19 = vld [vmem:[%s1635_s20 + $0x48] sm:$0xff]   ;;  %v1576_v21 = vld [vmem:[%s1635_s20 + $0x50] sm:$0xff]   ;;  %v1578_v23 = vld [vmem:[%s1635_s20 + $0x58] sm:$0xff]  }
  0x15   : > { %v1575_v20 = vld [vmem:[%s1635_s20 + $0xc8] sm:$0xff]   ;;  %v1577_v22 = vld [vmem:[%s1635_s20 + $0xd0] sm:$0xff]   ;;  %v1579_v24 = vld [vmem:[%s1635_s20 + $0xd8] sm:$0xff]  }
  0x16   : > { %v1580_v25 = vld [vmem:[%s1635_s20 + $0x60] sm:$0xff]   ;;  %v1582_v27 = vld [vmem:[%s1635_s20 + $0x68] sm:$0xff]   ;;  %v1584_v29 = vld [vmem:[%s1635_s20 + $0x70] sm:$0xff]  }
  0x17   : > { %v1581_v26 = vld [vmem:[%s1635_s20 + $0xe0] sm:$0xff]   ;;  %v1583_v28 = vld [vmem:[%s1635_s20 + $0xe8] sm:$0xff]   ;;  %v1585_v30 = vld [vmem:[%s1635_s20 + $0xf0] sm:$0xff]  }
  0x18   : > { %1486 = vmatmul.mubr.msk.bf16.gmra.mxu0 %vm414_vm0, %v1562_v7  ;;  %v1586_v31 = vld [vmem:[%s1635_s20 + $0x78] sm:$0xff]  }
  0x19   : > { %1518 = vmatmul.mubr.msk.bf16.gmra.mxu1 %vm414_vm0, %v1563_v8  ;;  %1489 = vmatprep.mubr.msk.bf16.mxu0 %vm414_vm0, %v1564_v9  ;;  %v1587_v32 = vld [vmem:[%s1635_s20 + $0xf8] sm:$0xff]  }
  0x1a   : > { %1521 = vmatprep.mubr.msk.bf16.mxu1 %vm414_vm0, %v1565_v10 }
  0x20   : > { %1490 = vmatmul.mubr.msk.bf16.gmra.mxu0 %vm414_vm0, %v1566_v11 }
  0x21   : > { %1522 = vmatmul.mubr.msk.bf16.gmra.mxu1 %vm414_vm0, %v1567_v12  ;;  %1493 = vmatprep.mubr.msk.bf16.mxu0 %vm414_vm0, %v1568_v13 }
  0x22   : > { %1525 = vmatprep.mubr.msk.bf16.mxu1 %vm414_vm0, %v1569_v14 }
  0x28   : > { %1494 = vmatmul.mubr.msk.bf16.gmra.mxu0 %vm414_vm0, %v1570_v15 }
  0x29   : > { %1526 = vmatmul.mubr.msk.bf16.gmra.mxu1 %vm414_vm0, %v1571_v16  ;;  %1497 = vmatprep.mubr.msk.bf16.mxu0 %vm414_vm0, %v1572_v17 }
  0x2a   : > { %1529 = vmatprep.mubr.msk.bf16.mxu1 %vm414_vm0, %v1573_v18 }
  0x30   : > { %1498 = vmatmul.mubr.msk.bf16.gmra.mxu0 %vm414_vm0, %v1574_v19 }
  0x31   : > { %1530 = vmatmul.mubr.msk.bf16.gmra.mxu1 %vm414_vm0, %v1575_v20  ;;  %1501 = vmatprep.mubr.msk.bf16.mxu0 %vm414_vm0, %v1576_v21 }
  0x32   : > { %1533 = vmatprep.mubr.msk.bf16.mxu1 %vm414_vm0, %v1577_v22 }
  0x38   : > { %1502 = vmatmul.mubr.msk.bf16.gmra.mxu0 %vm414_vm0, %v1578_v23 }
  0x39   : > { %1534 = vmatmul.mubr.msk.bf16.gmra.mxu1 %vm414_vm0, %v1579_v24  ;;  %1505 = vmatprep.mubr.msk.bf16.mxu0 %vm414_vm0, %v1580_v25 }
  0x3a   : > { %1537 = vmatprep.mubr.msk.bf16.mxu1 %vm414_vm0, %v1581_v26 }
  0x40   : > { %1506 = vmatmul.mubr.msk.bf16.gmra.mxu0 %vm414_vm0, %v1582_v27 }
  0x41   : > { %1538 = vmatmul.mubr.msk.bf16.gmra.mxu1 %vm414_vm0, %v1583_v28  ;;  %1509 = vmatprep.mubr.msk.bf16.mxu0 %vm414_vm0, %v1584_v29 }
  0x42   : > { %1541 = vmatprep.mubr.msk.bf16.mxu1 %vm414_vm0, %v1585_v30 }
  0x48   : > { %1510 = vmatmul.mubr.msk.bf16.gmra.mxu0 %vm414_vm0, %v1586_v31 }
  0x49   : > { %1542 = vmatmul.mubr.msk.bf16.gmra.mxu1 %vm414_vm0, %v1587_v32 }
  0xd0   : > { %v1483_v34 = vpop.f32.mrf.mxu0 }
  0xd1   : > { %v554_v35 = vadd.f32 %v1483_v34, %v1704_v33  ;;  %v1515_v36 = vpop.f32.mrf.mxu1 }
  0xd2   : > { %v682_v37 = vadd.f32 %v1515_v36, %v1704_v33  ;;  %v545_v38 = vpop.f32.mrf.mxu0 }
  0xd3   : > { %v802_v39 = vmax.f32 %v554_v35, 0.0  ;;  %v546_v40 = vadd.f32 %v1704_v33, %v545_v38  ;;  %v673_v41 = vpop.f32.mrf.mxu1 }
  0xd4   : > { %v834_v42 = vmax.f32 %v682_v37, 0.0  ;;  %v674_v43 = vadd.f32 %v1704_v33, %v673_v41  ;;  %v1484_v44 = vpop.f32.mrf.mxu0 }
  0xd5   : > { %v1384_v45 = vpack.c.bf16 %v802_v39, %v802_v39  ;;  %v800_v46 = vmax.f32 %v546_v40, 0.0  ;;  %v557_v47 = vadd.f32 %v1484_v44, %v1704_v33  ;;  %v1516_v48 = vpop.f32.mrf.mxu1 }
  0xd6   : > { %v1416_v49 = vpack.c.bf16 %v834_v42, %v834_v42  ;;  %v832_v50 = vmax.f32 %v674_v43, 0.0  ;;  %v685_v51 = vadd.f32 %v1516_v48, %v1704_v33  ;;  %v548_v52 = vpop.f32.mrf.mxu0 }
  0xd7   : > { %1123 = vst.msk [vmem:[%s1714_s25 + $0x8] sm:$0xf] %vm1120_vm1, %v1384_v45  ;;  %v1382_v53 = vpack.c.bf16 %v800_v46, %v800_v46  ;;  %v803_v54 = vmax.f32 %v557_v47, 0.0  ;;  %v549_v55 = vadd.f32 %v1704_v33, %v548_v52  ;;  %v676_v56 = vpop.f32.mrf.mxu1 }
  0xd8   : > { %1155 = vst.msk [vmem:[%s1714_s25 + $0x88] sm:$0xf] %vm1120_vm1, %v1416_v49  ;;  %v1414_v57 = vpack.c.bf16 %v832_v50, %v832_v50  ;;  %v835_v58 = vmax.f32 %v685_v51, 0.0  ;;  %v677_v59 = vadd.f32 %v1704_v33, %v676_v56  ;;  %v1487_v60 = vpop.f32.mrf.mxu0 }
  0xd9   : > { %1121 = vst.msk [vmem:[%s1714_s25] sm:$0xf] %vm1120_vm1, %v1382_v53  ;;  %v1385_v61 = vpack.c.bf16 %v803_v54, %v803_v54  ;;  %v801_v62 = vmax.f32 %v549_v55, 0.0  ;;  %v570_v63 = vadd.f32 %v1487_v60, %v1704_v33  ;;  %v1519_v0 = vpop.f32.mrf.mxu1 }
  0xda   : > { %1153 = vst.msk [vmem:[%s1714_s25 + $0x80] sm:$0xf] %vm1120_vm1, %v1414_v57  ;;  %v1417_v1 = vpack.c.bf16 %v835_v58, %v835_v58  ;;  %v833_v2 = vmax.f32 %v677_v59, 0.0  ;;  %v698_v3 = vadd.f32 %v1519_v0, %v1704_v33  ;;  %v561_v4 = vpop.f32.mrf.mxu0 }
  0xdb   : > { %1124 = vst.msk [vmem:[%s1714_s25 + $0xc] sm:$0xf] %vm1120_vm1, %v1385_v61  ;;  %v1383_v5 = vpack.c.bf16 %v801_v62, %v801_v62  ;;  %v806_v6 = vmax.f32 %v570_v63, 0.0  ;;  %v562_v7 = vadd.f32 %v1704_v33, %v561_v4  ;;  %v689_v8 = vpop.f32.mrf.mxu1 }
  0xdc   : > { %1156 = vst.msk [vmem:[%s1714_s25 + $0x8c] sm:$0xf] %vm1120_vm1, %v1417_v1  ;;  %v1415_v9 = vpack.c.bf16 %v833_v2, %v833_v2  ;;  %v838_v10 = vmax.f32 %v698_v3, 0.0  ;;  %v690_v11 = vadd.f32 %v1704_v33, %v689_v8  ;;  %v1488_v12 = vpop.f32.mrf.mxu0 }
  0xdd   : > { %1122 = vst.msk [vmem:[%s1714_s25 + $0x4] sm:$0xf] %vm1120_vm1, %v1383_v5  ;;  %v1388_v13 = vpack.c.bf16 %v806_v6, %v806_v6  ;;  %v804_v14 = vmax.f32 %v562_v7, 0.0  ;;  %v573_v15 = vadd.f32 %v1488_v12, %v1704_v33  ;;  %v1520_v16 = vpop.f32.mrf.mxu1 }
  0xde   : > { %1154 = vst.msk [vmem:[%s1714_s25 + $0x84] sm:$0xf] %vm1120_vm1, %v1415_v9  ;;  %v1420_v17 = vpack.c.bf16 %v838_v10, %v838_v10  ;;  %v836_v18 = vmax.f32 %v690_v11, 0.0  ;;  %v701_v19 = vadd.f32 %v1520_v16, %v1704_v33  ;;  %v564_v20 = vpop.f32.mrf.mxu0 }
  0xdf   : > { %1127 = vst.msk [vmem:[%s1714_s25 + $0x18] sm:$0xf] %vm1120_vm1, %v1388_v13  ;;  %v1386_v21 = vpack.c.bf16 %v804_v14, %v804_v14  ;;  %v807_v22 = vmax.f32 %v573_v15, 0.0  ;;  %v565_v23 = vadd.f32 %v1704_v33, %v564_v20  ;;  %v692_v24 = vpop.f32.mrf.mxu1 }
  0xe0   : > { %1159 = vst.msk [vmem:[%s1714_s25 + $0x98] sm:$0xf] %vm1120_vm1, %v1420_v17  ;;  %v1418_v25 = vpack.c.bf16 %v836_v18, %v836_v18  ;;  %v839_v26 = vmax.f32 %v701_v19, 0.0  ;;  %v693_v27 = vadd.f32 %v1704_v33, %v692_v24  ;;  %v1491_v28 = vpop.f32.mrf.mxu0 }
  0xe1   : > { %1125 = vst.msk [vmem:[%s1714_s25 + $0x10] sm:$0xf] %vm1120_vm1, %v1386_v21  ;;  %v1389_v29 = vpack.c.bf16 %v807_v22, %v807_v22  ;;  %v805_v30 = vmax.f32 %v565_v23, 0.0  ;;  %v586_v31 = vadd.f32 %v1491_v28, %v1704_v33  ;;  %v1523_v32 = vpop.f32.mrf.mxu1 }
  0xe2   : > { %1157 = vst.msk [vmem:[%s1714_s25 + $0x90] sm:$0xf] %vm1120_vm1, %v1418_v25  ;;  %v1421_v34 = vpack.c.bf16 %v839_v26, %v839_v26  ;;  %v837_v35 = vmax.f32 %v693_v27, 0.0  ;;  %v714_v36 = vadd.f32 %v1523_v32, %v1704_v33  ;;  %v577_v37 = vpop.f32.mrf.mxu0 }
  0xe3   : > { %1128 = vst.msk [vmem:[%s1714_s25 + $0x1c] sm:$0xf] %vm1120_vm1, %v1389_v29  ;;  %v1387_v38 = vpack.c.bf16 %v805_v30, %v805_v30  ;;  %v810_v39 = vmax.f32 %v586_v31, 0.0  ;;  %v578_v40 = vadd.f32 %v1704_v33, %v577_v37  ;;  %v705_v41 = vpop.f32.mrf.mxu1 }
  0xe4   : > { %1160 = vst.msk [vmem:[%s1714_s25 + $0x9c] sm:$0xf] %vm1120_vm1, %v1421_v34  ;;  %v1419_v42 = vpack.c.bf16 %v837_v35, %v837_v35  ;;  %v842_v43 = vmax.f32 %v714_v36, 0.0  ;;  %v706_v44 = vadd.f32 %v1704_v33, %v705_v41  ;;  %v1492_v45 = vpop.f32.mrf.mxu0 }
  0xe5   : > { %1126 = vst.msk [vmem:[%s1714_s25 + $0x14] sm:$0xf] %vm1120_vm1, %v1387_v38  ;;  %v1392_v46 = vpack.c.bf16 %v810_v39, %v810_v39  ;;  %v808_v47 = vmax.f32 %v578_v40, 0.0  ;;  %v589_v48 = vadd.f32 %v1492_v45, %v1704_v33  ;;  %v1524_v49 = vpop.f32.mrf.mxu1 }
  0xe6   : > { %1158 = vst.msk [vmem:[%s1714_s25 + $0x94] sm:$0xf] %vm1120_vm1, %v1419_v42  ;;  %v1424_v50 = vpack.c.bf16 %v842_v43, %v842_v43  ;;  %v840_v51 = vmax.f32 %v706_v44, 0.0  ;;  %v717_v52 = vadd.f32 %v1524_v49, %v1704_v33  ;;  %v580_v53 = vpop.f32.mrf.mxu0 }
  0xe7   : > { %1131 = vst.msk [vmem:[%s1714_s25 + $0x28] sm:$0xf] %vm1120_vm1, %v1392_v46  ;;  %v1390_v54 = vpack.c.bf16 %v808_v47, %v808_v47  ;;  %v811_v55 = vmax.f32 %v589_v48, 0.0  ;;  %v581_v56 = vadd.f32 %v1704_v33, %v580_v53  ;;  %v708_v57 = vpop.f32.mrf.mxu1 }
  0xe8   : > { %1163 = vst.msk [vmem:[%s1714_s25 + $0xa8] sm:$0xf] %vm1120_vm1, %v1424_v50  ;;  %v1422_v58 = vpack.c.bf16 %v840_v51, %v840_v51  ;;  %v843_v59 = vmax.f32 %v717_v52, 0.0  ;;  %v709_v60 = vadd.f32 %v1704_v33, %v708_v57  ;;  %v1495_v61 = vpop.f32.mrf.mxu0 }
  0xe9   : > { %1129 = vst.msk [vmem:[%s1714_s25 + $0x20] sm:$0xf] %vm1120_vm1, %v1390_v54  ;;  %v1393_v62 = vpack.c.bf16 %v811_v55, %v811_v55  ;;  %v809_v63 = vmax.f32 %v581_v56, 0.0  ;;  %v602_v0 = vadd.f32 %v1495_v61, %v1704_v33  ;;  %v1527_v1 = vpop.f32.mrf.mxu1 }
  0xea   : > { %1161 = vst.msk [vmem:[%s1714_s25 + $0xa0] sm:$0xf] %vm1120_vm1, %v1422_v58  ;;  %v1425_v2 = vpack.c.bf16 %v843_v59, %v843_v59  ;;  %v841_v3 = vmax.f32 %v709_v60, 0.0  ;;  %v730_v4 = vadd.f32 %v1527_v1, %v1704_v33  ;;  %v593_v5 = vpop.f32.mrf.mxu0 }
  0xeb   : > { %1132 = vst.msk [vmem:[%s1714_s25 + $0x2c] sm:$0xf] %vm1120_vm1, %v1393_v62  ;;  %v1391_v6 = vpack.c.bf16 %v809_v63, %v809_v63  ;;  %v814_v7 = vmax.f32 %v602_v0, 0.0  ;;  %v594_v8 = vadd.f32 %v1704_v33, %v593_v5  ;;  %v721_v9 = vpop.f32.mrf.mxu1 }
  0xec   : > { %1164 = vst.msk [vmem:[%s1714_s25 + $0xac] sm:$0xf] %vm1120_vm1, %v1425_v2  ;;  %v1423_v10 = vpack.c.bf16 %v841_v3, %v841_v3  ;;  %v846_v11 = vmax.f32 %v730_v4, 0.0  ;;  %v722_v12 = vadd.f32 %v1704_v33, %v721_v9  ;;  %v1496_v13 = vpop.f32.mrf.mxu0 }
  0xed   : > { %1130 = vst.msk [vmem:[%s1714_s25 + $0x24] sm:$0xf] %vm1120_vm1, %v1391_v6  ;;  %v1396_v14 = vpack.c.bf16 %v814_v7, %v814_v7  ;;  %v812_v15 = vmax.f32 %v594_v8, 0.0  ;;  %v605_v16 = vadd.f32 %v1496_v13, %v1704_v33  ;;  %v1528_v17 = vpop.f32.mrf.mxu1 }
  0xee   : > { %1162 = vst.msk [vmem:[%s1714_s25 + $0xa4] sm:$0xf] %vm1120_vm1, %v1423_v10  ;;  %v1428_v18 = vpack.c.bf16 %v846_v11, %v846_v11  ;;  %v844_v19 = vmax.f32 %v722_v12, 0.0  ;;  %v733_v20 = vadd.f32 %v1528_v17, %v1704_v33  ;;  %v596_v21 = vpop.f32.mrf.mxu0 }
  0xef   : > { %1135 = vst.msk [vmem:[%s1714_s25 + $0x38] sm:$0xf] %vm1120_vm1, %v1396_v14  ;;  %v1394_v22 = vpack.c.bf16 %v812_v15, %v812_v15  ;;  %v815_v23 = vmax.f32 %v605_v16, 0.0  ;;  %v597_v24 = vadd.f32 %v1704_v33, %v596_v21  ;;  %v724_v25 = vpop.f32.mrf.mxu1 }
  0xf0   : > { %1167 = vst.msk [vmem:[%s1714_s25 + $0xb8] sm:$0xf] %vm1120_vm1, %v1428_v18  ;;  %v1426_v26 = vpack.c.bf16 %v844_v19, %v844_v19  ;;  %v847_v27 = vmax.f32 %v733_v20, 0.0  ;;  %v725_v28 = vadd.f32 %v1704_v33, %v724_v25  ;;  %v1499_v29 = vpop.f32.mrf.mxu0 }
  0xf1   : > { %1133 = vst.msk [vmem:[%s1714_s25 + $0x30] sm:$0xf] %vm1120_vm1, %v1394_v22  ;;  %v1397_v30 = vpack.c.bf16 %v815_v23, %v815_v23  ;;  %v813_v31 = vmax.f32 %v597_v24, 0.0  ;;  %v618_v32 = vadd.f32 %v1499_v29, %v1704_v33  ;;  %v1531_v34 = vpop.f32.mrf.mxu1 }
  0xf2   : > { %1165 = vst.msk [vmem:[%s1714_s25 + $0xb0] sm:$0xf] %vm1120_vm1, %v1426_v26  ;;  %v1429_v35 = vpack.c.bf16 %v847_v27, %v847_v27  ;;  %v845_v36 = vmax.f32 %v725_v28, 0.0  ;;  %v746_v37 = vadd.f32 %v1531_v34, %v1704_v33  ;;  %v609_v38 = vpop.f32.mrf.mxu0 }
  0xf3   : > { %1136 = vst.msk [vmem:[%s1714_s25 + $0x3c] sm:$0xf] %vm1120_vm1, %v1397_v30  ;;  %v1395_v39 = vpack.c.bf16 %v813_v31, %v813_v31  ;;  %v818_v40 = vmax.f32 %v618_v32, 0.0  ;;  %v610_v41 = vadd.f32 %v1704_v33, %v609_v38  ;;  %v737_v42 = vpop.f32.mrf.mxu1 }
  0xf4   : > { %1168 = vst.msk [vmem:[%s1714_s25 + $0xbc] sm:$0xf] %vm1120_vm1, %v1429_v35  ;;  %v1427_v43 = vpack.c.bf16 %v845_v36, %v845_v36  ;;  %v850_v44 = vmax.f32 %v746_v37, 0.0  ;;  %v738_v45 = vadd.f32 %v1704_v33, %v737_v42  ;;  %v1500_v46 = vpop.f32.mrf.mxu0 }
  0xf5   : > { %1134 = vst.msk [vmem:[%s1714_s25 + $0x34] sm:$0xf] %vm1120_vm1, %v1395_v39  ;;  %v1400_v47 = vpack.c.bf16 %v818_v40, %v818_v40  ;;  %v816_v48 = vmax.f32 %v610_v41, 0.0  ;;  %v621_v49 = vadd.f32 %v1500_v46, %v1704_v33  ;;  %v1532_v50 = vpop.f32.mrf.mxu1 }
  0xf6   : > { %1166 = vst.msk [vmem:[%s1714_s25 + $0xb4] sm:$0xf] %vm1120_vm1, %v1427_v43  ;;  %v1432_v51 = vpack.c.bf16 %v850_v44, %v850_v44  ;;  %v848_v52 = vmax.f32 %v738_v45, 0.0  ;;  %v749_v53 = vadd.f32 %v1532_v50, %v1704_v33  ;;  %v612_v54 = vpop.f32.mrf.mxu0 }
  0xf7   : > { %1139 = vst.msk [vmem:[%s1714_s25 + $0x48] sm:$0xf] %vm1120_vm1, %v1400_v47  ;;  %v1398_v55 = vpack.c.bf16 %v816_v48, %v816_v48  ;;  %v819_v56 = vmax.f32 %v621_v49, 0.0  ;;  %v613_v57 = vadd.f32 %v1704_v33, %v612_v54  ;;  %v740_v58 = vpop.f32.mrf.mxu1 }
  0xf8   : > { %1171 = vst.msk [vmem:[%s1714_s25 + $0xc8] sm:$0xf] %vm1120_vm1, %v1432_v51  ;;  %v1430_v59 = vpack.c.bf16 %v848_v52, %v848_v52  ;;  %v851_v60 = vmax.f32 %v749_v53, 0.0  ;;  %v741_v61 = vadd.f32 %v1704_v33, %v740_v58  ;;  %v1503_v62 = vpop.f32.mrf.mxu0 }
  0xf9   : > { %1137 = vst.msk [vmem:[%s1714_s25 + $0x40] sm:$0xf] %vm1120_vm1, %v1398_v55  ;;  %v1401_v63 = vpack.c.bf16 %v819_v56, %v819_v56  ;;  %v817_v0 = vmax.f32 %v613_v57, 0.0  ;;  %v634_v1 = vadd.f32 %v1503_v62, %v1704_v33  ;;  %v1535_v2 = vpop.f32.mrf.mxu1 }
  0xfa   : > { %1169 = vst.msk [vmem:[%s1714_s25 + $0xc0] sm:$0xf] %vm1120_vm1, %v1430_v59  ;;  %v1433_v3 = vpack.c.bf16 %v851_v60, %v851_v60  ;;  %v849_v4 = vmax.f32 %v741_v61, 0.0  ;;  %v762_v5 = vadd.f32 %v1535_v2, %v1704_v33  ;;  %v625_v6 = vpop.f32.mrf.mxu0 }
  0xfb   : > { %1140 = vst.msk [vmem:[%s1714_s25 + $0x4c] sm:$0xf] %vm1120_vm1, %v1401_v63  ;;  %v1399_v7 = vpack.c.bf16 %v817_v0, %v817_v0  ;;  %v822_v8 = vmax.f32 %v634_v1, 0.0  ;;  %v626_v9 = vadd.f32 %v1704_v33, %v625_v6  ;;  %v753_v10 = vpop.f32.mrf.mxu1 }
  0xfc   : > { %1172 = vst.msk [vmem:[%s1714_s25 + $0xcc] sm:$0xf] %vm1120_vm1, %v1433_v3  ;;  %v1431_v11 = vpack.c.bf16 %v849_v4, %v849_v4  ;;  %v854_v12 = vmax.f32 %v762_v5, 0.0  ;;  %v754_v13 = vadd.f32 %v1704_v33, %v753_v10  ;;  %v1504_v14 = vpop.f32.mrf.mxu0 }
  0xfd   : > { %1138 = vst.msk [vmem:[%s1714_s25 + $0x44] sm:$0xf] %vm1120_vm1, %v1399_v7  ;;  %v1404_v15 = vpack.c.bf16 %v822_v8, %v822_v8  ;;  %v820_v16 = vmax.f32 %v626_v9, 0.0  ;;  %v637_v17 = vadd.f32 %v1504_v14, %v1704_v33  ;;  %v1536_v18 = vpop.f32.mrf.mxu1 }
  0xfe   : > { %1170 = vst.msk [vmem:[%s1714_s25 + $0xc4] sm:$0xf] %vm1120_vm1, %v1431_v11  ;;  %v1436_v19 = vpack.c.bf16 %v854_v12, %v854_v12  ;;  %v852_v20 = vmax.f32 %v754_v13, 0.0  ;;  %v765_v21 = vadd.f32 %v1536_v18, %v1704_v33  ;;  %v628_v22 = vpop.f32.mrf.mxu0 }
  0xff   : > { %1143 = vst.msk [vmem:[%s1714_s25 + $0x58] sm:$0xf] %vm1120_vm1, %v1404_v15  ;;  %v1402_v23 = vpack.c.bf16 %v820_v16, %v820_v16  ;;  %v823_v24 = vmax.f32 %v637_v17, 0.0  ;;  %v629_v25 = vadd.f32 %v1704_v33, %v628_v22  ;;  %v756_v26 = vpop.f32.mrf.mxu1 }
 0x100   : > { %1175 = vst.msk [vmem:[%s1714_s25 + $0xd8] sm:$0xf] %vm1120_vm1, %v1436_v19  ;;  %v1434_v27 = vpack.c.bf16 %v852_v20, %v852_v20  ;;  %v855_v28 = vmax.f32 %v765_v21, 0.0  ;;  %v757_v29 = vadd.f32 %v1704_v33, %v756_v26  ;;  %v1507_v30 = vpop.f32.mrf.mxu0 }
 0x101   : > { %1141 = vst.msk [vmem:[%s1714_s25 + $0x50] sm:$0xf] %vm1120_vm1, %v1402_v23  ;;  %v1405_v31 = vpack.c.bf16 %v823_v24, %v823_v24  ;;  %v821_v32 = vmax.f32 %v629_v25, 0.0  ;;  %v650_v34 = vadd.f32 %v1507_v30, %v1704_v33  ;;  %v1539_v35 = vpop.f32.mrf.mxu1 }
 0x102   : > { %1173 = vst.msk [vmem:[%s1714_s25 + $0xd0] sm:$0xf] %vm1120_vm1, %v1434_v27  ;;  %v1437_v36 = vpack.c.bf16 %v855_v28, %v855_v28  ;;  %v853_v37 = vmax.f32 %v757_v29, 0.0  ;;  %v778_v38 = vadd.f32 %v1539_v35, %v1704_v33  ;;  %v641_v39 = vpop.f32.mrf.mxu0 }
 0x103   : > { %1144 = vst.msk [vmem:[%s1714_s25 + $0x5c] sm:$0xf] %vm1120_vm1, %v1405_v31  ;;  %v1403_v40 = vpack.c.bf16 %v821_v32, %v821_v32  ;;  %v826_v41 = vmax.f32 %v650_v34, 0.0  ;;  %v642_v42 = vadd.f32 %v1704_v33, %v641_v39  ;;  %v769_v43 = vpop.f32.mrf.mxu1 }
 0x104   : > { %1176 = vst.msk [vmem:[%s1714_s25 + $0xdc] sm:$0xf] %vm1120_vm1, %v1437_v36  ;;  %v1435_v44 = vpack.c.bf16 %v853_v37, %v853_v37  ;;  %v858_v45 = vmax.f32 %v778_v38, 0.0  ;;  %v770_v46 = vadd.f32 %v1704_v33, %v769_v43  ;;  %v1508_v47 = vpop.f32.mrf.mxu0 }
 0x105   : > { %1142 = vst.msk [vmem:[%s1714_s25 + $0x54] sm:$0xf] %vm1120_vm1, %v1403_v40  ;;  %v1408_v48 = vpack.c.bf16 %v826_v41, %v826_v41  ;;  %v824_v49 = vmax.f32 %v642_v42, 0.0  ;;  %v653_v50 = vadd.f32 %v1508_v47, %v1704_v33  ;;  %v1540_v51 = vpop.f32.mrf.mxu1 }
 0x106   : > { %1174 = vst.msk [vmem:[%s1714_s25 + $0xd4] sm:$0xf] %vm1120_vm1, %v1435_v44  ;;  %v1440_v52 = vpack.c.bf16 %v858_v45, %v858_v45  ;;  %v856_v53 = vmax.f32 %v770_v46, 0.0  ;;  %v781_v54 = vadd.f32 %v1540_v51, %v1704_v33  ;;  %v644_v55 = vpop.f32.mrf.mxu0 }
 0x107   : > { %1147 = vst.msk [vmem:[%s1714_s25 + $0x68] sm:$0xf] %vm1120_vm1, %v1408_v48  ;;  %v1406_v56 = vpack.c.bf16 %v824_v49, %v824_v49  ;;  %v827_v57 = vmax.f32 %v653_v50, 0.0  ;;  %v645_v58 = vadd.f32 %v1704_v33, %v644_v55  ;;  %v772_v59 = vpop.f32.mrf.mxu1 }
 0x108   : > { %1179 = vst.msk [vmem:[%s1714_s25 + $0xe8] sm:$0xf] %vm1120_vm1, %v1440_v52  ;;  %v1438_v60 = vpack.c.bf16 %v856_v53, %v856_v53  ;;  %v859_v61 = vmax.f32 %v781_v54, 0.0  ;;  %v773_v62 = vadd.f32 %v1704_v33, %v772_v59  ;;  %v1511_v63 = vpop.f32.mrf.mxu0 }
 0x109   : > { %1145 = vst.msk [vmem:[%s1714_s25 + $0x60] sm:$0xf] %vm1120_vm1, %v1406_v56  ;;  %v1409_v0 = vpack.c.bf16 %v827_v57, %v827_v57  ;;  %v825_v1 = vmax.f32 %v645_v58, 0.0  ;;  %v666_v2 = vadd.f32 %v1511_v63, %v1704_v33  ;;  %v1543_v3 = vpop.f32.mrf.mxu1 }
 0x10a   : > { %1177 = vst.msk [vmem:[%s1714_s25 + $0xe0] sm:$0xf] %vm1120_vm1, %v1438_v60  ;;  %v1441_v4 = vpack.c.bf16 %v859_v61, %v859_v61  ;;  %v857_v5 = vmax.f32 %v773_v62, 0.0  ;;  %v794_v6 = vadd.f32 %v1543_v3, %v1704_v33  ;;  %v657_v7 = vpop.f32.mrf.mxu0 }
 0x10b   : > { %1148 = vst.msk [vmem:[%s1714_s25 + $0x6c] sm:$0xf] %vm1120_vm1, %v1409_v0  ;;  %v1407_v8 = vpack.c.bf16 %v825_v1, %v825_v1  ;;  %v830_v9 = vmax.f32 %v666_v2, 0.0  ;;  %v658_v10 = vadd.f32 %v1704_v33, %v657_v7  ;;  %v785_v11 = vpop.f32.mrf.mxu1 }
 0x10c   : > { %1180 = vst.msk [vmem:[%s1714_s25 + $0xec] sm:$0xf] %vm1120_vm1, %v1441_v4  ;;  %v1439_v12 = vpack.c.bf16 %v857_v5, %v857_v5  ;;  %v862_v13 = vmax.f32 %v794_v6, 0.0  ;;  %v786_v14 = vadd.f32 %v1704_v33, %v785_v11  ;;  %v1512_v15 = vpop.f32.mrf.mxu0 }
 0x10d   : > { %1146 = vst.msk [vmem:[%s1714_s25 + $0x64] sm:$0xf] %vm1120_vm1, %v1407_v8  ;;  %v1412_v16 = vpack.c.bf16 %v830_v9, %v830_v9  ;;  %v828_v17 = vmax.f32 %v658_v10, 0.0  ;;  %v669_v18 = vadd.f32 %v1512_v15, %v1704_v33  ;;  %v1544_v19 = vpop.f32.mrf.mxu1 }
 0x10e   : > { %1178 = vst.msk [vmem:[%s1714_s25 + $0xe4] sm:$0xf] %vm1120_vm1, %v1439_v12  ;;  %v1444_v20 = vpack.c.bf16 %v862_v13, %v862_v13  ;;  %v860_v21 = vmax.f32 %v786_v14, 0.0  ;;  %v797_v22 = vadd.f32 %v1544_v19, %v1704_v33  ;;  %v660_v23 = vpop.f32.mrf.mxu0 }
 0x10f   : > { %1151 = vst.msk [vmem:[%s1714_s25 + $0x78] sm:$0xf] %vm1120_vm1, %v1412_v16  ;;  %v1410_v24 = vpack.c.bf16 %v828_v17, %v828_v17  ;;  %v831_v25 = vmax.f32 %v669_v18, 0.0  ;;  %v661_v26 = vadd.f32 %v1704_v33, %v660_v23  ;;  %v788_v27 = vpop.f32.mrf.mxu1 }
 0x110   : > { %1183 = vst.msk [vmem:[%s1714_s25 + $0xf8] sm:$0xf] %vm1120_vm1, %v1444_v20  ;;  %v1442_v28 = vpack.c.bf16 %v860_v21, %v860_v21  ;;  %v863_v29 = vmax.f32 %v797_v22, 0.0  ;;  %v789_v30 = vadd.f32 %v1704_v33, %v788_v27 }
 0x111   : > { %1149 = vst.msk [vmem:[%s1714_s25 + $0x70] sm:$0xf] %vm1120_vm1, %v1410_v24  ;;  %v1413_v31 = vpack.c.bf16 %v831_v25, %v831_v25  ;;  %v829_v32 = vmax.f32 %v661_v26, 0.0 }
 0x112   : > { %1181 = vst.msk [vmem:[%s1714_s25 + $0xf0] sm:$0xf] %vm1120_vm1, %v1442_v28  ;;  %v1445_v34 = vpack.c.bf16 %v863_v29, %v863_v29  ;;  %v861_v35 = vmax.f32 %v789_v30, 0.0 }
 0x113   : > { %1152 = vst.msk [vmem:[%s1714_s25 + $0x7c] sm:$0xf] %vm1120_vm1, %v1413_v31  ;;  %v1411_v36 = vpack.c.bf16 %v829_v32, %v829_v32 }
 0x114   : > { %1184 = vst.msk [vmem:[%s1714_s25 + $0xfc] sm:$0xf] %vm1120_vm1, %v1445_v34  ;;  %v1443_v37 = vpack.c.bf16 %v861_v35, %v861_v35 }
 0x115   : > { %1150 = vst.msk [vmem:[%s1714_s25 + $0x74] sm:$0xf] %vm1120_vm1, %v1411_v36 }
 0x116   : > { %1182 = vst.msk [vmem:[%s1714_s25 + $0xf4] sm:$0xf] %vm1120_vm1, %v1443_v37 }
 0x117 PF: > { %s13_s12 = sadd.s32 1, %s1594_s12  }
 0x118   : > { %p10_p4 = scmp.ge.s32.totalorder %s13_s12, 4  }
 0x11a   :  { %12 = sbr.rel (!%p10_p4) target bundleno = 1 (0x1), region = 62 }

// kernel: _lambda_.15
= control target key start
LH: loop header
LB: loop body
LE: loop exit
PB: predicated region body
PF: predicated region fallthrough
CT: control target
= control target key end

     0   :  { %s2096_s15 = smov 0   ;;  %s2697_s0 = inlined_call_operand.vmem [shape: bf16[1024,4], index: 0, kind: input, shape index: {}]   ;;  %s2698_s1 = inlined_call_operand.vmem [shape: bf16[4,16], index: 1, kind: input, shape index: {}]   ;;  %s2699_s2 = inlined_call_operand.vmem [shape: f32[1,16], index: 2, kind: input, shape index: {}]   ;;  %s2700_s3 = inlined_call_operand.vmem [shape: bf16[1024,16], index: 3, kind: input, shape index: {}]   ;;  %s2701_s4 = inlined_call_operand.vmem [shape: bf16[1024,16], index: 4, kind: output, shape index: {}]  }
   0x1 LB: > { %s1555_s16 = sadd.s32 4294967295, %s2069_s15   ;;  %p1559_p0 = scmp.ge.s32.totalorder %s2069_s15, 1  ;;  %s2069_s15 = sphi %s2096_s15, %s14_s15  }
   0x2   : > { %p174_p1 = scmp.lt.s32.totalorder %s2069_s15, 3 }
   0x4   : > { %p175_p2 = pnand %p1559_p0, %p174_p1 }
   0x5   : > { %s1560_s19 = sshll.u32 (!%p175_p2), %s1555_s16, 6 }
   0x6   : > { %178 = sbr.rel (%p175_p2) target bundleno = 310 (0x136), region = 36  ;;  %p206_p3 = scmp.lt.s32.totalorder (!%p175_p2), %s1560_s19, 127 }
   0xb   : > { %v288_v0 = vld [vmem:[%s2698_s1] sm:$0x3]  ;;  %vm553_vm0 = vcmask 1041408   ;;  %s2754_s19 = smov (!%p206_p3, %s1560_s19), 127  ;;  %vm456_vm1 = vcmask 31744   ;;  %vm1422_vm2 = vcmask 125952  }
   0xc   : > { %2021 = vmatprep.subr.msk.bf16.mxu0 %vm553_vm0, %v288_v0  ;;  %2022 = vmatprep.subr.msk.bf16.mxu1 %vm553_vm0, %v288_v0  ;;  %v555_v1 = vsel %vm553_vm0, %v288_v0, 0  ;;  %s2107_s20 = sshll.u32 %s2754_s19, 2 }
   0xd   : > { %1954 = vmatpush3.bf16.msra.mxu0 %v555_v1  ;;  %2020 = vmatpush3.bf16.msra.mxu1 %v555_v1  ;;  %s2113_s23 = scalar_lea.vmem %s2697_s0, %s2107_s20  ;;  %s2183_s26 = scalar_lea.vmem %s2700_s3, %s2107_s20 }
   0xe   : > { %v2031_v2 = vld [vmem:[%s2113_s23] sm:$0xff]   ;;  %v2033_v4 = vld [vmem:[%s2113_s23 + $0x8] sm:$0xff]   ;;  %v2035_v6 = vld [vmem:[%s2113_s23 + $0x10] sm:$0xff]   ;;  %s2367_s5 = scalar_lea.vmem %s2701_s4, %s2107_s20 }
   0xf   : > { %v2032_v3 = vld [vmem:[%s2113_s23 + $0x80] sm:$0xff]   ;;  %1955 = vmatprep.mubr.msk.bf16.mxu0 %vm456_vm1, %v2031_v2  ;;  %v2034_v5 = vld [vmem:[%s2113_s23 + $0x88] sm:$0xff]   ;;  %v2036_v7 = vld [vmem:[%s2113_s23 + $0x90] sm:$0xff]  }
  0x10   : > { %1987 = vmatprep.mubr.msk.bf16.mxu1 %vm456_vm1, %v2032_v3  ;;  %1956 = vmatmul.mubr.msk.bf16.vlgmr.msra.gmra.mxu0 %vm456_vm1, %v2033_v4  ;;  %v2037_v8 = vld [vmem:[%s2113_s23 + $0x18] sm:$0xff]   ;;  %v2039_v10 = vld [vmem:[%s2113_s23 + $0x20] sm:$0xff]   ;;  %v2041_v12 = vld [vmem:[%s2113_s23 + $0x28] sm:$0xff]  }
  0x11   : > { %1988 = vmatmul.mubr.msk.bf16.vlgmr.msra.gmra.mxu1 %vm456_vm1, %v2034_v5  ;;  %1959 = vmatprep.mubr.msk.bf16.mxu0 %vm456_vm1, %v2035_v6  ;;  %v2038_v9 = vld [vmem:[%s2113_s23 + $0x98] sm:$0xff]   ;;  %v2040_v11 = vld [vmem:[%s2113_s23 + $0xa0] sm:$0xff]   ;;  %v2042_v13 = vld [vmem:[%s2113_s23 + $0xa8] sm:$0xff]  }
  0x12   : > { %1991 = vmatprep.mubr.msk.bf16.mxu1 %vm456_vm1, %v2036_v7  ;;  %v2043_v14 = vld [vmem:[%s2113_s23 + $0x30] sm:$0xff]   ;;  %v2045_v16 = vld [vmem:[%s2113_s23 + $0x38] sm:$0xff]   ;;  %v2047_v18 = vld [vmem:[%s2113_s23 + $0x40] sm:$0xff]  }
  0x13   : > { %v2044_v15 = vld [vmem:[%s2113_s23 + $0xb0] sm:$0xff]   ;;  %v2046_v17 = vld [vmem:[%s2113_s23 + $0xb8] sm:$0xff]   ;;  %v2048_v19 = vld [vmem:[%s2113_s23 + $0xc0] sm:$0xff]  }
  0x14   : > { %v2049_v20 = vld [vmem:[%s2113_s23 + $0x48] sm:$0xff]   ;;  %v2051_v22 = vld [vmem:[%s2113_s23 + $0x50] sm:$0xff]   ;;  %v2053_v24 = vld [vmem:[%s2113_s23 + $0x58] sm:$0xff]  }
  0x15   : > { %v2050_v21 = vld [vmem:[%s2113_s23 + $0xc8] sm:$0xff]   ;;  %v2052_v23 = vld [vmem:[%s2113_s23 + $0xd0] sm:$0xff]   ;;  %v2054_v25 = vld [vmem:[%s2113_s23 + $0xd8] sm:$0xff]  }
  0x16   : > { %v2055_v26 = vld [vmem:[%s2113_s23 + $0x60] sm:$0xff]   ;;  %v2057_v28 = vld [vmem:[%s2113_s23 + $0x68] sm:$0xff]   ;;  %v2059_v30 = vld [vmem:[%s2113_s23 + $0x70] sm:$0xff]  }
  0x17   : > { %v2056_v27 = vld [vmem:[%s2113_s23 + $0xe0] sm:$0xff]   ;;  %v2058_v29 = vld [vmem:[%s2113_s23 + $0xe8] sm:$0xff]   ;;  %v2060_v31 = vld [vmem:[%s2113_s23 + $0xf0] sm:$0xff]  }
  0x18   : > { %1960 = vmatmul.mubr.msk.bf16.gmra.mxu0 %vm456_vm1, %v2037_v8  ;;  %v2061_v32 = vld [vmem:[%s2113_s23 + $0x78] sm:$0xff]   ;;  %v2186_v34 = vld [vmem:[%s2183_s26 + $0x8] sm:$0xff]   ;;  %v2192_v36 = vld [vmem:[%s2183_s26] sm:$0xff]  }
  0x19   : > { %1992 = vmatmul.mubr.msk.bf16.gmra.mxu1 %vm456_vm1, %v2038_v9  ;;  %1963 = vmatprep.mubr.msk.bf16.mxu0 %vm456_vm1, %v2039_v10  ;;  %v2062_v33 = vld [vmem:[%s2113_s23 + $0xf8] sm:$0xff]   ;;  %v2189_v35 = vld [vmem:[%s2183_s26 + $0x88] sm:$0xff]   ;;  %v2195_v37 = vld [vmem:[%s2183_s26 + $0x80] sm:$0xff]   ;;  %v1767_v42 = vunpack.c.l.bf16 %v2186_v34  ;;  %v1763_v44 = vunpack.c.l.bf16 %v2192_v36  ;;  %v1768_v47 = vunpack.c.h.bf16 %v2186_v34  ;;  %v1764_v49 = vunpack.c.h.bf16 %v2192_v36 }
  0x1a   : > { %1995 = vmatprep.mubr.msk.bf16.mxu1 %vm456_vm1, %v2040_v11  ;;  %v2198_v38 = vld [vmem:[%s2183_s26 + $0x18] sm:$0xff]   ;;  %v2204_v40 = vld [vmem:[%s2183_s26 + $0x10] sm:$0xff]   ;;  %v1831_v43 = vunpack.c.l.bf16 %v2189_v35  ;;  %v1827_v45 = vunpack.c.l.bf16 %v2195_v37  ;;  %v2214_v46 = vld [vmem:[%s2183_s26 + $0x28] sm:$0xff]   ;;  %v1832_v48 = vunpack.c.h.bf16 %v2189_v35  ;;  %v1828_v50 = vunpack.c.h.bf16 %v2195_v37 }
  0x1b   : > { %v2201_v39 = vld [vmem:[%s2183_s26 + $0x98] sm:$0xff]   ;;  %v2207_v41 = vld [vmem:[%s2183_s26 + $0x90] sm:$0xff]   ;;  %v2221_v51 = vld [vmem:[%s2183_s26 + $0xa8] sm:$0xff]   ;;  %v1775_v54 = vunpack.c.l.bf16 %v2198_v38  ;;  %v1771_v56 = vunpack.c.l.bf16 %v2204_v40  ;;  %v1776_v59 = vunpack.c.h.bf16 %v2198_v38 }
  0x1c   : > { %v2224_v52 = vld [vmem:[%s2183_s26 + $0x20] sm:$0xff]   ;;  %v1839_v55 = vunpack.c.l.bf16 %v2201_v39  ;;  %v1835_v57 = vunpack.c.l.bf16 %v2207_v41  ;;  %v2234_v58 = vld [vmem:[%s2183_s26 + $0x38] sm:$0xff]   ;;  %v2244_v0 = vld [vmem:[%s2183_s26 + $0x30] sm:$0xff]  }
  0x1d   : > { %v2227_v53 = vld [vmem:[%s2183_s26 + $0xa0] sm:$0xff]   ;;  %v2241_v63 = vld [vmem:[%s2183_s26 + $0xb8] sm:$0xff]   ;;  %v2247_v1 = vld [vmem:[%s2183_s26 + $0xb0] sm:$0xff]  }
  0x1e   : > { %v2254_v6 = vld [vmem:[%s2183_s26 + $0x48] sm:$0xff]  }
  0x1f   : > { %v2261_v11 = vld [vmem:[%s2183_s26 + $0xc8] sm:$0xff]  }
  0x20   : > { %1964 = vmatmul.mubr.msk.bf16.gmra.mxu0 %vm456_vm1, %v2041_v12  ;;  %v2264_v12 = vld [vmem:[%s2183_s26 + $0x40] sm:$0xff]  }
  0x21   : > { %1996 = vmatmul.mubr.msk.bf16.gmra.mxu1 %vm456_vm1, %v2042_v13  ;;  %1967 = vmatprep.mubr.msk.bf16.mxu0 %vm456_vm1, %v2043_v14  ;;  %v2267_v13 = vld [vmem:[%s2183_s26 + $0xc0] sm:$0xff]   ;;  %v2333_v14 = vld [vmem:[%s2183_s26 + $0x70] sm:$0xff]  }
  0x22   : > { %1999 = vmatprep.mubr.msk.bf16.mxu1 %vm456_vm1, %v2044_v15  ;;  %v2326_v15 = vld [vmem:[%s2183_s26 + $0xf8] sm:$0xff]  }
  0x28   : > { %1968 = vmatmul.mubr.msk.bf16.gmra.mxu0 %vm456_vm1, %v2045_v16  ;;  %v2323_v16 = vld [vmem:[%s2183_s26 + $0x78] sm:$0xff]  }
  0x29   : > { %2000 = vmatmul.mubr.msk.bf16.gmra.mxu1 %vm456_vm1, %v2046_v17  ;;  %1971 = vmatprep.mubr.msk.bf16.mxu0 %vm456_vm1, %v2047_v18  ;;  %v2274_v18 = vld [vmem:[%s2183_s26 + $0x58] sm:$0xff]  }
  0x2a   : > { %2003 = vmatprep.mubr.msk.bf16.mxu1 %vm456_vm1, %v2048_v19 }
  0x30   : > { %1972 = vmatmul.mubr.msk.bf16.gmra.mxu0 %vm456_vm1, %v2049_v20  ;;  %v2336_v20 = vld [vmem:[%s2183_s26 + $0xf0] sm:$0xff]  }
  0x31   : > { %2004 = vmatmul.mubr.msk.bf16.gmra.mxu1 %vm456_vm1, %v2050_v21  ;;  %1975 = vmatprep.mubr.msk.bf16.mxu0 %vm456_vm1, %v2051_v22  ;;  %v2301_v21 = vld [vmem:[%s2183_s26 + $0xe8] sm:$0xff]  }
  0x32   : > { %2007 = vmatprep.mubr.msk.bf16.mxu1 %vm456_vm1, %v2052_v23  ;;  %v2281_v23 = vld [vmem:[%s2183_s26 + $0xd8] sm:$0xff]  }
  0x38   : > { %1976 = vmatmul.mubr.msk.bf16.gmra.mxu0 %vm456_vm1, %v2053_v24  ;;  %v2284_v24 = vld [vmem:[%s2183_s26 + $0x50] sm:$0xff]  }
  0x39   : > { %2008 = vmatmul.mubr.msk.bf16.gmra.mxu1 %vm456_vm1, %v2054_v25  ;;  %1979 = vmatprep.mubr.msk.bf16.mxu0 %vm456_vm1, %v2055_v26  ;;  %v2287_v25 = vld [vmem:[%s2183_s26 + $0xd0] sm:$0xff]   ;;  %v2304_v26 = vld [vmem:[%s2183_s26 + $0x60] sm:$0xff]  }
  0x3a   : > { %2011 = vmatprep.mubr.msk.bf16.mxu1 %vm456_vm1, %v2056_v27  ;;  %v2307_v27 = vld [vmem:[%s2183_s26 + $0xe0] sm:$0xff]  }
  0x40   : > { %1980 = vmatmul.mubr.msk.bf16.gmra.mxu0 %vm456_vm1, %v2057_v28 }
  0x41   : > { %2012 = vmatmul.mubr.msk.bf16.gmra.mxu1 %vm456_vm1, %v2058_v29  ;;  %1983 = vmatprep.mubr.msk.bf16.mxu0 %vm456_vm1, %v2059_v30  ;;  %v2294_v30 = vld [vmem:[%s2183_s26 + $0x68] sm:$0xff]   ;;  %v2312_v29 = vld [vmem:[%s2699_s2] ss:$0 sm:$0xff] }
  0x42   : > { %2015 = vmatprep.mubr.msk.bf16.mxu1 %vm456_vm1, %v2060_v31 }
  0x48   : > { %1984 = vmatmul.mubr.msk.bf16.gmra.mxu0 %vm456_vm1, %v2061_v32 }
  0x49   : > { %2016 = vmatmul.mubr.msk.bf16.gmra.mxu1 %vm456_vm1, %v2062_v33 }
  0xd0   : > { %v1957_v31 = vpop.f32.mrf.mxu0 }
  0xd1   : > { %v600_v17 = vadd.f32 %v1957_v31, %v2312_v29  ;;  %v1989_v19 = vpop.f32.mrf.mxu1 }
  0xd2   : > { %v728_v32 = vadd.f32 %v1989_v19, %v2312_v29  ;;  %v591_v33 = vpop.f32.mrf.mxu0 }
  0xd3   : > { %v848_v5 = vmax.f32 %v600_v17, 0.0  ;;  %v592_v4 = vadd.f32 %v2312_v29, %v591_v33  ;;  %v719_v31 = vpop.f32.mrf.mxu1 }
  0xd4   : > { %v880_v9 = vmax.f32 %v728_v32, 0.0  ;;  %v720_v8 = vadd.f32 %v2312_v29, %v719_v31  ;;  %v1958_v2 = vpop.f32.mrf.mxu0 }
  0xd5   : > { %v1040_v7 = vadd.f32 %v1767_v42, %v848_v5  ;;  %v846_v17 = vmax.f32 %v592_v4, 0.0  ;;  %v603_v33 = vadd.f32 %v1958_v2, %v2312_v29  ;;  %v1990_v28 = vpop.f32.mrf.mxu1 }
  0xd6   : > { %v1072_v32 = vadd.f32 %v1831_v43, %v880_v9  ;;  %v878_v10 = vmax.f32 %v720_v8, 0.0  ;;  %v731_v31 = vadd.f32 %v1990_v28, %v2312_v29  ;;  %v594_v62 = vpop.f32.mrf.mxu0 }
  0xd7   : > { %v1104_v22 = vmax.f32 %v1040_v7, 0.0  ;;  %v1038_v61 = vadd.f32 %v1763_v44, %v846_v17  ;;  %v849_v42 = vmax.f32 %v603_v33, 0.0  ;;  %v595_v4 = vadd.f32 %v2312_v29, %v594_v62  ;;  %v722_v2 = vpop.f32.mrf.mxu1 }
  0xd8   : > { %v1136_v43 = vmax.f32 %v1072_v32, 0.0  ;;  %v1070_v5 = vadd.f32 %v1827_v45, %v878_v10  ;;  %v881_v8 = vmax.f32 %v731_v31, 0.0  ;;  %v723_v7 = vadd.f32 %v2312_v29, %v722_v2  ;;  %v1961_v9 = vpop.f32.mrf.mxu0 }
  0xd9   : > { %v1699_v28 = vpack.c.bf16 %v1104_v22, %v1104_v22  ;;  %v1102_v44 = vmax.f32 %v1038_v61, 0.0  ;;  %v1041_v62 = vadd.f32 %v1768_v47, %v849_v42  ;;  %v847_v17 = vmax.f32 %v595_v4, 0.0  ;;  %v1993_v33 = vpop.f32.mrf.mxu1 }
  0xda   : > { %v1731_v19 = vpack.c.bf16 %v1136_v43, %v1136_v43  ;;  %v1134_v3 = vmax.f32 %v1070_v5, 0.0  ;;  %v1073_v32 = vadd.f32 %v1832_v48, %v881_v8  ;;  %v879_v60 = vmax.f32 %v723_v7, 0.0  ;;  %v607_v45 = vpop.f32.mrf.mxu0 }
  0xdb   : > { %1425 = vst.msk [vmem:[%s2367_s5 + $0x8] sm:$0xf] %vm1422_vm2, %v1699_v28  ;;  %v1697_v10 = vpack.c.bf16 %v1102_v44, %v1102_v44  ;;  %v1105_v31 = vmax.f32 %v1041_v62, 0.0  ;;  %v1039_v61 = vadd.f32 %v1764_v49, %v847_v17  ;;  %v616_v34 = vadd.f32 %v1961_v9, %v2312_v29  ;;  %v735_v47 = vpop.f32.mrf.mxu1 }
  0xdc   : > { %1457 = vst.msk [vmem:[%s2367_s5 + $0x88] sm:$0xf] %vm1422_vm2, %v1731_v19  ;;  %v1729_v22 = vpack.c.bf16 %v1134_v3, %v1134_v3  ;;  %v1137_v42 = vmax.f32 %v1073_v32, 0.0  ;;  %v1071_v35 = vadd.f32 %v1828_v50, %v879_v60  ;;  %v744_v48 = vadd.f32 %v1993_v33, %v2312_v29  ;;  %v1962_v4 = vpop.f32.mrf.mxu0 }
  0xdd   : > { %1423 = vst.msk [vmem:[%s2367_s5] sm:$0xf] %vm1422_vm2, %v1697_v10  ;;  %v1700_v2 = vpack.c.bf16 %v1105_v31, %v1105_v31  ;;  %v1103_v36 = vmax.f32 %v1039_v61, 0.0  ;;  %v852_v49 = vmax.f32 %v616_v34, 0.0  ;;  %v608_v43 = vadd.f32 %v2312_v29, %v607_v45  ;;  %v1994_v5 = vpop.f32.mrf.mxu1 }
  0xde   : > { %1455 = vst.msk [vmem:[%s2367_s5 + $0x80] sm:$0xf] %vm1422_vm2, %v1729_v22  ;;  %v1732_v3 = vpack.c.bf16 %v1137_v42, %v1137_v42  ;;  %v1135_v19 = vmax.f32 %v1071_v35, 0.0  ;;  %v884_v37 = vmax.f32 %v744_v48, 0.0  ;;  %v736_v50 = vadd.f32 %v2312_v29, %v735_v47  ;;  %v610_v60 = vpop.f32.mrf.mxu0 }
  0xdf   : > { %1426 = vst.msk [vmem:[%s2367_s5 + $0xc] sm:$0xf] %vm1422_vm2, %v1700_v2  ;;  %v1698_v8 = vpack.c.bf16 %v1103_v36, %v1103_v36  ;;  %v1044_v7 = vadd.f32 %v1775_v54, %v852_v49  ;;  %v850_v9 = vmax.f32 %v608_v43, 0.0  ;;  %v619_v28 = vadd.f32 %v1962_v4, %v2312_v29  ;;  %v738_v44 = vpop.f32.mrf.mxu1 }
  0xe0   : > { %1458 = vst.msk [vmem:[%s2367_s5 + $0x8c] sm:$0xf] %vm1422_vm2, %v1732_v3  ;;  %v1730_v62 = vpack.c.bf16 %v1135_v19, %v1135_v19  ;;  %v1076_v17 = vadd.f32 %v1839_v55, %v884_v37  ;;  %v882_v33 = vmax.f32 %v736_v50, 0.0  ;;  %v747_v32 = vadd.f32 %v1994_v5, %v2312_v29  ;;  %v1965_v45 = vpop.f32.mrf.mxu0 }
  0xe1   : > { %1424 = vst.msk [vmem:[%s2367_s5 + $0x4] sm:$0xf] %vm1422_vm2, %v1698_v8  ;;  %v1108_v10 = vmax.f32 %v1044_v7, 0.0  ;;  %v1042_v54 = vadd.f32 %v1771_v56, %v850_v9  ;;  %v853_v31 = vmax.f32 %v619_v28, 0.0  ;;  %v611_v61 = vadd.f32 %v2312_v29, %v610_v60  ;;  %v1997_v34 = vpop.f32.mrf.mxu1 }
  0xe2   : > { %1456 = vst.msk [vmem:[%s2367_s5 + $0x84] sm:$0xf] %vm1422_vm2, %v1730_v62  ;;  %v1140_v47 = vmax.f32 %v1076_v17, 0.0  ;;  %v1074_v55 = vadd.f32 %v1835_v57, %v882_v33  ;;  %v885_v22 = vmax.f32 %v747_v32, 0.0  ;;  %v739_v42 = vadd.f32 %v2312_v29, %v738_v44  ;;  %v623_v35 = vpop.f32.mrf.mxu0 }
  0xe3   : > { %v1703_v48 = vpack.c.bf16 %v1108_v10, %v1108_v10  ;;  %v1106_v4 = vmax.f32 %v1042_v54, 0.0  ;;  %v1045_v56 = vadd.f32 %v1776_v59, %v853_v31  ;;  %v851_v2 = vmax.f32 %v611_v61, 0.0  ;;  %v751_v36 = vpop.f32.mrf.mxu1 }
  0xe4   : > { %v1735_v49 = vpack.c.bf16 %v1140_v47, %v1140_v47  ;;  %v1138_v43 = vmax.f32 %v1074_v55, 0.0  ;;  %v2702_v5 = vunpack.c.h.bf16 %v2201_v39  ;;  %v883_v19 = vmax.f32 %v739_v42, 0.0  ;;  %v1966_v57 = vpop.f32.mrf.mxu0 }
  0xe5   : > { %1429 = vst.msk [vmem:[%s2367_s5 + $0x18] sm:$0xf] %vm1422_vm2, %v1703_v48  ;;  %v1701_v37 = vpack.c.bf16 %v1106_v4, %v1106_v4  ;;  %v1109_v50 = vmax.f32 %v1045_v56, 0.0  ;;  %v2703_v60 = vunpack.c.h.bf16 %v2204_v40  ;;  %v632_v38 = vadd.f32 %v1965_v45, %v2312_v29  ;;  %v1998_v59 = vpop.f32.mrf.mxu1 }
  0xe6   : > { %v1077_v3 = vadd.f32 %v2702_v5, %v885_v22  ;;  %1461 = vst.msk [vmem:[%s2367_s5 + $0x98] sm:$0xf] %vm1422_vm2, %v1735_v49  ;;  %v1733_v7 = vpack.c.bf16 %v1138_v43, %v1138_v43  ;;  %v2704_v39 = vunpack.c.h.bf16 %v2207_v41  ;;  %v760_v44 = vadd.f32 %v1997_v34, %v2312_v29  ;;  %v626_v62 = vpop.f32.mrf.mxu0 }
  0xe7   : > { %v1043_v8 = vadd.f32 %v2703_v60, %v851_v2  ;;  %1427 = vst.msk [vmem:[%s2367_s5 + $0x10] sm:$0xf] %vm1422_vm2, %v1701_v37  ;;  %v1704_v17 = vpack.c.bf16 %v1109_v50, %v1109_v50  ;;  %v856_v33 = vmax.f32 %v632_v38, 0.0  ;;  %v624_v32 = vadd.f32 %v2312_v29, %v623_v35  ;;  %v754_v45 = vpop.f32.mrf.mxu1 }
  0xe8   : > { %v1141_v9 = vmax.f32 %v1077_v3, 0.0  ;;  %v1075_v28 = vadd.f32 %v2704_v39, %v883_v19  ;;  %1459 = vst.msk [vmem:[%s2367_s5 + $0x90] sm:$0xf] %vm1422_vm2, %v1733_v7  ;;  %v888_v41 = vmax.f32 %v760_v44, 0.0  ;;  %v752_v31 = vadd.f32 %v2312_v29, %v751_v36  ;;  %v1969_v61 = vpop.f32.mrf.mxu0 }
  0xe9   : > { %v1107_v40 = vmax.f32 %v1043_v8, 0.0  ;;  %1430 = vst.msk [vmem:[%s2367_s5 + $0x1c] sm:$0xf] %vm1422_vm2, %v1704_v17  ;;  %v2705_v47 = vunpack.c.l.bf16 %v2214_v46  ;;  %v854_v22 = vmax.f32 %v624_v32, 0.0  ;;  %v635_v42 = vadd.f32 %v1966_v57, %v2312_v29  ;;  %v2001_v35 = vpop.f32.mrf.mxu1 }
  0xea   : > { %v1736_v10 = vpack.c.bf16 %v1141_v9, %v1141_v9  ;;  %v1139_v54 = vmax.f32 %v1075_v28, 0.0  ;;  %v2706_v4 = vunpack.c.l.bf16 %v2221_v51  ;;  %v886_v2 = vmax.f32 %v752_v31, 0.0  ;;  %v639_v49 = vpop.f32.mrf.mxu0 }
  0xeb   : > { %v1702_v34 = vpack.c.bf16 %v1107_v40, %v1107_v40  ;;  %v1048_v55 = vadd.f32 %v2705_v47, %v856_v33  ;;  %v763_v36 = vadd.f32 %v1998_v59, %v2312_v29  ;;  %v2707_v5 = vunpack.c.l.bf16 %v2224_v52  ;;  %v767_v37 = vpop.f32.mrf.mxu1 }
  0xec   : > { %1462 = vst.msk [vmem:[%s2367_s5 + $0x9c] sm:$0xf] %vm1422_vm2, %v1736_v10  ;;  %v1734_v48 = vpack.c.bf16 %v1139_v54, %v1139_v54  ;;  %v1080_v56 = vadd.f32 %v2706_v4, %v888_v41  ;;  %v857_v19 = vmax.f32 %v635_v42, 0.0  ;;  %v627_v57 = vadd.f32 %v2312_v29, %v626_v62  ;;  %v1970_v7 = vpop.f32.mrf.mxu0 }
  0xed   : > { %1428 = vst.msk [vmem:[%s2367_s5 + $0x14] sm:$0xf] %vm1422_vm2, %v1702_v34  ;;  %v1112_v43 = vmax.f32 %v1048_v55, 0.0  ;;  %v1046_v3 = vadd.f32 %v2707_v5, %v854_v22  ;;  %v2708_v60 = vunpack.c.l.bf16 %v2227_v53  ;;  %v889_v38 = vmax.f32 %v763_v36, 0.0  ;;  %v2002_v62 = vpop.f32.mrf.mxu1 }
  0xee   : > { %1460 = vst.msk [vmem:[%s2367_s5 + $0x94] sm:$0xf] %vm1422_vm2, %v1734_v48  ;;  %v1144_v50 = vmax.f32 %v1080_v56, 0.0  ;;  %v755_v59 = vadd.f32 %v2312_v29, %v754_v45  ;;  %v2709_v28 = vunpack.c.h.bf16 %v2214_v46  ;;  %v855_v17 = vmax.f32 %v627_v57, 0.0  ;;  %v642_v41 = vpop.f32.mrf.mxu0 }
  0xef   : > { %v1078_v8 = vadd.f32 %v2708_v60, %v886_v2  ;;  %v1707_v9 = vpack.c.bf16 %v1112_v43, %v1112_v43  ;;  %v1110_v39 = vmax.f32 %v1046_v3, 0.0  ;;  %v2710_v32 = vunpack.c.h.bf16 %v2221_v51  ;;  %v770_v55 = vpop.f32.mrf.mxu1 }
  0xf0   : > { %v1049_v44 = vadd.f32 %v2709_v28, %v857_v19  ;;  %v1739_v40 = vpack.c.bf16 %v1144_v50, %v1144_v50  ;;  %v887_v54 = vmax.f32 %v755_v59, 0.0  ;;  %v2711_v34 = vunpack.c.h.bf16 %v2224_v52  ;;  %v1973_v56 = vpop.f32.mrf.mxu0 }
  0xf1   : > { %v1142_v33 = vmax.f32 %v1078_v8, 0.0  ;;  %v1081_v10 = vadd.f32 %v2710_v32, %v889_v38  ;;  %1433 = vst.msk [vmem:[%s2367_s5 + $0x28] sm:$0xf] %vm1422_vm2, %v1707_v9  ;;  %v1705_v45 = vpack.c.bf16 %v1110_v39, %v1110_v39  ;;  %v648_v46 = vadd.f32 %v1969_v61, %v2312_v29  ;;  %v2005_v43 = vpop.f32.mrf.mxu1 }
  0xf2   : > { %v1113_v31 = vmax.f32 %v1049_v44, 0.0  ;;  %v1047_v47 = vadd.f32 %v2711_v34, %v855_v17  ;;  %1465 = vst.msk [vmem:[%s2367_s5 + $0xa8] sm:$0xf] %vm1422_vm2, %v1739_v40  ;;  %v2712_v51 = vunpack.c.h.bf16 %v2227_v53  ;;  %v776_v4 = vadd.f32 %v2001_v35, %v2312_v29  ;;  %v655_v57 = vpop.f32.mrf.mxu0 }
  0xf3   : > { %v1737_v22 = vpack.c.bf16 %v1142_v33, %v1142_v33  ;;  %v1145_v42 = vmax.f32 %v1081_v10, 0.0  ;;  %1431 = vst.msk [vmem:[%s2367_s5 + $0x20] sm:$0xf] %vm1422_vm2, %v1705_v45  ;;  %v860_v36 = vmax.f32 %v648_v46, 0.0  ;;  %v640_v61 = vadd.f32 %v2312_v29, %v639_v49  ;;  %v783_v38 = vpop.f32.mrf.mxu1 }
  0xf4   : > { %v1079_v48 = vadd.f32 %v2712_v51, %v887_v54  ;;  %v1708_v2 = vpack.c.bf16 %v1113_v31, %v1113_v31  ;;  %v1111_v52 = vmax.f32 %v1047_v47, 0.0  ;;  %v892_v53 = vmax.f32 %v776_v4, 0.0  ;;  %v1974_v44 = vpop.f32.mrf.mxu0 }
  0xf5   : > { %1463 = vst.msk [vmem:[%s2367_s5 + $0xa0] sm:$0xf] %vm1422_vm2, %v1737_v22  ;;  %v1740_v5 = vpack.c.bf16 %v1145_v42, %v1145_v42  ;;  %v768_v19 = vadd.f32 %v2312_v29, %v767_v37  ;;  %v2713_v50 = vunpack.c.l.bf16 %v2234_v58  ;;  %v858_v8 = vmax.f32 %v640_v61, 0.0  ;;  %v2006_v10 = vpop.f32.mrf.mxu1 }
  0xf6   : > { %v1143_v3 = vmax.f32 %v1079_v48, 0.0  ;;  %1434 = vst.msk [vmem:[%s2367_s5 + $0x2c] sm:$0xf] %vm1422_vm2, %v1708_v2  ;;  %v1706_v35 = vpack.c.bf16 %v1111_v52, %v1111_v52  ;;  %v651_v49 = vadd.f32 %v1970_v7, %v2312_v29  ;;  %v2714_v9 = vunpack.c.l.bf16 %v2241_v63  ;;  %v658_v47 = vpop.f32.mrf.mxu0 }
  0xf7   : > { %v1052_v60 = vadd.f32 %v2713_v50, %v860_v36  ;;  %1466 = vst.msk [vmem:[%s2367_s5 + $0xac] sm:$0xf] %vm1422_vm2, %v1740_v5  ;;  %v890_v28 = vmax.f32 %v768_v19, 0.0  ;;  %v779_v37 = vadd.f32 %v2002_v62, %v2312_v29  ;;  %v2715_v40 = vunpack.c.l.bf16 %v2244_v0 }
  0xf8   : > { %v1738_v59 = vpack.c.bf16 %v1143_v3, %v1143_v3  ;;  %v1084_v39 = vadd.f32 %v2714_v9, %v892_v53  ;;  %1432 = vst.msk [vmem:[%s2367_s5 + $0x24] sm:$0xf] %vm1422_vm2, %v1706_v35  ;;  %v861_v32 = vmax.f32 %v651_v49, 0.0  ;;  %v643_v7 = vadd.f32 %v2312_v29, %v642_v41  ;;  %v786_v41 = vpop.f32.mrf.mxu1  ;;  %v2496_v5 = vpop.f32.mrf.mxu0 }
  0xf9   : > { %v1116_v17 = vmax.f32 %v1052_v60, 0.0  ;;  %v1050_v33 = vadd.f32 %v2715_v40, %v858_v8  ;;  %v2716_v45 = vunpack.c.l.bf16 %v2247_v1  ;;  %v893_v34 = vmax.f32 %v779_v37, 0.0 }
  0xfa   : > { %1464 = vst.msk [vmem:[%s2367_s5 + $0xa4] sm:$0xf] %vm1422_vm2, %v1738_v59  ;;  %v1148_v54 = vmax.f32 %v1084_v39, 0.0  ;;  %v771_v62 = vadd.f32 %v2312_v29, %v770_v55  ;;  %v2717_v42 = vunpack.c.h.bf16 %v2234_v58  ;;  %v859_v48 = vmax.f32 %v643_v7, 0.0  ;;  %v2503_v35 = vpop.f32.mrf.mxu1  ;;  %v671_v59 = vpop.f32.mrf.mxu0 }
  0xfb   : > { %v1082_v31 = vadd.f32 %v2716_v45, %v890_v28  ;;  %v1711_v46 = vpack.c.bf16 %v1116_v17, %v1116_v17  ;;  %v1114_v22 = vmax.f32 %v1050_v33, 0.0  ;;  %v2718_v52 = vunpack.c.h.bf16 %v2241_v63 }
  0xfc   : > { %v1053_v51 = vadd.f32 %v2717_v42, %v861_v32  ;;  %v1743_v4 = vpack.c.bf16 %v1148_v54, %v1148_v54  ;;  %v891_v61 = vmax.f32 %v771_v62, 0.0  ;;  %v2719_v53 = vunpack.c.h.bf16 %v2244_v0  ;;  %v799_v28 = vpop.f32.mrf.mxu1  ;;  %v1978_v33 = vpop.f32.mrf.mxu0 }
  0xfd   : > { %v1146_v2 = vmax.f32 %v1082_v31, 0.0  ;;  %v1085_v36 = vadd.f32 %v2718_v52, %v893_v34  ;;  %1437 = vst.msk [vmem:[%s2367_s5 + $0x38] sm:$0xf] %vm1422_vm2, %v1711_v46  ;;  %v1709_v55 = vpack.c.bf16 %v1114_v22, %v1114_v22  ;;  %v664_v19 = vadd.f32 %v1973_v56, %v2312_v29 }
  0xfe   : > { %v1117_v3 = vmax.f32 %v1053_v51, 0.0  ;;  %v1051_v58 = vadd.f32 %v2719_v53, %v859_v48  ;;  %1469 = vst.msk [vmem:[%s2367_s5 + $0xb8] sm:$0xf] %vm1422_vm2, %v1743_v4  ;;  %v2720_v60 = vunpack.c.h.bf16 %v2247_v1  ;;  %v792_v49 = vadd.f32 %v2005_v43, %v2312_v29  ;;  %v2010_v45 = vpop.f32.mrf.mxu1  ;;  %v674_v22 = vpop.f32.mrf.mxu0 }
  0xff   : > { %v1741_v63 = vpack.c.bf16 %v1146_v2, %v1146_v2  ;;  %v1149_v50 = vmax.f32 %v1085_v36, 0.0  ;;  %1435 = vst.msk [vmem:[%s2367_s5 + $0x30] sm:$0xf] %vm1422_vm2, %v1709_v55  ;;  %v864_v39 = vmax.f32 %v664_v19, 0.0  ;;  %v656_v56 = vadd.f32 %v2312_v29, %v655_v57 }
 0x100   : > { %v1083_v8 = vadd.f32 %v2720_v60, %v891_v61  ;;  %v1712_v0 = vpack.c.bf16 %v1117_v3, %v1117_v3  ;;  %v1115_v9 = vmax.f32 %v1051_v58, 0.0  ;;  %v896_v1 = vmax.f32 %v792_v49, 0.0  ;;  %v802_v2 = vpop.f32.mrf.mxu1  ;;  %v2536_v3 = vpop.f32.mrf.mxu0 }
 0x101   : > { %1467 = vst.msk [vmem:[%s2367_s5 + $0xb0] sm:$0xf] %vm1422_vm2, %v1741_v63  ;;  %v1744_v37 = vpack.c.bf16 %v1149_v50, %v1149_v50  ;;  %v784_v40 = vadd.f32 %v2312_v29, %v783_v38  ;;  %v2721_v32 = vunpack.c.l.bf16 %v2254_v6  ;;  %v862_v54 = vmax.f32 %v656_v56, 0.0 }
 0x102   : > { %v1147_v17 = vmax.f32 %v1083_v8, 0.0  ;;  %1438 = vst.msk [vmem:[%s2367_s5 + $0x3c] sm:$0xf] %vm1422_vm2, %v1712_v0  ;;  %v1710_v43 = vpack.c.bf16 %v1115_v9, %v1115_v9  ;;  %v667_v57 = vadd.f32 %v1974_v44, %v2312_v29  ;;  %v2722_v34 = vunpack.c.l.bf16 %v2261_v11  ;;  %v2540_v50 = vpop.f32.mrf.mxu1 }
 0x103   : > { %v1056_v7 = vadd.f32 %v2721_v32, %v864_v39  ;;  %1470 = vst.msk [vmem:[%s2367_s5 + $0xbc] sm:$0xf] %vm1422_vm2, %v1744_v37  ;;  %v894_v46 = vmax.f32 %v784_v40, 0.0  ;;  %v795_v38 = vadd.f32 %v2006_v10, %v2312_v29  ;;  %v2723_v51 = vunpack.c.l.bf16 %v2264_v12  ;;  %v2544_v39 = vpop.f32.mrf.mxu0 }
 0x104   : > { %v1742_v31 = vpack.c.bf16 %v1147_v17, %v1147_v17  ;;  %v1088_v62 = vadd.f32 %v2722_v34, %v896_v1  ;;  %1436 = vst.msk [vmem:[%s2367_s5 + $0x34] sm:$0xf] %vm1422_vm2, %v1710_v43  ;;  %v865_v4 = vmax.f32 %v667_v57, 0.0  ;;  %v659_v44 = vadd.f32 %v2312_v29, %v658_v47  ;;  %v2552_v1 = vpop.f32.mrf.mxu1 }
 0x105   : > { %v1120_v42 = vmax.f32 %v1056_v7, 0.0  ;;  %v1054_v48 = vadd.f32 %v2723_v51, %v862_v54  ;;  %v2724_v36 = vunpack.c.l.bf16 %v2267_v13  ;;  %v897_v55 = vmax.f32 %v795_v38, 0.0 }
 0x106   : > { %1468 = vst.msk [vmem:[%s2367_s5 + $0xb4] sm:$0xf] %vm1422_vm2, %v1742_v31  ;;  %v1152_v52 = vmax.f32 %v1088_v62, 0.0  ;;  %v787_v10 = vadd.f32 %v2312_v29, %v786_v41  ;;  %v2725_v19 = vunpack.c.h.bf16 %v2254_v6  ;;  %v863_v47 = vmax.f32 %v659_v44, 0.0 }
 0x107   : > { %v1086_v61 = vadd.f32 %v2724_v36, %v894_v46  ;;  %v1715_v53 = vpack.c.bf16 %v1120_v42, %v1120_v42  ;;  %v1118_v58 = vmax.f32 %v1054_v48, 0.0  ;;  %v2726_v49 = vunpack.c.h.bf16 %v2261_v11  ;;  %v1982_v46 = vpop.f32.mrf.mxu0 }
 0x108   : > { %v1057_v63 = vadd.f32 %v2725_v19, %v865_v4  ;;  %v1747_v60 = vpack.c.bf16 %v1152_v52, %v1152_v52  ;;  %v895_v9 = vmax.f32 %v787_v10, 0.0  ;;  %v2727_v6 = vunpack.c.h.bf16 %v2264_v12 }
 0x109   : > { %v1150_v8 = vmax.f32 %v1086_v61, 0.0  ;;  %v1089_v0 = vadd.f32 %v2726_v49, %v897_v55  ;;  %1441 = vst.msk [vmem:[%s2367_s5 + $0x48] sm:$0xf] %vm1422_vm2, %v1715_v53  ;;  %v1713_v41 = vpack.c.bf16 %v1118_v58, %v1118_v58  ;;  %v680_v17 = vadd.f32 %v2496_v5, %v2312_v29 }
 0x10a   : > { %v1121_v56 = vmax.f32 %v1057_v63, 0.0  ;;  %v1055_v37 = vadd.f32 %v2727_v6, %v863_v47  ;;  %1473 = vst.msk [vmem:[%s2367_s5 + $0xc8] sm:$0xf] %vm1422_vm2, %v1747_v60  ;;  %v2728_v43 = vunpack.c.h.bf16 %v2267_v13  ;;  %v808_v7 = vadd.f32 %v2503_v35, %v2312_v29 }
 0x10b   : > { %v1745_v11 = vpack.c.bf16 %v1150_v8, %v1150_v8  ;;  %v1153_v40 = vmax.f32 %v1089_v0, 0.0  ;;  %1439 = vst.msk [vmem:[%s2367_s5 + $0x40] sm:$0xf] %vm1422_vm2, %v1713_v41  ;;  %v868_v57 = vmax.f32 %v680_v17, 0.0  ;;  %v672_v5 = vadd.f32 %v2312_v29, %v671_v59  ;;  %v2014_v59 = vpop.f32.mrf.mxu1 }
 0x10c   : > { %v1087_v32 = vadd.f32 %v2728_v43, %v895_v9  ;;  %v1716_v12 = vpack.c.bf16 %v1121_v56, %v1121_v56  ;;  %v1119_v54 = vmax.f32 %v1055_v37, 0.0  ;;  %v900_v62 = vmax.f32 %v808_v7, 0.0 }
 0x10d   : > { %1471 = vst.msk [vmem:[%s2367_s5 + $0xc0] sm:$0xf] %vm1422_vm2, %v1745_v11  ;;  %v1748_v31 = vpack.c.bf16 %v1153_v40, %v1153_v40  ;;  %v800_v13 = vadd.f32 %v2312_v29, %v799_v28  ;;  %v2729_v38 = vunpack.c.l.bf16 %v2274_v18  ;;  %v866_v51 = vmax.f32 %v672_v5, 0.0  ;;  %v818_v56 = vpop.f32.mrf.mxu1 }
 0x10e   : > { %v1151_v34 = vmax.f32 %v1087_v32, 0.0  ;;  %1442 = vst.msk [vmem:[%s2367_s5 + $0x4c] sm:$0xf] %vm1422_vm2, %v1716_v12  ;;  %v1714_v35 = vpack.c.bf16 %v1119_v54, %v1119_v54  ;;  %v683_v48 = vadd.f32 %v1978_v33, %v2312_v29  ;;  %v2730_v44 = vunpack.c.l.bf16 %v2281_v23 }
 0x10f   : > { %v1060_v42 = vadd.f32 %v2729_v38, %v868_v57  ;;  %1474 = vst.msk [vmem:[%s2367_s5 + $0xcc] sm:$0xf] %vm1422_vm2, %v1748_v31  ;;  %v898_v36 = vmax.f32 %v800_v13, 0.0  ;;  %v811_v28 = vadd.f32 %v2010_v45, %v2312_v29  ;;  %v2731_v55 = vunpack.c.l.bf16 %v2284_v24  ;;  %v690_v45 = vpop.f32.mrf.mxu0 }
 0x110   : > { %v1746_v4 = vpack.c.bf16 %v1151_v34, %v1151_v34  ;;  %v1092_v52 = vadd.f32 %v2730_v44, %v900_v62  ;;  %1440 = vst.msk [vmem:[%s2367_s5 + $0x44] sm:$0xf] %vm1422_vm2, %v1714_v35  ;;  %v869_v53 = vmax.f32 %v683_v48, 0.0  ;;  %v675_v58 = vadd.f32 %v2312_v29, %v674_v22  ;;  %v2017_v62 = vpop.f32.mrf.mxu1 }
 0x111   : > { %v1124_v61 = vmax.f32 %v1060_v42, 0.0  ;;  %v1058_v10 = vadd.f32 %v2731_v55, %v866_v51  ;;  %v2732_v19 = vunpack.c.l.bf16 %v2287_v25  ;;  %v901_v47 = vmax.f32 %v811_v28, 0.0  ;;  %v1985_v5 = vpop.f32.mrf.mxu0 }
 0x112   : > { %1472 = vst.msk [vmem:[%s2367_s5 + $0xc4] sm:$0xf] %vm1422_vm2, %v1746_v4  ;;  %v1156_v33 = vmax.f32 %v1092_v52, 0.0  ;;  %v803_v60 = vadd.f32 %v2312_v29, %v802_v2  ;;  %v2733_v0 = vunpack.c.h.bf16 %v2274_v18  ;;  %v867_v41 = vmax.f32 %v675_v58, 0.0 }
 0x113   : > { %v1090_v63 = vadd.f32 %v2732_v19, %v898_v36  ;;  %v1719_v8 = vpack.c.bf16 %v1124_v61, %v1124_v61  ;;  %v1122_v49 = vmax.f32 %v1058_v10, 0.0  ;;  %v2734_v37 = vunpack.c.h.bf16 %v2281_v23 }
 0x114   : > { %v1061_v9 = vadd.f32 %v2733_v0, %v869_v53  ;;  %v1751_v22 = vpack.c.bf16 %v1156_v33, %v1156_v33  ;;  %v899_v11 = vmax.f32 %v803_v60, 0.0  ;;  %v2735_v43 = vunpack.c.h.bf16 %v2284_v24 }
 0x115   : > { %v1154_v6 = vmax.f32 %v1090_v63, 0.0  ;;  %v1093_v17 = vadd.f32 %v2734_v37, %v901_v47  ;;  %1445 = vst.msk [vmem:[%s2367_s5 + $0x58] sm:$0xf] %vm1422_vm2, %v1719_v8  ;;  %v1717_v40 = vpack.c.bf16 %v1122_v49, %v1122_v49  ;;  %v696_v18 = vadd.f32 %v2536_v3, %v2312_v29 }
 0x116   : > { %v1125_v2 = vmax.f32 %v1061_v9, 0.0  ;;  %v1059_v32 = vadd.f32 %v2735_v43, %v867_v41  ;;  %1477 = vst.msk [vmem:[%s2367_s5 + $0xd8] sm:$0xf] %vm1422_vm2, %v1751_v22  ;;  %v2736_v23 = vunpack.c.h.bf16 %v2287_v25  ;;  %v824_v57 = vadd.f32 %v2540_v50, %v2312_v29 }
 0x117   : > { %v1749_v7 = vpack.c.bf16 %v1154_v6, %v1154_v6  ;;  %v1157_v12 = vmax.f32 %v1093_v17, 0.0  ;;  %1443 = vst.msk [vmem:[%s2367_s5 + $0x50] sm:$0xf] %vm1422_vm2, %v1717_v40  ;;  %v872_v34 = vmax.f32 %v696_v18, 0.0  ;;  %v688_v3 = vadd.f32 %v2312_v29, %v2544_v39 }
 0x118   : > { %v1091_v54 = vadd.f32 %v2736_v23, %v899_v11  ;;  %v1720_v24 = vpack.c.bf16 %v1125_v2, %v1125_v2  ;;  %v1123_v31 = vmax.f32 %v1059_v32, 0.0  ;;  %v904_v35 = vmax.f32 %v824_v57, 0.0 }
 0x119   : > { %1475 = vst.msk [vmem:[%s2367_s5 + $0xd0] sm:$0xf] %vm1422_vm2, %v1749_v7  ;;  %v1752_v13 = vpack.c.bf16 %v1157_v12, %v1157_v12  ;;  %v816_v50 = vadd.f32 %v2312_v29, %v2552_v1  ;;  %v2737_v42 = vunpack.c.l.bf16 %v2294_v30  ;;  %v870_v48 = vmax.f32 %v688_v3, 0.0  ;;  %v703_v1 = vpop.f32.mrf.mxu0 }
 0x11a   : > { %v1155_v25 = vmax.f32 %v1091_v54, 0.0  ;;  %1446 = vst.msk [vmem:[%s2367_s5 + $0x5c] sm:$0xf] %vm1422_vm2, %v1720_v24  ;;  %v1718_v38 = vpack.c.bf16 %v1123_v31, %v1123_v31  ;;  %v699_v39 = vadd.f32 %v1982_v46, %v2312_v29  ;;  %v2738_v44 = vunpack.c.l.bf16 %v2301_v21  ;;  %v831_v46 = vpop.f32.mrf.mxu1 }
 0x11b   : > { %v1064_v51 = vadd.f32 %v2737_v42, %v872_v34  ;;  %1478 = vst.msk [vmem:[%s2367_s5 + $0xdc] sm:$0xf] %vm1422_vm2, %v1752_v13  ;;  %v902_v36 = vmax.f32 %v816_v50, 0.0  ;;  %v827_v28 = vadd.f32 %v2014_v59, %v2312_v29  ;;  %v2739_v55 = vunpack.c.l.bf16 %v2304_v26  ;;  %v1986_v17 = vpop.f32.mrf.mxu0 }
 0x11c   : > { %v1750_v4 = vpack.c.bf16 %v1155_v25, %v1155_v25  ;;  %v1096_v52 = vadd.f32 %v2738_v44, %v904_v35  ;;  %1444 = vst.msk [vmem:[%s2367_s5 + $0x54] sm:$0xf] %vm1422_vm2, %v1718_v38  ;;  %v873_v53 = vmax.f32 %v699_v39, 0.0  ;;  %v691_v58 = vadd.f32 %v2312_v29, %v690_v45  ;;  %v2018_v43 = vpop.f32.mrf.mxu1 }
 0x11d   : > { %v1128_v61 = vmax.f32 %v1064_v51, 0.0  ;;  %v1062_v10 = vadd.f32 %v2739_v55, %v870_v48  ;;  %v2740_v19 = vunpack.c.l.bf16 %v2307_v27  ;;  %v905_v47 = vmax.f32 %v827_v28, 0.0 }
 0x11e   : > { %1476 = vst.msk [vmem:[%s2367_s5 + $0xd4] sm:$0xf] %vm1422_vm2, %v1750_v4  ;;  %v1160_v33 = vmax.f32 %v1096_v52, 0.0  ;;  %v819_v59 = vadd.f32 %v2312_v29, %v818_v56  ;;  %v2741_v49 = vunpack.c.h.bf16 %v2294_v30  ;;  %v871_v9 = vmax.f32 %v691_v58, 0.0  ;;  %v834_v50 = vpop.f32.mrf.mxu1 }
 0x11f   : > { %v1094_v63 = vadd.f32 %v2740_v19, %v902_v36  ;;  %v1723_v60 = vpack.c.bf16 %v1128_v61, %v1128_v61  ;;  %v1126_v8 = vmax.f32 %v1062_v10, 0.0  ;;  %v2742_v22 = vunpack.c.h.bf16 %v2301_v21 }
 0x120   : > { %v1065_v0 = vadd.f32 %v2741_v49, %v873_v53  ;;  %v1755_v41 = vpack.c.bf16 %v1160_v33, %v1160_v33  ;;  %v903_v37 = vmax.f32 %v819_v59, 0.0  ;;  %v2743_v40 = vunpack.c.h.bf16 %v2304_v26 }
 0x121   : > { %v1158_v45 = vmax.f32 %v1094_v63, 0.0  ;;  %v1097_v6 = vadd.f32 %v2742_v22, %v905_v47  ;;  %1449 = vst.msk [vmem:[%s2367_s5 + $0x68] sm:$0xf] %vm1422_vm2, %v1723_v60  ;;  %v1721_v11 = vpack.c.bf16 %v1126_v8, %v1126_v8  ;;  %v712_v30 = vadd.f32 %v1985_v5, %v2312_v29 }
 0x122   : > { %v1129_v56 = vmax.f32 %v1065_v0, 0.0  ;;  %v1063_v2 = vadd.f32 %v2743_v40, %v871_v9  ;;  %1481 = vst.msk [vmem:[%s2367_s5 + $0xe8] sm:$0xf] %vm1422_vm2, %v1755_v41  ;;  %v2744_v21 = vunpack.c.h.bf16 %v2307_v27  ;;  %v840_v12 = vadd.f32 %v2017_v62, %v2312_v29  ;;  %v706_v27 = vpop.f32.mrf.mxu0 }
 0x123   : > { %v1753_v32 = vpack.c.bf16 %v1158_v45, %v1158_v45  ;;  %v1161_v18 = vmax.f32 %v1097_v6, 0.0  ;;  %1447 = vst.msk [vmem:[%s2367_s5 + $0x60] sm:$0xf] %vm1422_vm2, %v1721_v11  ;;  %v876_v26 = vmax.f32 %v712_v30, 0.0  ;;  %v704_v57 = vadd.f32 %v2312_v29, %v703_v1 }
 0x124   : > { %v1095_v7 = vadd.f32 %v2744_v21, %v903_v37  ;;  %v1724_v23 = vpack.c.bf16 %v1129_v56, %v1129_v56  ;;  %v1127_v54 = vmax.f32 %v1063_v2, 0.0  ;;  %v908_v31 = vmax.f32 %v840_v12, 0.0 }
 0x125   : > { %1479 = vst.msk [vmem:[%s2367_s5 + $0xe0] sm:$0xf] %vm1422_vm2, %v1753_v32  ;;  %v1756_v5 = vpack.c.bf16 %v1161_v18, %v1161_v18  ;;  %v832_v34 = vadd.f32 %v2312_v29, %v831_v46  ;;  %v2745_v62 = vunpack.c.l.bf16 %v2323_v16  ;;  %v874_v25 = vmax.f32 %v704_v57, 0.0 }
 0x126   : > { %v1159_v24 = vmax.f32 %v1095_v7, 0.0  ;;  %1450 = vst.msk [vmem:[%s2367_s5 + $0x6c] sm:$0xf] %vm1422_vm2, %v1724_v23  ;;  %v1722_v3 = vpack.c.bf16 %v1127_v54, %v1127_v54  ;;  %v715_v35 = vadd.f32 %v1986_v17, %v2312_v29  ;;  %v2746_v42 = vunpack.c.l.bf16 %v2326_v15 }
 0x127   : > { %v1068_v13 = vadd.f32 %v2745_v62, %v876_v26  ;;  %1482 = vst.msk [vmem:[%s2367_s5 + $0xec] sm:$0xf] %vm1422_vm2, %v1756_v5  ;;  %v906_v48 = vmax.f32 %v832_v34, 0.0  ;;  %v843_v39 = vadd.f32 %v2018_v43, %v2312_v29  ;;  %v2747_v44 = vunpack.c.l.bf16 %v2333_v14 }
 0x128   : > { %v1754_v38 = vpack.c.bf16 %v1159_v24, %v1159_v24  ;;  %v1100_v51 = vadd.f32 %v2746_v42, %v908_v31  ;;  %1448 = vst.msk [vmem:[%s2367_s5 + $0x64] sm:$0xf] %vm1422_vm2, %v1722_v3  ;;  %v877_v36 = vmax.f32 %v715_v35, 0.0  ;;  %v707_v28 = vadd.f32 %v2312_v29, %v706_v27 }
 0x129   : > { %v1132_v4 = vmax.f32 %v1068_v13, 0.0  ;;  %v1066_v52 = vadd.f32 %v2747_v44, %v874_v25  ;;  %v2748_v61 = vunpack.c.l.bf16 %v2336_v20  ;;  %v909_v10 = vmax.f32 %v843_v39, 0.0 }
 0x12a   : > { %1480 = vst.msk [vmem:[%s2367_s5 + $0xe4] sm:$0xf] %vm1422_vm2, %v1754_v38  ;;  %v1164_v1 = vmax.f32 %v1100_v51, 0.0  ;;  %v835_v53 = vadd.f32 %v2312_v29, %v834_v50  ;;  %v2749_v33 = vunpack.c.h.bf16 %v2323_v16  ;;  %v875_v63 = vmax.f32 %v707_v28, 0.0 }
 0x12b   : > { %v1098_v55 = vadd.f32 %v2748_v61, %v906_v48  ;;  %v1727_v58 = vpack.c.bf16 %v1132_v4, %v1132_v4  ;;  %v1130_v46 = vmax.f32 %v1066_v52, 0.0  ;;  %v2750_v60 = vunpack.c.h.bf16 %v2326_v15 }
 0x12c   : > { %v1069_v19 = vadd.f32 %v2749_v33, %v877_v36  ;;  %v1759_v47 = vpack.c.bf16 %v1164_v1, %v1164_v1  ;;  %v907_v49 = vmax.f32 %v835_v53, 0.0  ;;  %v2751_v9 = vunpack.c.h.bf16 %v2333_v14 }
 0x12d   : > { %v1162_v59 = vmax.f32 %v1098_v55, 0.0  ;;  %v1101_v8 = vadd.f32 %v2750_v60, %v909_v10  ;;  %1453 = vst.msk [vmem:[%s2367_s5 + $0x78] sm:$0xf] %vm1422_vm2, %v1727_v58  ;;  %v1725_v0 = vpack.c.bf16 %v1130_v46, %v1130_v46  ;;  %v2752_v22 = vunpack.c.h.bf16 %v2336_v20 }
 0x12e   : > { %v1133_v29 = vmax.f32 %v1069_v19, 0.0  ;;  %v1067_v41 = vadd.f32 %v2751_v9, %v875_v63  ;;  %1485 = vst.msk [vmem:[%s2367_s5 + $0xf8] sm:$0xf] %vm1422_vm2, %v1759_v47 }
 0x12f   : > { %v1757_v16 = vpack.c.bf16 %v1162_v59, %v1162_v59  ;;  %v1165_v45 = vmax.f32 %v1101_v8, 0.0  ;;  %v1099_v15 = vadd.f32 %v2752_v22, %v907_v49  ;;  %1451 = vst.msk [vmem:[%s2367_s5 + $0x70] sm:$0xf] %vm1422_vm2, %v1725_v0 }
 0x130   : > { %v1728_v6 = vpack.c.bf16 %v1133_v29, %v1133_v29  ;;  %v1131_v37 = vmax.f32 %v1067_v41, 0.0 }
 0x131   : > { %1483 = vst.msk [vmem:[%s2367_s5 + $0xf0] sm:$0xf] %vm1422_vm2, %v1757_v16  ;;  %v1760_v17 = vpack.c.bf16 %v1165_v45, %v1165_v45  ;;  %v1163_v11 = vmax.f32 %v1099_v15, 0.0 }
 0x132   : > { %1454 = vst.msk [vmem:[%s2367_s5 + $0x7c] sm:$0xf] %vm1422_vm2, %v1728_v6  ;;  %v1726_v14 = vpack.c.bf16 %v1131_v37, %v1131_v37 }
 0x133   : > { %1486 = vst.msk [vmem:[%s2367_s5 + $0xfc] sm:$0xf] %vm1422_vm2, %v1760_v17  ;;  %v1758_v56 = vpack.c.bf16 %v1163_v11, %v1163_v11 }
 0x134   : > { %1452 = vst.msk [vmem:[%s2367_s5 + $0x74] sm:$0xf] %vm1422_vm2, %v1726_v14 }
 0x135   : > { %1484 = vst.msk [vmem:[%s2367_s5 + $0xf4] sm:$0xf] %vm1422_vm2, %v1758_v56 }
 0x136 PF: > { %s14_s15 = sadd.s32 1, %s2069_s15  }
 0x137   : > { %p11_p4 = scmp.ge.s32.totalorder %s14_s15, 4  }
 0x139   :  { %13 = sbr.rel (!%p11_p4) target bundleno = 1 (0x1), region = 69 }

// kernel: _lambda_.19
= control target key start
LH: loop header
LB: loop body
LE: loop exit
PB: predicated region body
PF: predicated region fallthrough
CT: control target
= control target key end

     0   :  { %s2607_s18 = smov 0   ;;  %s3065_s0 = inlined_call_operand.vmem [shape: bf16[1024,16], index: 0, kind: input, shape index: {}]   ;;  %s3066_s1 = inlined_call_operand.vmem [shape: bf16[16,8], index: 1, kind: input, shape index: {}]   ;;  %s3067_s2 = inlined_call_operand.vmem [shape: f32[1,8], index: 2, kind: input, shape index: {}]   ;;  %s3068_s3 = inlined_call_operand.vmem [shape: bf16[16,32], index: 3, kind: input, shape index: {}]   ;;  %s3069_s4 = inlined_call_operand.vmem [shape: bf16[1024,8], index: 4, kind: output, shape index: {0}]   ;;  %s3070_s5 = inlined_call_operand.vmem [shape: bf16[1024,32], index: 5, kind: output, shape index: {1}]  }
   0x1 LB: > { %s1961_s19 = sadd.s32 4294967295, %s2575_s18   ;;  %p1965_p0 = scmp.ge.s32.totalorder %s2575_s18, 1  ;;  %s2575_s18 = sphi %s2607_s18, %s16_s18  }
   0x2   : > { %p191_p1 = scmp.lt.s32.totalorder %s2575_s18, 3 }
   0x4   : > { %p192_p2 = pnand %p1965_p0, %p191_p1 }
   0x5   : > { %s1966_s22 = sshll.u32 (!%p192_p2), %s1961_s19, 6 }
   0x6   : > { %195 = sbr.rel (%p192_p2) target bundleno = 342 (0x156), region = 36  ;;  %p225_p3 = scmp.lt.s32.totalorder (!%p192_p2), %s1966_s22, 127 }
   0xb   : > { %v2535_v0 = vld [vmem:[%s3066_s1] sm:$0xff]   ;;  %s3072_s22 = smov (!%p225_p3, %s1966_s22), 127  ;;  %vm482_vm0 = vcmask 130048   ;;  %vm1806_vm1 = vcmask 257024   ;;  %vm1188_vm2 = vcmask 60416  }
   0xc   : > { %v2536_v1 = vld [vmem:[%s3068_s3] sm:$0xff]   ;;  %2395 = vmatprep.subr.bf16.mxu0 %v2535_v0  ;;  %s2621_s25 = sshll.u32 %s3072_s22, 2 }
   0xd   : > { %2461 = vmatprep.subr.bf16.mxu1 %v2536_v1  ;;  %2396 = vmatpush3.bf16.msra.mxu0 %v2535_v0  ;;  %s2627_s28 = scalar_lea.vmem %s3065_s0, %s2621_s25  ;;  %v2728_v34 = vld [vmem:[%s3067_s2] ss:$0 sm:$0xff]  ;;  %s2734_s8 = scalar_lea.vmem %s3070_s5, %s2621_s25 }
   0xe   : > { %2462 = vmatpush3.bf16.msra.mxu1 %v2536_v1  ;;  %v2537_v2 = vld [vmem:[%s2627_s28] sm:$0xff]   ;;  %v2538_v3 = vld [vmem:[%s2627_s28 + $0x8] sm:$0xff]   ;;  %v2539_v4 = vld [vmem:[%s2627_s28 + $0x10] sm:$0xff]   ;;  %s2744_s11 = scalar_lea.vmem %s3069_s4, %s2621_s25 }
   0xf   : > { %2397 = vmatprep.mubr.msk.bf16.mxu0 %vm482_vm0, %v2537_v2  ;;  %2463 = vmatprep.mubr.msk.bf16.mxu1 %vm482_vm0, %v2537_v2  ;;  %v2540_v5 = vld [vmem:[%s2627_s28 + $0x18] sm:$0xff]   ;;  %v2541_v6 = vld [vmem:[%s2627_s28 + $0x20] sm:$0xff]   ;;  %v2542_v7 = vld [vmem:[%s2627_s28 + $0x28] sm:$0xff]  }
  0x10   : > { %2398 = vmatmul.mubr.msk.bf16.vlgmr.msra.gmra.mxu0 %vm482_vm0, %v2538_v3  ;;  %v2543_v8 = vld [vmem:[%s2627_s28 + $0x30] sm:$0xff]   ;;  %v2544_v9 = vld [vmem:[%s2627_s28 + $0x38] sm:$0xff]   ;;  %v2545_v10 = vld [vmem:[%s2627_s28 + $0x40] sm:$0xff]  }
  0x11   : > { %2464 = vmatmul.mubr.msk.bf16.vlgmr.msra.gmra.mxu1 %vm482_vm0, %v2538_v3  ;;  %2401 = vmatprep.mubr.msk.bf16.mxu0 %vm482_vm0, %v2539_v4  ;;  %v2546_v11 = vld [vmem:[%s2627_s28 + $0x48] sm:$0xff]   ;;  %v2547_v12 = vld [vmem:[%s2627_s28 + $0x50] sm:$0xff]   ;;  %v2548_v13 = vld [vmem:[%s2627_s28 + $0x58] sm:$0xff]  }
  0x12   : > { %2467 = vmatprep.mubr.msk.bf16.mxu1 %vm482_vm0, %v2539_v4  ;;  %v2549_v14 = vld [vmem:[%s2627_s28 + $0x60] sm:$0xff]   ;;  %v2550_v15 = vld [vmem:[%s2627_s28 + $0x68] sm:$0xff]   ;;  %v2551_v16 = vld [vmem:[%s2627_s28 + $0x70] sm:$0xff]  }
  0x13   : > { %v2552_v17 = vld [vmem:[%s2627_s28 + $0x78] sm:$0xff]   ;;  %v2553_v18 = vld [vmem:[%s2627_s28 + $0x80] sm:$0xff]   ;;  %v2554_v19 = vld [vmem:[%s2627_s28 + $0x88] sm:$0xff]  }
  0x14   : > { %v2555_v20 = vld [vmem:[%s2627_s28 + $0x90] sm:$0xff]   ;;  %v2556_v21 = vld [vmem:[%s2627_s28 + $0x98] sm:$0xff]   ;;  %v2557_v22 = vld [vmem:[%s2627_s28 + $0xa0] sm:$0xff]  }
  0x15   : > { %v2558_v23 = vld [vmem:[%s2627_s28 + $0xa8] sm:$0xff]   ;;  %v2559_v24 = vld [vmem:[%s2627_s28 + $0xb0] sm:$0xff]   ;;  %v2560_v25 = vld [vmem:[%s2627_s28 + $0xb8] sm:$0xff]  }
  0x16   : > { %v2561_v26 = vld [vmem:[%s2627_s28 + $0xc0] sm:$0xff]   ;;  %v2562_v27 = vld [vmem:[%s2627_s28 + $0xc8] sm:$0xff]   ;;  %v2563_v28 = vld [vmem:[%s2627_s28 + $0xd0] sm:$0xff]  }
  0x17   : > { %v2564_v29 = vld [vmem:[%s2627_s28 + $0xd8] sm:$0xff]   ;;  %v2565_v30 = vld [vmem:[%s2627_s28 + $0xe0] sm:$0xff]   ;;  %v2566_v31 = vld [vmem:[%s2627_s28 + $0xe8] sm:$0xff]  }
  0x18   : > { %2402 = vmatmul.mubr.msk.bf16.gmra.mxu0 %vm482_vm0, %v2540_v5  ;;  %v2567_v32 = vld [vmem:[%s2627_s28 + $0xf0] sm:$0xff]   ;;  %v2568_v33 = vld [vmem:[%s2627_s28 + $0xf8] sm:$0xff]  }
  0x19   : > { %2468 = vmatmul.mubr.msk.bf16.gmra.mxu1 %vm482_vm0, %v2540_v5  ;;  %2405 = vmatprep.mubr.msk.bf16.mxu0 %vm482_vm0, %v2541_v6 }
  0x1a   : > { %2471 = vmatprep.mubr.msk.bf16.mxu1 %vm482_vm0, %v2541_v6 }
  0x20   : > { %2406 = vmatmul.mubr.msk.bf16.gmra.mxu0 %vm482_vm0, %v2542_v7 }
  0x21   : > { %2472 = vmatmul.mubr.msk.bf16.gmra.mxu1 %vm482_vm0, %v2542_v7  ;;  %2409 = vmatprep.mubr.msk.bf16.mxu0 %vm482_vm0, %v2543_v8 }
  0x22   : > { %2475 = vmatprep.mubr.msk.bf16.mxu1 %vm482_vm0, %v2543_v8 }
  0x28   : > { %2410 = vmatmul.mubr.msk.bf16.gmra.mxu0 %vm482_vm0, %v2544_v9 }
  0x29   : > { %2476 = vmatmul.mubr.msk.bf16.gmra.mxu1 %vm482_vm0, %v2544_v9  ;;  %2413 = vmatprep.mubr.msk.bf16.mxu0 %vm482_vm0, %v2545_v10 }
  0x2a   : > { %2479 = vmatprep.mubr.msk.bf16.mxu1 %vm482_vm0, %v2545_v10 }
  0x30   : > { %2414 = vmatmul.mubr.msk.bf16.gmra.mxu0 %vm482_vm0, %v2546_v11 }
  0x31   : > { %2480 = vmatmul.mubr.msk.bf16.gmra.mxu1 %vm482_vm0, %v2546_v11  ;;  %2417 = vmatprep.mubr.msk.bf16.mxu0 %vm482_vm0, %v2547_v12 }
  0x32   : > { %2483 = vmatprep.mubr.msk.bf16.mxu1 %vm482_vm0, %v2547_v12 }
  0x38   : > { %2418 = vmatmul.mubr.msk.bf16.gmra.mxu0 %vm482_vm0, %v2548_v13 }
  0x39   : > { %2484 = vmatmul.mubr.msk.bf16.gmra.mxu1 %vm482_vm0, %v2548_v13  ;;  %2421 = vmatprep.mubr.msk.bf16.mxu0 %vm482_vm0, %v2549_v14 }
  0x3a   : > { %2487 = vmatprep.mubr.msk.bf16.mxu1 %vm482_vm0, %v2549_v14 }
  0x40   : > { %2422 = vmatmul.mubr.msk.bf16.gmra.mxu0 %vm482_vm0, %v2550_v15 }
  0x41   : > { %2488 = vmatmul.mubr.msk.bf16.gmra.mxu1 %vm482_vm0, %v2550_v15  ;;  %2425 = vmatprep.mubr.msk.bf16.mxu0 %vm482_vm0, %v2551_v16 }
  0x42   : > { %2491 = vmatprep.mubr.msk.bf16.mxu1 %vm482_vm0, %v2551_v16 }
  0x48   : > { %2426 = vmatmul.mubr.msk.bf16.gmra.mxu0 %vm482_vm0, %v2552_v17 }
  0x49   : > { %2492 = vmatmul.mubr.msk.bf16.gmra.mxu1 %vm482_vm0, %v2552_v17  ;;  %2429 = vmatprep.mubr.msk.bf16.mxu0 %vm482_vm0, %v2553_v18 }
  0x4a   : > { %2495 = vmatprep.mubr.msk.bf16.mxu1 %vm482_vm0, %v2553_v18 }
  0x50   : > { %2430 = vmatmul.mubr.msk.bf16.gmra.mxu0 %vm482_vm0, %v2554_v19 }
  0x51   : > { %2496 = vmatmul.mubr.msk.bf16.gmra.mxu1 %vm482_vm0, %v2554_v19  ;;  %2433 = vmatprep.mubr.msk.bf16.mxu0 %vm482_vm0, %v2555_v20 }
  0x52   : > { %2499 = vmatprep.mubr.msk.bf16.mxu1 %vm482_vm0, %v2555_v20 }
  0x58   : > { %2434 = vmatmul.mubr.msk.bf16.gmra.mxu0 %vm482_vm0, %v2556_v21 }
  0x59   : > { %2500 = vmatmul.mubr.msk.bf16.gmra.mxu1 %vm482_vm0, %v2556_v21  ;;  %2437 = vmatprep.mubr.msk.bf16.mxu0 %vm482_vm0, %v2557_v22 }
  0x5a   : > { %2503 = vmatprep.mubr.msk.bf16.mxu1 %vm482_vm0, %v2557_v22 }
  0x60   : > { %2438 = vmatmul.mubr.msk.bf16.gmra.mxu0 %vm482_vm0, %v2558_v23 }
  0x61   : > { %2504 = vmatmul.mubr.msk.bf16.gmra.mxu1 %vm482_vm0, %v2558_v23  ;;  %2441 = vmatprep.mubr.msk.bf16.mxu0 %vm482_vm0, %v2559_v24 }
  0x62   : > { %2507 = vmatprep.mubr.msk.bf16.mxu1 %vm482_vm0, %v2559_v24 }
  0x68   : > { %2442 = vmatmul.mubr.msk.bf16.gmra.mxu0 %vm482_vm0, %v2560_v25 }
  0x69   : > { %2508 = vmatmul.mubr.msk.bf16.gmra.mxu1 %vm482_vm0, %v2560_v25  ;;  %2445 = vmatprep.mubr.msk.bf16.mxu0 %vm482_vm0, %v2561_v26 }
  0x6a   : > { %2511 = vmatprep.mubr.msk.bf16.mxu1 %vm482_vm0, %v2561_v26 }
  0x70   : > { %2446 = vmatmul.mubr.msk.bf16.gmra.mxu0 %vm482_vm0, %v2562_v27 }
  0x71   : > { %2512 = vmatmul.mubr.msk.bf16.gmra.mxu1 %vm482_vm0, %v2562_v27  ;;  %2449 = vmatprep.mubr.msk.bf16.mxu0 %vm482_vm0, %v2563_v28 }
  0x72   : > { %2515 = vmatprep.mubr.msk.bf16.mxu1 %vm482_vm0, %v2563_v28 }
  0x78   : > { %2450 = vmatmul.mubr.msk.bf16.gmra.mxu0 %vm482_vm0, %v2564_v29 }
  0x79   : > { %2516 = vmatmul.mubr.msk.bf16.gmra.mxu1 %vm482_vm0, %v2564_v29  ;;  %2453 = vmatprep.mubr.msk.bf16.mxu0 %vm482_vm0, %v2565_v30 }
  0x7a   : > { %2519 = vmatprep.mubr.msk.bf16.mxu1 %vm482_vm0, %v2565_v30 }
  0x80   : > { %2454 = vmatmul.mubr.msk.bf16.gmra.mxu0 %vm482_vm0, %v2566_v31 }
  0x81   : > { %2520 = vmatmul.mubr.msk.bf16.gmra.mxu1 %vm482_vm0, %v2566_v31  ;;  %2457 = vmatprep.mubr.msk.bf16.mxu0 %vm482_vm0, %v2567_v32 }
  0x82   : > { %2523 = vmatprep.mubr.msk.bf16.mxu1 %vm482_vm0, %v2567_v32 }
  0x88   : > { %2458 = vmatmul.mubr.msk.bf16.gmra.mxu0 %vm482_vm0, %v2568_v33 }
  0x89   : > { %2524 = vmatmul.mubr.msk.bf16.gmra.mxu1 %vm482_vm0, %v2568_v33 }
  0xd0   : > { %v2399_v35 = vpop.f32.mrf.mxu0 }
  0xd1   : > { %v2465_v36 = vpop.f32.mrf.mxu1  ;;  %v622_v37 = vadd.f32 %v2399_v35, %v2728_v34 }
  0xd2   : > { %v2267_v38 = vpack.c.bf16 %v2465_v36, %v2465_v36  ;;  %v613_v39 = vpop.f32.mrf.mxu0 }
  0xd3   : > { %v1295_v40 = vpop.f32.mrf.mxu1  ;;  %v870_v41 = vmax.f32 %v622_v37, 0.0  ;;  %v614_v42 = vadd.f32 %v2728_v34, %v613_v39 }
  0xd4   : > { %1809 = vst.msk [vmem:[%s2734_s8 + $0x8] sm:$0xf] %vm1806_vm1, %v2267_v38  ;;  %v2265_v43 = vpack.c.bf16 %v1295_v40, %v1295_v40  ;;  %v2400_v44 = vpop.f32.mrf.mxu0 }
  0xd5   : > { %v2466_v45 = vpop.f32.mrf.mxu1  ;;  %v2203_v46 = vpack.c.bf16 %v870_v41, %v870_v41  ;;  %v868_v47 = vmax.f32 %v614_v42, 0.0  ;;  %v625_v48 = vadd.f32 %v2400_v44, %v2728_v34 }
  0xd6   : > { %1807 = vst.msk [vmem:[%s2734_s8] sm:$0xf] %vm1806_vm1, %v2265_v43  ;;  %v2268_v49 = vpack.c.bf16 %v2466_v45, %v2466_v45  ;;  %v616_v50 = vpop.f32.mrf.mxu0 }
  0xd7   : > { %v1298_v51 = vpop.f32.mrf.mxu1  ;;  %1191 = vst.msk [vmem:[%s2744_s11 + $0x8] sm:$0xf] %vm1188_vm2, %v2203_v46  ;;  %v2201_v52 = vpack.c.bf16 %v868_v47, %v868_v47  ;;  %v871_v53 = vmax.f32 %v625_v48, 0.0  ;;  %v617_v54 = vadd.f32 %v2728_v34, %v616_v50 }
  0xd8   : > { %1810 = vst.msk [vmem:[%s2734_s8 + $0xc] sm:$0xf] %vm1806_vm1, %v2268_v49  ;;  %v2266_v55 = vpack.c.bf16 %v1298_v51, %v1298_v51  ;;  %v2403_v56 = vpop.f32.mrf.mxu0 }
  0xd9   : > { %v2469_v57 = vpop.f32.mrf.mxu1  ;;  %1189 = vst.msk [vmem:[%s2744_s11] sm:$0xf] %vm1188_vm2, %v2201_v52  ;;  %v2204_v58 = vpack.c.bf16 %v871_v53, %v871_v53  ;;  %v869_v59 = vmax.f32 %v617_v54, 0.0  ;;  %v638_v60 = vadd.f32 %v2403_v56, %v2728_v34 }
  0xda   : > { %1808 = vst.msk [vmem:[%s2734_s8 + $0x4] sm:$0xf] %vm1806_vm1, %v2266_v55  ;;  %v2271_v61 = vpack.c.bf16 %v2469_v57, %v2469_v57  ;;  %v629_v62 = vpop.f32.mrf.mxu0 }
  0xdb   : > { %v1311_v63 = vpop.f32.mrf.mxu1  ;;  %1192 = vst.msk [vmem:[%s2744_s11 + $0xc] sm:$0xf] %vm1188_vm2, %v2204_v58  ;;  %v2202_v0 = vpack.c.bf16 %v869_v59, %v869_v59  ;;  %v874_v1 = vmax.f32 %v638_v60, 0.0  ;;  %v630_v2 = vadd.f32 %v2728_v34, %v629_v62 }
  0xdc   : > { %1813 = vst.msk [vmem:[%s2734_s8 + $0x18] sm:$0xf] %vm1806_vm1, %v2271_v61  ;;  %v2269_v3 = vpack.c.bf16 %v1311_v63, %v1311_v63  ;;  %v2404_v4 = vpop.f32.mrf.mxu0 }
  0xdd   : > { %v2470_v5 = vpop.f32.mrf.mxu1  ;;  %1190 = vst.msk [vmem:[%s2744_s11 + $0x4] sm:$0xf] %vm1188_vm2, %v2202_v0  ;;  %v2207_v6 = vpack.c.bf16 %v874_v1, %v874_v1  ;;  %v872_v7 = vmax.f32 %v630_v2, 0.0  ;;  %v641_v8 = vadd.f32 %v2404_v4, %v2728_v34 }
  0xde   : > { %1811 = vst.msk [vmem:[%s2734_s8 + $0x10] sm:$0xf] %vm1806_vm1, %v2269_v3  ;;  %v2272_v9 = vpack.c.bf16 %v2470_v5, %v2470_v5  ;;  %v632_v10 = vpop.f32.mrf.mxu0 }
  0xdf   : > { %v1314_v11 = vpop.f32.mrf.mxu1  ;;  %1195 = vst.msk [vmem:[%s2744_s11 + $0x18] sm:$0xf] %vm1188_vm2, %v2207_v6  ;;  %v2205_v12 = vpack.c.bf16 %v872_v7, %v872_v7  ;;  %v875_v13 = vmax.f32 %v641_v8, 0.0  ;;  %v633_v14 = vadd.f32 %v2728_v34, %v632_v10 }
  0xe0   : > { %1814 = vst.msk [vmem:[%s2734_s8 + $0x1c] sm:$0xf] %vm1806_vm1, %v2272_v9  ;;  %v2270_v15 = vpack.c.bf16 %v1314_v11, %v1314_v11  ;;  %v2407_v16 = vpop.f32.mrf.mxu0 }
  0xe1   : > { %v2473_v17 = vpop.f32.mrf.mxu1  ;;  %1193 = vst.msk [vmem:[%s2744_s11 + $0x10] sm:$0xf] %vm1188_vm2, %v2205_v12  ;;  %v2208_v18 = vpack.c.bf16 %v875_v13, %v875_v13  ;;  %v873_v19 = vmax.f32 %v633_v14, 0.0  ;;  %v654_v20 = vadd.f32 %v2407_v16, %v2728_v34 }
  0xe2   : > { %1812 = vst.msk [vmem:[%s2734_s8 + $0x14] sm:$0xf] %vm1806_vm1, %v2270_v15  ;;  %v2275_v21 = vpack.c.bf16 %v2473_v17, %v2473_v17  ;;  %v645_v22 = vpop.f32.mrf.mxu0 }
  0xe3   : > { %v1327_v23 = vpop.f32.mrf.mxu1  ;;  %1196 = vst.msk [vmem:[%s2744_s11 + $0x1c] sm:$0xf] %vm1188_vm2, %v2208_v18  ;;  %v2206_v24 = vpack.c.bf16 %v873_v19, %v873_v19  ;;  %v878_v25 = vmax.f32 %v654_v20, 0.0  ;;  %v646_v26 = vadd.f32 %v2728_v34, %v645_v22 }
  0xe4   : > { %1817 = vst.msk [vmem:[%s2734_s8 + $0x28] sm:$0xf] %vm1806_vm1, %v2275_v21  ;;  %v2273_v27 = vpack.c.bf16 %v1327_v23, %v1327_v23  ;;  %v2408_v28 = vpop.f32.mrf.mxu0 }
  0xe5   : > { %v2474_v29 = vpop.f32.mrf.mxu1  ;;  %1194 = vst.msk [vmem:[%s2744_s11 + $0x14] sm:$0xf] %vm1188_vm2, %v2206_v24  ;;  %v2211_v30 = vpack.c.bf16 %v878_v25, %v878_v25  ;;  %v876_v31 = vmax.f32 %v646_v26, 0.0  ;;  %v657_v32 = vadd.f32 %v2408_v28, %v2728_v34 }
  0xe6   : > { %1815 = vst.msk [vmem:[%s2734_s8 + $0x20] sm:$0xf] %vm1806_vm1, %v2273_v27  ;;  %v2276_v33 = vpack.c.bf16 %v2474_v29, %v2474_v29  ;;  %v648_v35 = vpop.f32.mrf.mxu0 }
  0xe7   : > { %v1330_v36 = vpop.f32.mrf.mxu1  ;;  %1199 = vst.msk [vmem:[%s2744_s11 + $0x28] sm:$0xf] %vm1188_vm2, %v2211_v30  ;;  %v2209_v37 = vpack.c.bf16 %v876_v31, %v876_v31  ;;  %v879_v38 = vmax.f32 %v657_v32, 0.0  ;;  %v649_v39 = vadd.f32 %v2728_v34, %v648_v35 }
  0xe8   : > { %1818 = vst.msk [vmem:[%s2734_s8 + $0x2c] sm:$0xf] %vm1806_vm1, %v2276_v33  ;;  %v2274_v40 = vpack.c.bf16 %v1330_v36, %v1330_v36  ;;  %v2411_v41 = vpop.f32.mrf.mxu0 }
  0xe9   : > { %v2477_v42 = vpop.f32.mrf.mxu1  ;;  %1197 = vst.msk [vmem:[%s2744_s11 + $0x20] sm:$0xf] %vm1188_vm2, %v2209_v37  ;;  %v2212_v43 = vpack.c.bf16 %v879_v38, %v879_v38  ;;  %v877_v44 = vmax.f32 %v649_v39, 0.0  ;;  %v670_v45 = vadd.f32 %v2411_v41, %v2728_v34 }
  0xea   : > { %1816 = vst.msk [vmem:[%s2734_s8 + $0x24] sm:$0xf] %vm1806_vm1, %v2274_v40  ;;  %v2279_v46 = vpack.c.bf16 %v2477_v42, %v2477_v42  ;;  %v661_v47 = vpop.f32.mrf.mxu0 }
  0xeb   : > { %v1343_v48 = vpop.f32.mrf.mxu1  ;;  %1200 = vst.msk [vmem:[%s2744_s11 + $0x2c] sm:$0xf] %vm1188_vm2, %v2212_v43  ;;  %v2210_v49 = vpack.c.bf16 %v877_v44, %v877_v44  ;;  %v882_v50 = vmax.f32 %v670_v45, 0.0  ;;  %v662_v51 = vadd.f32 %v2728_v34, %v661_v47 }
  0xec   : > { %1821 = vst.msk [vmem:[%s2734_s8 + $0x38] sm:$0xf] %vm1806_vm1, %v2279_v46  ;;  %v2277_v52 = vpack.c.bf16 %v1343_v48, %v1343_v48  ;;  %v2412_v53 = vpop.f32.mrf.mxu0 }
  0xed   : > { %v2478_v54 = vpop.f32.mrf.mxu1  ;;  %1198 = vst.msk [vmem:[%s2744_s11 + $0x24] sm:$0xf] %vm1188_vm2, %v2210_v49  ;;  %v2215_v55 = vpack.c.bf16 %v882_v50, %v882_v50  ;;  %v880_v56 = vmax.f32 %v662_v51, 0.0  ;;  %v673_v57 = vadd.f32 %v2412_v53, %v2728_v34 }
  0xee   : > { %1819 = vst.msk [vmem:[%s2734_s8 + $0x30] sm:$0xf] %vm1806_vm1, %v2277_v52  ;;  %v2280_v58 = vpack.c.bf16 %v2478_v54, %v2478_v54  ;;  %v664_v59 = vpop.f32.mrf.mxu0 }
  0xef   : > { %v1346_v60 = vpop.f32.mrf.mxu1  ;;  %1203 = vst.msk [vmem:[%s2744_s11 + $0x38] sm:$0xf] %vm1188_vm2, %v2215_v55  ;;  %v2213_v61 = vpack.c.bf16 %v880_v56, %v880_v56  ;;  %v883_v62 = vmax.f32 %v673_v57, 0.0  ;;  %v665_v63 = vadd.f32 %v2728_v34, %v664_v59 }
  0xf0   : > { %1822 = vst.msk [vmem:[%s2734_s8 + $0x3c] sm:$0xf] %vm1806_vm1, %v2280_v58  ;;  %v2278_v0 = vpack.c.bf16 %v1346_v60, %v1346_v60  ;;  %v2415_v1 = vpop.f32.mrf.mxu0 }
  0xf1   : > { %v2481_v2 = vpop.f32.mrf.mxu1  ;;  %1201 = vst.msk [vmem:[%s2744_s11 + $0x30] sm:$0xf] %vm1188_vm2, %v2213_v61  ;;  %v2216_v3 = vpack.c.bf16 %v883_v62, %v883_v62  ;;  %v881_v4 = vmax.f32 %v665_v63, 0.0  ;;  %v686_v5 = vadd.f32 %v2415_v1, %v2728_v34 }
  0xf2   : > { %1820 = vst.msk [vmem:[%s2734_s8 + $0x34] sm:$0xf] %vm1806_vm1, %v2278_v0  ;;  %v2283_v6 = vpack.c.bf16 %v2481_v2, %v2481_v2  ;;  %v677_v7 = vpop.f32.mrf.mxu0 }
  0xf3   : > { %v1359_v8 = vpop.f32.mrf.mxu1  ;;  %1204 = vst.msk [vmem:[%s2744_s11 + $0x3c] sm:$0xf] %vm1188_vm2, %v2216_v3  ;;  %v2214_v9 = vpack.c.bf16 %v881_v4, %v881_v4  ;;  %v886_v10 = vmax.f32 %v686_v5, 0.0  ;;  %v678_v11 = vadd.f32 %v2728_v34, %v677_v7 }
  0xf4   : > { %1825 = vst.msk [vmem:[%s2734_s8 + $0x48] sm:$0xf] %vm1806_vm1, %v2283_v6  ;;  %v2281_v12 = vpack.c.bf16 %v1359_v8, %v1359_v8  ;;  %v2416_v13 = vpop.f32.mrf.mxu0 }
  0xf5   : > { %v2482_v14 = vpop.f32.mrf.mxu1  ;;  %1202 = vst.msk [vmem:[%s2744_s11 + $0x34] sm:$0xf] %vm1188_vm2, %v2214_v9  ;;  %v2219_v15 = vpack.c.bf16 %v886_v10, %v886_v10  ;;  %v884_v16 = vmax.f32 %v678_v11, 0.0  ;;  %v689_v17 = vadd.f32 %v2416_v13, %v2728_v34 }
  0xf6   : > { %1823 = vst.msk [vmem:[%s2734_s8 + $0x40] sm:$0xf] %vm1806_vm1, %v2281_v12  ;;  %v2284_v18 = vpack.c.bf16 %v2482_v14, %v2482_v14  ;;  %v680_v19 = vpop.f32.mrf.mxu0 }
  0xf7   : > { %v1362_v20 = vpop.f32.mrf.mxu1  ;;  %1207 = vst.msk [vmem:[%s2744_s11 + $0x48] sm:$0xf] %vm1188_vm2, %v2219_v15  ;;  %v2217_v21 = vpack.c.bf16 %v884_v16, %v884_v16  ;;  %v887_v22 = vmax.f32 %v689_v17, 0.0  ;;  %v681_v23 = vadd.f32 %v2728_v34, %v680_v19 }
  0xf8   : > { %1826 = vst.msk [vmem:[%s2734_s8 + $0x4c] sm:$0xf] %vm1806_vm1, %v2284_v18  ;;  %v2282_v24 = vpack.c.bf16 %v1362_v20, %v1362_v20  ;;  %v2419_v25 = vpop.f32.mrf.mxu0 }
  0xf9   : > { %v2485_v26 = vpop.f32.mrf.mxu1  ;;  %1205 = vst.msk [vmem:[%s2744_s11 + $0x40] sm:$0xf] %vm1188_vm2, %v2217_v21  ;;  %v2220_v27 = vpack.c.bf16 %v887_v22, %v887_v22  ;;  %v885_v28 = vmax.f32 %v681_v23, 0.0  ;;  %v702_v29 = vadd.f32 %v2419_v25, %v2728_v34 }
  0xfa   : > { %1824 = vst.msk [vmem:[%s2734_s8 + $0x44] sm:$0xf] %vm1806_vm1, %v2282_v24  ;;  %v2287_v30 = vpack.c.bf16 %v2485_v26, %v2485_v26  ;;  %v693_v31 = vpop.f32.mrf.mxu0 }
  0xfb   : > { %v1375_v32 = vpop.f32.mrf.mxu1  ;;  %1208 = vst.msk [vmem:[%s2744_s11 + $0x4c] sm:$0xf] %vm1188_vm2, %v2220_v27  ;;  %v2218_v33 = vpack.c.bf16 %v885_v28, %v885_v28  ;;  %v890_v35 = vmax.f32 %v702_v29, 0.0  ;;  %v694_v36 = vadd.f32 %v2728_v34, %v693_v31 }
  0xfc   : > { %1829 = vst.msk [vmem:[%s2734_s8 + $0x58] sm:$0xf] %vm1806_vm1, %v2287_v30  ;;  %v2285_v37 = vpack.c.bf16 %v1375_v32, %v1375_v32  ;;  %v2420_v38 = vpop.f32.mrf.mxu0 }
  0xfd   : > { %v2486_v39 = vpop.f32.mrf.mxu1  ;;  %1206 = vst.msk [vmem:[%s2744_s11 + $0x44] sm:$0xf] %vm1188_vm2, %v2218_v33  ;;  %v2223_v40 = vpack.c.bf16 %v890_v35, %v890_v35  ;;  %v888_v41 = vmax.f32 %v694_v36, 0.0  ;;  %v705_v42 = vadd.f32 %v2420_v38, %v2728_v34 }
  0xfe   : > { %1827 = vst.msk [vmem:[%s2734_s8 + $0x50] sm:$0xf] %vm1806_vm1, %v2285_v37  ;;  %v2288_v43 = vpack.c.bf16 %v2486_v39, %v2486_v39  ;;  %v696_v44 = vpop.f32.mrf.mxu0 }
  0xff   : > { %v1378_v45 = vpop.f32.mrf.mxu1  ;;  %1211 = vst.msk [vmem:[%s2744_s11 + $0x58] sm:$0xf] %vm1188_vm2, %v2223_v40  ;;  %v2221_v46 = vpack.c.bf16 %v888_v41, %v888_v41  ;;  %v891_v47 = vmax.f32 %v705_v42, 0.0  ;;  %v697_v48 = vadd.f32 %v2728_v34, %v696_v44 }
 0x100   : > { %1830 = vst.msk [vmem:[%s2734_s8 + $0x5c] sm:$0xf] %vm1806_vm1, %v2288_v43  ;;  %v2286_v49 = vpack.c.bf16 %v1378_v45, %v1378_v45  ;;  %v2423_v50 = vpop.f32.mrf.mxu0 }
 0x101   : > { %v2489_v51 = vpop.f32.mrf.mxu1  ;;  %1209 = vst.msk [vmem:[%s2744_s11 + $0x50] sm:$0xf] %vm1188_vm2, %v2221_v46  ;;  %v2224_v52 = vpack.c.bf16 %v891_v47, %v891_v47  ;;  %v889_v53 = vmax.f32 %v697_v48, 0.0  ;;  %v718_v54 = vadd.f32 %v2423_v50, %v2728_v34 }
 0x102   : > { %1828 = vst.msk [vmem:[%s2734_s8 + $0x54] sm:$0xf] %vm1806_vm1, %v2286_v49  ;;  %v2291_v55 = vpack.c.bf16 %v2489_v51, %v2489_v51  ;;  %v709_v56 = vpop.f32.mrf.mxu0 }
 0x103   : > { %v1391_v57 = vpop.f32.mrf.mxu1  ;;  %1212 = vst.msk [vmem:[%s2744_s11 + $0x5c] sm:$0xf] %vm1188_vm2, %v2224_v52  ;;  %v2222_v58 = vpack.c.bf16 %v889_v53, %v889_v53  ;;  %v894_v59 = vmax.f32 %v718_v54, 0.0  ;;  %v710_v60 = vadd.f32 %v2728_v34, %v709_v56 }
 0x104   : > { %1833 = vst.msk [vmem:[%s2734_s8 + $0x68] sm:$0xf] %vm1806_vm1, %v2291_v55  ;;  %v2289_v61 = vpack.c.bf16 %v1391_v57, %v1391_v57  ;;  %v2424_v62 = vpop.f32.mrf.mxu0 }
 0x105   : > { %v2490_v63 = vpop.f32.mrf.mxu1  ;;  %1210 = vst.msk [vmem:[%s2744_s11 + $0x54] sm:$0xf] %vm1188_vm2, %v2222_v58  ;;  %v2227_v0 = vpack.c.bf16 %v894_v59, %v894_v59  ;;  %v892_v1 = vmax.f32 %v710_v60, 0.0  ;;  %v721_v2 = vadd.f32 %v2424_v62, %v2728_v34 }
 0x106   : > { %1831 = vst.msk [vmem:[%s2734_s8 + $0x60] sm:$0xf] %vm1806_vm1, %v2289_v61  ;;  %v2292_v3 = vpack.c.bf16 %v2490_v63, %v2490_v63  ;;  %v712_v4 = vpop.f32.mrf.mxu0 }
 0x107   : > { %v1394_v5 = vpop.f32.mrf.mxu1  ;;  %1215 = vst.msk [vmem:[%s2744_s11 + $0x68] sm:$0xf] %vm1188_vm2, %v2227_v0  ;;  %v2225_v6 = vpack.c.bf16 %v892_v1, %v892_v1  ;;  %v895_v7 = vmax.f32 %v721_v2, 0.0  ;;  %v713_v8 = vadd.f32 %v2728_v34, %v712_v4 }
 0x108   : > { %1834 = vst.msk [vmem:[%s2734_s8 + $0x6c] sm:$0xf] %vm1806_vm1, %v2292_v3  ;;  %v2290_v9 = vpack.c.bf16 %v1394_v5, %v1394_v5  ;;  %v2427_v10 = vpop.f32.mrf.mxu0 }
 0x109   : > { %v2493_v11 = vpop.f32.mrf.mxu1  ;;  %1213 = vst.msk [vmem:[%s2744_s11 + $0x60] sm:$0xf] %vm1188_vm2, %v2225_v6  ;;  %v2228_v12 = vpack.c.bf16 %v895_v7, %v895_v7  ;;  %v893_v13 = vmax.f32 %v713_v8, 0.0  ;;  %v734_v14 = vadd.f32 %v2427_v10, %v2728_v34 }
 0x10a   : > { %1832 = vst.msk [vmem:[%s2734_s8 + $0x64] sm:$0xf] %vm1806_vm1, %v2290_v9  ;;  %v2295_v15 = vpack.c.bf16 %v2493_v11, %v2493_v11  ;;  %v725_v16 = vpop.f32.mrf.mxu0 }
 0x10b   : > { %v1407_v17 = vpop.f32.mrf.mxu1  ;;  %1216 = vst.msk [vmem:[%s2744_s11 + $0x6c] sm:$0xf] %vm1188_vm2, %v2228_v12  ;;  %v2226_v18 = vpack.c.bf16 %v893_v13, %v893_v13  ;;  %v898_v19 = vmax.f32 %v734_v14, 0.0  ;;  %v726_v20 = vadd.f32 %v2728_v34, %v725_v16 }
 0x10c   : > { %1837 = vst.msk [vmem:[%s2734_s8 + $0x78] sm:$0xf] %vm1806_vm1, %v2295_v15  ;;  %v2293_v21 = vpack.c.bf16 %v1407_v17, %v1407_v17  ;;  %v2428_v22 = vpop.f32.mrf.mxu0 }
 0x10d   : > { %v2494_v23 = vpop.f32.mrf.mxu1  ;;  %1214 = vst.msk [vmem:[%s2744_s11 + $0x64] sm:$0xf] %vm1188_vm2, %v2226_v18  ;;  %v2231_v24 = vpack.c.bf16 %v898_v19, %v898_v19  ;;  %v896_v25 = vmax.f32 %v726_v20, 0.0  ;;  %v737_v26 = vadd.f32 %v2428_v22, %v2728_v34 }
 0x10e   : > { %1835 = vst.msk [vmem:[%s2734_s8 + $0x70] sm:$0xf] %vm1806_vm1, %v2293_v21  ;;  %v2296_v27 = vpack.c.bf16 %v2494_v23, %v2494_v23  ;;  %v728_v28 = vpop.f32.mrf.mxu0 }
 0x10f   : > { %v1410_v29 = vpop.f32.mrf.mxu1  ;;  %1219 = vst.msk [vmem:[%s2744_s11 + $0x78] sm:$0xf] %vm1188_vm2, %v2231_v24  ;;  %v2229_v30 = vpack.c.bf16 %v896_v25, %v896_v25  ;;  %v899_v31 = vmax.f32 %v737_v26, 0.0  ;;  %v729_v32 = vadd.f32 %v2728_v34, %v728_v28 }
 0x110   : > { %1838 = vst.msk [vmem:[%s2734_s8 + $0x7c] sm:$0xf] %vm1806_vm1, %v2296_v27  ;;  %v2294_v33 = vpack.c.bf16 %v1410_v29, %v1410_v29  ;;  %v2431_v35 = vpop.f32.mrf.mxu0 }
 0x111   : > { %v2497_v36 = vpop.f32.mrf.mxu1  ;;  %1217 = vst.msk [vmem:[%s2744_s11 + $0x70] sm:$0xf] %vm1188_vm2, %v2229_v30  ;;  %v2232_v37 = vpack.c.bf16 %v899_v31, %v899_v31  ;;  %v897_v38 = vmax.f32 %v729_v32, 0.0  ;;  %v750_v39 = vadd.f32 %v2431_v35, %v2728_v34 }
 0x112   : > { %1836 = vst.msk [vmem:[%s2734_s8 + $0x74] sm:$0xf] %vm1806_vm1, %v2294_v33  ;;  %v2299_v40 = vpack.c.bf16 %v2497_v36, %v2497_v36  ;;  %v741_v41 = vpop.f32.mrf.mxu0 }
 0x113   : > { %v1423_v42 = vpop.f32.mrf.mxu1  ;;  %1220 = vst.msk [vmem:[%s2744_s11 + $0x7c] sm:$0xf] %vm1188_vm2, %v2232_v37  ;;  %v2230_v43 = vpack.c.bf16 %v897_v38, %v897_v38  ;;  %v902_v44 = vmax.f32 %v750_v39, 0.0  ;;  %v742_v45 = vadd.f32 %v2728_v34, %v741_v41 }
 0x114   : > { %1841 = vst.msk [vmem:[%s2734_s8 + $0x88] sm:$0xf] %vm1806_vm1, %v2299_v40  ;;  %v2297_v46 = vpack.c.bf16 %v1423_v42, %v1423_v42  ;;  %v2432_v47 = vpop.f32.mrf.mxu0 }
 0x115   : > { %v2498_v48 = vpop.f32.mrf.mxu1  ;;  %1218 = vst.msk [vmem:[%s2744_s11 + $0x74] sm:$0xf] %vm1188_vm2, %v2230_v43  ;;  %v2235_v49 = vpack.c.bf16 %v902_v44, %v902_v44  ;;  %v900_v50 = vmax.f32 %v742_v45, 0.0  ;;  %v753_v51 = vadd.f32 %v2432_v47, %v2728_v34 }
 0x116   : > { %1839 = vst.msk [vmem:[%s2734_s8 + $0x80] sm:$0xf] %vm1806_vm1, %v2297_v46  ;;  %v2300_v52 = vpack.c.bf16 %v2498_v48, %v2498_v48  ;;  %v744_v53 = vpop.f32.mrf.mxu0 }
 0x117   : > { %v1426_v54 = vpop.f32.mrf.mxu1  ;;  %1223 = vst.msk [vmem:[%s2744_s11 + $0x88] sm:$0xf] %vm1188_vm2, %v2235_v49  ;;  %v2233_v55 = vpack.c.bf16 %v900_v50, %v900_v50  ;;  %v903_v56 = vmax.f32 %v753_v51, 0.0  ;;  %v745_v57 = vadd.f32 %v2728_v34, %v744_v53 }
 0x118   : > { %1842 = vst.msk [vmem:[%s2734_s8 + $0x8c] sm:$0xf] %vm1806_vm1, %v2300_v52  ;;  %v2298_v58 = vpack.c.bf16 %v1426_v54, %v1426_v54  ;;  %v2435_v59 = vpop.f32.mrf.mxu0 }
 0x119   : > { %v2501_v60 = vpop.f32.mrf.mxu1  ;;  %1221 = vst.msk [vmem:[%s2744_s11 + $0x80] sm:$0xf] %vm1188_vm2, %v2233_v55  ;;  %v2236_v61 = vpack.c.bf16 %v903_v56, %v903_v56  ;;  %v901_v62 = vmax.f32 %v745_v57, 0.0  ;;  %v766_v63 = vadd.f32 %v2435_v59, %v2728_v34 }
 0x11a   : > { %1840 = vst.msk [vmem:[%s2734_s8 + $0x84] sm:$0xf] %vm1806_vm1, %v2298_v58  ;;  %v2303_v0 = vpack.c.bf16 %v2501_v60, %v2501_v60  ;;  %v757_v1 = vpop.f32.mrf.mxu0 }
 0x11b   : > { %v1439_v2 = vpop.f32.mrf.mxu1  ;;  %1224 = vst.msk [vmem:[%s2744_s11 + $0x8c] sm:$0xf] %vm1188_vm2, %v2236_v61  ;;  %v2234_v3 = vpack.c.bf16 %v901_v62, %v901_v62  ;;  %v906_v4 = vmax.f32 %v766_v63, 0.0  ;;  %v758_v5 = vadd.f32 %v2728_v34, %v757_v1 }
 0x11c   : > { %1845 = vst.msk [vmem:[%s2734_s8 + $0x98] sm:$0xf] %vm1806_vm1, %v2303_v0  ;;  %v2301_v6 = vpack.c.bf16 %v1439_v2, %v1439_v2  ;;  %v2436_v7 = vpop.f32.mrf.mxu0 }
 0x11d   : > { %v2502_v8 = vpop.f32.mrf.mxu1  ;;  %1222 = vst.msk [vmem:[%s2744_s11 + $0x84] sm:$0xf] %vm1188_vm2, %v2234_v3  ;;  %v2239_v9 = vpack.c.bf16 %v906_v4, %v906_v4  ;;  %v904_v10 = vmax.f32 %v758_v5, 0.0  ;;  %v769_v11 = vadd.f32 %v2436_v7, %v2728_v34 }
 0x11e   : > { %1843 = vst.msk [vmem:[%s2734_s8 + $0x90] sm:$0xf] %vm1806_vm1, %v2301_v6  ;;  %v2304_v12 = vpack.c.bf16 %v2502_v8, %v2502_v8  ;;  %v760_v13 = vpop.f32.mrf.mxu0 }
 0x11f   : > { %v1442_v14 = vpop.f32.mrf.mxu1  ;;  %1227 = vst.msk [vmem:[%s2744_s11 + $0x98] sm:$0xf] %vm1188_vm2, %v2239_v9  ;;  %v2237_v15 = vpack.c.bf16 %v904_v10, %v904_v10  ;;  %v907_v16 = vmax.f32 %v769_v11, 0.0  ;;  %v761_v17 = vadd.f32 %v2728_v34, %v760_v13 }
 0x120   : > { %1846 = vst.msk [vmem:[%s2734_s8 + $0x9c] sm:$0xf] %vm1806_vm1, %v2304_v12  ;;  %v2302_v18 = vpack.c.bf16 %v1442_v14, %v1442_v14  ;;  %v2439_v19 = vpop.f32.mrf.mxu0 }
 0x121   : > { %v2505_v20 = vpop.f32.mrf.mxu1  ;;  %1225 = vst.msk [vmem:[%s2744_s11 + $0x90] sm:$0xf] %vm1188_vm2, %v2237_v15  ;;  %v2240_v21 = vpack.c.bf16 %v907_v16, %v907_v16  ;;  %v905_v22 = vmax.f32 %v761_v17, 0.0  ;;  %v782_v23 = vadd.f32 %v2439_v19, %v2728_v34 }
 0x122   : > { %1844 = vst.msk [vmem:[%s2734_s8 + $0x94] sm:$0xf] %vm1806_vm1, %v2302_v18  ;;  %v2307_v24 = vpack.c.bf16 %v2505_v20, %v2505_v20  ;;  %v773_v25 = vpop.f32.mrf.mxu0 }
 0x123   : > { %v1455_v26 = vpop.f32.mrf.mxu1  ;;  %1228 = vst.msk [vmem:[%s2744_s11 + $0x9c] sm:$0xf] %vm1188_vm2, %v2240_v21  ;;  %v2238_v27 = vpack.c.bf16 %v905_v22, %v905_v22  ;;  %v910_v28 = vmax.f32 %v782_v23, 0.0  ;;  %v774_v29 = vadd.f32 %v2728_v34, %v773_v25 }
 0x124   : > { %1849 = vst.msk [vmem:[%s2734_s8 + $0xa8] sm:$0xf] %vm1806_vm1, %v2307_v24  ;;  %v2305_v30 = vpack.c.bf16 %v1455_v26, %v1455_v26  ;;  %v2440_v31 = vpop.f32.mrf.mxu0 }
 0x125   : > { %v2506_v32 = vpop.f32.mrf.mxu1  ;;  %1226 = vst.msk [vmem:[%s2744_s11 + $0x94] sm:$0xf] %vm1188_vm2, %v2238_v27  ;;  %v2243_v33 = vpack.c.bf16 %v910_v28, %v910_v28  ;;  %v908_v35 = vmax.f32 %v774_v29, 0.0  ;;  %v785_v36 = vadd.f32 %v2440_v31, %v2728_v34 }
 0x126   : > { %1847 = vst.msk [vmem:[%s2734_s8 + $0xa0] sm:$0xf] %vm1806_vm1, %v2305_v30  ;;  %v2308_v37 = vpack.c.bf16 %v2506_v32, %v2506_v32  ;;  %v776_v38 = vpop.f32.mrf.mxu0 }
 0x127   : > { %v1458_v39 = vpop.f32.mrf.mxu1  ;;  %1231 = vst.msk [vmem:[%s2744_s11 + $0xa8] sm:$0xf] %vm1188_vm2, %v2243_v33  ;;  %v2241_v40 = vpack.c.bf16 %v908_v35, %v908_v35  ;;  %v911_v41 = vmax.f32 %v785_v36, 0.0  ;;  %v777_v42 = vadd.f32 %v2728_v34, %v776_v38 }
 0x128   : > { %1850 = vst.msk [vmem:[%s2734_s8 + $0xac] sm:$0xf] %vm1806_vm1, %v2308_v37  ;;  %v2306_v43 = vpack.c.bf16 %v1458_v39, %v1458_v39  ;;  %v2443_v44 = vpop.f32.mrf.mxu0 }
 0x129   : > { %v2509_v45 = vpop.f32.mrf.mxu1  ;;  %1229 = vst.msk [vmem:[%s2744_s11 + $0xa0] sm:$0xf] %vm1188_vm2, %v2241_v40  ;;  %v2244_v46 = vpack.c.bf16 %v911_v41, %v911_v41  ;;  %v909_v47 = vmax.f32 %v777_v42, 0.0  ;;  %v798_v48 = vadd.f32 %v2443_v44, %v2728_v34 }
 0x12a   : > { %1848 = vst.msk [vmem:[%s2734_s8 + $0xa4] sm:$0xf] %vm1806_vm1, %v2306_v43  ;;  %v2311_v49 = vpack.c.bf16 %v2509_v45, %v2509_v45  ;;  %v789_v50 = vpop.f32.mrf.mxu0 }
 0x12b   : > { %v1471_v51 = vpop.f32.mrf.mxu1  ;;  %1232 = vst.msk [vmem:[%s2744_s11 + $0xac] sm:$0xf] %vm1188_vm2, %v2244_v46  ;;  %v2242_v52 = vpack.c.bf16 %v909_v47, %v909_v47  ;;  %v914_v53 = vmax.f32 %v798_v48, 0.0  ;;  %v790_v54 = vadd.f32 %v2728_v34, %v789_v50 }
 0x12c   : > { %1853 = vst.msk [vmem:[%s2734_s8 + $0xb8] sm:$0xf] %vm1806_vm1, %v2311_v49  ;;  %v2309_v55 = vpack.c.bf16 %v1471_v51, %v1471_v51  ;;  %v2444_v56 = vpop.f32.mrf.mxu0 }
 0x12d   : > { %v2510_v57 = vpop.f32.mrf.mxu1  ;;  %1230 = vst.msk [vmem:[%s2744_s11 + $0xa4] sm:$0xf] %vm1188_vm2, %v2242_v52  ;;  %v2247_v58 = vpack.c.bf16 %v914_v53, %v914_v53  ;;  %v912_v59 = vmax.f32 %v790_v54, 0.0  ;;  %v801_v60 = vadd.f32 %v2444_v56, %v2728_v34 }
 0x12e   : > { %1851 = vst.msk [vmem:[%s2734_s8 + $0xb0] sm:$0xf] %vm1806_vm1, %v2309_v55  ;;  %v2312_v61 = vpack.c.bf16 %v2510_v57, %v2510_v57  ;;  %v792_v62 = vpop.f32.mrf.mxu0 }
 0x12f   : > { %v1474_v63 = vpop.f32.mrf.mxu1  ;;  %1235 = vst.msk [vmem:[%s2744_s11 + $0xb8] sm:$0xf] %vm1188_vm2, %v2247_v58  ;;  %v2245_v0 = vpack.c.bf16 %v912_v59, %v912_v59  ;;  %v915_v1 = vmax.f32 %v801_v60, 0.0  ;;  %v793_v2 = vadd.f32 %v2728_v34, %v792_v62 }
 0x130   : > { %1854 = vst.msk [vmem:[%s2734_s8 + $0xbc] sm:$0xf] %vm1806_vm1, %v2312_v61  ;;  %v2310_v3 = vpack.c.bf16 %v1474_v63, %v1474_v63  ;;  %v2447_v4 = vpop.f32.mrf.mxu0 }
 0x131   : > { %v2513_v5 = vpop.f32.mrf.mxu1  ;;  %1233 = vst.msk [vmem:[%s2744_s11 + $0xb0] sm:$0xf] %vm1188_vm2, %v2245_v0  ;;  %v2248_v6 = vpack.c.bf16 %v915_v1, %v915_v1  ;;  %v913_v7 = vmax.f32 %v793_v2, 0.0  ;;  %v814_v8 = vadd.f32 %v2447_v4, %v2728_v34 }
 0x132   : > { %1852 = vst.msk [vmem:[%s2734_s8 + $0xb4] sm:$0xf] %vm1806_vm1, %v2310_v3  ;;  %v2315_v9 = vpack.c.bf16 %v2513_v5, %v2513_v5  ;;  %v805_v10 = vpop.f32.mrf.mxu0 }
 0x133   : > { %v1487_v11 = vpop.f32.mrf.mxu1  ;;  %1236 = vst.msk [vmem:[%s2744_s11 + $0xbc] sm:$0xf] %vm1188_vm2, %v2248_v6  ;;  %v2246_v12 = vpack.c.bf16 %v913_v7, %v913_v7  ;;  %v918_v13 = vmax.f32 %v814_v8, 0.0  ;;  %v806_v14 = vadd.f32 %v2728_v34, %v805_v10 }
 0x134   : > { %1857 = vst.msk [vmem:[%s2734_s8 + $0xc8] sm:$0xf] %vm1806_vm1, %v2315_v9  ;;  %v2313_v15 = vpack.c.bf16 %v1487_v11, %v1487_v11  ;;  %v2448_v16 = vpop.f32.mrf.mxu0 }
 0x135   : > { %v2514_v17 = vpop.f32.mrf.mxu1  ;;  %1234 = vst.msk [vmem:[%s2744_s11 + $0xb4] sm:$0xf] %vm1188_vm2, %v2246_v12  ;;  %v2251_v18 = vpack.c.bf16 %v918_v13, %v918_v13  ;;  %v916_v19 = vmax.f32 %v806_v14, 0.0  ;;  %v817_v20 = vadd.f32 %v2448_v16, %v2728_v34 }
 0x136   : > { %1855 = vst.msk [vmem:[%s2734_s8 + $0xc0] sm:$0xf] %vm1806_vm1, %v2313_v15  ;;  %v2316_v21 = vpack.c.bf16 %v2514_v17, %v2514_v17  ;;  %v808_v22 = vpop.f32.mrf.mxu0 }
 0x137   : > { %v1490_v23 = vpop.f32.mrf.mxu1  ;;  %1239 = vst.msk [vmem:[%s2744_s11 + $0xc8] sm:$0xf] %vm1188_vm2, %v2251_v18  ;;  %v2249_v24 = vpack.c.bf16 %v916_v19, %v916_v19  ;;  %v919_v25 = vmax.f32 %v817_v20, 0.0  ;;  %v809_v26 = vadd.f32 %v2728_v34, %v808_v22 }
 0x138   : > { %1858 = vst.msk [vmem:[%s2734_s8 + $0xcc] sm:$0xf] %vm1806_vm1, %v2316_v21  ;;  %v2314_v27 = vpack.c.bf16 %v1490_v23, %v1490_v23  ;;  %v2451_v28 = vpop.f32.mrf.mxu0 }
 0x139   : > { %v2517_v29 = vpop.f32.mrf.mxu1  ;;  %1237 = vst.msk [vmem:[%s2744_s11 + $0xc0] sm:$0xf] %vm1188_vm2, %v2249_v24  ;;  %v2252_v30 = vpack.c.bf16 %v919_v25, %v919_v25  ;;  %v917_v31 = vmax.f32 %v809_v26, 0.0  ;;  %v830_v32 = vadd.f32 %v2451_v28, %v2728_v34 }
 0x13a   : > { %1856 = vst.msk [vmem:[%s2734_s8 + $0xc4] sm:$0xf] %vm1806_vm1, %v2314_v27  ;;  %v2319_v33 = vpack.c.bf16 %v2517_v29, %v2517_v29  ;;  %v821_v35 = vpop.f32.mrf.mxu0 }
 0x13b   : > { %v1503_v36 = vpop.f32.mrf.mxu1  ;;  %1240 = vst.msk [vmem:[%s2744_s11 + $0xcc] sm:$0xf] %vm1188_vm2, %v2252_v30  ;;  %v2250_v37 = vpack.c.bf16 %v917_v31, %v917_v31  ;;  %v922_v38 = vmax.f32 %v830_v32, 0.0  ;;  %v822_v39 = vadd.f32 %v2728_v34, %v821_v35 }
 0x13c   : > { %1861 = vst.msk [vmem:[%s2734_s8 + $0xd8] sm:$0xf] %vm1806_vm1, %v2319_v33  ;;  %v2317_v40 = vpack.c.bf16 %v1503_v36, %v1503_v36  ;;  %v2452_v41 = vpop.f32.mrf.mxu0 }
 0x13d   : > { %v2518_v42 = vpop.f32.mrf.mxu1  ;;  %1238 = vst.msk [vmem:[%s2744_s11 + $0xc4] sm:$0xf] %vm1188_vm2, %v2250_v37  ;;  %v2255_v43 = vpack.c.bf16 %v922_v38, %v922_v38  ;;  %v920_v44 = vmax.f32 %v822_v39, 0.0  ;;  %v833_v45 = vadd.f32 %v2452_v41, %v2728_v34 }
 0x13e   : > { %1859 = vst.msk [vmem:[%s2734_s8 + $0xd0] sm:$0xf] %vm1806_vm1, %v2317_v40  ;;  %v2320_v46 = vpack.c.bf16 %v2518_v42, %v2518_v42  ;;  %v824_v47 = vpop.f32.mrf.mxu0 }
 0x13f   : > { %v1506_v48 = vpop.f32.mrf.mxu1  ;;  %1243 = vst.msk [vmem:[%s2744_s11 + $0xd8] sm:$0xf] %vm1188_vm2, %v2255_v43  ;;  %v2253_v49 = vpack.c.bf16 %v920_v44, %v920_v44  ;;  %v923_v50 = vmax.f32 %v833_v45, 0.0  ;;  %v825_v51 = vadd.f32 %v2728_v34, %v824_v47 }
 0x140   : > { %1862 = vst.msk [vmem:[%s2734_s8 + $0xdc] sm:$0xf] %vm1806_vm1, %v2320_v46  ;;  %v2318_v52 = vpack.c.bf16 %v1506_v48, %v1506_v48  ;;  %v2455_v53 = vpop.f32.mrf.mxu0 }
 0x141   : > { %v2521_v54 = vpop.f32.mrf.mxu1  ;;  %1241 = vst.msk [vmem:[%s2744_s11 + $0xd0] sm:$0xf] %vm1188_vm2, %v2253_v49  ;;  %v2256_v55 = vpack.c.bf16 %v923_v50, %v923_v50  ;;  %v921_v56 = vmax.f32 %v825_v51, 0.0  ;;  %v846_v57 = vadd.f32 %v2455_v53, %v2728_v34 }
 0x142   : > { %1860 = vst.msk [vmem:[%s2734_s8 + $0xd4] sm:$0xf] %vm1806_vm1, %v2318_v52  ;;  %v2323_v58 = vpack.c.bf16 %v2521_v54, %v2521_v54  ;;  %v837_v59 = vpop.f32.mrf.mxu0 }
 0x143   : > { %v1519_v60 = vpop.f32.mrf.mxu1  ;;  %1244 = vst.msk [vmem:[%s2744_s11 + $0xdc] sm:$0xf] %vm1188_vm2, %v2256_v55  ;;  %v2254_v61 = vpack.c.bf16 %v921_v56, %v921_v56  ;;  %v926_v62 = vmax.f32 %v846_v57, 0.0  ;;  %v838_v63 = vadd.f32 %v2728_v34, %v837_v59 }
 0x144   : > { %1865 = vst.msk [vmem:[%s2734_s8 + $0xe8] sm:$0xf] %vm1806_vm1, %v2323_v58  ;;  %v2321_v0 = vpack.c.bf16 %v1519_v60, %v1519_v60  ;;  %v2456_v1 = vpop.f32.mrf.mxu0 }
 0x145   : > { %v2522_v2 = vpop.f32.mrf.mxu1  ;;  %1242 = vst.msk [vmem:[%s2744_s11 + $0xd4] sm:$0xf] %vm1188_vm2, %v2254_v61  ;;  %v2259_v3 = vpack.c.bf16 %v926_v62, %v926_v62  ;;  %v924_v4 = vmax.f32 %v838_v63, 0.0  ;;  %v849_v5 = vadd.f32 %v2456_v1, %v2728_v34 }
 0x146   : > { %1863 = vst.msk [vmem:[%s2734_s8 + $0xe0] sm:$0xf] %vm1806_vm1, %v2321_v0  ;;  %v2324_v6 = vpack.c.bf16 %v2522_v2, %v2522_v2  ;;  %v840_v7 = vpop.f32.mrf.mxu0 }
 0x147   : > { %v1522_v8 = vpop.f32.mrf.mxu1  ;;  %1247 = vst.msk [vmem:[%s2744_s11 + $0xe8] sm:$0xf] %vm1188_vm2, %v2259_v3  ;;  %v2257_v9 = vpack.c.bf16 %v924_v4, %v924_v4  ;;  %v927_v10 = vmax.f32 %v849_v5, 0.0  ;;  %v841_v11 = vadd.f32 %v2728_v34, %v840_v7 }
 0x148   : > { %1866 = vst.msk [vmem:[%s2734_s8 + $0xec] sm:$0xf] %vm1806_vm1, %v2324_v6  ;;  %v2322_v12 = vpack.c.bf16 %v1522_v8, %v1522_v8  ;;  %v2459_v13 = vpop.f32.mrf.mxu0 }
 0x149   : > { %v2525_v14 = vpop.f32.mrf.mxu1  ;;  %1245 = vst.msk [vmem:[%s2744_s11 + $0xe0] sm:$0xf] %vm1188_vm2, %v2257_v9  ;;  %v2260_v15 = vpack.c.bf16 %v927_v10, %v927_v10  ;;  %v925_v16 = vmax.f32 %v841_v11, 0.0  ;;  %v862_v17 = vadd.f32 %v2459_v13, %v2728_v34 }
 0x14a   : > { %1864 = vst.msk [vmem:[%s2734_s8 + $0xe4] sm:$0xf] %vm1806_vm1, %v2322_v12  ;;  %v2327_v18 = vpack.c.bf16 %v2525_v14, %v2525_v14  ;;  %v853_v19 = vpop.f32.mrf.mxu0 }
 0x14b   : > { %v1535_v20 = vpop.f32.mrf.mxu1  ;;  %1248 = vst.msk [vmem:[%s2744_s11 + $0xec] sm:$0xf] %vm1188_vm2, %v2260_v15  ;;  %v2258_v21 = vpack.c.bf16 %v925_v16, %v925_v16  ;;  %v930_v22 = vmax.f32 %v862_v17, 0.0  ;;  %v854_v23 = vadd.f32 %v2728_v34, %v853_v19 }
 0x14c   : > { %1869 = vst.msk [vmem:[%s2734_s8 + $0xf8] sm:$0xf] %vm1806_vm1, %v2327_v18  ;;  %v2325_v24 = vpack.c.bf16 %v1535_v20, %v1535_v20  ;;  %v2460_v25 = vpop.f32.mrf.mxu0 }
 0x14d   : > { %v2526_v26 = vpop.f32.mrf.mxu1  ;;  %1246 = vst.msk [vmem:[%s2744_s11 + $0xe4] sm:$0xf] %vm1188_vm2, %v2258_v21  ;;  %v2263_v27 = vpack.c.bf16 %v930_v22, %v930_v22  ;;  %v928_v28 = vmax.f32 %v854_v23, 0.0  ;;  %v865_v29 = vadd.f32 %v2460_v25, %v2728_v34 }
 0x14e   : > { %1867 = vst.msk [vmem:[%s2734_s8 + $0xf0] sm:$0xf] %vm1806_vm1, %v2325_v24  ;;  %v2328_v30 = vpack.c.bf16 %v2526_v26, %v2526_v26  ;;  %v856_v31 = vpop.f32.mrf.mxu0 }
 0x14f   : > { %v1538_v32 = vpop.f32.mrf.mxu1  ;;  %1251 = vst.msk [vmem:[%s2744_s11 + $0xf8] sm:$0xf] %vm1188_vm2, %v2263_v27  ;;  %v2261_v33 = vpack.c.bf16 %v928_v28, %v928_v28  ;;  %v931_v35 = vmax.f32 %v865_v29, 0.0  ;;  %v857_v36 = vadd.f32 %v2728_v34, %v856_v31 }
 0x150   : > { %1870 = vst.msk [vmem:[%s2734_s8 + $0xfc] sm:$0xf] %vm1806_vm1, %v2328_v30  ;;  %v2326_v37 = vpack.c.bf16 %v1538_v32, %v1538_v32 }
 0x151   : > { %1249 = vst.msk [vmem:[%s2744_s11 + $0xf0] sm:$0xf] %vm1188_vm2, %v2261_v33  ;;  %v2264_v38 = vpack.c.bf16 %v931_v35, %v931_v35  ;;  %v929_v39 = vmax.f32 %v857_v36, 0.0 }
 0x152   : > { %1868 = vst.msk [vmem:[%s2734_s8 + $0xf4] sm:$0xf] %vm1806_vm1, %v2326_v37 }
 0x153   : > { %1252 = vst.msk [vmem:[%s2744_s11 + $0xfc] sm:$0xf] %vm1188_vm2, %v2264_v38  ;;  %v2262_v40 = vpack.c.bf16 %v929_v39, %v929_v39 }
 0x155   : > { %1250 = vst.msk [vmem:[%s2744_s11 + $0xf4] sm:$0xf] %vm1188_vm2, %v2262_v40 }
 0x156 PF: > { %s16_s18 = sadd.s32 1, %s2575_s18  }
 0x157   : > { %p13_p4 = scmp.ge.s32.totalorder %s16_s18, 4  }
 0x159   :  { %15 = sbr.rel (!%p13_p4) target bundleno = 1 (0x1), region = 78 }

// kernel: _lambda_.20
= control target key start
LH: loop header
LB: loop body
LE: loop exit
PB: predicated region body
PF: predicated region fallthrough
CT: control target
= control target key end

     0   :  { %s2396_s12 = smov 0   ;;  %s2398_s13 = smov 0   ;;  %s2861_s0 = inlined_call_operand.vmem [shape: bf16[2,10,10,10,8], index: 0, kind: input, shape index: {}]   ;;  %s2862_s1 = inlined_call_operand.vmem [shape: bf16[3,9,8,8], index: 1, kind: input, shape index: {}]   ;;  %s2863_s2 = inlined_call_operand.vmem [shape: f32[1,8], index: 2, kind: input, shape index: {}]   ;;  %s2864_s3 = inlined_call_operand.vmem [shape: bf16[2,8,8,8,8], index: 3, kind: output, shape index: {}]  }
   0x1   :  { %s2400_s14 = smov 0   ;;  %s2402_s15 = smov 0  }
   0x2   :  { %s2404_s16 = smov 0   ;;  %s2406_s17 = smov 0  }
   0x3   :  { %s2408_s18 = smov 0  }
   0x4 LB: > { %s25_s19 = sadd.s32 1, %s2361_s15  ;;  %s28_s20 = sadd.s32 1, %s2365_s16  ;;  %s2373_s18 = sphi %s2408_s18, %s13_s18   ;;  %s2369_s17 = sphi %s2406_s17, %s2874_s17   ;;  %s2365_s16 = sphi %s2404_s16, %s2873_s16   ;;  %s2361_s15 = sphi %s2402_s15, %s2872_s15   ;;  %s2357_s14 = sphi %s2400_s14, %s2871_s14   ;;  %s2353_s13 = sphi %s2398_s13, %s2870_s13   ;;  %s2349_s12 = sphi %s2396_s12, %s2869_s12  }
   0x5   : > { %p26_p0 = scmp.ge.s32.totalorder %s25_s19, 3  ;;  %p1928_p1 = scmp.ge.s32.totalorder %s2373_s18, 1 }
   0x6   : > { %p168_p2 = scmp.lt.s32.totalorder %s2373_s18, 49  ;;  %s32_s21 = sadd.s32 1, %s2369_s17 }
   0x7   : > { %s2876_s19 = smov (%p26_p0, %s25_s19), 0  ;;  %s2878_s20 = smov (!%p26_p0, %s28_s20), %s2365_s16 }
   0x8   : > { %p169_p3 = pnand %p1928_p1, %p168_p2  ;;  %p30_p4 = scmp.ge.s32.totalorder %s2878_s20, 8 }
   0x9   : > { %s201_s22 = sadd.s32 (!%p169_p3), %s2349_s12, %s2353_s13  ;;  %p202_p6 = scmp.lt.s32.totalorder (!%p169_p3), %s2357_s14, 1 }
   0xa   : > { %s2880_s20 = smov (%p30_p4, %s2878_s20), 0  ;;  %s2882_s21 = smov (!%p30_p4, %s32_s21), %s2369_s17 }
   0xb   : > { %p34_p5 = scmp.ge.s32.totalorder %s2882_s21, 2  ;;  %172 = sbr.rel (%p169_p3) target bundleno = 344 (0x158), region = 32 }
   0xc   : > { %p204_p7 = scmp.lt.s32.totalorder (!%p169_p3), %s201_s22, 9  ;;  %p214_p8 = scmp.lt.s32.totalorder (!%p169_p3), %s2353_s13, 7 }
   0xd   : > { %s2884_s21 = smov (%p34_p5, %s2882_s21), 0  ;;  %p1933_p9 = scmp.ne.s32.totalorder (!%p169_p3), %s2349_s12, 0 }
  0x10   : > { %s2886_s14 = smov (!%p202_p6, %s2357_s14), 1  ;;  %s2888_s22 = smov (!%p204_p7, %s201_s22), 9 }
  0x11   : > { %s2249_s23 = smul.u32 200, %s2886_s14  ;;  %s1931_s25 = sshll.u32 %s2886_s14, 6 }
  0x12   : > { %s2248_s24 = smul.u32 20, %s2888_s22  ;;  %s2890_s13 = smov (!%p214_p8, %s2353_s13), 7 }
  0x13   : > { %s1930_s28 = sshll.u32 %s2890_s13, 3  ;;  %225 = sbr.rel (%p1933_p9) target bundleno = 29 (0x1d), region = 36 }
  0x14   : > { %s208_s26 = sadd.s32 %s2249_s23, %s2248_s24  ;;  %s218_s5 = sadd.s32 %s1931_s25, %s1930_s28 }
  0x15   : > { %s1929_s27 = sshll.u32 %s208_s26, 2  ;;  %s1932_s6 = sshll.u32 %s218_s5, 2 }
  0x16   : > { %s2449_s4 = scalar_lea.vmem %s2861_s0, %s1929_s27  ;;  %s2454_s9 = scalar_lea.vmem %s2864_s3, %s1932_s6 }
  0x18   : > { %vm226_vm0 = vcmask 64512   ;;  %v2375_v0 = vmov 0.0  }
  0x19   : > { %227 = vst.msk [vmem:[#allocation2] sm:$0xff] %vm226_vm0, %v2375_v0  ;;  %228 = vst.msk [vmem:[#allocation2 + $0x8] sm:$0xff] %vm226_vm0, %v2375_v0 }
  0x1a   : > { %229 = vst.msk [vmem:[#allocation2 + $0x10] sm:$0xff] %vm226_vm0, %v2375_v0  ;;  %230 = vst.msk [vmem:[#allocation2 + $0x18] sm:$0xff] %vm226_vm0, %v2375_v0 }
  0x1b   : > { %231 = vst.msk [vmem:[#allocation2 + $0x20] sm:$0xff] %vm226_vm0, %v2375_v0  ;;  %232 = vst.msk [vmem:[#allocation2 + $0x28] sm:$0xff] %vm226_vm0, %v2375_v0 }
  0x1c   : > { %233 = vst.msk [vmem:[#allocation2 + $0x30] sm:$0xff] %vm226_vm0, %v2375_v0  ;;  %234 = vst.msk [vmem:[#allocation2 + $0x38] sm:$0xff] %vm226_vm0, %v2375_v0 }
  0x1d PF: > { %s2100_s10 = smul.u32 36, %s2349_s12  ;;  %vm296_vm1 = vcmask 1043456   ;;  %v2307_v1 = vld [vmem:[%s2449_s4] ss:$8 sps:$4 sm:$0xff]   ;;  %vm283_vm2 = vcmask 64512   ;;  %vm628_vm3 = vcmask 1042432  }
  0x1e   : > { %v2308_v2 = vld [vmem:[%s2449_s4 + $0x20] ss:$8 sps:$4 sm:$0xff]   ;;  %2148 = vmatprep.mubr.msk.bf16.mxu0 %vm283_vm2, %v2307_v1  ;;  %v2309_v4 = vld [vmem:[%s2449_s4 + $0x10] ss:$8 sps:$4 sm:$0xff]   ;;  %vm629_vm4 = vcmask 1046532   ;;  %p2095_p10 = scmp.ge.s32.totalorder %s2349_s12, 2 }
  0x1f   : > { %s2462_s14 = scalar_lea.vmem %s2862_s1, %s2100_s10  ;;  %v2310_v6 = vld [vmem:[%s2449_s4 + $0x30] ss:$8 sps:$4 sm:$0xff]   ;;  %2152 = vmatprep.mubr.msk.bf16.mxu1 %vm283_vm2, %v2308_v2  ;;  %v373_v11 = vld [vmem:[%s2449_s4] sm:$0xf]  ;;  %v374_v12 = vld [vmem:[%s2449_s4 + $0x4] sm:$0x1] }
  0x20   : > { %v238_v3 = vld [vmem:[%s2462_s14] sm:$0xf]  ;;  %v239_v7 = vld [vmem:[%s2462_s14 + $0x4] sm:$0xf]  ;;  %v240_v8 = vld [vmem:[%s2462_s14 + $0x8] sm:$0xf] }
  0x21   : > { %2238 = vmatprep.subr.msk.bf16.mxu0 %vm296_vm1, %v238_v3  ;;  %2239 = vmatprep.subr.msk.bf16.mxu1 %vm296_vm1, %v238_v3  ;;  %v298_v5 = vsel %vm296_vm1, %v238_v3, 0  ;;  %v529_v9 = vsel %vm296_vm1, %v239_v7, 0  ;;  %v688_v10 = vsel %vm296_vm1, %v240_v8, 0  ;;  %v375_v13 = vld [vmem:[%s2449_s4 + $0x8] sm:$0xf]  ;;  %v393_v15 = vshrl.u32 %v373_v11, 16  ;;  %vm2488_vm7 = vmor %vm628_vm3, %vm629_vm4 }
  0x22   : > { %2147 = vmatpush3.bf16.msra.mxu0 %v298_v5  ;;  %2237 = vmatpush3.bf16.msra.mxu1 %v298_v5  ;;  %v376_v14 = vld [vmem:[%s2449_s4 + $0xc] sm:$0x1]  ;;  %vm389_vm5 = vsmask.f32 3328  ;;  %vm390_vm6 = vsmask.f32 7440 }
  0x23   : > { %2240 = vmatprep.subr.msk.bf16.mxu1 %vm296_vm1, %v239_v7  ;;  %2241 = vmatprep.subr.msk.bf16.mxu0 %vm296_vm1, %v240_v8  ;;  %v396_v16 = vshll.u32 %v373_v11, 16  ;;  %v402_v17 = vshll.u32 %v374_v12, 16  ;;  %v407_v18 = vshrl.u32 %v375_v13, 16  ;;  %v410_v19 = vshll.u32 %v375_v13, 16  ;;  %v604_v21 = vld [vmem:[%s2449_s4] sm:$0xe]  ;;  %vm2500_vm8 = vmor %vm389_vm5, %vm390_vm6 }
  0x24   : > { %v416_v20 = vshll.u32 %v376_v14, 16  ;;  %v633_v23 = vrot.slane %v374_v12, 5  ;;  %v395_v24 = vrot.slane %v393_v15, 4  ;;  %v605_v27 = vld [vmem:[%s2449_s4 + $0x8] sm:$0xe]  ;;  %v1951_v28 = vrot.slane %v604_v21, 9 }
  0x25   : > { %2149 = vmatmul.mubr.msk.bf16.vlgmr.msra.gmra.mxu0 %vm283_vm2, %v2309_v4  ;;  %2153 = vmatmul.mubr.msk.bf16.vlgmr.msra.gmra.mxu1 %vm283_vm2, %v2310_v6  ;;  %v398_v25 = vrot.slane %v396_v16, 5  ;;  %v404_v26 = vrot.slane %v402_v17, 5  ;;  %v409_v29 = vrot.slane %v407_v18, 4  ;;  %v412_v30 = vrot.slane %v410_v19, 5  ;;  %v377_v33 = vld [vmem:[%s2449_s4 + $0x10] sm:$0xf] }
  0x26   : > { %2157 = vmatpush3.bf16.msra.mxu1 %v529_v9  ;;  %2167 = vmatpush3.bf16.msra.mxu0 %v688_v10  ;;  %v418_v31 = vrot.slane %v416_v20, 5  ;;  %v1952_v32 = vrot.slane %v605_v27, 9  ;;  %v634_v35 = vsel %vm2488_vm7, %v1951_v28, %v633_v23  ;;  %v637_v36 = vrot.slane %v376_v14, 5  ;;  %v378_v37 = vld [vmem:[%s2449_s4 + $0x14] sm:$0x1] }
  0x27   : > { %v399_v34 = vor.u32 %v398_v25, %v395_v24  ;;  %v379_v38 = vld [vmem:[%s2449_s4 + $0x18] sm:$0xf]  ;;  %v421_v39 = vshrl.u32 %v377_v33, 16  ;;  %v413_v41 = vor.u32 %v412_v30, %v409_v29  ;;  %v380_v42 = vld [vmem:[%s2449_s4 + $0x1c] sm:$0x1]  ;;  %v424_v43 = vshll.u32 %v377_v33, 16 }
  0x28   : > { %v430_v44 = vshll.u32 %v378_v37, 16  ;;  %v435_v45 = vshrl.u32 %v379_v38, 16  ;;  %v638_v47 = vsel %vm2488_vm7, %v1952_v32, %v637_v36  ;;  %v438_v49 = vshll.u32 %v379_v38, 16  ;;  %v606_v50 = vld [vmem:[%s2449_s4 + $0x10] sm:$0xe] }
  0x29   : > { %v400_v46 = vrot.slane %v399_v34, 4  ;;  %v423_v48 = vrot.slane %v421_v39, 4  ;;  %v414_v51 = vrot.slane %v413_v41, 4  ;;  %v1959_v52 = vcombine.low %v634_v35, %v638_v47  ;;  %v607_v55 = vld [vmem:[%s2449_s4 + $0x18] sm:$0xe] }
  0x2a   : > { %v426_v53 = vrot.slane %v424_v43, 5  ;;  %v432_v54 = vrot.slane %v430_v44, 5  ;;  %v437_v57 = vrot.slane %v435_v45, 4  ;;  %v440_v58 = vrot.slane %v438_v49, 5  ;;  %v241_v60 = vld [vmem:[%s2462_s14 + $0xc] sm:$0xf] }
  0x2b   : > { %v405_v56 = vsel %vm2500_vm8, %v400_v46, %v404_v26  ;;  %v444_v59 = vshll.u32 %v380_v42, 16  ;;  %v419_v61 = vsel %vm2500_vm8, %v414_v51, %v418_v31  ;;  %2168 = vmatprep.mubr.msk.bf16.mxu0 %vm283_vm2, %v1959_v52  ;;  %v1953_v63 = vrot.slane %v606_v50, 9  ;;  %2242 = vmatprep.subr.msk.bf16.mxu1 %vm296_vm1, %v241_v60  ;;  %v242_v1 = vld [vmem:[%s2462_s14 + $0x10] sm:$0xf]  ;;  %v381_v2 = vld [vmem:[%s2449_s4 + $0x20] sm:$0xf] }
  0x2c   : > { %v427_v62 = vor.u32 %v426_v53, %v423_v48  ;;  %v641_v0 = vrot.slane %v378_v37, 5  ;;  %v1943_v3 = vcombine.low %v405_v56, %v419_v61  ;;  %v441_v4 = vor.u32 %v440_v58, %v437_v57  ;;  %2243 = vmatprep.subr.msk.bf16.mxu0 %vm296_vm1, %v242_v1  ;;  %v382_v7 = vld [vmem:[%s2449_s4 + $0x24] sm:$0x1]  ;;  %v383_v8 = vld [vmem:[%s2449_s4 + $0x28] sm:$0xf] }
  0x2d   : > { %v446_v5 = vrot.slane %v444_v59, 5  ;;  %v1954_v6 = vrot.slane %v607_v55, 9  ;;  %v645_v11 = vrot.slane %v380_v42, 5  ;;  %v805_v12 = vsel %vm296_vm1, %v241_v60, 0  ;;  %v384_v19 = vld [vmem:[%s2449_s4 + $0x2c] sm:$0x1] }
  0x2e   : > { %v428_v9 = vrot.slane %v427_v62, 4  ;;  %v642_v10 = vsel %vm2488_vm7, %v1953_v63, %v641_v0  ;;  %2158 = vmatprep.mubr.msk.bf16.mxu1 %vm283_vm2, %v1943_v3  ;;  %v442_v13 = vrot.slane %v441_v4, 4  ;;  %v1033_v14 = vsel %vm296_vm1, %v242_v1, 0  ;;  %v608_v23 = vld [vmem:[%s2449_s4 + $0x20] sm:$0xe] }
  0x2f   : > { %v449_v15 = vshrl.u32 %v381_v2, 16  ;;  %v452_v16 = vshll.u32 %v381_v2, 16  ;;  %v646_v18 = vsel %vm2488_vm7, %v1954_v6, %v645_v11  ;;  %v458_v20 = vshll.u32 %v382_v7, 16  ;;  %v609_v28 = vld [vmem:[%s2449_s4 + $0x28] sm:$0xe] }
  0x30   : > { %v433_v17 = vsel %vm2500_vm8, %v428_v9, %v432_v54  ;;  %v463_v21 = vshrl.u32 %v383_v8, 16  ;;  %v447_v24 = vsel %vm2500_vm8, %v442_v13, %v446_v5  ;;  %v1960_v25 = vcombine.low %v642_v10, %v646_v18  ;;  %v385_v29 = vld [vmem:[%s2449_s4 + $0x30] sm:$0xf]  ;;  %v386_v34 = vld [vmem:[%s2449_s4 + $0x34] sm:$0x1] }
  0x31   : > { %v451_v26 = vrot.slane %v449_v15, 4  ;;  %v454_v27 = vrot.slane %v452_v16, 5  ;;  %v1944_v30 = vcombine.low %v433_v17, %v447_v24  ;;  %v460_v31 = vrot.slane %v458_v20, 5  ;;  %v387_v39 = vld [vmem:[%s2449_s4 + $0x38] sm:$0xf] }
  0x32   : > { %v465_v32 = vrot.slane %v463_v21, 4  ;;  %v466_v33 = vshll.u32 %v383_v8, 16  ;;  %2169 = vmatmul.mubr.msk.bf16.vlgmr.msra.gmra.mxu0 %vm283_vm2, %v1960_v25  ;;  %v472_v36 = vshll.u32 %v384_v19, 16  ;;  %v1955_v37 = vrot.slane %v608_v23, 9  ;;  %v388_v44 = vld [vmem:[%s2449_s4 + $0x3c] sm:$0x1] }
  0x33   : > { %v455_v35 = vor.u32 %v454_v27, %v451_v26  ;;  %v649_v38 = vrot.slane %v382_v7, 5  ;;  %2159 = vmatmul.mubr.msk.bf16.vlgmr.msra.gmra.mxu1 %vm283_vm2, %v1944_v30  ;;  %2187 = vmatpush3.bf16.msra.mxu0 %v1033_v14  ;;  %v1956_v42 = vrot.slane %v609_v28, 9  ;;  %v653_v43 = vrot.slane %v384_v19, 5  ;;  %v610_v54 = vld [vmem:[%s2449_s4 + $0x30] sm:$0xe] }
  0x34   : > { %v468_v41 = vrot.slane %v466_v33, 5  ;;  %v477_v45 = vshrl.u32 %v385_v29, 16  ;;  %2177 = vmatpush3.bf16.msra.mxu1 %v805_v12  ;;  %v474_v47 = vrot.slane %v472_v36, 5  ;;  %v480_v49 = vshll.u32 %v385_v29, 16  ;;  %v611_v59 = vld [vmem:[%s2449_s4 + $0x38] sm:$0xe] }
  0x35   : > { %v456_v46 = vrot.slane %v455_v35, 4  ;;  %v650_v48 = vsel %vm2488_vm7, %v1955_v37, %v649_v38  ;;  %v654_v51 = vsel %vm2488_vm7, %v1956_v42, %v653_v43  ;;  %v486_v53 = vshll.u32 %v386_v34, 16  ;;  %v1983_v60 = vld [vmem:[%s2449_s4 + $0x8] sm:$0xf]  ;;  %v2551_v1 = vld [vmem:[%s2449_s4 + $0xc] sm:$0x1] }
  0x36   : > { %v469_v50 = vor.u32 %v468_v41, %v465_v32  ;;  %v479_v52 = vrot.slane %v477_v45, 4  ;;  %v1961_v56 = vcombine.low %v650_v48, %v654_v51  ;;  %v482_v57 = vrot.slane %v480_v49, 5  ;;  %v1985_v6 = vld [vmem:[%s2449_s4 + $0x10] sm:$0xf]  ;;  %v2560_v15 = vld [vmem:[%s2449_s4 + $0x14] sm:$0x1] }
  0x37   : > { %v461_v55 = vsel %vm2500_vm8, %v456_v46, %v460_v31  ;;  %v491_v58 = vshrl.u32 %v387_v39, 16  ;;  %v488_v62 = vrot.slane %v486_v53, 5  ;;  %v494_v63 = vshll.u32 %v387_v39, 16  ;;  %v1987_v20 = vld [vmem:[%s2449_s4 + $0x18] sm:$0xf] }
  0x38   : > { %v470_v61 = vrot.slane %v469_v50, 4  ;;  %v500_v0 = vshll.u32 %v388_v44, 16  ;;  %2172 = vmatprep.mubr.msk.bf16.mxu0 %vm283_vm2, %v1961_v56  ;;  %v483_v2 = vor.u32 %v482_v57, %v479_v52  ;;  %v1957_v4 = vrot.slane %v610_v54, 9  ;;  %v2570_v26 = vld [vmem:[%s2449_s4 + $0x1c] sm:$0x1] }
  0x39   : > { %v493_v3 = vrot.slane %v491_v58, 4  ;;  %v657_v5 = vrot.slane %v386_v34, 5  ;;  %v496_v8 = vrot.slane %v494_v63, 5  ;;  %v1958_v10 = vrot.slane %v611_v59, 9  ;;  %v1989_v27 = vld [vmem:[%s2449_s4 + $0x20] sm:$0xf] }
  0x3a   : > { %v475_v7 = vsel %vm2500_vm8, %v470_v61, %v474_v47  ;;  %v502_v9 = vrot.slane %v500_v0, 5  ;;  %v484_v12 = vrot.slane %v483_v2, 4  ;;  %v661_v14 = vrot.slane %v388_v44, 5  ;;  %v2311_v30 = vld [vmem:[%s2449_s4 + $0x8] ss:$8 sps:$4 sm:$0xff]  }
  0x3b   : > { %v1945_v11 = vcombine.low %v461_v55, %v475_v7  ;;  %v658_v13 = vsel %vm2488_vm7, %v1957_v4, %v657_v5  ;;  %v497_v16 = vor.u32 %v496_v8, %v493_v3  ;;  %v897_v17 = vshrl.u32 %v1983_v60, 16  ;;  %v2575_v33 = vld [vmem:[%s2449_s4 + $0x24] sm:$0x1]  ;;  %v243_v38 = vld [vmem:[%s2462_s14 + $0x14] sm:$0xf] }
  0x3c   : > { %v900_v18 = vshll.u32 %v1983_v60, 16  ;;  %v906_v19 = vshll.u32 %v2551_v1, 16  ;;  %v489_v21 = vsel %vm2500_vm8, %v484_v12, %v488_v62  ;;  %v662_v23 = vsel %vm2488_vm7, %v1958_v10, %v661_v14  ;;  %2244 = vmatprep.subr.msk.bf16.mxu1 %vm296_vm1, %v243_v38  ;;  %v244_v44 = vld [vmem:[%s2462_s14 + $0x18] sm:$0xf]  ;;  %v1991_v53 = vld [vmem:[%s2449_s4 + $0x28] sm:$0xf] }
  0x3d   : > { %2162 = vmatprep.mubr.msk.bf16.mxu1 %vm283_vm2, %v1945_v11  ;;  %v911_v24 = vshrl.u32 %v1985_v6, 16  ;;  %v914_v25 = vshll.u32 %v1985_v6, 16  ;;  %v498_v28 = vrot.slane %v497_v16, 4  ;;  %v1962_v29 = vcombine.low %v658_v13, %v662_v23  ;;  %2245 = vmatprep.subr.msk.bf16.mxu0 %vm296_vm1, %v244_v44  ;;  %v2590_v58 = vld [vmem:[%s2449_s4 + $0x2c] sm:$0x1] }
  0x3e   : > { %v899_v31 = vrot.slane %v897_v17, 4  ;;  %v902_v32 = vrot.slane %v900_v18, 5  ;;  %v908_v34 = vrot.slane %v906_v19, 5  ;;  %v920_v37 = vshll.u32 %v2560_v15, 16  ;;  %v1993_v63 = vld [vmem:[%s2449_s4 + $0x30] sm:$0xf] }
  0x3f   : > { %v913_v35 = vrot.slane %v911_v24, 4  ;;  %v916_v36 = vrot.slane %v914_v25, 5  ;;  %v503_v39 = vsel %vm2500_vm8, %v498_v28, %v502_v9  ;;  %2173 = vmatmul.mubr.msk.bf16.gmra.mxu0 %vm283_vm2, %v1962_v29  ;;  %v925_v42 = vshrl.u32 %v1987_v20, 16  ;;  %v2598_v0 = vld [vmem:[%s2449_s4 + $0x34] sm:$0x1] }
  0x40   : > { %v903_v41 = vor.u32 %v902_v32, %v899_v31  ;;  %v928_v43 = vshll.u32 %v1987_v20, 16  ;;  %v1946_v45 = vcombine.low %v489_v21, %v503_v39  ;;  %v922_v47 = vrot.slane %v920_v37, 5  ;;  %v2312_v3 = vld [vmem:[%s2449_s4 + $0x18] ss:$8 sps:$4 sm:$0xff]   ;;  %v2313_v12 = vld [vmem:[%s2449_s4 + $0x28] ss:$8 sps:$4 sm:$0xff]  }
  0x41   : > { %v917_v46 = vor.u32 %v916_v36, %v913_v35  ;;  %v934_v48 = vshll.u32 %v2570_v26, 16  ;;  %v927_v50 = vrot.slane %v925_v42, 4  ;;  %v939_v52 = vshrl.u32 %v1989_v27, 16  ;;  %v1995_v21 = vld [vmem:[%s2449_s4 + $0x38] sm:$0xf] }
  0x42   : > { %v904_v49 = vrot.slane %v903_v41, 4  ;;  %v930_v51 = vrot.slane %v928_v43, 5  ;;  %2163 = vmatmul.mubr.msk.bf16.gmra.mxu1 %vm283_vm2, %v1946_v45  ;;  %v942_v56 = vshll.u32 %v1989_v27, 16  ;;  %v948_v57 = vshll.u32 %v2575_v33, 16  ;;  %v2612_v28 = vld [vmem:[%s2449_s4 + $0x3c] sm:$0x1] }
  0x43   : > { %v918_v54 = vrot.slane %v917_v46, 4  ;;  %v936_v55 = vrot.slane %v934_v48, 5  ;;  %2178 = vmatprep.mubr.msk.bf16.mxu1 %vm283_vm2, %v2311_v30  ;;  %v941_v61 = vrot.slane %v939_v52, 4  ;;  %v1189_v62 = vsel %vm296_vm1, %v243_v38, 0  ;;  %v1997_v31 = vld [vmem:[%s2449_s4 + $0x40] sm:$0xf] }
  0x44   : > { %v909_v59 = vsel %vm2500_vm8, %v904_v49, %v908_v34  ;;  %v931_v60 = vor.u32 %v930_v51, %v927_v50  ;;  %v944_v4 = vrot.slane %v942_v56, 5  ;;  %v950_v5 = vrot.slane %v948_v57, 5  ;;  %v2616_v32 = vld [vmem:[%s2449_s4 + $0x44] sm:$0x1]  ;;  %v2007_v39 = vld [vmem:[%s2449_s4 + $0x8] sm:$0xe] }
  0x45   : > { %v923_v2 = vsel %vm2500_vm8, %v918_v54, %v922_v47  ;;  %v1306_v6 = vsel %vm296_vm1, %v244_v44, 0  ;;  %v953_v9 = vshrl.u32 %v1991_v53, 16  ;;  %v956_v10 = vshll.u32 %v1991_v53, 16  ;;  %v2008_v41 = vld [vmem:[%s2449_s4 + $0x10] sm:$0xe] }
  0x46   : > { %v1999_v7 = vcombine.low %v909_v59, %v923_v2  ;;  %v932_v8 = vrot.slane %v931_v60, 4  ;;  %v945_v11 = vor.u32 %v944_v4, %v941_v61  ;;  %v962_v13 = vshll.u32 %v2590_v58, 16  ;;  %v2314_v51 = vld [vmem:[%s2449_s4 + $0x38] ss:$8 sps:$4 sm:$0xff]  }
  0x47   : > { %v967_v14 = vshrl.u32 %v1993_v63, 16  ;;  %v970_v16 = vshll.u32 %v1993_v63, 16  ;;  %v955_v18 = vrot.slane %v953_v9, 4  ;;  %v958_v19 = vrot.slane %v956_v10, 5  ;;  %v2009_v60 = vld [vmem:[%s2449_s4 + $0x18] sm:$0xe] }
  0x48   : > { %2188 = vmatprep.mubr.msk.bf16.mxu0 %vm283_vm2, %v1999_v7  ;;  %v937_v17 = vsel %vm2500_vm8, %v932_v8, %v936_v55  ;;  %v976_v20 = vshll.u32 %v2598_v0, 16  ;;  %v946_v23 = vrot.slane %v945_v11, 4  ;;  %v964_v24 = vrot.slane %v962_v13, 5  ;;  %v2010_v61 = vld [vmem:[%s2449_s4 + $0x20] sm:$0xe] }
  0x49   : > { %v969_v25 = vrot.slane %v967_v14, 4  ;;  %v972_v27 = vrot.slane %v970_v16, 5  ;;  %v959_v29 = vor.u32 %v958_v19, %v955_v18  ;;  %v981_v34 = vshrl.u32 %v1995_v21, 16  ;;  %v246_v14 = vld [vmem:[%s2462_s14 + $0x20] sm:$0xf] }
  0x4a   : > { %v978_v30 = vrot.slane %v976_v20, 5  ;;  %2179 = vmatmul.mubr.msk.bf16.vlgmr.msra.gmra.mxu1 %vm283_vm2, %v2312_v3  ;;  %v951_v35 = vsel %vm2500_vm8, %v946_v23, %v950_v5  ;;  %v984_v37 = vshll.u32 %v1995_v21, 16  ;;  %v990_v38 = vshll.u32 %v2612_v28, 16  ;;  %v2011_v16 = vld [vmem:[%s2449_s4 + $0x28] sm:$0xe] }
  0x4b   : > { %v973_v36 = vor.u32 %v972_v27, %v969_v25  ;;  %v2000_v42 = vcombine.low %v937_v17, %v951_v35  ;;  %2197 = vmatpush3.bf16.msra.mxu1 %v1189_v62  ;;  %2182 = vmatprep.mubr.msk.bf16.mxu1 %vm283_vm2, %v2313_v12  ;;  %v960_v43 = vrot.slane %v959_v29, 4  ;;  %v983_v44 = vrot.slane %v981_v34, 4  ;;  %v2012_v17 = vld [vmem:[%s2449_s4 + $0x30] sm:$0xe]  ;;  %v2013_v29 = vld [vmem:[%s2449_s4 + $0x38] sm:$0xe] }
  0x4c   : > { %v995_v45 = vshrl.u32 %v1997_v31, 16  ;;  %v986_v47 = vrot.slane %v984_v37, 5  ;;  %v992_v48 = vrot.slane %v990_v38, 5  ;;  %v998_v49 = vshll.u32 %v1997_v31, 16  ;;  %v2315_v20 = vld [vmem:[%s2449_s4 + $0x10] ss:$8 sps:$4 sm:$0xff]  }
  0x4d   : > { %v974_v46 = vrot.slane %v973_v36, 4  ;;  %2189 = vmatmul.mubr.msk.bf16.vlgmr.msra.gmra.mxu0 %vm283_vm2, %v2000_v42  ;;  %v965_v50 = vsel %vm2500_vm8, %v960_v43, %v964_v24  ;;  %v1004_v53 = vshll.u32 %v2616_v32, 16  ;;  %v2015_v54 = vrot.slane %v2007_v39, 9  ;;  %v2048_v42 = vld [vmem:[%s2449_s4 + $0x14] sm:$0x1] }
  0x4e   : > { %v997_v52 = vrot.slane %v995_v45, 4  ;;  %2207 = vmatpush3.bf16.msra.mxu0 %v1306_v6  ;;  %v987_v56 = vor.u32 %v986_v47, %v983_v44  ;;  %v1000_v57 = vrot.slane %v998_v49, 5  ;;  %v1134_v59 = vrot.slane %v2551_v1, 5  ;;  %v2049_v43 = vld [vmem:[%s2449_s4 + $0x18] sm:$0xf] }
  0x4f   : > { %v979_v55 = vsel %vm2500_vm8, %v974_v46, %v978_v30  ;;  %v1006_v63 = vrot.slane %v1004_v53, 5  ;;  %v2016_v2 = vrot.slane %v2008_v41, 9  ;;  %v1138_v3 = vrot.slane %v2560_v15, 5  ;;  %v245_v15 = vld [vmem:[%s2462_s14 + $0x1c] sm:$0xf]  ;;  %2247 = vmatprep.subr.msk.bf16.mxu0 %vm296_vm1, %v246_v14 }
  0x50   : > { %v2001_v62 = vcombine.low %v965_v50, %v979_v55  ;;  %v988_v4 = vrot.slane %v987_v56, 4  ;;  %v1001_v5 = vor.u32 %v1000_v57, %v997_v52  ;;  %v1135_v6 = vsel %vm2488_vm7, %v2015_v54, %v1134_v59  ;;  %2246 = vmatprep.subr.msk.bf16.mxu1 %vm296_vm1, %v245_v15  ;;  %v2014_v30 = vld [vmem:[%s2449_s4 + $0x40] sm:$0xe]  ;;  %v2050_v44 = vld [vmem:[%s2449_s4 + $0x1c] sm:$0x1] }
  0x51   : > { %v2017_v7 = vrot.slane %v2009_v60, 9  ;;  %v1139_v1 = vsel %vm2488_vm7, %v2016_v2, %v1138_v3  ;;  %v1142_v8 = vrot.slane %v2570_v26, 5  ;;  %v2018_v9 = vrot.slane %v2010_v61, 9  ;;  %v2316_v45 = vld [vmem:[%s2449_s4 + $0x20] ss:$8 sps:$4 sm:$0xff]  }
  0x52   : > { %2192 = vmatprep.mubr.msk.bf16.mxu0 %vm283_vm2, %v2001_v62  ;;  %v1146_v10 = vrot.slane %v2575_v33, 5  ;;  %2183 = vmatmul.mubr.msk.bf16.gmra.mxu1 %vm283_vm2, %v2314_v51  ;;  %v993_v11 = vsel %vm2500_vm8, %v988_v4, %v992_v48  ;;  %v1002_v12 = vrot.slane %v1001_v5, 4  ;;  %v2023_v13 = vcombine.low %v1135_v6, %v1139_v1  ;;  %v2071_v50 = vld [vmem:[%s2449_s4 + $0x10] sm:$0xe]  ;;  %v2072_v55 = vld [vmem:[%s2449_s4 + $0x18] sm:$0xe] }
  0x53   : > { %v1143_v26 = vsel %vm2488_vm7, %v2017_v7, %v1142_v8  ;;  %v2019_v18 = vrot.slane %v2011_v16, 9  ;;  %v1150_v21 = vrot.slane %v2590_v58, 5  ;;  %v2020_v23 = vrot.slane %v2012_v17, 9  ;;  %v2317_v51 = vld [vmem:[%s2449_s4 + $0x30] ss:$8 sps:$4 sm:$0xff]  }
  0x54   : > { %v1147_v33 = vsel %vm2488_vm7, %v2018_v9, %v1146_v10  ;;  %v1007_v19 = vsel %vm2500_vm8, %v1002_v12, %v1006_v63  ;;  %2198 = vmatprep.mubr.msk.bf16.mxu1 %vm283_vm2, %v2023_v13  ;;  %v1154_v27 = vrot.slane %v2598_v0, 5  ;;  %v1158_v31 = vrot.slane %v2612_v28, 5  ;;  %v2047_v28 = vld [vmem:[%s2449_s4 + $0x10] sm:$0xf]  ;;  %v2051_v62 = vld [vmem:[%s2449_s4 + $0x20] sm:$0xf] }
  0x55   : > { %v2002_v24 = vcombine.low %v993_v11, %v1007_v19  ;;  %v2024_v25 = vcombine.low %v1143_v26, %v1147_v33  ;;  %v1151_v34 = vsel %vm2488_vm7, %v2019_v18, %v1150_v21  ;;  %v2021_v35 = vrot.slane %v2013_v29, 9  ;;  %v2052_v5 = vld [vmem:[%s2449_s4 + $0x24] sm:$0x1]  ;;  %v2053_v8 = vld [vmem:[%s2449_s4 + $0x28] sm:$0xf] }
  0x56   : > { %v2022_v36 = vrot.slane %v2014_v30, 9  ;;  %v1162_v58 = vrot.slane %v2616_v32, 5  ;;  %v1534_v37 = vsel %vm296_vm1, %v245_v15, 0  ;;  %v1690_v0 = vsel %vm296_vm1, %v246_v14, 0  ;;  %v2054_v15 = vld [vmem:[%s2449_s4 + $0x2c] sm:$0x1] }
  0x57   : > { %2193 = vmatmul.mubr.msk.bf16.gmra.mxu0 %vm283_vm2, %v2002_v24  ;;  %v1155_v38 = vsel %vm2488_vm7, %v2020_v23, %v1154_v27  ;;  %v1159_v41 = vsel %vm2488_vm7, %v2021_v35, %v1158_v31  ;;  %v1398_v47 = vshrl.u32 %v2047_v28, 16  ;;  %v1401_v48 = vshll.u32 %v2047_v28, 16  ;;  %v2073_v17 = vld [vmem:[%s2449_s4 + $0x20] sm:$0xe]  ;;  %v2074_v23 = vld [vmem:[%s2449_s4 + $0x28] sm:$0xe] }
  0x58   : > { %2208 = vmatprep.mubr.msk.bf16.mxu0 %vm283_vm2, %v2315_v20  ;;  %v2025_v39 = vcombine.low %v1151_v34, %v1155_v38  ;;  %v1163_v32 = vsel %vm2488_vm7, %v2022_v36, %v1162_v58  ;;  %v1407_v49 = vshll.u32 %v2048_v42, 16  ;;  %v1412_v52 = vshrl.u32 %v2049_v43, 16  ;;  %v2055_v30 = vld [vmem:[%s2449_s4 + $0x30] sm:$0xf]  ;;  %v2056_v58 = vld [vmem:[%s2449_s4 + $0x34] sm:$0x1] }
  0x59   : > { %v2026_v46 = vcombine.low %v1159_v41, %v1163_v32  ;;  %v1415_v53 = vshll.u32 %v2049_v43, 16  ;;  %v1421_v54 = vshll.u32 %v2050_v44, 16  ;;  %v2079_v56 = vrot.slane %v2071_v50, 9 }
  0x5a   : > { %2199 = vmatmul.mubr.msk.bf16.vlgmr.msra.gmra.mxu1 %vm283_vm2, %v2024_v25  ;;  %v1400_v57 = vrot.slane %v1398_v47, 4  ;;  %v1403_v59 = vrot.slane %v1401_v48, 5  ;;  %v1409_v60 = vrot.slane %v1407_v49, 5  ;;  %v1635_v61 = vrot.slane %v2048_v42, 5 }
  0x5b   : > { %2217 = vmatpush3.bf16.msra.mxu1 %v1534_v37  ;;  %2202 = vmatprep.mubr.msk.bf16.mxu1 %vm283_vm2, %v2025_v39  ;;  %v1414_v63 = vrot.slane %v1412_v52, 4  ;;  %v1417_v2 = vrot.slane %v1415_v53, 5  ;;  %v1423_v3 = vrot.slane %v1421_v54, 5  ;;  %v2080_v4 = vrot.slane %v2072_v55, 9  ;;  %v2057_v37 = vld [vmem:[%s2449_s4 + $0x38] sm:$0xf] }
  0x5c   : > { %v1404_v6 = vor.u32 %v1403_v59, %v1400_v57  ;;  %v1636_v7 = vsel %vm2488_vm7, %v2079_v56, %v1635_v61  ;;  %v1639_v1 = vrot.slane %v2050_v44, 5  ;;  %v1426_v9 = vshrl.u32 %v2051_v62, 16  ;;  %v2075_v54 = vld [vmem:[%s2449_s4 + $0x30] sm:$0xe]  ;;  %v2076_v55 = vld [vmem:[%s2449_s4 + $0x38] sm:$0xe] }
  0x5d   : > { %v1418_v10 = vor.u32 %v1417_v2, %v1414_v63  ;;  %v1429_v11 = vshll.u32 %v2051_v62, 16  ;;  %v1435_v12 = vshll.u32 %v2052_v5, 16  ;;  %v1440_v13 = vshrl.u32 %v2053_v8, 16  ;;  %v2059_v61 = vld [vmem:[%s2449_s4 + $0x40] sm:$0xf] }
  0x5e   : > { %v1405_v14 = vrot.slane %v1404_v6, 4  ;;  %v1640_v16 = vsel %vm2488_vm7, %v2080_v4, %v1639_v1  ;;  %v1428_v26 = vrot.slane %v1426_v9, 4  ;;  %v1443_v33 = vshll.u32 %v2053_v8, 16  ;;  %v2060_v4 = vld [vmem:[%s2449_s4 + $0x44] sm:$0x1] }
  0x5f   : > { %2209 = vmatmul.mubr.msk.bf16.vlgmr.msra.gmra.mxu0 %vm283_vm2, %v2316_v45  ;;  %v1419_v18 = vrot.slane %v1418_v10, 4  ;;  %v2087_v19 = vcombine.low %v1636_v7, %v1640_v16  ;;  %v1431_v20 = vrot.slane %v1429_v11, 5  ;;  %v1437_v21 = vrot.slane %v1435_v12, 5  ;;  %v2061_v8 = vld [vmem:[%s2449_s4 + $0x48] sm:$0xf] }
  0x60   : > { %2227 = vmatpush3.bf16.msra.mxu0 %v1690_v0  ;;  %2212 = vmatprep.mubr.msk.bf16.mxu0 %vm283_vm2, %v2317_v51  ;;  %v1410_v24 = vsel %vm2500_vm8, %v1405_v14, %v1409_v60  ;;  %v1442_v25 = vrot.slane %v1440_v13, 4  ;;  %v1445_v27 = vrot.slane %v1443_v33, 5  ;;  %v1449_v29 = vshll.u32 %v2054_v15, 16  ;;  %v2318_v0 = vld [vmem:[%s2449_s4 + $0x40] ss:$8 sps:$4 sm:$0xff]  }
  0x61   : > { %v1424_v31 = vsel %vm2500_vm8, %v1419_v18, %v1423_v3  ;;  %v1432_v34 = vor.u32 %v1431_v20, %v1428_v26  ;;  %v2081_v35 = vrot.slane %v2073_v17, 9  ;;  %v1643_v36 = vrot.slane %v2052_v5, 5  ;;  %v2062_v14 = vld [vmem:[%s2449_s4 + $0x4c] sm:$0x1]  ;;  %v2077_v20 = vld [vmem:[%s2449_s4 + $0x40] sm:$0xe] }
  0x62   : > { %2203 = vmatmul.mubr.msk.bf16.gmra.mxu1 %vm283_vm2, %v2026_v46  ;;  %v2063_v38 = vcombine.low %v1410_v24, %v1424_v31  ;;  %v1446_v28 = vor.u32 %v1445_v27, %v1442_v25  ;;  %v1451_v39 = vrot.slane %v1449_v29, 5  ;;  %v2082_v41 = vrot.slane %v2074_v23, 9  ;;  %v2058_v46 = vld [vmem:[%s2449_s4 + $0x3c] sm:$0x1]  ;;  %v2078_v25 = vld [vmem:[%s2449_s4 + $0x48] sm:$0xe] }
  0x63   : > { %v1433_v32 = vrot.slane %v1432_v34, 4  ;;  %v1644_v42 = vsel %vm2488_vm7, %v2081_v35, %v1643_v36  ;;  %v1647_v43 = vrot.slane %v2054_v15, 5  ;;  %v1454_v44 = vshrl.u32 %v2055_v30, 16 }
  0x64   : > { %2218 = vmatprep.mubr.msk.bf16.mxu1 %vm283_vm2, %v2063_v38  ;;  %v1447_v45 = vrot.slane %v1446_v28, 4  ;;  %v1457_v47 = vshll.u32 %v2055_v30, 16  ;;  %v1463_v48 = vshll.u32 %v2056_v58, 16  ;;  %v1468_v49 = vshrl.u32 %v2057_v37, 16 }
  0x65   : > { %v1438_v50 = vsel %vm2500_vm8, %v1433_v32, %v1437_v21  ;;  %v1648_v51 = vsel %vm2488_vm7, %v2082_v41, %v1647_v43  ;;  %v1456_v52 = vrot.slane %v1454_v44, 4  ;;  %v1471_v53 = vshll.u32 %v2057_v37, 16 }
  0x66   : > { %v1452_v56 = vsel %vm2500_vm8, %v1447_v45, %v1451_v39  ;;  %v2088_v57 = vcombine.low %v1644_v42, %v1648_v51  ;;  %v1459_v59 = vrot.slane %v1457_v47, 5  ;;  %v1465_v60 = vrot.slane %v1463_v48, 5 }
  0x67   : > { %2213 = vmatmul.mubr.msk.bf16.gmra.mxu0 %vm283_vm2, %v2318_v0  ;;  %v2064_v62 = vcombine.low %v1438_v50, %v1452_v56  ;;  %v1470_v63 = vrot.slane %v1468_v49, 4  ;;  %v1473_v2 = vrot.slane %v1471_v53, 5  ;;  %v1477_v3 = vshll.u32 %v2058_v46, 16 }
  0x68   : > { %2228 = vmatprep.mubr.msk.bf16.mxu0 %vm283_vm2, %v2087_v19  ;;  %v1460_v5 = vor.u32 %v1459_v59, %v1456_v52  ;;  %v2083_v6 = vrot.slane %v2075_v54, 9  ;;  %v1651_v7 = vrot.slane %v2056_v58, 5  ;;  %v2084_v1 = vrot.slane %v2076_v55, 9 }
  0x69   : > { %v1474_v9 = vor.u32 %v1473_v2, %v1470_v63  ;;  %v1479_v10 = vrot.slane %v1477_v3, 5  ;;  %v1655_v15 = vrot.slane %v2058_v46, 5  ;;  %v1482_v11 = vshrl.u32 %v2059_v61, 16 }
  0x6a   : > { %2219 = vmatmul.mubr.msk.bf16.vlgmr.msra.gmra.mxu1 %vm283_vm2, %v2064_v62  ;;  %v1461_v12 = vrot.slane %v1460_v5, 4  ;;  %v1652_v13 = vsel %vm2488_vm7, %v2083_v6, %v1651_v7  ;;  %v1485_v16 = vshll.u32 %v2059_v61, 16  ;;  %v1491_v26 = vshll.u32 %v2060_v4, 16 }
  0x6b   : > { %v1475_v33 = vrot.slane %v1474_v9, 4  ;;  %v1656_v17 = vsel %vm2488_vm7, %v2084_v1, %v1655_v15  ;;  %v1484_v18 = vrot.slane %v1482_v11, 4  ;;  %v1496_v19 = vshrl.u32 %v2061_v8, 16 }
  0x6c   : > { %v1466_v21 = vsel %vm2500_vm8, %v1461_v12, %v1465_v60  ;;  %v2089_v23 = vcombine.low %v1652_v13, %v1656_v17  ;;  %v1487_v24 = vrot.slane %v1485_v16, 5  ;;  %v1499_v30 = vshll.u32 %v2061_v8, 16  ;;  %v249_v17 = vld [vmem:[#allocation2 + $0x10] sm:$0xff] }
  0x6d   : > { %v1480_v27 = vsel %vm2500_vm8, %v1475_v33, %v1479_v10  ;;  %v1498_v29 = vrot.slane %v1496_v19, 4  ;;  %v1505_v31 = vshll.u32 %v2062_v14, 16  ;;  %v2085_v36 = vrot.slane %v2077_v20, 9  ;;  %v247_v19 = vld [vmem:[#allocation2] sm:$0xff] }
  0x6e   : > { %v2065_v34 = vcombine.low %v1466_v21, %v1480_v27  ;;  %v1488_v35 = vor.u32 %v1487_v24, %v1484_v18  ;;  %v1659_v58 = vrot.slane %v2060_v4, 5  ;;  %v1493_v37 = vrot.slane %v1491_v26, 5  ;;  %v250_v24 = vld [vmem:[#allocation2 + $0x18] sm:$0xff] }
  0x6f   : > { %2229 = vmatmul.mubr.msk.bf16.vlgmr.msra.gmra.mxu0 %vm283_vm2, %v2088_v57  ;;  %v1501_v0 = vrot.slane %v1499_v30, 5  ;;  %v2086_v38 = vrot.slane %v2078_v25, 9  ;;  %v1663_v28 = vrot.slane %v2062_v14, 5  ;;  %v1507_v42 = vrot.slane %v1505_v31, 5  ;;  %v248_v31 = vld [vmem:[#allocation2 + $0x8] sm:$0xff] }
  0x70   : > { %2232 = vmatprep.mubr.msk.bf16.mxu0 %vm283_vm2, %v2089_v23  ;;  %2222 = vmatprep.mubr.msk.bf16.mxu1 %vm283_vm2, %v2065_v34  ;;  %v1489_v39 = vrot.slane %v1488_v35, 4  ;;  %v1660_v41 = vsel %vm2488_vm7, %v2085_v36, %v1659_v58 }
  0x71   : > { %v1502_v32 = vor.u32 %v1501_v0, %v1498_v29  ;;  %v1664_v43 = vsel %vm2488_vm7, %v2086_v38, %v1663_v28 }
  0x72   : > { %v2090_v44 = vcombine.low %v1660_v41, %v1664_v43  ;;  %v1494_v45 = vsel %vm2500_vm8, %v1489_v39, %v1493_v37 }
  0x73   : > { %v1503_v46 = vrot.slane %v1502_v32, 4 }
  0x75   : > { %v1508_v47 = vsel %vm2500_vm8, %v1503_v46, %v1507_v42 }
  0x76   : > { %v2066_v48 = vcombine.low %v1494_v45, %v1508_v47 }
  0x77   : > { %2233 = vmatmul.mubr.msk.bf16.gmra.mxu0 %vm283_vm2, %v2090_v44 }
  0x78   : > { %2223 = vmatmul.mubr.msk.bf16.gmra.mxu1 %vm283_vm2, %v2066_v48 }
  0xe5   : > { %v2150_v49 = vpop.f32.mrf.mxu0  ;;  %v2751_v50 = vpop.f32.mrf.mxu1 }
  0xe6   : > { %v367_v21 = vadd.f32 %v2150_v49, %v249_v17  ;;  %v253_v49 = vld [vmem:[#allocation2 + $0x30] sm:$0xff] }
  0xe7   : > { %v334_v51 = vpop.f32.mrf.mxu0  ;;  %v2753_v52 = vpop.f32.mrf.mxu1 }
  0xe8   : > { %v365_v27 = vadd.f32 %v334_v51, %v247_v19  ;;  %v251_v19 = vld [vmem:[#allocation2 + $0x20] sm:$0xff] }
  0xe9   : > { %v2151_v22 = vpop.f32.mrf.mxu0  ;;  %v2755_v53 = vpop.f32.mrf.mxu1 }
  0xea   : > { %v368_v35 = vadd.f32 %v2151_v22, %v250_v24 }
  0xeb   : > { %v337_v54 = vpop.f32.mrf.mxu0  ;;  %v2757_v55 = vpop.f32.mrf.mxu1 }
  0xec   : > { %v366_v0 = vadd.f32 %v337_v54, %v248_v31 }
  0xf2   : > { %v2170_v56 = vpop.f32.mrf.mxu0 }
  0xf3   : > { %v2160_v40 = vpop.f32.mrf.mxu1 }
  0xf4   : > { %v724_v57 = vpop.f32.mrf.mxu0  ;;  %v598_v29 = vadd.f32 %v2160_v40, %v367_v21 }
  0xf5   : > { %v565_v59 = vpop.f32.mrf.mxu1 }
  0xf6   : > { %v2171_v60 = vpop.f32.mrf.mxu0  ;;  %v596_v36 = vadd.f32 %v565_v59, %v365_v27  ;;  %v757_v38 = vadd.f32 %v2170_v56, %v598_v29  ;;  %v371_v56 = vadd.f32 %v2751_v50, %v253_v49 }
  0xf7   : > { %v2161_v61 = vpop.f32.mrf.mxu1 }
  0xf8   : > { %v727_v62 = vpop.f32.mrf.mxu0  ;;  %v599_v28 = vadd.f32 %v2161_v61, %v368_v35  ;;  %v755_v32 = vadd.f32 %v724_v57, %v596_v36  ;;  %v254_v61 = vld [vmem:[#allocation2 + $0x38] sm:$0xff] }
  0xf9   : > { %v568_v63 = vpop.f32.mrf.mxu1 }
  0xfa   : > { %v597_v42 = vadd.f32 %v568_v63, %v366_v0  ;;  %v758_v46 = vadd.f32 %v2171_v60, %v599_v28  ;;  %v369_v60 = vadd.f32 %v2753_v52, %v251_v19 }
  0xfc   : > { %v756_v22 = vadd.f32 %v727_v62, %v597_v42 }
  0xff   : > { %v2759_v2 = vpop.f32.mrf.mxu0 }
 0x101   : > { %v2761_v3 = vpop.f32.mrf.mxu0 }
 0x102   : > { %v2763_v4 = vpop.f32.mrf.mxu1 }
 0x103   : > { %v2767_v6 = vpop.f32.mrf.mxu0  ;;  %v602_v27 = vadd.f32 %v2763_v4, %v371_v56 }
 0x104   : > { %v2765_v5 = vpop.f32.mrf.mxu1 }
 0x105   : > { %v2773_v8 = vpop.f32.mrf.mxu0  ;;  %v600_v35 = vadd.f32 %v2765_v5, %v369_v60 }
 0x106   : > { %v2769_v7 = vpop.f32.mrf.mxu1 }
 0x107   : > { %v759_v5 = vadd.f32 %v2761_v3, %v600_v35 }
 0x108   : > { %v2771_v1 = vpop.f32.mrf.mxu1 }
 0x10a   : > { %v2180_v9 = vpop.f32.mrf.mxu1 }
 0x10b   : > { %v874_v43 = vadd.f32 %v2180_v9, %v757_v38  ;;  %v761_v38 = vadd.f32 %v2759_v2, %v602_v27 }
 0x10c   : > { %v841_v10 = vpop.f32.mrf.mxu1 }
 0x10d   : > { %v2190_v15 = vpop.f32.mrf.mxu0  ;;  %v872_v47 = vadd.f32 %v841_v10, %v755_v32  ;;  %v252_v10 = vld [vmem:[#allocation2 + $0x28] sm:$0xff] }
 0x10e   : > { %v2181_v11 = vpop.f32.mrf.mxu1  ;;  %v1102_v40 = vadd.f32 %v2190_v15, %v874_v43 }
 0x10f   : > { %v1069_v12 = vpop.f32.mrf.mxu0  ;;  %v875_v59 = vadd.f32 %v2181_v11, %v758_v46  ;;  %v372_v11 = vadd.f32 %v2755_v53, %v254_v61 }
 0x110   : > { %v844_v13 = vpop.f32.mrf.mxu1  ;;  %v1100_v21 = vadd.f32 %v1069_v12, %v872_v47 }
 0x111   : > { %v2191_v14 = vpop.f32.mrf.mxu0  ;;  %v873_v57 = vadd.f32 %v844_v13, %v756_v22  ;;  %v603_v0 = vadd.f32 %v2769_v7, %v372_v11 }
 0x112   : > { %v2775_v16 = vpop.f32.mrf.mxu1  ;;  %v1103_v29 = vadd.f32 %v2191_v14, %v875_v59 }
 0x113   : > { %v1072_v26 = vpop.f32.mrf.mxu0 }
 0x114   : > { %v2777_v33 = vpop.f32.mrf.mxu1  ;;  %v1101_v50 = vadd.f32 %v1072_v26, %v873_v57  ;;  %v878_v26 = vadd.f32 %v2775_v16, %v761_v38 }
 0x115   : > { %v876_v43 = vadd.f32 %v2777_v33, %v759_v5 }
 0x116   : > { %v2779_v18 = vpop.f32.mrf.mxu1 }
 0x117   : > { %v2781_v20 = vpop.f32.mrf.mxu0 }
 0x118   : > { %v2783_v23 = vpop.f32.mrf.mxu1  ;;  %v1106_v49 = vadd.f32 %v2781_v20, %v878_v26 }
 0x119   : > { %v2785_v25 = vpop.f32.mrf.mxu0 }
 0x11a   : > { %v2200_v30 = vpop.f32.mrf.mxu1 }
 0x11b   : > { %v2787_v34 = vpop.f32.mrf.mxu0  ;;  %v1258_v63 = vadd.f32 %v2200_v30, %v1102_v40  ;;  %v370_v30 = vadd.f32 %v2757_v55, %v252_v10  ;;  %v762_v55 = vadd.f32 %v2767_v6, %v603_v0  ;;  %v1104_v40 = vadd.f32 %v2785_v25, %v876_v43 }
 0x11c   : > { %v1225_v58 = vpop.f32.mrf.mxu1 }
 0x11d   : > { %v2789_v37 = vpop.f32.mrf.mxu0  ;;  %v1256_v62 = vadd.f32 %v1225_v58, %v1100_v21  ;;  %v601_v53 = vadd.f32 %v2771_v1, %v370_v30  ;;  %v879_v3 = vadd.f32 %v2779_v18, %v762_v55 }
 0x11e   : > { %v2201_v39 = vpop.f32.mrf.mxu1 }
 0x11f   : > { %v2210_v41 = vpop.f32.mrf.mxu0  ;;  %v1259_v12 = vadd.f32 %v2201_v39, %v1103_v29  ;;  %v760_v47 = vadd.f32 %v2773_v8, %v601_v53 }
 0x120   : > { %v1228_v44 = vpop.f32.mrf.mxu1  ;;  %v1375_v36 = vadd.f32 %v2210_v41, %v1258_v63 }
 0x121   : > { %v1342_v45 = vpop.f32.mrf.mxu0  ;;  %v1257_v14 = vadd.f32 %v1228_v44, %v1101_v50  ;;  %v877_v6 = vadd.f32 %v2783_v23, %v760_v47 }
 0x122   : > { %v2204_v48 = vpop.f32.mrf.mxu1  ;;  %v1373_v4 = vadd.f32 %v1342_v45, %v1256_v62 }
 0x123   : > { %v2211_v51 = vpop.f32.mrf.mxu0  ;;  %v1262_v59 = vadd.f32 %v2204_v48, %v1106_v49  ;;  %v1105_v21 = vadd.f32 %v2789_v37, %v877_v6 }
 0x124   : > { %v1241_v17 = vpop.f32.mrf.mxu1  ;;  %v1376_v39 = vadd.f32 %v2211_v51, %v1259_v12 }
 0x125   : > { %v1345_v54 = vpop.f32.mrf.mxu0  ;;  %v1260_v56 = vadd.f32 %v1241_v17, %v1104_v40 }
 0x126   : > { %v2205_v9 = vpop.f32.mrf.mxu1  ;;  %v1374_v2 = vadd.f32 %v1345_v54, %v1257_v14  ;;  %v1107_v54 = vadd.f32 %v2787_v34, %v879_v3 }
 0x127   : > { %v2214_v24 = vpop.f32.mrf.mxu0 }
 0x128   : > { %v1244_v15 = vpop.f32.mrf.mxu1  ;;  %v1379_v20 = vadd.f32 %v2214_v24, %v1262_v59  ;;  %v1263_v57 = vadd.f32 %v2205_v9, %v1107_v54 }
 0x129   : > { %v1358_v31 = vpop.f32.mrf.mxu0  ;;  %v1261_v10 = vadd.f32 %v1244_v15, %v1105_v21 }
 0x12a   : > { %v2220_v13 = vpop.f32.mrf.mxu1  ;;  %v1377_v60 = vadd.f32 %v1358_v31, %v1260_v56 }
 0x12b   : > { %v2215_v52 = vpop.f32.mrf.mxu0  ;;  %v1603_v58 = vadd.f32 %v2220_v13, %v1375_v36 }
 0x12c   : > { %v1570_v28 = vpop.f32.mrf.mxu1  ;;  %v1380_v29 = vadd.f32 %v2215_v52, %v1263_v57 }
 0x12d   : > { %v1361_v32 = vpop.f32.mrf.mxu0  ;;  %v1601_v41 = vadd.f32 %v1570_v28, %v1373_v4 }
 0x12e   : > { %v2221_v42 = vpop.f32.mrf.mxu1  ;;  %v1378_v35 = vadd.f32 %v1361_v32, %v1261_v10 }
 0x12f   : > { %v2230_v7 = vpop.f32.mrf.mxu0  ;;  %v1604_v44 = vadd.f32 %v2221_v42, %v1376_v39 }
 0x130   : > { %v1759_v45 = vadd.f32 %v2230_v7, %v1603_v58  ;;  %v1573_v46 = vpop.f32.mrf.mxu1 }
 0x131   : > { %v1726_v1 = vpop.f32.mrf.mxu0  ;;  %v1602_v51 = vadd.f32 %v1573_v46, %v1374_v2 }
 0x132   : > { %v1757_v16 = vadd.f32 %v1726_v1, %v1601_v41 }
 0x133   : > { %v2231_v22 = vpop.f32.mrf.mxu0 }
 0x134   : > { %v1760_v33 = vadd.f32 %v2231_v22, %v1604_v44 }
 0x135   : > { %v1729_v19 = vpop.f32.mrf.mxu0 }
 0x136   : > { %v1758_v61 = vadd.f32 %v1729_v19, %v1602_v51 }
 0x137   : > { %v2234_v8 = vpop.f32.mrf.mxu0 }
 0x138   : > { %v2224_v18 = vpop.f32.mrf.mxu1 }
 0x139   : > { %v1742_v63 = vpop.f32.mrf.mxu0  ;;  %v1607_v27 = vadd.f32 %v2224_v18, %v1379_v20 }
 0x13a   : > { %v1586_v25 = vpop.f32.mrf.mxu1 }
 0x13b   : > { %v1763_v23 = vadd.f32 %v2234_v8, %v1607_v27  ;;  %v1605_v48 = vadd.f32 %v1586_v25, %v1377_v60  ;;  %v2235_v11 = vpop.f32.mrf.mxu0 }
 0x13c   : > { %v2225_v62 = vpop.f32.mrf.mxu1 }
 0x13d   : > { %v1761_v34 = vadd.f32 %v1742_v63, %v1605_v48  ;;  %v1608_v17 = vadd.f32 %v2225_v62, %v1380_v29  ;;  %v1745_v37 = vpop.f32.mrf.mxu0  ;;  %1768 = sbr.rel (%p2095_p10) target bundleno = 326 (0x146), region = 40 }
 0x13e   : > { %v1589_v50 = vpop.f32.mrf.mxu1 }
 0x13f   : > { %v1764_v36 = vadd.f32 %v2235_v11, %v1608_v17  ;;  %v1606_v12 = vadd.f32 %v1589_v50, %v1378_v35 }
 0x141   : > { %v1762_v24 = vadd.f32 %v1745_v37, %v1606_v12 }
 0x142   : > { %1769 = vst.msk [vmem:[#allocation2] sm:$0xff] %vm283_vm2, %v1757_v16  ;;  %1770 = vst.msk [vmem:[#allocation2 + $0x8] sm:$0xff] %vm283_vm2, %v1758_v61 }
 0x143   : > { %1771 = vst.msk [vmem:[#allocation2 + $0x10] sm:$0xff] %vm283_vm2, %v1759_v45  ;;  %1772 = vst.msk [vmem:[#allocation2 + $0x18] sm:$0xff] %vm283_vm2, %v1760_v33 }
 0x144   : > { %1773 = vst.msk [vmem:[#allocation2 + $0x20] sm:$0xff] %vm283_vm2, %v1761_v34  ;;  %1774 = vst.msk [vmem:[#allocation2 + $0x28] sm:$0xff] %vm283_vm2, %v1762_v24 }
 0x145   : > { %1775 = vst.msk [vmem:[#allocation2 + $0x30] sm:$0xff] %vm283_vm2, %v1763_v23  ;;  %1776 = vst.msk [vmem:[#allocation2 + $0x38] sm:$0xff] %vm283_vm2, %v1764_v36 }
 0x146 PF: > { %p2096_p11 = scmp.ne.s32.totalorder %s2349_s12, 2 }
 0x148   : > { %1780 = sbr.rel (%p2096_p11) target bundleno = 344 (0x158), region = 44 }
 0x14d   : > { %v2097_v9 = vld [vmem:[%s2863_s2] ss:$0 sm:$0xff]  ;;  %vm1812_vm9 = vcmask 60416  }
 0x14e   : > { %v1788_v15 = vadd.f32 %v2097_v9, %v1757_v16  ;;  %v1789_v31 = vadd.f32 %v2097_v9, %v1758_v61  ;;  %v1790_v13 = vadd.f32 %v2097_v9, %v1759_v45  ;;  %v1791_v30 = vadd.f32 %v2097_v9, %v1760_v33 }
 0x14f   : > { %v1792_v0 = vadd.f32 %v2097_v9, %v1761_v34  ;;  %v1793_v52 = vadd.f32 %v2097_v9, %v1762_v24  ;;  %v1794_v38 = vadd.f32 %v2097_v9, %v1763_v23  ;;  %v1795_v4 = vadd.f32 %v2097_v9, %v1764_v36 }
 0x150   : > { %v1796_v14 = vmax.f32 %v1788_v15, 0.0  ;;  %v1797_v58 = vmax.f32 %v1789_v31, 0.0  ;;  %v1798_v28 = vmax.f32 %v1790_v13, 0.0  ;;  %v1799_v53 = vmax.f32 %v1791_v30, 0.0 }
 0x151   : > { %v1800_v32 = vmax.f32 %v1792_v0, 0.0  ;;  %v1801_v5 = vmax.f32 %v1793_v52, 0.0  ;;  %v1802_v26 = vmax.f32 %v1794_v38, 0.0  ;;  %v1803_v39 = vmax.f32 %v1795_v4, 0.0 }
 0x152   : > { %v1804_v41 = vpack.c.bf16 %v1796_v14, %v1796_v14  ;;  %v1805_v42 = vpack.c.bf16 %v1797_v58, %v1797_v58  ;;  %v1806_v55 = vpack.c.bf16 %v1798_v28, %v1798_v28  ;;  %v1807_v7 = vpack.c.bf16 %v1799_v53, %v1799_v53 }
 0x153   : > { %v1808_v43 = vpack.c.bf16 %v1800_v32, %v1800_v32  ;;  %v1809_v2 = vpack.c.bf16 %v1801_v5, %v1801_v5  ;;  %v1810_v45 = vpack.c.bf16 %v1802_v26, %v1802_v26  ;;  %v1811_v44 = vpack.c.bf16 %v1803_v39, %v1803_v39 }
 0x154   : > { %1813 = vst.msk [vmem:[%s2454_s9] sm:$0xf] %vm1812_vm9, %v1804_v41  ;;  %1814 = vst.msk [vmem:[%s2454_s9 + $0x4] sm:$0xf] %vm1812_vm9, %v1805_v42 }
 0x155   : > { %1815 = vst.msk [vmem:[%s2454_s9 + $0x8] sm:$0xf] %vm1812_vm9, %v1806_v55  ;;  %1816 = vst.msk [vmem:[%s2454_s9 + $0xc] sm:$0xf] %vm1812_vm9, %v1807_v7 }
 0x156   : > { %1817 = vst.msk [vmem:[%s2454_s9 + $0x10] sm:$0xf] %vm1812_vm9, %v1808_v43  ;;  %1818 = vst.msk [vmem:[%s2454_s9 + $0x14] sm:$0xf] %vm1812_vm9, %v1809_v2 }
 0x157   : > { %1819 = vst.msk [vmem:[%s2454_s9 + $0x18] sm:$0xf] %vm1812_vm9, %v1810_v45  ;;  %1820 = vst.msk [vmem:[%s2454_s9 + $0x1c] sm:$0xf] %vm1812_vm9, %v1811_v44 }
 0x158 PF: > { %s13_s18 = sadd.s32 1, %s2373_s18   ;;  %s2869_s12 = smov %s2361_s15 }
 0x159   : > { %p10_p12 = scmp.ge.s32.totalorder %s13_s18, 50   ;;  %s2870_s13 = smov %s2365_s16 }
 0x15a   : > { %s2871_s14 = smov %s2369_s17  ;;  %s2872_s15 = smov %s2876_s19 }
 0x15b   : > { %s2873_s16 = smov %s2880_s20  ;;  %s2874_s17 = smov %s2884_s21 }
 0x15c   :  { %12 = sbr.rel (!%p10_p12) target bundleno = 4 (0x4), region = 77 }

// kernel: _lambda_.21
= control target key start
LH: loop header
LB: loop body
LE: loop exit
PB: predicated region body
PF: predicated region fallthrough
CT: control target
= control target key end

     0   :  { %s2096_s15 = smov 0   ;;  %s2697_s0 = inlined_call_operand.vmem [shape: bf16[1024,8], index: 0, kind: input, shape index: {}]   ;;  %s2698_s1 = inlined_call_operand.vmem [shape: bf16[8,32], index: 1, kind: input, shape index: {}]   ;;  %s2699_s2 = inlined_call_operand.vmem [shape: f32[1,32], index: 2, kind: input, shape index: {}]   ;;  %s2700_s3 = inlined_call_operand.vmem [shape: bf16[1024,32], index: 3, kind: input, shape index: {}]   ;;  %s2701_s4 = inlined_call_operand.vmem [shape: bf16[1024,32], index: 4, kind: output, shape index: {}]  }
   0x1 LB: > { %s1555_s16 = sadd.s32 4294967295, %s2069_s15   ;;  %p1559_p0 = scmp.ge.s32.totalorder %s2069_s15, 1  ;;  %s2069_s15 = sphi %s2096_s15, %s14_s15  }
   0x2   : > { %p174_p1 = scmp.lt.s32.totalorder %s2069_s15, 3 }
   0x4   : > { %p175_p2 = pnand %p1559_p0, %p174_p1 }
   0x5   : > { %s1560_s19 = sshll.u32 (!%p175_p2), %s1555_s16, 6 }
   0x6   : > { %178 = sbr.rel (%p175_p2) target bundleno = 310 (0x136), region = 36  ;;  %p206_p3 = scmp.lt.s32.totalorder (!%p175_p2), %s1560_s19, 127 }
   0xb   : > { %v288_v0 = vld [vmem:[%s2698_s1] sm:$0xf]  ;;  %vm553_vm0 = vcmask 1043456   ;;  %s2754_s19 = smov (!%p206_p3, %s1560_s19), 127  ;;  %vm456_vm1 = vcmask 64512   ;;  %vm1422_vm2 = vcmask 257024  }
   0xc   : > { %2021 = vmatprep.subr.msk.bf16.mxu0 %vm553_vm0, %v288_v0  ;;  %2022 = vmatprep.subr.msk.bf16.mxu1 %vm553_vm0, %v288_v0  ;;  %v555_v1 = vsel %vm553_vm0, %v288_v0, 0  ;;  %s2107_s20 = sshll.u32 %s2754_s19, 2 }
   0xd   : > { %1954 = vmatpush3.bf16.msra.mxu0 %v555_v1  ;;  %2020 = vmatpush3.bf16.msra.mxu1 %v555_v1  ;;  %s2113_s23 = scalar_lea.vmem %s2697_s0, %s2107_s20  ;;  %s2183_s26 = scalar_lea.vmem %s2700_s3, %s2107_s20 }
   0xe   : > { %v2031_v2 = vld [vmem:[%s2113_s23] sm:$0xff]   ;;  %v2033_v4 = vld [vmem:[%s2113_s23 + $0x8] sm:$0xff]   ;;  %v2035_v6 = vld [vmem:[%s2113_s23 + $0x10] sm:$0xff]   ;;  %s2367_s5 = scalar_lea.vmem %s2701_s4, %s2107_s20 }
   0xf   : > { %v2032_v3 = vld [vmem:[%s2113_s23 + $0x80] sm:$0xff]   ;;  %1955 = vmatprep.mubr.msk.bf16.mxu0 %vm456_vm1, %v2031_v2  ;;  %v2034_v5 = vld [vmem:[%s2113_s23 + $0x88] sm:$0xff]   ;;  %v2036_v7 = vld [vmem:[%s2113_s23 + $0x90] sm:$0xff]  }
  0x10   : > { %1987 = vmatprep.mubr.msk.bf16.mxu1 %vm456_vm1, %v2032_v3  ;;  %1956 = vmatmul.mubr.msk.bf16.vlgmr.msra.gmra.mxu0 %vm456_vm1, %v2033_v4  ;;  %v2037_v8 = vld [vmem:[%s2113_s23 + $0x18] sm:$0xff]   ;;  %v2039_v10 = vld [vmem:[%s2113_s23 + $0x20] sm:$0xff]   ;;  %v2041_v12 = vld [vmem:[%s2113_s23 + $0x28] sm:$0xff]  }
  0x11   : > { %1988 = vmatmul.mubr.msk.bf16.vlgmr.msra.gmra.mxu1 %vm456_vm1, %v2034_v5  ;;  %1959 = vmatprep.mubr.msk.bf16.mxu0 %vm456_vm1, %v2035_v6  ;;  %v2038_v9 = vld [vmem:[%s2113_s23 + $0x98] sm:$0xff]   ;;  %v2040_v11 = vld [vmem:[%s2113_s23 + $0xa0] sm:$0xff]   ;;  %v2042_v13 = vld [vmem:[%s2113_s23 + $0xa8] sm:$0xff]  }
  0x12   : > { %1991 = vmatprep.mubr.msk.bf16.mxu1 %vm456_vm1, %v2036_v7  ;;  %v2043_v14 = vld [vmem:[%s2113_s23 + $0x30] sm:$0xff]   ;;  %v2045_v16 = vld [vmem:[%s2113_s23 + $0x38] sm:$0xff]   ;;  %v2047_v18 = vld [vmem:[%s2113_s23 + $0x40] sm:$0xff]  }
  0x13   : > { %v2044_v15 = vld [vmem:[%s2113_s23 + $0xb0] sm:$0xff]   ;;  %v2046_v17 = vld [vmem:[%s2113_s23 + $0xb8] sm:$0xff]   ;;  %v2048_v19 = vld [vmem:[%s2113_s23 + $0xc0] sm:$0xff]  }
  0x14   : > { %v2049_v20 = vld [vmem:[%s2113_s23 + $0x48] sm:$0xff]   ;;  %v2051_v22 = vld [vmem:[%s2113_s23 + $0x50] sm:$0xff]   ;;  %v2053_v24 = vld [vmem:[%s2113_s23 + $0x58] sm:$0xff]  }
  0x15   : > { %v2050_v21 = vld [vmem:[%s2113_s23 + $0xc8] sm:$0xff]   ;;  %v2052_v23 = vld [vmem:[%s2113_s23 + $0xd0] sm:$0xff]   ;;  %v2054_v25 = vld [vmem:[%s2113_s23 + $0xd8] sm:$0xff]  }
  0x16   : > { %v2055_v26 = vld [vmem:[%s2113_s23 + $0x60] sm:$0xff]   ;;  %v2057_v28 = vld [vmem:[%s2113_s23 + $0x68] sm:$0xff]   ;;  %v2059_v30 = vld [vmem:[%s2113_s23 + $0x70] sm:$0xff]  }
  0x17   : > { %v2056_v27 = vld [vmem:[%s2113_s23 + $0xe0] sm:$0xff]   ;;  %v2058_v29 = vld [vmem:[%s2113_s23 + $0xe8] sm:$0xff]   ;;  %v2060_v31 = vld [vmem:[%s2113_s23 + $0xf0] sm:$0xff]  }
  0x18   : > { %1960 = vmatmul.mubr.msk.bf16.gmra.mxu0 %vm456_vm1, %v2037_v8  ;;  %v2061_v32 = vld [vmem:[%s2113_s23 + $0x78] sm:$0xff]   ;;  %v2186_v34 = vld [vmem:[%s2183_s26 + $0x8] sm:$0xff]   ;;  %v2192_v36 = vld [vmem:[%s2183_s26] sm:$0xff]  }
  0x19   : > { %1992 = vmatmul.mubr.msk.bf16.gmra.mxu1 %vm456_vm1, %v2038_v9  ;;  %1963 = vmatprep.mubr.msk.bf16.mxu0 %vm456_vm1, %v2039_v10  ;;  %v2062_v33 = vld [vmem:[%s2113_s23 + $0xf8] sm:$0xff]   ;;  %v2189_v35 = vld [vmem:[%s2183_s26 + $0x88] sm:$0xff]   ;;  %v2195_v37 = vld [vmem:[%s2183_s26 + $0x80] sm:$0xff]   ;;  %v1767_v42 = vunpack.c.l.bf16 %v2186_v34  ;;  %v1763_v44 = vunpack.c.l.bf16 %v2192_v36  ;;  %v1768_v47 = vunpack.c.h.bf16 %v2186_v34  ;;  %v1764_v49 = vunpack.c.h.bf16 %v2192_v36 }
  0x1a   : > { %1995 = vmatprep.mubr.msk.bf16.mxu1 %vm456_vm1, %v2040_v11  ;;  %v2198_v38 = vld [vmem:[%s2183_s26 + $0x18] sm:$0xff]   ;;  %v2204_v40 = vld [vmem:[%s2183_s26 + $0x10] sm:$0xff]   ;;  %v1831_v43 = vunpack.c.l.bf16 %v2189_v35  ;;  %v1827_v45 = vunpack.c.l.bf16 %v2195_v37  ;;  %v2214_v46 = vld [vmem:[%s2183_s26 + $0x28] sm:$0xff]   ;;  %v1832_v48 = vunpack.c.h.bf16 %v2189_v35  ;;  %v1828_v50 = vunpack.c.h.bf16 %v2195_v37 }
  0x1b   : > { %v2201_v39 = vld [vmem:[%s2183_s26 + $0x98] sm:$0xff]   ;;  %v2207_v41 = vld [vmem:[%s2183_s26 + $0x90] sm:$0xff]   ;;  %v2221_v51 = vld [vmem:[%s2183_s26 + $0xa8] sm:$0xff]   ;;  %v1775_v54 = vunpack.c.l.bf16 %v2198_v38  ;;  %v1771_v56 = vunpack.c.l.bf16 %v2204_v40  ;;  %v1776_v59 = vunpack.c.h.bf16 %v2198_v38 }
  0x1c   : > { %v2224_v52 = vld [vmem:[%s2183_s26 + $0x20] sm:$0xff]   ;;  %v1839_v55 = vunpack.c.l.bf16 %v2201_v39  ;;  %v1835_v57 = vunpack.c.l.bf16 %v2207_v41  ;;  %v2234_v58 = vld [vmem:[%s2183_s26 + $0x38] sm:$0xff]   ;;  %v2244_v0 = vld [vmem:[%s2183_s26 + $0x30] sm:$0xff]  }
  0x1d   : > { %v2227_v53 = vld [vmem:[%s2183_s26 + $0xa0] sm:$0xff]   ;;  %v2241_v63 = vld [vmem:[%s2183_s26 + $0xb8] sm:$0xff]   ;;  %v2247_v1 = vld [vmem:[%s2183_s26 + $0xb0] sm:$0xff]  }
  0x1e   : > { %v2254_v6 = vld [vmem:[%s2183_s26 + $0x48] sm:$0xff]  }
  0x1f   : > { %v2261_v11 = vld [vmem:[%s2183_s26 + $0xc8] sm:$0xff]  }
  0x20   : > { %1964 = vmatmul.mubr.msk.bf16.gmra.mxu0 %vm456_vm1, %v2041_v12  ;;  %v2264_v12 = vld [vmem:[%s2183_s26 + $0x40] sm:$0xff]  }
  0x21   : > { %1996 = vmatmul.mubr.msk.bf16.gmra.mxu1 %vm456_vm1, %v2042_v13  ;;  %1967 = vmatprep.mubr.msk.bf16.mxu0 %vm456_vm1, %v2043_v14  ;;  %v2267_v13 = vld [vmem:[%s2183_s26 + $0xc0] sm:$0xff]   ;;  %v2333_v14 = vld [vmem:[%s2183_s26 + $0x70] sm:$0xff]  }
  0x22   : > { %1999 = vmatprep.mubr.msk.bf16.mxu1 %vm456_vm1, %v2044_v15  ;;  %v2326_v15 = vld [vmem:[%s2183_s26 + $0xf8] sm:$0xff]  }
  0x28   : > { %1968 = vmatmul.mubr.msk.bf16.gmra.mxu0 %vm456_vm1, %v2045_v16  ;;  %v2323_v16 = vld [vmem:[%s2183_s26 + $0x78] sm:$0xff]  }
  0x29   : > { %2000 = vmatmul.mubr.msk.bf16.gmra.mxu1 %vm456_vm1, %v2046_v17  ;;  %1971 = vmatprep.mubr.msk.bf16.mxu0 %vm456_vm1, %v2047_v18  ;;  %v2274_v18 = vld [vmem:[%s2183_s26 + $0x58] sm:$0xff]  }
  0x2a   : > { %2003 = vmatprep.mubr.msk.bf16.mxu1 %vm456_vm1, %v2048_v19 }
  0x30   : > { %1972 = vmatmul.mubr.msk.bf16.gmra.mxu0 %vm456_vm1, %v2049_v20  ;;  %v2336_v20 = vld [vmem:[%s2183_s26 + $0xf0] sm:$0xff]  }
  0x31   : > { %2004 = vmatmul.mubr.msk.bf16.gmra.mxu1 %vm456_vm1, %v2050_v21  ;;  %1975 = vmatprep.mubr.msk.bf16.mxu0 %vm456_vm1, %v2051_v22  ;;  %v2301_v21 = vld [vmem:[%s2183_s26 + $0xe8] sm:$0xff]  }
  0x32   : > { %2007 = vmatprep.mubr.msk.bf16.mxu1 %vm456_vm1, %v2052_v23  ;;  %v2281_v23 = vld [vmem:[%s2183_s26 + $0xd8] sm:$0xff]  }
  0x38   : > { %1976 = vmatmul.mubr.msk.bf16.gmra.mxu0 %vm456_vm1, %v2053_v24  ;;  %v2284_v24 = vld [vmem:[%s2183_s26 + $0x50] sm:$0xff]  }
  0x39   : > { %2008 = vmatmul.mubr.msk.bf16.gmra.mxu1 %vm456_vm1, %v2054_v25  ;;  %1979 = vmatprep.mubr.msk.bf16.mxu0 %vm456_vm1, %v2055_v26  ;;  %v2287_v25 = vld [vmem:[%s2183_s26 + $0xd0] sm:$0xff]   ;;  %v2304_v26 = vld [vmem:[%s2183_s26 + $0x60] sm:$0xff]  }
  0x3a   : > { %2011 = vmatprep.mubr.msk.bf16.mxu1 %vm456_vm1, %v2056_v27  ;;  %v2307_v27 = vld [vmem:[%s2183_s26 + $0xe0] sm:$0xff]  }
  0x40   : > { %1980 = vmatmul.mubr.msk.bf16.gmra.mxu0 %vm456_vm1, %v2057_v28 }
  0x41   : > { %2012 = vmatmul.mubr.msk.bf16.gmra.mxu1 %vm456_vm1, %v2058_v29  ;;  %1983 = vmatprep.mubr.msk.bf16.mxu0 %vm456_vm1, %v2059_v30  ;;  %v2294_v30 = vld [vmem:[%s2183_s26 + $0x68] sm:$0xff]   ;;  %v2312_v29 = vld [vmem:[%s2699_s2] ss:$0 sm:$0xff] }
  0x42   : > { %2015 = vmatprep.mubr.msk.bf16.mxu1 %vm456_vm1, %v2060_v31 }
  0x48   : > { %1984 = vmatmul.mubr.msk.bf16.gmra.mxu0 %vm456_vm1, %v2061_v32 }
  0x49   : > { %2016 = vmatmul.mubr.msk.bf16.gmra.mxu1 %vm456_vm1, %v2062_v33 }
  0xd0   : > { %v1957_v31 = vpop.f32.mrf.mxu0 }
  0xd1   : > { %v600_v17 = vadd.f32 %v1957_v31, %v2312_v29  ;;  %v1989_v19 = vpop.f32.mrf.mxu1 }
  0xd2   : > { %v728_v32 = vadd.f32 %v1989_v19, %v2312_v29  ;;  %v591_v33 = vpop.f32.mrf.mxu0 }
  0xd3   : > { %v848_v5 = vmax.f32 %v600_v17, 0.0  ;;  %v592_v4 = vadd.f32 %v2312_v29, %v591_v33  ;;  %v719_v31 = vpop.f32.mrf.mxu1 }
  0xd4   : > { %v880_v9 = vmax.f32 %v728_v32, 0.0  ;;  %v720_v8 = vadd.f32 %v2312_v29, %v719_v31  ;;  %v1958_v2 = vpop.f32.mrf.mxu0 }
  0xd5   : > { %v1040_v7 = vadd.f32 %v1767_v42, %v848_v5  ;;  %v846_v17 = vmax.f32 %v592_v4, 0.0  ;;  %v603_v33 = vadd.f32 %v1958_v2, %v2312_v29  ;;  %v1990_v28 = vpop.f32.mrf.mxu1 }
  0xd6   : > { %v1072_v32 = vadd.f32 %v1831_v43, %v880_v9  ;;  %v878_v10 = vmax.f32 %v720_v8, 0.0  ;;  %v731_v31 = vadd.f32 %v1990_v28, %v2312_v29  ;;  %v594_v62 = vpop.f32.mrf.mxu0 }
  0xd7   : > { %v1104_v22 = vmax.f32 %v1040_v7, 0.0  ;;  %v1038_v61 = vadd.f32 %v1763_v44, %v846_v17  ;;  %v849_v42 = vmax.f32 %v603_v33, 0.0  ;;  %v595_v4 = vadd.f32 %v2312_v29, %v594_v62  ;;  %v722_v2 = vpop.f32.mrf.mxu1 }
  0xd8   : > { %v1136_v43 = vmax.f32 %v1072_v32, 0.0  ;;  %v1070_v5 = vadd.f32 %v1827_v45, %v878_v10  ;;  %v881_v8 = vmax.f32 %v731_v31, 0.0  ;;  %v723_v7 = vadd.f32 %v2312_v29, %v722_v2  ;;  %v1961_v9 = vpop.f32.mrf.mxu0 }
  0xd9   : > { %v1699_v28 = vpack.c.bf16 %v1104_v22, %v1104_v22  ;;  %v1102_v44 = vmax.f32 %v1038_v61, 0.0  ;;  %v1041_v62 = vadd.f32 %v1768_v47, %v849_v42  ;;  %v847_v17 = vmax.f32 %v595_v4, 0.0  ;;  %v1993_v33 = vpop.f32.mrf.mxu1 }
  0xda   : > { %v1731_v19 = vpack.c.bf16 %v1136_v43, %v1136_v43  ;;  %v1134_v3 = vmax.f32 %v1070_v5, 0.0  ;;  %v1073_v32 = vadd.f32 %v1832_v48, %v881_v8  ;;  %v879_v60 = vmax.f32 %v723_v7, 0.0  ;;  %v607_v45 = vpop.f32.mrf.mxu0 }
  0xdb   : > { %1425 = vst.msk [vmem:[%s2367_s5 + $0x8] sm:$0xf] %vm1422_vm2, %v1699_v28  ;;  %v1697_v10 = vpack.c.bf16 %v1102_v44, %v1102_v44  ;;  %v1105_v31 = vmax.f32 %v1041_v62, 0.0  ;;  %v1039_v61 = vadd.f32 %v1764_v49, %v847_v17  ;;  %v616_v34 = vadd.f32 %v1961_v9, %v2312_v29  ;;  %v735_v47 = vpop.f32.mrf.mxu1 }
  0xdc   : > { %1457 = vst.msk [vmem:[%s2367_s5 + $0x88] sm:$0xf] %vm1422_vm2, %v1731_v19  ;;  %v1729_v22 = vpack.c.bf16 %v1134_v3, %v1134_v3  ;;  %v1137_v42 = vmax.f32 %v1073_v32, 0.0  ;;  %v1071_v35 = vadd.f32 %v1828_v50, %v879_v60  ;;  %v744_v48 = vadd.f32 %v1993_v33, %v2312_v29  ;;  %v1962_v4 = vpop.f32.mrf.mxu0 }
  0xdd   : > { %1423 = vst.msk [vmem:[%s2367_s5] sm:$0xf] %vm1422_vm2, %v1697_v10  ;;  %v1700_v2 = vpack.c.bf16 %v1105_v31, %v1105_v31  ;;  %v1103_v36 = vmax.f32 %v1039_v61, 0.0  ;;  %v852_v49 = vmax.f32 %v616_v34, 0.0  ;;  %v608_v43 = vadd.f32 %v2312_v29, %v607_v45  ;;  %v1994_v5 = vpop.f32.mrf.mxu1 }
  0xde   : > { %1455 = vst.msk [vmem:[%s2367_s5 + $0x80] sm:$0xf] %vm1422_vm2, %v1729_v22  ;;  %v1732_v3 = vpack.c.bf16 %v1137_v42, %v1137_v42  ;;  %v1135_v19 = vmax.f32 %v1071_v35, 0.0  ;;  %v884_v37 = vmax.f32 %v744_v48, 0.0  ;;  %v736_v50 = vadd.f32 %v2312_v29, %v735_v47  ;;  %v610_v60 = vpop.f32.mrf.mxu0 }
  0xdf   : > { %1426 = vst.msk [vmem:[%s2367_s5 + $0xc] sm:$0xf] %vm1422_vm2, %v1700_v2  ;;  %v1698_v8 = vpack.c.bf16 %v1103_v36, %v1103_v36  ;;  %v1044_v7 = vadd.f32 %v1775_v54, %v852_v49  ;;  %v850_v9 = vmax.f32 %v608_v43, 0.0  ;;  %v619_v28 = vadd.f32 %v1962_v4, %v2312_v29  ;;  %v738_v44 = vpop.f32.mrf.mxu1 }
  0xe0   : > { %1458 = vst.msk [vmem:[%s2367_s5 + $0x8c] sm:$0xf] %vm1422_vm2, %v1732_v3  ;;  %v1730_v62 = vpack.c.bf16 %v1135_v19, %v1135_v19  ;;  %v1076_v17 = vadd.f32 %v1839_v55, %v884_v37  ;;  %v882_v33 = vmax.f32 %v736_v50, 0.0  ;;  %v747_v32 = vadd.f32 %v1994_v5, %v2312_v29  ;;  %v1965_v45 = vpop.f32.mrf.mxu0 }
  0xe1   : > { %1424 = vst.msk [vmem:[%s2367_s5 + $0x4] sm:$0xf] %vm1422_vm2, %v1698_v8  ;;  %v1108_v10 = vmax.f32 %v1044_v7, 0.0  ;;  %v1042_v54 = vadd.f32 %v1771_v56, %v850_v9  ;;  %v853_v31 = vmax.f32 %v619_v28, 0.0  ;;  %v611_v61 = vadd.f32 %v2312_v29, %v610_v60  ;;  %v1997_v34 = vpop.f32.mrf.mxu1 }
  0xe2   : > { %1456 = vst.msk [vmem:[%s2367_s5 + $0x84] sm:$0xf] %vm1422_vm2, %v1730_v62  ;;  %v1140_v47 = vmax.f32 %v1076_v17, 0.0  ;;  %v1074_v55 = vadd.f32 %v1835_v57, %v882_v33  ;;  %v885_v22 = vmax.f32 %v747_v32, 0.0  ;;  %v739_v42 = vadd.f32 %v2312_v29, %v738_v44  ;;  %v623_v35 = vpop.f32.mrf.mxu0 }
  0xe3   : > { %v1703_v48 = vpack.c.bf16 %v1108_v10, %v1108_v10  ;;  %v1106_v4 = vmax.f32 %v1042_v54, 0.0  ;;  %v1045_v56 = vadd.f32 %v1776_v59, %v853_v31  ;;  %v851_v2 = vmax.f32 %v611_v61, 0.0  ;;  %v751_v36 = vpop.f32.mrf.mxu1 }
  0xe4   : > { %v1735_v49 = vpack.c.bf16 %v1140_v47, %v1140_v47  ;;  %v1138_v43 = vmax.f32 %v1074_v55, 0.0  ;;  %v2702_v5 = vunpack.c.h.bf16 %v2201_v39  ;;  %v883_v19 = vmax.f32 %v739_v42, 0.0  ;;  %v1966_v57 = vpop.f32.mrf.mxu0 }
  0xe5   : > { %1429 = vst.msk [vmem:[%s2367_s5 + $0x18] sm:$0xf] %vm1422_vm2, %v1703_v48  ;;  %v1701_v37 = vpack.c.bf16 %v1106_v4, %v1106_v4  ;;  %v1109_v50 = vmax.f32 %v1045_v56, 0.0  ;;  %v2703_v60 = vunpack.c.h.bf16 %v2204_v40  ;;  %v632_v38 = vadd.f32 %v1965_v45, %v2312_v29  ;;  %v1998_v59 = vpop.f32.mrf.mxu1 }
  0xe6   : > { %v1077_v3 = vadd.f32 %v2702_v5, %v885_v22  ;;  %1461 = vst.msk [vmem:[%s2367_s5 + $0x98] sm:$0xf] %vm1422_vm2, %v1735_v49  ;;  %v1733_v7 = vpack.c.bf16 %v1138_v43, %v1138_v43  ;;  %v2704_v39 = vunpack.c.h.bf16 %v2207_v41  ;;  %v760_v44 = vadd.f32 %v1997_v34, %v2312_v29  ;;  %v626_v62 = vpop.f32.mrf.mxu0 }
  0xe7   : > { %v1043_v8 = vadd.f32 %v2703_v60, %v851_v2  ;;  %1427 = vst.msk [vmem:[%s2367_s5 + $0x10] sm:$0xf] %vm1422_vm2, %v1701_v37  ;;  %v1704_v17 = vpack.c.bf16 %v1109_v50, %v1109_v50  ;;  %v856_v33 = vmax.f32 %v632_v38, 0.0  ;;  %v624_v32 = vadd.f32 %v2312_v29, %v623_v35  ;;  %v754_v45 = vpop.f32.mrf.mxu1 }
  0xe8   : > { %v1141_v9 = vmax.f32 %v1077_v3, 0.0  ;;  %v1075_v28 = vadd.f32 %v2704_v39, %v883_v19  ;;  %1459 = vst.msk [vmem:[%s2367_s5 + $0x90] sm:$0xf] %vm1422_vm2, %v1733_v7  ;;  %v888_v41 = vmax.f32 %v760_v44, 0.0  ;;  %v752_v31 = vadd.f32 %v2312_v29, %v751_v36  ;;  %v1969_v61 = vpop.f32.mrf.mxu0 }
  0xe9   : > { %v1107_v40 = vmax.f32 %v1043_v8, 0.0  ;;  %1430 = vst.msk [vmem:[%s2367_s5 + $0x1c] sm:$0xf] %vm1422_vm2, %v1704_v17  ;;  %v2705_v47 = vunpack.c.l.bf16 %v2214_v46  ;;  %v854_v22 = vmax.f32 %v624_v32, 0.0  ;;  %v635_v42 = vadd.f32 %v1966_v57, %v2312_v29  ;;  %v2001_v35 = vpop.f32.mrf.mxu1 }
  0xea   : > { %v1736_v10 = vpack.c.bf16 %v1141_v9, %v1141_v9  ;;  %v1139_v54 = vmax.f32 %v1075_v28, 0.0  ;;  %v2706_v4 = vunpack.c.l.bf16 %v2221_v51  ;;  %v886_v2 = vmax.f32 %v752_v31, 0.0  ;;  %v639_v49 = vpop.f32.mrf.mxu0 }
  0xeb   : > { %v1702_v34 = vpack.c.bf16 %v1107_v40, %v1107_v40  ;;  %v1048_v55 = vadd.f32 %v2705_v47, %v856_v33  ;;  %v763_v36 = vadd.f32 %v1998_v59, %v2312_v29  ;;  %v2707_v5 = vunpack.c.l.bf16 %v2224_v52  ;;  %v767_v37 = vpop.f32.mrf.mxu1 }
  0xec   : > { %1462 = vst.msk [vmem:[%s2367_s5 + $0x9c] sm:$0xf] %vm1422_vm2, %v1736_v10  ;;  %v1734_v48 = vpack.c.bf16 %v1139_v54, %v1139_v54  ;;  %v1080_v56 = vadd.f32 %v2706_v4, %v888_v41  ;;  %v857_v19 = vmax.f32 %v635_v42, 0.0  ;;  %v627_v57 = vadd.f32 %v2312_v29, %v626_v62  ;;  %v1970_v7 = vpop.f32.mrf.mxu0 }
  0xed   : > { %1428 = vst.msk [vmem:[%s2367_s5 + $0x14] sm:$0xf] %vm1422_vm2, %v1702_v34  ;;  %v1112_v43 = vmax.f32 %v1048_v55, 0.0  ;;  %v1046_v3 = vadd.f32 %v2707_v5, %v854_v22  ;;  %v2708_v60 = vunpack.c.l.bf16 %v2227_v53  ;;  %v889_v38 = vmax.f32 %v763_v36, 0.0  ;;  %v2002_v62 = vpop.f32.mrf.mxu1 }
  0xee   : > { %1460 = vst.msk [vmem:[%s2367_s5 + $0x94] sm:$0xf] %vm1422_vm2, %v1734_v48  ;;  %v1144_v50 = vmax.f32 %v1080_v56, 0.0  ;;  %v755_v59 = vadd.f32 %v2312_v29, %v754_v45  ;;  %v2709_v28 = vunpack.c.h.bf16 %v2214_v46  ;;  %v855_v17 = vmax.f32 %v627_v57, 0.0  ;;  %v642_v41 = vpop.f32.mrf.mxu0 }
  0xef   : > { %v1078_v8 = vadd.f32 %v2708_v60, %v886_v2  ;;  %v1707_v9 = vpack.c.bf16 %v1112_v43, %v1112_v43  ;;  %v1110_v39 = vmax.f32 %v1046_v3, 0.0  ;;  %v2710_v32 = vunpack.c.h.bf16 %v2221_v51  ;;  %v770_v55 = vpop.f32.mrf.mxu1 }
  0xf0   : > { %v1049_v44 = vadd.f32 %v2709_v28, %v857_v19  ;;  %v1739_v40 = vpack.c.bf16 %v1144_v50, %v1144_v50  ;;  %v887_v54 = vmax.f32 %v755_v59, 0.0  ;;  %v2711_v34 = vunpack.c.h.bf16 %v2224_v52  ;;  %v1973_v56 = vpop.f32.mrf.mxu0 }
  0xf1   : > { %v1142_v33 = vmax.f32 %v1078_v8, 0.0  ;;  %v1081_v10 = vadd.f32 %v2710_v32, %v889_v38  ;;  %1433 = vst.msk [vmem:[%s2367_s5 + $0x28] sm:$0xf] %vm1422_vm2, %v1707_v9  ;;  %v1705_v45 = vpack.c.bf16 %v1110_v39, %v1110_v39  ;;  %v648_v46 = vadd.f32 %v1969_v61, %v2312_v29  ;;  %v2005_v43 = vpop.f32.mrf.mxu1 }
  0xf2   : > { %v1113_v31 = vmax.f32 %v1049_v44, 0.0  ;;  %v1047_v47 = vadd.f32 %v2711_v34, %v855_v17  ;;  %1465 = vst.msk [vmem:[%s2367_s5 + $0xa8] sm:$0xf] %vm1422_vm2, %v1739_v40  ;;  %v2712_v51 = vunpack.c.h.bf16 %v2227_v53  ;;  %v776_v4 = vadd.f32 %v2001_v35, %v2312_v29  ;;  %v655_v57 = vpop.f32.mrf.mxu0 }
  0xf3   : > { %v1737_v22 = vpack.c.bf16 %v1142_v33, %v1142_v33  ;;  %v1145_v42 = vmax.f32 %v1081_v10, 0.0  ;;  %1431 = vst.msk [vmem:[%s2367_s5 + $0x20] sm:$0xf] %vm1422_vm2, %v1705_v45  ;;  %v860_v36 = vmax.f32 %v648_v46, 0.0  ;;  %v640_v61 = vadd.f32 %v2312_v29, %v639_v49  ;;  %v783_v38 = vpop.f32.mrf.mxu1 }
  0xf4   : > { %v1079_v48 = vadd.f32 %v2712_v51, %v887_v54  ;;  %v1708_v2 = vpack.c.bf16 %v1113_v31, %v1113_v31  ;;  %v1111_v52 = vmax.f32 %v1047_v47, 0.0  ;;  %v892_v53 = vmax.f32 %v776_v4, 0.0  ;;  %v1974_v44 = vpop.f32.mrf.mxu0 }
  0xf5   : > { %1463 = vst.msk [vmem:[%s2367_s5 + $0xa0] sm:$0xf] %vm1422_vm2, %v1737_v22  ;;  %v1740_v5 = vpack.c.bf16 %v1145_v42, %v1145_v42  ;;  %v768_v19 = vadd.f32 %v2312_v29, %v767_v37  ;;  %v2713_v50 = vunpack.c.l.bf16 %v2234_v58  ;;  %v858_v8 = vmax.f32 %v640_v61, 0.0  ;;  %v2006_v10 = vpop.f32.mrf.mxu1 }
  0xf6   : > { %v1143_v3 = vmax.f32 %v1079_v48, 0.0  ;;  %1434 = vst.msk [vmem:[%s2367_s5 + $0x2c] sm:$0xf] %vm1422_vm2, %v1708_v2  ;;  %v1706_v35 = vpack.c.bf16 %v1111_v52, %v1111_v52  ;;  %v651_v49 = vadd.f32 %v1970_v7, %v2312_v29  ;;  %v2714_v9 = vunpack.c.l.bf16 %v2241_v63  ;;  %v658_v47 = vpop.f32.mrf.mxu0 }
  0xf7   : > { %v1052_v60 = vadd.f32 %v2713_v50, %v860_v36  ;;  %1466 = vst.msk [vmem:[%s2367_s5 + $0xac] sm:$0xf] %vm1422_vm2, %v1740_v5  ;;  %v890_v28 = vmax.f32 %v768_v19, 0.0  ;;  %v779_v37 = vadd.f32 %v2002_v62, %v2312_v29  ;;  %v2715_v40 = vunpack.c.l.bf16 %v2244_v0 }
  0xf8   : > { %v1738_v59 = vpack.c.bf16 %v1143_v3, %v1143_v3  ;;  %v1084_v39 = vadd.f32 %v2714_v9, %v892_v53  ;;  %1432 = vst.msk [vmem:[%s2367_s5 + $0x24] sm:$0xf] %vm1422_vm2, %v1706_v35  ;;  %v861_v32 = vmax.f32 %v651_v49, 0.0  ;;  %v643_v7 = vadd.f32 %v2312_v29, %v642_v41  ;;  %v786_v41 = vpop.f32.mrf.mxu1  ;;  %v2496_v5 = vpop.f32.mrf.mxu0 }
  0xf9   : > { %v1116_v17 = vmax.f32 %v1052_v60, 0.0  ;;  %v1050_v33 = vadd.f32 %v2715_v40, %v858_v8  ;;  %v2716_v45 = vunpack.c.l.bf16 %v2247_v1  ;;  %v893_v34 = vmax.f32 %v779_v37, 0.0 }
  0xfa   : > { %1464 = vst.msk [vmem:[%s2367_s5 + $0xa4] sm:$0xf] %vm1422_vm2, %v1738_v59  ;;  %v1148_v54 = vmax.f32 %v1084_v39, 0.0  ;;  %v771_v62 = vadd.f32 %v2312_v29, %v770_v55  ;;  %v2717_v42 = vunpack.c.h.bf16 %v2234_v58  ;;  %v859_v48 = vmax.f32 %v643_v7, 0.0  ;;  %v2503_v35 = vpop.f32.mrf.mxu1  ;;  %v671_v59 = vpop.f32.mrf.mxu0 }
  0xfb   : > { %v1082_v31 = vadd.f32 %v2716_v45, %v890_v28  ;;  %v1711_v46 = vpack.c.bf16 %v1116_v17, %v1116_v17  ;;  %v1114_v22 = vmax.f32 %v1050_v33, 0.0  ;;  %v2718_v52 = vunpack.c.h.bf16 %v2241_v63 }
  0xfc   : > { %v1053_v51 = vadd.f32 %v2717_v42, %v861_v32  ;;  %v1743_v4 = vpack.c.bf16 %v1148_v54, %v1148_v54  ;;  %v891_v61 = vmax.f32 %v771_v62, 0.0  ;;  %v2719_v53 = vunpack.c.h.bf16 %v2244_v0  ;;  %v799_v28 = vpop.f32.mrf.mxu1  ;;  %v1978_v33 = vpop.f32.mrf.mxu0 }
  0xfd   : > { %v1146_v2 = vmax.f32 %v1082_v31, 0.0  ;;  %v1085_v36 = vadd.f32 %v2718_v52, %v893_v34  ;;  %1437 = vst.msk [vmem:[%s2367_s5 + $0x38] sm:$0xf] %vm1422_vm2, %v1711_v46  ;;  %v1709_v55 = vpack.c.bf16 %v1114_v22, %v1114_v22  ;;  %v664_v19 = vadd.f32 %v1973_v56, %v2312_v29 }
  0xfe   : > { %v1117_v3 = vmax.f32 %v1053_v51, 0.0  ;;  %v1051_v58 = vadd.f32 %v2719_v53, %v859_v48  ;;  %1469 = vst.msk [vmem:[%s2367_s5 + $0xb8] sm:$0xf] %vm1422_vm2, %v1743_v4  ;;  %v2720_v60 = vunpack.c.h.bf16 %v2247_v1  ;;  %v792_v49 = vadd.f32 %v2005_v43, %v2312_v29  ;;  %v2010_v45 = vpop.f32.mrf.mxu1  ;;  %v674_v22 = vpop.f32.mrf.mxu0 }
  0xff   : > { %v1741_v63 = vpack.c.bf16 %v1146_v2, %v1146_v2  ;;  %v1149_v50 = vmax.f32 %v1085_v36, 0.0  ;;  %1435 = vst.msk [vmem:[%s2367_s5 + $0x30] sm:$0xf] %vm1422_vm2, %v1709_v55  ;;  %v864_v39 = vmax.f32 %v664_v19, 0.0  ;;  %v656_v56 = vadd.f32 %v2312_v29, %v655_v57 }
 0x100   : > { %v1083_v8 = vadd.f32 %v2720_v60, %v891_v61  ;;  %v1712_v0 = vpack.c.bf16 %v1117_v3, %v1117_v3  ;;  %v1115_v9 = vmax.f32 %v1051_v58, 0.0  ;;  %v896_v1 = vmax.f32 %v792_v49, 0.0  ;;  %v802_v2 = vpop.f32.mrf.mxu1  ;;  %v2536_v3 = vpop.f32.mrf.mxu0 }
 0x101   : > { %1467 = vst.msk [vmem:[%s2367_s5 + $0xb0] sm:$0xf] %vm1422_vm2, %v1741_v63  ;;  %v1744_v37 = vpack.c.bf16 %v1149_v50, %v1149_v50  ;;  %v784_v40 = vadd.f32 %v2312_v29, %v783_v38  ;;  %v2721_v32 = vunpack.c.l.bf16 %v2254_v6  ;;  %v862_v54 = vmax.f32 %v656_v56, 0.0 }
 0x102   : > { %v1147_v17 = vmax.f32 %v1083_v8, 0.0  ;;  %1438 = vst.msk [vmem:[%s2367_s5 + $0x3c] sm:$0xf] %vm1422_vm2, %v1712_v0  ;;  %v1710_v43 = vpack.c.bf16 %v1115_v9, %v1115_v9  ;;  %v667_v57 = vadd.f32 %v1974_v44, %v2312_v29  ;;  %v2722_v34 = vunpack.c.l.bf16 %v2261_v11  ;;  %v2540_v50 = vpop.f32.mrf.mxu1 }
 0x103   : > { %v1056_v7 = vadd.f32 %v2721_v32, %v864_v39  ;;  %1470 = vst.msk [vmem:[%s2367_s5 + $0xbc] sm:$0xf] %vm1422_vm2, %v1744_v37  ;;  %v894_v46 = vmax.f32 %v784_v40, 0.0  ;;  %v795_v38 = vadd.f32 %v2006_v10, %v2312_v29  ;;  %v2723_v51 = vunpack.c.l.bf16 %v2264_v12  ;;  %v2544_v39 = vpop.f32.mrf.mxu0 }
 0x104   : > { %v1742_v31 = vpack.c.bf16 %v1147_v17, %v1147_v17  ;;  %v1088_v62 = vadd.f32 %v2722_v34, %v896_v1  ;;  %1436 = vst.msk [vmem:[%s2367_s5 + $0x34] sm:$0xf] %vm1422_vm2, %v1710_v43  ;;  %v865_v4 = vmax.f32 %v667_v57, 0.0  ;;  %v659_v44 = vadd.f32 %v2312_v29, %v658_v47  ;;  %v2552_v1 = vpop.f32.mrf.mxu1 }
 0x105   : > { %v1120_v42 = vmax.f32 %v1056_v7, 0.0  ;;  %v1054_v48 = vadd.f32 %v2723_v51, %v862_v54  ;;  %v2724_v36 = vunpack.c.l.bf16 %v2267_v13  ;;  %v897_v55 = vmax.f32 %v795_v38, 0.0 }
 0x106   : > { %1468 = vst.msk [vmem:[%s2367_s5 + $0xb4] sm:$0xf] %vm1422_vm2, %v1742_v31  ;;  %v1152_v52 = vmax.f32 %v1088_v62, 0.0  ;;  %v787_v10 = vadd.f32 %v2312_v29, %v786_v41  ;;  %v2725_v19 = vunpack.c.h.bf16 %v2254_v6  ;;  %v863_v47 = vmax.f32 %v659_v44, 0.0 }
 0x107   : > { %v1086_v61 = vadd.f32 %v2724_v36, %v894_v46  ;;  %v1715_v53 = vpack.c.bf16 %v1120_v42, %v1120_v42  ;;  %v1118_v58 = vmax.f32 %v1054_v48, 0.0  ;;  %v2726_v49 = vunpack.c.h.bf16 %v2261_v11  ;;  %v1982_v46 = vpop.f32.mrf.mxu0 }
 0x108   : > { %v1057_v63 = vadd.f32 %v2725_v19, %v865_v4  ;;  %v1747_v60 = vpack.c.bf16 %v1152_v52, %v1152_v52  ;;  %v895_v9 = vmax.f32 %v787_v10, 0.0  ;;  %v2727_v6 = vunpack.c.h.bf16 %v2264_v12 }
 0x109   : > { %v1150_v8 = vmax.f32 %v1086_v61, 0.0  ;;  %v1089_v0 = vadd.f32 %v2726_v49, %v897_v55  ;;  %1441 = vst.msk [vmem:[%s2367_s5 + $0x48] sm:$0xf] %vm1422_vm2, %v1715_v53  ;;  %v1713_v41 = vpack.c.bf16 %v1118_v58, %v1118_v58  ;;  %v680_v17 = vadd.f32 %v2496_v5, %v2312_v29 }
 0x10a   : > { %v1121_v56 = vmax.f32 %v1057_v63, 0.0  ;;  %v1055_v37 = vadd.f32 %v2727_v6, %v863_v47  ;;  %1473 = vst.msk [vmem:[%s2367_s5 + $0xc8] sm:$0xf] %vm1422_vm2, %v1747_v60  ;;  %v2728_v43 = vunpack.c.h.bf16 %v2267_v13  ;;  %v808_v7 = vadd.f32 %v2503_v35, %v2312_v29 }
 0x10b   : > { %v1745_v11 = vpack.c.bf16 %v1150_v8, %v1150_v8  ;;  %v1153_v40 = vmax.f32 %v1089_v0, 0.0  ;;  %1439 = vst.msk [vmem:[%s2367_s5 + $0x40] sm:$0xf] %vm1422_vm2, %v1713_v41  ;;  %v868_v57 = vmax.f32 %v680_v17, 0.0  ;;  %v672_v5 = vadd.f32 %v2312_v29, %v671_v59  ;;  %v2014_v59 = vpop.f32.mrf.mxu1 }
 0x10c   : > { %v1087_v32 = vadd.f32 %v2728_v43, %v895_v9  ;;  %v1716_v12 = vpack.c.bf16 %v1121_v56, %v1121_v56  ;;  %v1119_v54 = vmax.f32 %v1055_v37, 0.0  ;;  %v900_v62 = vmax.f32 %v808_v7, 0.0 }
 0x10d   : > { %1471 = vst.msk [vmem:[%s2367_s5 + $0xc0] sm:$0xf] %vm1422_vm2, %v1745_v11  ;;  %v1748_v31 = vpack.c.bf16 %v1153_v40, %v1153_v40  ;;  %v800_v13 = vadd.f32 %v2312_v29, %v799_v28  ;;  %v2729_v38 = vunpack.c.l.bf16 %v2274_v18  ;;  %v866_v51 = vmax.f32 %v672_v5, 0.0  ;;  %v818_v56 = vpop.f32.mrf.mxu1 }
 0x10e   : > { %v1151_v34 = vmax.f32 %v1087_v32, 0.0  ;;  %1442 = vst.msk [vmem:[%s2367_s5 + $0x4c] sm:$0xf] %vm1422_vm2, %v1716_v12  ;;  %v1714_v35 = vpack.c.bf16 %v1119_v54, %v1119_v54  ;;  %v683_v48 = vadd.f32 %v1978_v33, %v2312_v29  ;;  %v2730_v44 = vunpack.c.l.bf16 %v2281_v23 }
 0x10f   : > { %v1060_v42 = vadd.f32 %v2729_v38, %v868_v57  ;;  %1474 = vst.msk [vmem:[%s2367_s5 + $0xcc] sm:$0xf] %vm1422_vm2, %v1748_v31  ;;  %v898_v36 = vmax.f32 %v800_v13, 0.0  ;;  %v811_v28 = vadd.f32 %v2010_v45, %v2312_v29  ;;  %v2731_v55 = vunpack.c.l.bf16 %v2284_v24  ;;  %v690_v45 = vpop.f32.mrf.mxu0 }
 0x110   : > { %v1746_v4 = vpack.c.bf16 %v1151_v34, %v1151_v34  ;;  %v1092_v52 = vadd.f32 %v2730_v44, %v900_v62  ;;  %1440 = vst.msk [vmem:[%s2367_s5 + $0x44] sm:$0xf] %vm1422_vm2, %v1714_v35  ;;  %v869_v53 = vmax.f32 %v683_v48, 0.0  ;;  %v675_v58 = vadd.f32 %v2312_v29, %v674_v22  ;;  %v2017_v62 = vpop.f32.mrf.mxu1 }
 0x111   : > { %v1124_v61 = vmax.f32 %v1060_v42, 0.0  ;;  %v1058_v10 = vadd.f32 %v2731_v55, %v866_v51  ;;  %v2732_v19 = vunpack.c.l.bf16 %v2287_v25  ;;  %v901_v47 = vmax.f32 %v811_v28, 0.0  ;;  %v1985_v5 = vpop.f32.mrf.mxu0 }
 0x112   : > { %1472 = vst.msk [vmem:[%s2367_s5 + $0xc4] sm:$0xf] %vm1422_vm2, %v1746_v4  ;;  %v1156_v33 = vmax.f32 %v1092_v52, 0.0  ;;  %v803_v60 = vadd.f32 %v2312_v29, %v802_v2  ;;  %v2733_v0 = vunpack.c.h.bf16 %v2274_v18  ;;  %v867_v41 = vmax.f32 %v675_v58, 0.0 }
 0x113   : > { %v1090_v63 = vadd.f32 %v2732_v19, %v898_v36  ;;  %v1719_v8 = vpack.c.bf16 %v1124_v61, %v1124_v61  ;;  %v1122_v49 = vmax.f32 %v1058_v10, 0.0  ;;  %v2734_v37 = vunpack.c.h.bf16 %v2281_v23 }
 0x114   : > { %v1061_v9 = vadd.f32 %v2733_v0, %v869_v53  ;;  %v1751_v22 = vpack.c.bf16 %v1156_v33, %v1156_v33  ;;  %v899_v11 = vmax.f32 %v803_v60, 0.0  ;;  %v2735_v43 = vunpack.c.h.bf16 %v2284_v24 }
 0x115   : > { %v1154_v6 = vmax.f32 %v1090_v63, 0.0  ;;  %v1093_v17 = vadd.f32 %v2734_v37, %v901_v47  ;;  %1445 = vst.msk [vmem:[%s2367_s5 + $0x58] sm:$0xf] %vm1422_vm2, %v1719_v8  ;;  %v1717_v40 = vpack.c.bf16 %v1122_v49, %v1122_v49  ;;  %v696_v18 = vadd.f32 %v2536_v3, %v2312_v29 }
 0x116   : > { %v1125_v2 = vmax.f32 %v1061_v9, 0.0  ;;  %v1059_v32 = vadd.f32 %v2735_v43, %v867_v41  ;;  %1477 = vst.msk [vmem:[%s2367_s5 + $0xd8] sm:$0xf] %vm1422_vm2, %v1751_v22  ;;  %v2736_v23 = vunpack.c.h.bf16 %v2287_v25  ;;  %v824_v57 = vadd.f32 %v2540_v50, %v2312_v29 }
 0x117   : > { %v1749_v7 = vpack.c.bf16 %v1154_v6, %v1154_v6  ;;  %v1157_v12 = vmax.f32 %v1093_v17, 0.0  ;;  %1443 = vst.msk [vmem:[%s2367_s5 + $0x50] sm:$0xf] %vm1422_vm2, %v1717_v40  ;;  %v872_v34 = vmax.f32 %v696_v18, 0.0  ;;  %v688_v3 = vadd.f32 %v2312_v29, %v2544_v39 }
 0x118   : > { %v1091_v54 = vadd.f32 %v2736_v23, %v899_v11  ;;  %v1720_v24 = vpack.c.bf16 %v1125_v2, %v1125_v2  ;;  %v1123_v31 = vmax.f32 %v1059_v32, 0.0  ;;  %v904_v35 = vmax.f32 %v824_v57, 0.0 }
 0x119   : > { %1475 = vst.msk [vmem:[%s2367_s5 + $0xd0] sm:$0xf] %vm1422_vm2, %v1749_v7  ;;  %v1752_v13 = vpack.c.bf16 %v1157_v12, %v1157_v12  ;;  %v816_v50 = vadd.f32 %v2312_v29, %v2552_v1  ;;  %v2737_v42 = vunpack.c.l.bf16 %v2294_v30  ;;  %v870_v48 = vmax.f32 %v688_v3, 0.0  ;;  %v703_v1 = vpop.f32.mrf.mxu0 }
 0x11a   : > { %v1155_v25 = vmax.f32 %v1091_v54, 0.0  ;;  %1446 = vst.msk [vmem:[%s2367_s5 + $0x5c] sm:$0xf] %vm1422_vm2, %v1720_v24  ;;  %v1718_v38 = vpack.c.bf16 %v1123_v31, %v1123_v31  ;;  %v699_v39 = vadd.f32 %v1982_v46, %v2312_v29  ;;  %v2738_v44 = vunpack.c.l.bf16 %v2301_v21  ;;  %v831_v46 = vpop.f32.mrf.mxu1 }
 0x11b   : > { %v1064_v51 = vadd.f32 %v2737_v42, %v872_v34  ;;  %1478 = vst.msk [vmem:[%s2367_s5 + $0xdc] sm:$0xf] %vm1422_vm2, %v1752_v13  ;;  %v902_v36 = vmax.f32 %v816_v50, 0.0  ;;  %v827_v28 = vadd.f32 %v2014_v59, %v2312_v29  ;;  %v2739_v55 = vunpack.c.l.bf16 %v2304_v26  ;;  %v1986_v17 = vpop.f32.mrf.mxu0 }
 0x11c   : > { %v1750_v4 = vpack.c.bf16 %v1155_v25, %v1155_v25  ;;  %v1096_v52 = vadd.f32 %v2738_v44, %v904_v35  ;;  %1444 = vst.msk [vmem:[%s2367_s5 + $0x54] sm:$0xf] %vm1422_vm2, %v1718_v38  ;;  %v873_v53 = vmax.f32 %v699_v39, 0.0  ;;  %v691_v58 = vadd.f32 %v2312_v29, %v690_v45  ;;  %v2018_v43 = vpop.f32.mrf.mxu1 }
 0x11d   : > { %v1128_v61 = vmax.f32 %v1064_v51, 0.0  ;;  %v1062_v10 = vadd.f32 %v2739_v55, %v870_v48  ;;  %v2740_v19 = vunpack.c.l.bf16 %v2307_v27  ;;  %v905_v47 = vmax.f32 %v827_v28, 0.0 }
 0x11e   : > { %1476 = vst.msk [vmem:[%s2367_s5 + $0xd4] sm:$0xf] %vm1422_vm2, %v1750_v4  ;;  %v1160_v33 = vmax.f32 %v1096_v52, 0.0  ;;  %v819_v59 = vadd.f32 %v2312_v29, %v818_v56  ;;  %v2741_v49 = vunpack.c.h.bf16 %v2294_v30  ;;  %v871_v9 = vmax.f32 %v691_v58, 0.0  ;;  %v834_v50 = vpop.f32.mrf.mxu1 }
 0x11f   : > { %v1094_v63 = vadd.f32 %v2740_v19, %v902_v36  ;;  %v1723_v60 = vpack.c.bf16 %v1128_v61, %v1128_v61  ;;  %v1126_v8 = vmax.f32 %v1062_v10, 0.0  ;;  %v2742_v22 = vunpack.c.h.bf16 %v2301_v21 }
 0x120   : > { %v1065_v0 = vadd.f32 %v2741_v49, %v873_v53  ;;  %v1755_v41 = vpack.c.bf16 %v1160_v33, %v1160_v33  ;;  %v903_v37 = vmax.f32 %v819_v59, 0.0  ;;  %v2743_v40 = vunpack.c.h.bf16 %v2304_v26 }
 0x121   : > { %v1158_v45 = vmax.f32 %v1094_v63, 0.0  ;;  %v1097_v6 = vadd.f32 %v2742_v22, %v905_v47  ;;  %1449 = vst.msk [vmem:[%s2367_s5 + $0x68] sm:$0xf] %vm1422_vm2, %v1723_v60  ;;  %v1721_v11 = vpack.c.bf16 %v1126_v8, %v1126_v8  ;;  %v712_v30 = vadd.f32 %v1985_v5, %v2312_v29 }
 0x122   : > { %v1129_v56 = vmax.f32 %v1065_v0, 0.0  ;;  %v1063_v2 = vadd.f32 %v2743_v40, %v871_v9  ;;  %1481 = vst.msk [vmem:[%s2367_s5 + $0xe8] sm:$0xf] %vm1422_vm2, %v1755_v41  ;;  %v2744_v21 = vunpack.c.h.bf16 %v2307_v27  ;;  %v840_v12 = vadd.f32 %v2017_v62, %v2312_v29  ;;  %v706_v27 = vpop.f32.mrf.mxu0 }
 0x123   : > { %v1753_v32 = vpack.c.bf16 %v1158_v45, %v1158_v45  ;;  %v1161_v18 = vmax.f32 %v1097_v6, 0.0  ;;  %1447 = vst.msk [vmem:[%s2367_s5 + $0x60] sm:$0xf] %vm1422_vm2, %v1721_v11  ;;  %v876_v26 = vmax.f32 %v712_v30, 0.0  ;;  %v704_v57 = vadd.f32 %v2312_v29, %v703_v1 }
 0x124   : > { %v1095_v7 = vadd.f32 %v2744_v21, %v903_v37  ;;  %v1724_v23 = vpack.c.bf16 %v1129_v56, %v1129_v56  ;;  %v1127_v54 = vmax.f32 %v1063_v2, 0.0  ;;  %v908_v31 = vmax.f32 %v840_v12, 0.0 }
 0x125   : > { %1479 = vst.msk [vmem:[%s2367_s5 + $0xe0] sm:$0xf] %vm1422_vm2, %v1753_v32  ;;  %v1756_v5 = vpack.c.bf16 %v1161_v18, %v1161_v18  ;;  %v832_v34 = vadd.f32 %v2312_v29, %v831_v46  ;;  %v2745_v62 = vunpack.c.l.bf16 %v2323_v16  ;;  %v874_v25 = vmax.f32 %v704_v57, 0.0 }
 0x126   : > { %v1159_v24 = vmax.f32 %v1095_v7, 0.0  ;;  %1450 = vst.msk [vmem:[%s2367_s5 + $0x6c] sm:$0xf] %vm1422_vm2, %v1724_v23  ;;  %v1722_v3 = vpack.c.bf16 %v1127_v54, %v1127_v54  ;;  %v715_v35 = vadd.f32 %v1986_v17, %v2312_v29  ;;  %v2746_v42 = vunpack.c.l.bf16 %v2326_v15 }
 0x127   : > { %v1068_v13 = vadd.f32 %v2745_v62, %v876_v26  ;;  %1482 = vst.msk [vmem:[%s2367_s5 + $0xec] sm:$0xf] %vm1422_vm2, %v1756_v5  ;;  %v906_v48 = vmax.f32 %v832_v34, 0.0  ;;  %v843_v39 = vadd.f32 %v2018_v43, %v2312_v29  ;;  %v2747_v44 = vunpack.c.l.bf16 %v2333_v14 }
 0x128   : > { %v1754_v38 = vpack.c.bf16 %v1159_v24, %v1159_v24  ;;  %v1100_v51 = vadd.f32 %v2746_v42, %v908_v31  ;;  %1448 = vst.msk [vmem:[%s2367_s5 + $0x64] sm:$0xf] %vm1422_vm2, %v1722_v3  ;;  %v877_v36 = vmax.f32 %v715_v35, 0.0  ;;  %v707_v28 = vadd.f32 %v2312_v29, %v706_v27 }
 0x129   : > { %v1132_v4 = vmax.f32 %v1068_v13, 0.0  ;;  %v1066_v52 = vadd.f32 %v2747_v44, %v874_v25  ;;  %v2748_v61 = vunpack.c.l.bf16 %v2336_v20  ;;  %v909_v10 = vmax.f32 %v843_v39, 0.0 }
 0x12a   : > { %1480 = vst.msk [vmem:[%s2367_s5 + $0xe4] sm:$0xf] %vm1422_vm2, %v1754_v38  ;;  %v1164_v1 = vmax.f32 %v1100_v51, 0.0  ;;  %v835_v53 = vadd.f32 %v2312_v29, %v834_v50  ;;  %v2749_v33 = vunpack.c.h.bf16 %v2323_v16  ;;  %v875_v63 = vmax.f32 %v707_v28, 0.0 }
 0x12b   : > { %v1098_v55 = vadd.f32 %v2748_v61, %v906_v48  ;;  %v1727_v58 = vpack.c.bf16 %v1132_v4, %v1132_v4  ;;  %v1130_v46 = vmax.f32 %v1066_v52, 0.0  ;;  %v2750_v60 = vunpack.c.h.bf16 %v2326_v15 }
 0x12c   : > { %v1069_v19 = vadd.f32 %v2749_v33, %v877_v36  ;;  %v1759_v47 = vpack.c.bf16 %v1164_v1, %v1164_v1  ;;  %v907_v49 = vmax.f32 %v835_v53, 0.0  ;;  %v2751_v9 = vunpack.c.h.bf16 %v2333_v14 }
 0x12d   : > { %v1162_v59 = vmax.f32 %v1098_v55, 0.0  ;;  %v1101_v8 = vadd.f32 %v2750_v60, %v909_v10  ;;  %1453 = vst.msk [vmem:[%s2367_s5 + $0x78] sm:$0xf] %vm1422_vm2, %v1727_v58  ;;  %v1725_v0 = vpack.c.bf16 %v1130_v46, %v1130_v46  ;;  %v2752_v22 = vunpack.c.h.bf16 %v2336_v20 }
 0x12e   : > { %v1133_v29 = vmax.f32 %v1069_v19, 0.0  ;;  %v1067_v41 = vadd.f32 %v2751_v9, %v875_v63  ;;  %1485 = vst.msk [vmem:[%s2367_s5 + $0xf8] sm:$0xf] %vm1422_vm2, %v1759_v47 }
 0x12f   : > { %v1757_v16 = vpack.c.bf16 %v1162_v59, %v1162_v59  ;;  %v1165_v45 = vmax.f32 %v1101_v8, 0.0  ;;  %v1099_v15 = vadd.f32 %v2752_v22, %v907_v49  ;;  %1451 = vst.msk [vmem:[%s2367_s5 + $0x70] sm:$0xf] %vm1422_vm2, %v1725_v0 }
 0x130   : > { %v1728_v6 = vpack.c.bf16 %v1133_v29, %v1133_v29  ;;  %v1131_v37 = vmax.f32 %v1067_v41, 0.0 }
 0x131   : > { %1483 = vst.msk [vmem:[%s2367_s5 + $0xf0] sm:$0xf] %vm1422_vm2, %v1757_v16  ;;  %v1760_v17 = vpack.c.bf16 %v1165_v45, %v1165_v45  ;;  %v1163_v11 = vmax.f32 %v1099_v15, 0.0 }
 0x132   : > { %1454 = vst.msk [vmem:[%s2367_s5 + $0x7c] sm:$0xf] %vm1422_vm2, %v1728_v6  ;;  %v1726_v14 = vpack.c.bf16 %v1131_v37, %v1131_v37 }
 0x133   : > { %1486 = vst.msk [vmem:[%s2367_s5 + $0xfc] sm:$0xf] %vm1422_vm2, %v1760_v17  ;;  %v1758_v56 = vpack.c.bf16 %v1163_v11, %v1163_v11 }
 0x134   : > { %1452 = vst.msk [vmem:[%s2367_s5 + $0x74] sm:$0xf] %vm1422_vm2, %v1726_v14 }
 0x135   : > { %1484 = vst.msk [vmem:[%s2367_s5 + $0xf4] sm:$0xf] %vm1422_vm2, %v1758_v56 }
 0x136 PF: > { %s14_s15 = sadd.s32 1, %s2069_s15  }
 0x137   : > { %p11_p4 = scmp.ge.s32.totalorder %s14_s15, 4  }
 0x139   :  { %13 = sbr.rel (!%p11_p4) target bundleno = 1 (0x1), region = 69 }

// kernel: _lambda_.22
= control target key start
LH: loop header
LB: loop body
LE: loop exit
PB: predicated region body
PF: predicated region fallthrough
CT: control target
= control target key end

     0   :  { %s1631_s12 = smov 0   ;;  %s1926_s0 = inlined_call_operand.vmem [shape: bf16[1024,32], index: 0, kind: input, shape index: {}]   ;;  %s1927_s1 = inlined_call_operand.vmem [shape: bf16[32,8], index: 1, kind: input, shape index: {}]   ;;  %s1928_s2 = inlined_call_operand.vmem [shape: f32[1,8], index: 2, kind: input, shape index: {}]   ;;  %s1929_s3 = inlined_call_operand.vmem [shape: bf16[1024,8], index: 3, kind: output, shape index: {}]  }
   0x1 LB: > { %s1249_s13 = sadd.s32 4294967295, %s1609_s12   ;;  %p1253_p0 = scmp.ge.s32.totalorder %s1609_s12, 1  ;;  %s1609_s12 = sphi %s1631_s12, %s13_s12  }
   0x2   : > { %p138_p1 = scmp.lt.s32.totalorder %s1609_s12, 3 }
   0x4   : > { %p139_p2 = pnand %p1253_p0, %p138_p1 }
   0x5   : > { %s1254_s16 = sshll.u32 (!%p139_p2), %s1249_s13, 6 }
   0x6   : > { %142 = sbr.rel (%p139_p2) target bundleno = 283 (0x11b), region = 32  ;;  %p163_p3 = scmp.lt.s32.totalorder (!%p139_p2), %s1254_s16, 127 }
   0xb   : > { %v1569_v0 = vld [vmem:[%s1927_s1 + $0x8] sm:$0xff]   ;;  %v1570_v1 = vld [vmem:[%s1927_s1] sm:$0xff]   ;;  %s1931_s16 = smov (!%p163_p3, %s1254_s16), 127  ;;  %vm422_vm0 = vcmask 261120   ;;  %vm1128_vm1 = vcmask 60416  }
   0xc   : > { %1489 = vmatprep.subr.bf16.mxu0 %v1569_v0  ;;  %1557 = vmatprep.subr.bf16.mxu1 %v1569_v0  ;;  %s1255_s19 = sshll.u32 %s1931_s16, 2  ;;  %v1722_v34 = vld [vmem:[%s1928_s2] ss:$0 sm:$0xff] }
   0xd   : > { %1490 = vmatpush3.bf16.msra.mxu0 %v1569_v0  ;;  %1559 = vmatpush3.bf16.msra.mxu1 %v1569_v0  ;;  %s1653_s22 = scalar_lea.vmem %s1926_s0, %s1255_s19  ;;  %s1732_s27 = scalar_lea.vmem %s1929_s3, %s1255_s19 }
   0xe   : > { %1491 = vmatprep.subr.bf16.mxu0 %v1570_v1  ;;  %1558 = vmatprep.subr.bf16.mxu1 %v1570_v1  ;;  %v1571_v2 = vld [vmem:[%s1653_s22] sm:$0xff]   ;;  %v1573_v4 = vld [vmem:[%s1653_s22 + $0x8] sm:$0xff]   ;;  %v1575_v6 = vld [vmem:[%s1653_s22 + $0x10] sm:$0xff]  }
   0xf   : > { %v1572_v3 = vld [vmem:[%s1653_s22 + $0x80] sm:$0xff]   ;;  %1493 = vmatprep.mubr.msk.bf16.mxu0 %vm422_vm0, %v1571_v2  ;;  %v1574_v5 = vld [vmem:[%s1653_s22 + $0x88] sm:$0xff]   ;;  %v1576_v7 = vld [vmem:[%s1653_s22 + $0x90] sm:$0xff]  }
  0x10   : > { %1525 = vmatprep.mubr.msk.bf16.mxu1 %vm422_vm0, %v1572_v3  ;;  %v1577_v8 = vld [vmem:[%s1653_s22 + $0x18] sm:$0xff]   ;;  %v1579_v10 = vld [vmem:[%s1653_s22 + $0x20] sm:$0xff]   ;;  %v1581_v12 = vld [vmem:[%s1653_s22 + $0x28] sm:$0xff]  }
  0x11   : > { %1492 = vmatpush3.bf16.msra.mxu0 %v1570_v1  ;;  %1560 = vmatpush3.bf16.msra.mxu1 %v1570_v1  ;;  %v1578_v9 = vld [vmem:[%s1653_s22 + $0x98] sm:$0xff]   ;;  %v1580_v11 = vld [vmem:[%s1653_s22 + $0xa0] sm:$0xff]   ;;  %v1582_v13 = vld [vmem:[%s1653_s22 + $0xa8] sm:$0xff]  }
  0x12   : > { %v1583_v14 = vld [vmem:[%s1653_s22 + $0x30] sm:$0xff]   ;;  %v1585_v16 = vld [vmem:[%s1653_s22 + $0x38] sm:$0xff]   ;;  %v1587_v18 = vld [vmem:[%s1653_s22 + $0x40] sm:$0xff]  }
  0x13   : > { %v1584_v15 = vld [vmem:[%s1653_s22 + $0xb0] sm:$0xff]   ;;  %v1586_v17 = vld [vmem:[%s1653_s22 + $0xb8] sm:$0xff]   ;;  %v1588_v19 = vld [vmem:[%s1653_s22 + $0xc0] sm:$0xff]  }
  0x14   : > { %1494 = vmatmul.mubr.msk.bf16.vlgmr.msra.gmra.mxu0 %vm422_vm0, %v1573_v4  ;;  %1526 = vmatmul.mubr.msk.bf16.vlgmr.msra.gmra.mxu1 %vm422_vm0, %v1574_v5  ;;  %v1589_v20 = vld [vmem:[%s1653_s22 + $0x48] sm:$0xff]   ;;  %v1591_v22 = vld [vmem:[%s1653_s22 + $0x50] sm:$0xff]   ;;  %v1593_v24 = vld [vmem:[%s1653_s22 + $0x58] sm:$0xff]  }
  0x15   : > { %1497 = vmatprep.mubr.msk.bf16.mxu0 %vm422_vm0, %v1575_v6  ;;  %1529 = vmatprep.mubr.msk.bf16.mxu1 %vm422_vm0, %v1576_v7  ;;  %v1590_v21 = vld [vmem:[%s1653_s22 + $0xc8] sm:$0xff]   ;;  %v1592_v23 = vld [vmem:[%s1653_s22 + $0xd0] sm:$0xff]   ;;  %v1594_v25 = vld [vmem:[%s1653_s22 + $0xd8] sm:$0xff]  }
  0x16   : > { %v1595_v26 = vld [vmem:[%s1653_s22 + $0x60] sm:$0xff]   ;;  %v1597_v28 = vld [vmem:[%s1653_s22 + $0x68] sm:$0xff]   ;;  %v1599_v30 = vld [vmem:[%s1653_s22 + $0x70] sm:$0xff]  }
  0x17   : > { %v1596_v27 = vld [vmem:[%s1653_s22 + $0xe0] sm:$0xff]   ;;  %v1598_v29 = vld [vmem:[%s1653_s22 + $0xe8] sm:$0xff]   ;;  %v1600_v31 = vld [vmem:[%s1653_s22 + $0xf0] sm:$0xff]  }
  0x18   : > { %v1601_v32 = vld [vmem:[%s1653_s22 + $0x78] sm:$0xff]  }
  0x19   : > { %v1602_v33 = vld [vmem:[%s1653_s22 + $0xf8] sm:$0xff]  }
  0x1c   : > { %1498 = vmatmul.mubr.msk.bf16.gmra.mxu0 %vm422_vm0, %v1577_v8  ;;  %1530 = vmatmul.mubr.msk.bf16.gmra.mxu1 %vm422_vm0, %v1578_v9 }
  0x1d   : > { %1501 = vmatprep.mubr.msk.bf16.mxu0 %vm422_vm0, %v1579_v10  ;;  %1533 = vmatprep.mubr.msk.bf16.mxu1 %vm422_vm0, %v1580_v11 }
  0x24   : > { %1502 = vmatmul.mubr.msk.bf16.gmra.mxu0 %vm422_vm0, %v1581_v12  ;;  %1534 = vmatmul.mubr.msk.bf16.gmra.mxu1 %vm422_vm0, %v1582_v13 }
  0x25   : > { %1505 = vmatprep.mubr.msk.bf16.mxu0 %vm422_vm0, %v1583_v14  ;;  %1537 = vmatprep.mubr.msk.bf16.mxu1 %vm422_vm0, %v1584_v15 }
  0x2c   : > { %1506 = vmatmul.mubr.msk.bf16.gmra.mxu0 %vm422_vm0, %v1585_v16  ;;  %1538 = vmatmul.mubr.msk.bf16.gmra.mxu1 %vm422_vm0, %v1586_v17 }
  0x2d   : > { %1509 = vmatprep.mubr.msk.bf16.mxu0 %vm422_vm0, %v1587_v18  ;;  %1541 = vmatprep.mubr.msk.bf16.mxu1 %vm422_vm0, %v1588_v19 }
  0x34   : > { %1510 = vmatmul.mubr.msk.bf16.gmra.mxu0 %vm422_vm0, %v1589_v20  ;;  %1542 = vmatmul.mubr.msk.bf16.gmra.mxu1 %vm422_vm0, %v1590_v21 }
  0x35   : > { %1513 = vmatprep.mubr.msk.bf16.mxu0 %vm422_vm0, %v1591_v22  ;;  %1545 = vmatprep.mubr.msk.bf16.mxu1 %vm422_vm0, %v1592_v23 }
  0x3c   : > { %1514 = vmatmul.mubr.msk.bf16.gmra.mxu0 %vm422_vm0, %v1593_v24  ;;  %1546 = vmatmul.mubr.msk.bf16.gmra.mxu1 %vm422_vm0, %v1594_v25 }
  0x3d   : > { %1517 = vmatprep.mubr.msk.bf16.mxu0 %vm422_vm0, %v1595_v26  ;;  %1549 = vmatprep.mubr.msk.bf16.mxu1 %vm422_vm0, %v1596_v27 }
  0x44   : > { %1518 = vmatmul.mubr.msk.bf16.gmra.mxu0 %vm422_vm0, %v1597_v28  ;;  %1550 = vmatmul.mubr.msk.bf16.gmra.mxu1 %vm422_vm0, %v1598_v29 }
  0x45   : > { %1521 = vmatprep.mubr.msk.bf16.mxu0 %vm422_vm0, %v1599_v30  ;;  %1553 = vmatprep.mubr.msk.bf16.mxu1 %vm422_vm0, %v1600_v31 }
  0x4c   : > { %1522 = vmatmul.mubr.msk.bf16.gmra.mxu0 %vm422_vm0, %v1601_v32  ;;  %1554 = vmatmul.mubr.msk.bf16.gmra.mxu1 %vm422_vm0, %v1602_v33 }
  0xd4   : > { %v1495_v35 = vpop.f32.mrf.mxu0  ;;  %v1527_v37 = vpop.f32.mrf.mxu1 }
  0xd5   : > { %v562_v36 = vadd.f32 %v1495_v35, %v1722_v34  ;;  %v690_v38 = vadd.f32 %v1527_v37, %v1722_v34 }
  0xd6   : > { %v553_v39 = vpop.f32.mrf.mxu0  ;;  %v681_v42 = vpop.f32.mrf.mxu1 }
  0xd7   : > { %v810_v40 = vmax.f32 %v562_v36, 0.0  ;;  %v554_v41 = vadd.f32 %v1722_v34, %v553_v39  ;;  %v842_v43 = vmax.f32 %v690_v38, 0.0  ;;  %v682_v44 = vadd.f32 %v1722_v34, %v681_v42 }
  0xd8   : > { %v1496_v45 = vpop.f32.mrf.mxu0  ;;  %v1528_v49 = vpop.f32.mrf.mxu1 }
  0xd9   : > { %v1393_v46 = vpack.c.bf16 %v810_v40, %v810_v40  ;;  %v808_v47 = vmax.f32 %v554_v41, 0.0  ;;  %v565_v48 = vadd.f32 %v1496_v45, %v1722_v34  ;;  %v1425_v50 = vpack.c.bf16 %v842_v43, %v842_v43 }
  0xda   : > { %v840_v51 = vmax.f32 %v682_v44, 0.0  ;;  %v693_v52 = vadd.f32 %v1528_v49, %v1722_v34  ;;  %v556_v53 = vpop.f32.mrf.mxu0  ;;  %v684_v57 = vpop.f32.mrf.mxu1 }
  0xdb   : > { %1131 = vst.msk [vmem:[%s1732_s27 + $0x8] sm:$0xf] %vm1128_vm1, %v1393_v46  ;;  %v1391_v54 = vpack.c.bf16 %v808_v47, %v808_v47  ;;  %v811_v55 = vmax.f32 %v565_v48, 0.0  ;;  %v557_v56 = vadd.f32 %v1722_v34, %v556_v53  ;;  %1163 = vst.msk [vmem:[%s1732_s27 + $0x88] sm:$0xf] %vm1128_vm1, %v1425_v50  ;;  %v685_v60 = vadd.f32 %v1722_v34, %v684_v57 }
  0xdc   : > { %v1423_v58 = vpack.c.bf16 %v840_v51, %v840_v51  ;;  %v843_v59 = vmax.f32 %v693_v52, 0.0  ;;  %v1499_v61 = vpop.f32.mrf.mxu0  ;;  %v1531_v1 = vpop.f32.mrf.mxu1 }
  0xdd   : > { %1129 = vst.msk [vmem:[%s1732_s27] sm:$0xf] %vm1128_vm1, %v1391_v54  ;;  %v1394_v62 = vpack.c.bf16 %v811_v55, %v811_v55  ;;  %v809_v63 = vmax.f32 %v557_v56, 0.0  ;;  %v578_v0 = vadd.f32 %v1499_v61, %v1722_v34  ;;  %v841_v3 = vmax.f32 %v685_v60, 0.0 }
  0xde   : > { %1161 = vst.msk [vmem:[%s1732_s27 + $0x80] sm:$0xf] %vm1128_vm1, %v1423_v58  ;;  %v1426_v2 = vpack.c.bf16 %v843_v59, %v843_v59  ;;  %v706_v4 = vadd.f32 %v1531_v1, %v1722_v34  ;;  %v569_v5 = vpop.f32.mrf.mxu0  ;;  %v697_v9 = vpop.f32.mrf.mxu1 }
  0xdf   : > { %1132 = vst.msk [vmem:[%s1732_s27 + $0xc] sm:$0xf] %vm1128_vm1, %v1394_v62  ;;  %v1392_v6 = vpack.c.bf16 %v809_v63, %v809_v63  ;;  %v814_v7 = vmax.f32 %v578_v0, 0.0  ;;  %v570_v8 = vadd.f32 %v1722_v34, %v569_v5  ;;  %v1424_v10 = vpack.c.bf16 %v841_v3, %v841_v3 }
  0xe0   : > { %1164 = vst.msk [vmem:[%s1732_s27 + $0x8c] sm:$0xf] %vm1128_vm1, %v1426_v2  ;;  %v846_v11 = vmax.f32 %v706_v4, 0.0  ;;  %v698_v12 = vadd.f32 %v1722_v34, %v697_v9  ;;  %v1500_v13 = vpop.f32.mrf.mxu0  ;;  %v1532_v17 = vpop.f32.mrf.mxu1 }
  0xe1   : > { %1130 = vst.msk [vmem:[%s1732_s27 + $0x4] sm:$0xf] %vm1128_vm1, %v1392_v6  ;;  %v1397_v14 = vpack.c.bf16 %v814_v7, %v814_v7  ;;  %v812_v15 = vmax.f32 %v570_v8, 0.0  ;;  %v581_v16 = vadd.f32 %v1500_v13, %v1722_v34  ;;  %1162 = vst.msk [vmem:[%s1732_s27 + $0x84] sm:$0xf] %vm1128_vm1, %v1424_v10  ;;  %v709_v20 = vadd.f32 %v1532_v17, %v1722_v34 }
  0xe2   : > { %v1429_v18 = vpack.c.bf16 %v846_v11, %v846_v11  ;;  %v844_v19 = vmax.f32 %v698_v12, 0.0  ;;  %v572_v21 = vpop.f32.mrf.mxu0  ;;  %v700_v25 = vpop.f32.mrf.mxu1 }
  0xe3   : > { %1135 = vst.msk [vmem:[%s1732_s27 + $0x18] sm:$0xf] %vm1128_vm1, %v1397_v14  ;;  %v1395_v22 = vpack.c.bf16 %v812_v15, %v812_v15  ;;  %v815_v23 = vmax.f32 %v581_v16, 0.0  ;;  %v573_v24 = vadd.f32 %v1722_v34, %v572_v21  ;;  %v847_v27 = vmax.f32 %v709_v20, 0.0 }
  0xe4   : > { %1167 = vst.msk [vmem:[%s1732_s27 + $0x98] sm:$0xf] %vm1128_vm1, %v1429_v18  ;;  %v1427_v26 = vpack.c.bf16 %v844_v19, %v844_v19  ;;  %v701_v28 = vadd.f32 %v1722_v34, %v700_v25  ;;  %v1503_v29 = vpop.f32.mrf.mxu0  ;;  %v1535_v33 = vpop.f32.mrf.mxu1 }
  0xe5   : > { %1133 = vst.msk [vmem:[%s1732_s27 + $0x10] sm:$0xf] %vm1128_vm1, %v1395_v22  ;;  %v1398_v30 = vpack.c.bf16 %v815_v23, %v815_v23  ;;  %v813_v31 = vmax.f32 %v573_v24, 0.0  ;;  %v594_v32 = vadd.f32 %v1503_v29, %v1722_v34  ;;  %v1430_v35 = vpack.c.bf16 %v847_v27, %v847_v27 }
  0xe6   : > { %1165 = vst.msk [vmem:[%s1732_s27 + $0x90] sm:$0xf] %vm1128_vm1, %v1427_v26  ;;  %v845_v36 = vmax.f32 %v701_v28, 0.0  ;;  %v722_v37 = vadd.f32 %v1535_v33, %v1722_v34  ;;  %v585_v38 = vpop.f32.mrf.mxu0  ;;  %v713_v42 = vpop.f32.mrf.mxu1 }
  0xe7   : > { %1136 = vst.msk [vmem:[%s1732_s27 + $0x1c] sm:$0xf] %vm1128_vm1, %v1398_v30  ;;  %v1396_v39 = vpack.c.bf16 %v813_v31, %v813_v31  ;;  %v818_v40 = vmax.f32 %v594_v32, 0.0  ;;  %v586_v41 = vadd.f32 %v1722_v34, %v585_v38  ;;  %1168 = vst.msk [vmem:[%s1732_s27 + $0x9c] sm:$0xf] %vm1128_vm1, %v1430_v35  ;;  %v714_v45 = vadd.f32 %v1722_v34, %v713_v42 }
  0xe8   : > { %v1428_v43 = vpack.c.bf16 %v845_v36, %v845_v36  ;;  %v850_v44 = vmax.f32 %v722_v37, 0.0  ;;  %v1504_v46 = vpop.f32.mrf.mxu0  ;;  %v1536_v50 = vpop.f32.mrf.mxu1 }
  0xe9   : > { %1134 = vst.msk [vmem:[%s1732_s27 + $0x14] sm:$0xf] %vm1128_vm1, %v1396_v39  ;;  %v1401_v47 = vpack.c.bf16 %v818_v40, %v818_v40  ;;  %v816_v48 = vmax.f32 %v586_v41, 0.0  ;;  %v597_v49 = vadd.f32 %v1504_v46, %v1722_v34  ;;  %v848_v52 = vmax.f32 %v714_v45, 0.0 }
  0xea   : > { %1166 = vst.msk [vmem:[%s1732_s27 + $0x94] sm:$0xf] %vm1128_vm1, %v1428_v43  ;;  %v1433_v51 = vpack.c.bf16 %v850_v44, %v850_v44  ;;  %v725_v53 = vadd.f32 %v1536_v50, %v1722_v34  ;;  %v588_v54 = vpop.f32.mrf.mxu0  ;;  %v716_v58 = vpop.f32.mrf.mxu1 }
  0xeb   : > { %1139 = vst.msk [vmem:[%s1732_s27 + $0x28] sm:$0xf] %vm1128_vm1, %v1401_v47  ;;  %v1399_v55 = vpack.c.bf16 %v816_v48, %v816_v48  ;;  %v819_v56 = vmax.f32 %v597_v49, 0.0  ;;  %v589_v57 = vadd.f32 %v1722_v34, %v588_v54  ;;  %v1431_v59 = vpack.c.bf16 %v848_v52, %v848_v52 }
  0xec   : > { %1171 = vst.msk [vmem:[%s1732_s27 + $0xa8] sm:$0xf] %vm1128_vm1, %v1433_v51  ;;  %v851_v60 = vmax.f32 %v725_v53, 0.0  ;;  %v717_v61 = vadd.f32 %v1722_v34, %v716_v58  ;;  %v1507_v62 = vpop.f32.mrf.mxu0  ;;  %v1539_v2 = vpop.f32.mrf.mxu1 }
  0xed   : > { %1137 = vst.msk [vmem:[%s1732_s27 + $0x20] sm:$0xf] %vm1128_vm1, %v1399_v55  ;;  %v1402_v63 = vpack.c.bf16 %v819_v56, %v819_v56  ;;  %v817_v0 = vmax.f32 %v589_v57, 0.0  ;;  %v610_v1 = vadd.f32 %v1507_v62, %v1722_v34  ;;  %1169 = vst.msk [vmem:[%s1732_s27 + $0xa0] sm:$0xf] %vm1128_vm1, %v1431_v59  ;;  %v738_v5 = vadd.f32 %v1539_v2, %v1722_v34 }
  0xee   : > { %v1434_v3 = vpack.c.bf16 %v851_v60, %v851_v60  ;;  %v849_v4 = vmax.f32 %v717_v61, 0.0  ;;  %v601_v6 = vpop.f32.mrf.mxu0  ;;  %v729_v10 = vpop.f32.mrf.mxu1 }
  0xef   : > { %1140 = vst.msk [vmem:[%s1732_s27 + $0x2c] sm:$0xf] %vm1128_vm1, %v1402_v63  ;;  %v1400_v7 = vpack.c.bf16 %v817_v0, %v817_v0  ;;  %v822_v8 = vmax.f32 %v610_v1, 0.0  ;;  %v602_v9 = vadd.f32 %v1722_v34, %v601_v6  ;;  %v854_v12 = vmax.f32 %v738_v5, 0.0 }
  0xf0   : > { %1172 = vst.msk [vmem:[%s1732_s27 + $0xac] sm:$0xf] %vm1128_vm1, %v1434_v3  ;;  %v1432_v11 = vpack.c.bf16 %v849_v4, %v849_v4  ;;  %v730_v13 = vadd.f32 %v1722_v34, %v729_v10  ;;  %v1508_v14 = vpop.f32.mrf.mxu0  ;;  %v1540_v18 = vpop.f32.mrf.mxu1 }
  0xf1   : > { %1138 = vst.msk [vmem:[%s1732_s27 + $0x24] sm:$0xf] %vm1128_vm1, %v1400_v7  ;;  %v1405_v15 = vpack.c.bf16 %v822_v8, %v822_v8  ;;  %v820_v16 = vmax.f32 %v602_v9, 0.0  ;;  %v613_v17 = vadd.f32 %v1508_v14, %v1722_v34  ;;  %v1437_v19 = vpack.c.bf16 %v854_v12, %v854_v12 }
  0xf2   : > { %1170 = vst.msk [vmem:[%s1732_s27 + $0xa4] sm:$0xf] %vm1128_vm1, %v1432_v11  ;;  %v852_v20 = vmax.f32 %v730_v13, 0.0  ;;  %v741_v21 = vadd.f32 %v1540_v18, %v1722_v34  ;;  %v604_v22 = vpop.f32.mrf.mxu0  ;;  %v732_v26 = vpop.f32.mrf.mxu1 }
  0xf3   : > { %1143 = vst.msk [vmem:[%s1732_s27 + $0x38] sm:$0xf] %vm1128_vm1, %v1405_v15  ;;  %v1403_v23 = vpack.c.bf16 %v820_v16, %v820_v16  ;;  %v823_v24 = vmax.f32 %v613_v17, 0.0  ;;  %v605_v25 = vadd.f32 %v1722_v34, %v604_v22  ;;  %1175 = vst.msk [vmem:[%s1732_s27 + $0xb8] sm:$0xf] %vm1128_vm1, %v1437_v19  ;;  %v733_v29 = vadd.f32 %v1722_v34, %v732_v26 }
  0xf4   : > { %v1435_v27 = vpack.c.bf16 %v852_v20, %v852_v20  ;;  %v855_v28 = vmax.f32 %v741_v21, 0.0  ;;  %v1511_v30 = vpop.f32.mrf.mxu0  ;;  %v1543_v35 = vpop.f32.mrf.mxu1 }
  0xf5   : > { %1141 = vst.msk [vmem:[%s1732_s27 + $0x30] sm:$0xf] %vm1128_vm1, %v1403_v23  ;;  %v1406_v31 = vpack.c.bf16 %v823_v24, %v823_v24  ;;  %v821_v32 = vmax.f32 %v605_v25, 0.0  ;;  %v626_v33 = vadd.f32 %v1511_v30, %v1722_v34  ;;  %v853_v37 = vmax.f32 %v733_v29, 0.0 }
  0xf6   : > { %1173 = vst.msk [vmem:[%s1732_s27 + $0xb0] sm:$0xf] %vm1128_vm1, %v1435_v27  ;;  %v1438_v36 = vpack.c.bf16 %v855_v28, %v855_v28  ;;  %v754_v38 = vadd.f32 %v1543_v35, %v1722_v34  ;;  %v617_v39 = vpop.f32.mrf.mxu0  ;;  %v745_v43 = vpop.f32.mrf.mxu1 }
  0xf7   : > { %1144 = vst.msk [vmem:[%s1732_s27 + $0x3c] sm:$0xf] %vm1128_vm1, %v1406_v31  ;;  %v1404_v40 = vpack.c.bf16 %v821_v32, %v821_v32  ;;  %v826_v41 = vmax.f32 %v626_v33, 0.0  ;;  %v618_v42 = vadd.f32 %v1722_v34, %v617_v39  ;;  %v1436_v44 = vpack.c.bf16 %v853_v37, %v853_v37 }
  0xf8   : > { %1176 = vst.msk [vmem:[%s1732_s27 + $0xbc] sm:$0xf] %vm1128_vm1, %v1438_v36  ;;  %v858_v45 = vmax.f32 %v754_v38, 0.0  ;;  %v746_v46 = vadd.f32 %v1722_v34, %v745_v43  ;;  %v1512_v47 = vpop.f32.mrf.mxu0  ;;  %v1544_v51 = vpop.f32.mrf.mxu1 }
  0xf9   : > { %1142 = vst.msk [vmem:[%s1732_s27 + $0x34] sm:$0xf] %vm1128_vm1, %v1404_v40  ;;  %v1409_v48 = vpack.c.bf16 %v826_v41, %v826_v41  ;;  %v824_v49 = vmax.f32 %v618_v42, 0.0  ;;  %v629_v50 = vadd.f32 %v1512_v47, %v1722_v34  ;;  %1174 = vst.msk [vmem:[%s1732_s27 + $0xb4] sm:$0xf] %vm1128_vm1, %v1436_v44  ;;  %v757_v54 = vadd.f32 %v1544_v51, %v1722_v34 }
  0xfa   : > { %v1441_v52 = vpack.c.bf16 %v858_v45, %v858_v45  ;;  %v856_v53 = vmax.f32 %v746_v46, 0.0  ;;  %v620_v55 = vpop.f32.mrf.mxu0  ;;  %v748_v59 = vpop.f32.mrf.mxu1 }
  0xfb   : > { %1147 = vst.msk [vmem:[%s1732_s27 + $0x48] sm:$0xf] %vm1128_vm1, %v1409_v48  ;;  %v1407_v56 = vpack.c.bf16 %v824_v49, %v824_v49  ;;  %v827_v57 = vmax.f32 %v629_v50, 0.0  ;;  %v621_v58 = vadd.f32 %v1722_v34, %v620_v55  ;;  %v859_v61 = vmax.f32 %v757_v54, 0.0 }
  0xfc   : > { %1179 = vst.msk [vmem:[%s1732_s27 + $0xc8] sm:$0xf] %vm1128_vm1, %v1441_v52  ;;  %v1439_v60 = vpack.c.bf16 %v856_v53, %v856_v53  ;;  %v749_v62 = vadd.f32 %v1722_v34, %v748_v59  ;;  %v1515_v63 = vpop.f32.mrf.mxu0  ;;  %v1547_v3 = vpop.f32.mrf.mxu1 }
  0xfd   : > { %1145 = vst.msk [vmem:[%s1732_s27 + $0x40] sm:$0xf] %vm1128_vm1, %v1407_v56  ;;  %v1410_v0 = vpack.c.bf16 %v827_v57, %v827_v57  ;;  %v825_v1 = vmax.f32 %v621_v58, 0.0  ;;  %v642_v2 = vadd.f32 %v1515_v63, %v1722_v34  ;;  %v1442_v4 = vpack.c.bf16 %v859_v61, %v859_v61 }
  0xfe   : > { %1177 = vst.msk [vmem:[%s1732_s27 + $0xc0] sm:$0xf] %vm1128_vm1, %v1439_v60  ;;  %v857_v5 = vmax.f32 %v749_v62, 0.0  ;;  %v770_v6 = vadd.f32 %v1547_v3, %v1722_v34  ;;  %v633_v7 = vpop.f32.mrf.mxu0  ;;  %v761_v11 = vpop.f32.mrf.mxu1 }
  0xff   : > { %1148 = vst.msk [vmem:[%s1732_s27 + $0x4c] sm:$0xf] %vm1128_vm1, %v1410_v0  ;;  %v1408_v8 = vpack.c.bf16 %v825_v1, %v825_v1  ;;  %v830_v9 = vmax.f32 %v642_v2, 0.0  ;;  %v634_v10 = vadd.f32 %v1722_v34, %v633_v7  ;;  %1180 = vst.msk [vmem:[%s1732_s27 + $0xcc] sm:$0xf] %vm1128_vm1, %v1442_v4  ;;  %v762_v14 = vadd.f32 %v1722_v34, %v761_v11 }
 0x100   : > { %v1440_v12 = vpack.c.bf16 %v857_v5, %v857_v5  ;;  %v862_v13 = vmax.f32 %v770_v6, 0.0  ;;  %v1516_v15 = vpop.f32.mrf.mxu0  ;;  %v1548_v19 = vpop.f32.mrf.mxu1 }
 0x101   : > { %1146 = vst.msk [vmem:[%s1732_s27 + $0x44] sm:$0xf] %vm1128_vm1, %v1408_v8  ;;  %v1413_v16 = vpack.c.bf16 %v830_v9, %v830_v9  ;;  %v828_v17 = vmax.f32 %v634_v10, 0.0  ;;  %v645_v18 = vadd.f32 %v1516_v15, %v1722_v34  ;;  %v860_v21 = vmax.f32 %v762_v14, 0.0 }
 0x102   : > { %1178 = vst.msk [vmem:[%s1732_s27 + $0xc4] sm:$0xf] %vm1128_vm1, %v1440_v12  ;;  %v1445_v20 = vpack.c.bf16 %v862_v13, %v862_v13  ;;  %v773_v22 = vadd.f32 %v1548_v19, %v1722_v34  ;;  %v636_v23 = vpop.f32.mrf.mxu0  ;;  %v764_v27 = vpop.f32.mrf.mxu1 }
 0x103   : > { %1151 = vst.msk [vmem:[%s1732_s27 + $0x58] sm:$0xf] %vm1128_vm1, %v1413_v16  ;;  %v1411_v24 = vpack.c.bf16 %v828_v17, %v828_v17  ;;  %v831_v25 = vmax.f32 %v645_v18, 0.0  ;;  %v637_v26 = vadd.f32 %v1722_v34, %v636_v23  ;;  %v1443_v28 = vpack.c.bf16 %v860_v21, %v860_v21 }
 0x104   : > { %1183 = vst.msk [vmem:[%s1732_s27 + $0xd8] sm:$0xf] %vm1128_vm1, %v1445_v20  ;;  %v863_v29 = vmax.f32 %v773_v22, 0.0  ;;  %v765_v30 = vadd.f32 %v1722_v34, %v764_v27  ;;  %v1519_v31 = vpop.f32.mrf.mxu0  ;;  %v1551_v36 = vpop.f32.mrf.mxu1 }
 0x105   : > { %1149 = vst.msk [vmem:[%s1732_s27 + $0x50] sm:$0xf] %vm1128_vm1, %v1411_v24  ;;  %v1414_v32 = vpack.c.bf16 %v831_v25, %v831_v25  ;;  %v829_v33 = vmax.f32 %v637_v26, 0.0  ;;  %v658_v35 = vadd.f32 %v1519_v31, %v1722_v34  ;;  %1181 = vst.msk [vmem:[%s1732_s27 + $0xd0] sm:$0xf] %vm1128_vm1, %v1443_v28  ;;  %v786_v39 = vadd.f32 %v1551_v36, %v1722_v34 }
 0x106   : > { %v1446_v37 = vpack.c.bf16 %v863_v29, %v863_v29  ;;  %v861_v38 = vmax.f32 %v765_v30, 0.0  ;;  %v649_v40 = vpop.f32.mrf.mxu0  ;;  %v777_v44 = vpop.f32.mrf.mxu1 }
 0x107   : > { %1152 = vst.msk [vmem:[%s1732_s27 + $0x5c] sm:$0xf] %vm1128_vm1, %v1414_v32  ;;  %v1412_v41 = vpack.c.bf16 %v829_v33, %v829_v33  ;;  %v834_v42 = vmax.f32 %v658_v35, 0.0  ;;  %v650_v43 = vadd.f32 %v1722_v34, %v649_v40  ;;  %v866_v46 = vmax.f32 %v786_v39, 0.0 }
 0x108   : > { %1184 = vst.msk [vmem:[%s1732_s27 + $0xdc] sm:$0xf] %vm1128_vm1, %v1446_v37  ;;  %v1444_v45 = vpack.c.bf16 %v861_v38, %v861_v38  ;;  %v778_v47 = vadd.f32 %v1722_v34, %v777_v44  ;;  %v1520_v48 = vpop.f32.mrf.mxu0  ;;  %v1552_v52 = vpop.f32.mrf.mxu1 }
 0x109   : > { %1150 = vst.msk [vmem:[%s1732_s27 + $0x54] sm:$0xf] %vm1128_vm1, %v1412_v41  ;;  %v1417_v49 = vpack.c.bf16 %v834_v42, %v834_v42  ;;  %v832_v50 = vmax.f32 %v650_v43, 0.0  ;;  %v661_v51 = vadd.f32 %v1520_v48, %v1722_v34  ;;  %v1449_v53 = vpack.c.bf16 %v866_v46, %v866_v46 }
 0x10a   : > { %1182 = vst.msk [vmem:[%s1732_s27 + $0xd4] sm:$0xf] %vm1128_vm1, %v1444_v45  ;;  %v864_v54 = vmax.f32 %v778_v47, 0.0  ;;  %v789_v55 = vadd.f32 %v1552_v52, %v1722_v34  ;;  %v652_v56 = vpop.f32.mrf.mxu0  ;;  %v780_v60 = vpop.f32.mrf.mxu1 }
 0x10b   : > { %1155 = vst.msk [vmem:[%s1732_s27 + $0x68] sm:$0xf] %vm1128_vm1, %v1417_v49  ;;  %v1415_v57 = vpack.c.bf16 %v832_v50, %v832_v50  ;;  %v835_v58 = vmax.f32 %v661_v51, 0.0  ;;  %v653_v59 = vadd.f32 %v1722_v34, %v652_v56  ;;  %1187 = vst.msk [vmem:[%s1732_s27 + $0xe8] sm:$0xf] %vm1128_vm1, %v1449_v53  ;;  %v781_v63 = vadd.f32 %v1722_v34, %v780_v60 }
 0x10c   : > { %v1447_v61 = vpack.c.bf16 %v864_v54, %v864_v54  ;;  %v867_v62 = vmax.f32 %v789_v55, 0.0  ;;  %v1523_v0 = vpop.f32.mrf.mxu0  ;;  %v1555_v4 = vpop.f32.mrf.mxu1 }
 0x10d   : > { %1153 = vst.msk [vmem:[%s1732_s27 + $0x60] sm:$0xf] %vm1128_vm1, %v1415_v57  ;;  %v1418_v1 = vpack.c.bf16 %v835_v58, %v835_v58  ;;  %v833_v2 = vmax.f32 %v653_v59, 0.0  ;;  %v674_v3 = vadd.f32 %v1523_v0, %v1722_v34  ;;  %v865_v6 = vmax.f32 %v781_v63, 0.0 }
 0x10e   : > { %1185 = vst.msk [vmem:[%s1732_s27 + $0xe0] sm:$0xf] %vm1128_vm1, %v1447_v61  ;;  %v1450_v5 = vpack.c.bf16 %v867_v62, %v867_v62  ;;  %v802_v7 = vadd.f32 %v1555_v4, %v1722_v34  ;;  %v665_v8 = vpop.f32.mrf.mxu0  ;;  %v793_v12 = vpop.f32.mrf.mxu1 }
 0x10f   : > { %1156 = vst.msk [vmem:[%s1732_s27 + $0x6c] sm:$0xf] %vm1128_vm1, %v1418_v1  ;;  %v1416_v9 = vpack.c.bf16 %v833_v2, %v833_v2  ;;  %v838_v10 = vmax.f32 %v674_v3, 0.0  ;;  %v666_v11 = vadd.f32 %v1722_v34, %v665_v8  ;;  %v1448_v13 = vpack.c.bf16 %v865_v6, %v865_v6 }
 0x110   : > { %1188 = vst.msk [vmem:[%s1732_s27 + $0xec] sm:$0xf] %vm1128_vm1, %v1450_v5  ;;  %v870_v14 = vmax.f32 %v802_v7, 0.0  ;;  %v794_v15 = vadd.f32 %v1722_v34, %v793_v12  ;;  %v1524_v16 = vpop.f32.mrf.mxu0  ;;  %v1556_v20 = vpop.f32.mrf.mxu1 }
 0x111   : > { %1154 = vst.msk [vmem:[%s1732_s27 + $0x64] sm:$0xf] %vm1128_vm1, %v1416_v9  ;;  %v1421_v17 = vpack.c.bf16 %v838_v10, %v838_v10  ;;  %v836_v18 = vmax.f32 %v666_v11, 0.0  ;;  %v677_v19 = vadd.f32 %v1524_v16, %v1722_v34  ;;  %1186 = vst.msk [vmem:[%s1732_s27 + $0xe4] sm:$0xf] %vm1128_vm1, %v1448_v13  ;;  %v805_v23 = vadd.f32 %v1556_v20, %v1722_v34 }
 0x112   : > { %v1453_v21 = vpack.c.bf16 %v870_v14, %v870_v14  ;;  %v868_v22 = vmax.f32 %v794_v15, 0.0  ;;  %v668_v24 = vpop.f32.mrf.mxu0  ;;  %v796_v28 = vpop.f32.mrf.mxu1 }
 0x113   : > { %1159 = vst.msk [vmem:[%s1732_s27 + $0x78] sm:$0xf] %vm1128_vm1, %v1421_v17  ;;  %v1419_v25 = vpack.c.bf16 %v836_v18, %v836_v18  ;;  %v839_v26 = vmax.f32 %v677_v19, 0.0  ;;  %v669_v27 = vadd.f32 %v1722_v34, %v668_v24  ;;  %v871_v30 = vmax.f32 %v805_v23, 0.0 }
 0x114   : > { %1191 = vst.msk [vmem:[%s1732_s27 + $0xf8] sm:$0xf] %vm1128_vm1, %v1453_v21  ;;  %v1451_v29 = vpack.c.bf16 %v868_v22, %v868_v22  ;;  %v797_v31 = vadd.f32 %v1722_v34, %v796_v28 }
 0x115   : > { %1157 = vst.msk [vmem:[%s1732_s27 + $0x70] sm:$0xf] %vm1128_vm1, %v1419_v25  ;;  %v1422_v32 = vpack.c.bf16 %v839_v26, %v839_v26  ;;  %v837_v33 = vmax.f32 %v669_v27, 0.0  ;;  %v1454_v35 = vpack.c.bf16 %v871_v30, %v871_v30 }
 0x116   : > { %1189 = vst.msk [vmem:[%s1732_s27 + $0xf0] sm:$0xf] %vm1128_vm1, %v1451_v29  ;;  %v869_v36 = vmax.f32 %v797_v31, 0.0 }
 0x117   : > { %1160 = vst.msk [vmem:[%s1732_s27 + $0x7c] sm:$0xf] %vm1128_vm1, %v1422_v32  ;;  %v1420_v37 = vpack.c.bf16 %v837_v33, %v837_v33  ;;  %1192 = vst.msk [vmem:[%s1732_s27 + $0xfc] sm:$0xf] %vm1128_vm1, %v1454_v35 }
 0x118   : > { %v1452_v38 = vpack.c.bf16 %v869_v36, %v869_v36 }
 0x119   : > { %1158 = vst.msk [vmem:[%s1732_s27 + $0x74] sm:$0xf] %vm1128_vm1, %v1420_v37 }
 0x11a   : > { %1190 = vst.msk [vmem:[%s1732_s27 + $0xf4] sm:$0xf] %vm1128_vm1, %v1452_v38 }
 0x11b PF: > { %s13_s12 = sadd.s32 1, %s1609_s12  }
 0x11c   : > { %p10_p4 = scmp.ge.s32.totalorder %s13_s12, 4  }
 0x11e   :  { %12 = sbr.rel (!%p10_p4) target bundleno = 1 (0x1), region = 62 }

// kernel: _lambda_.23
= control target key start
LH: loop header
LB: loop body
LE: loop exit
PB: predicated region body
PF: predicated region fallthrough
CT: control target
= control target key end

     0   :  { %s1640_s12 = smov 0   ;;  %s1642_s13 = smov 0   ;;  %s1866_s0 = inlined_call_operand.vmem [shape: bf16[2,10,20,5,8], index: 0, kind: input, shape index: {}]   ;;  %s1867_s1 = inlined_call_operand.vmem [shape: bf16[3,9,8,8], index: 1, kind: input, shape index: {}]   ;;  %s1868_s2 = inlined_call_operand.vmem [shape: f32[1,8], index: 2, kind: input, shape index: {}]   ;;  %s1869_s3 = inlined_call_operand.vmem [shape: bf16[2,4,4,4,8], index: 3, kind: output, shape index: {}]  }
   0x1   :  { %s1644_s14 = smov 0   ;;  %s1646_s15 = smov 0  }
   0x2   :  { %s1648_s16 = smov 0   ;;  %s1650_s17 = smov 0  }
   0x3   :  { %s1652_s18 = smov 0  }
   0x4 LB: > { %s25_s19 = sadd.s32 1, %s1602_s15  ;;  %s28_s20 = sadd.s32 1, %s1606_s16  ;;  %s1614_s18 = sphi %s1652_s18, %s13_s18   ;;  %s1610_s17 = sphi %s1650_s17, %s1879_s17   ;;  %s1606_s16 = sphi %s1648_s16, %s1878_s16   ;;  %s1602_s15 = sphi %s1646_s15, %s1877_s15   ;;  %s1598_s14 = sphi %s1644_s14, %s1876_s14   ;;  %s1594_s13 = sphi %s1642_s13, %s1875_s13   ;;  %s1590_s12 = sphi %s1640_s12, %s1874_s12  }
   0x5   : > { %p26_p0 = scmp.ge.s32.totalorder %s25_s19, 3  ;;  %p1339_p1 = scmp.ge.s32.totalorder %s1614_s18, 1 }
   0x6   : > { %p172_p2 = scmp.lt.s32.totalorder %s1614_s18, 25  ;;  %s32_s21 = sadd.s32 1, %s1610_s17 }
   0x7   : > { %s1881_s19 = smov (%p26_p0, %s25_s19), 0  ;;  %s1883_s20 = smov (!%p26_p0, %s28_s20), %s1606_s16 }
   0x8   : > { %p173_p3 = pnand %p1339_p1, %p172_p2  ;;  %p30_p4 = scmp.ge.s32.totalorder %s1883_s20, 4 }
   0x9   : > { %s1340_s22 = sshll.u32 (!%p173_p3), %s1594_s13, 1  ;;  %p208_p6 = scmp.lt.s32.totalorder (!%p173_p3), %s1598_s14, 1 }
   0xa   : > { %s1885_s20 = smov (%p30_p4, %s1883_s20), 0  ;;  %s1887_s21 = smov (!%p30_p4, %s32_s21), %s1610_s17 }
   0xb   : > { %p34_p5 = scmp.ge.s32.totalorder %s1887_s21, 2  ;;  %176 = sbr.rel (%p173_p3) target bundleno = 298 (0x12a), region = 32 }
   0xc   : > { %s207_s23 = sadd.s32 (!%p173_p3), %s1590_s12, %s1340_s22  ;;  %p221_p7 = scmp.lt.s32.totalorder (!%p173_p3), %s1594_s13, 3 }
   0xd   : > { %s1889_s21 = smov (%p34_p5, %s1887_s21), 0  ;;  %p210_p8 = scmp.lt.s32.totalorder (!%p173_p3), %s207_s23, 9 }
   0xe   : > { %p1345_p9 = scmp.ne.s32.totalorder (!%p173_p3), %s1590_s12, 0 }
  0x10   : > { %s1891_s14 = smov (!%p208_p6, %s1598_s14), 1  ;;  %s1893_s23 = smov (!%p210_p8, %s207_s23), 9 }
  0x11   : > { %s1475_s24 = smul.u32 200, %s1891_s14  ;;  %s1343_s25 = sshll.u32 %s1891_s14, 4 }
  0x12   : > { %s1895_s13 = smov (!%p221_p7, %s1594_s13), 3  ;;  %s1474_s26 = smul.u32 20, %s1893_s23 }
  0x13   : > { %s1342_s27 = sshll.u32 %s1895_s13, 2  ;;  %232 = sbr.rel (%p1345_p9) target bundleno = 26 (0x1a), region = 36 }
  0x14   : > { %s214_s28 = sadd.s32 %s1475_s24, %s1474_s26  ;;  %s225_s29 = sadd.s32 %s1343_s25, %s1342_s27 }
  0x15   : > { %s1341_s30 = sshll.u32 %s214_s28, 2  ;;  %s1344_s4 = sshll.u32 %s225_s29, 1 }
  0x16   : > { %s1693_s7 = scalar_lea.vmem %s1866_s0, %s1341_s30  ;;  %s1698_s10 = scalar_lea.vmem %s1869_s3, %s1344_s4 }
  0x18   : > { %vm233_vm0 = vcmask 64512   ;;  %v1616_v0 = vmov 0.0  }
  0x19   : > { %234 = vst.msk [vmem:[#allocation2] sm:$0xff] %vm233_vm0, %v1616_v0  ;;  %235 = vst.msk [vmem:[#allocation2 + $0x8] sm:$0xff] %vm233_vm0, %v1616_v0 }
  0x1a PF: > { %s1401_s11 = smul.u32 36, %s1590_s12  ;;  %vm279_vm1 = vcmask 1043456   ;;  %v263_v1 = vlaneseq  ;;  %v1617_v2 = vmov 0.0   ;;  %vm1618_vm2 = vmmov 0   ;;  %p1396_p10 = scmp.ge.s32.totalorder %s1590_s12, 2 }
  0x1b   : > { %1420 = vmatprep.subr.bf16.mxu0 %v1617_v2  ;;  %1426 = vmatprep.subr.bf16.mxu1 %v1617_v2  ;;  %v1548_v5 = vld.sshfl [vmem:[%s1693_s7] sm:$0xf pattern:$0x76325410]  ;;  %v1619_v7 = vmov 1983009808  }
  0x1c   : > { %s1707_s22 = scalar_lea.vmem %s1867_s1, %s1401_s11  ;;  %1422 = vmatprep.mubr.msk.bf16.mxu0 %vm1618_vm2, %v1617_v2  ;;  %1428 = vmatprep.mubr.msk.bf16.mxu1 %vm1618_vm2, %v1617_v2  ;;  %v1549_v6 = vld.sshfl [vmem:[%s1693_s7 + $0x8] sm:$0xf pattern:$0x76325410]  ;;  %v261_v8 = vunpack.c.l.s4 %v1619_v7  ;;  %v264_v9 = vshrl.u32 %v263_v1, 7  ;;  %vm275_vm3 = vcmask 64512  }
  0x1d   : > { %v239_v3 = vld [vmem:[%s1707_s22] sm:$0xf]  ;;  %v240_v4 = vld [vmem:[%s1707_s22 + $0x4] sm:$0xf]  ;;  %v241_v12 = vld [vmem:[%s1707_s22 + $0x8] sm:$0xf]  ;;  %v274_v28 = vcombine.low %v1548_v5, %v1549_v6 }
  0x1e   : > { %v281_v10 = vsel %vm279_vm1, %v239_v3, 0  ;;  %v356_v11 = vsel %vm279_vm1, %v240_v4, 0  ;;  %v262_v13 = vunpack.c.0.s8 %v261_v8  ;;  %v525_v14 = vsel %vm279_vm1, %v241_v12, 0  ;;  %v242_v18 = vld [vmem:[%s1707_s22 + $0xc] sm:$0xf] }
  0x1f   : > { %1421 = vmatpush3.bf16.msra.mxu0 %v281_v10  ;;  %1427 = vmatpush3.bf16.msra.mxu1 %v356_v11  ;;  %v1550_v15 = vld.sshfl [vmem:[%s1693_s7 + $0x14] sm:$0xf pattern:$0x76325410]  ;;  %v600_v20 = vsel %vm279_vm1, %v242_v18, 0 }
  0x20   : > { %1432 = vmatprep.subr.bf16.mxu0 %v1617_v2  ;;  %v1551_v16 = vld.sshfl [vmem:[%s1693_s7 + $0x1c] sm:$0xf pattern:$0x76325410]  ;;  %1438 = vmatprep.subr.bf16.mxu1 %v1617_v2  ;;  %v1725_v17 = vsub.s32 %v262_v13, %v264_v9  ;;  %vm441_vm4 = vsmask.f32 1280 }
  0x21   : > { %v1353_v19 = vld.sshfl [vmem:[%s1693_s7] sm:$0x13 pattern:$0x76325410]  ;;  %v351_v29 = vcombine.low %v1550_v15, %v1551_v16  ;;  %vm442_vm5 = vsmask.f32 3336 }
  0x22   : > { %v1354_v21 = vld.sshfl [vmem:[%s1693_s7 + $0x4] sm:$0x13 pattern:$0x76325410]  ;;  %v416_v22 = vcombine.high %v1353_v19, %v1353_v19  ;;  %v449_v23 = vshrl.u32 %v1353_v19, 16  ;;  %vm443_vm6 = vmor %vm441_vm4, %vm442_vm5  ;;  %v452_v32 = vshll.u32 %v1353_v19, 16  ;;  %1423 = vmatmul.mubr.msk.bf16.vlgmr.msra.gmra.mxu0 %vm275_vm3, %v274_v28 }
  0x23   : > { %v1355_v24 = vld.sshfl [vmem:[%s1693_s7 + $0x8] sm:$0x13 pattern:$0x76325410]  ;;  %v424_v26 = vcombine.high %v1354_v21, %v1354_v21  ;;  %vm444_vm7 = vsmask.f32 5392  ;;  %1429 = vmatmul.mubr.msk.bf16.vlgmr.msra.gmra.mxu1 %vm275_vm3, %v351_v29  ;;  %1433 = vmatpush3.bf16.msra.mxu0 %v525_v14 }
  0x24   : > { %v1356_v25 = vld.sshfl [vmem:[%s1693_s7 + $0xc] sm:$0x13 pattern:$0x76325410]  ;;  %v432_v27 = vcombine.high %v1355_v24, %v1355_v24  ;;  %vm446_vm8 = vsmask.f32 7448  ;;  %1439 = vmatpush3.bf16.msra.mxu1 %v600_v20  ;;  %vm1735_vm9 = vmor %vm443_vm6, %vm444_vm7  ;;  %1434 = vmatprep.mubr.msk.bf16.mxu0 %vm1618_vm2, %v1617_v2 }
  0x25   : > { %v440_v30 = vcombine.high %v1356_v25, %v1356_v25  ;;  %v451_v31 = vrot.slane %v449_v23, 6  ;;  %v458_v33 = vshll.u32 %v416_v22, 16  ;;  %v463_v34 = vshrl.u32 %v1354_v21, 16  ;;  %1444 = vmatprep.subr.bf16.mxu0 %v1617_v2  ;;  %1440 = vmatprep.mubr.msk.bf16.mxu1 %vm1618_vm2, %v1617_v2  ;;  %vm1750_vm10 = vmor %vm1735_vm9, %vm446_vm8  ;;  %v244_v56 = vld [vmem:[%s1707_s22 + $0x14] sm:$0xf] }
  0x26   : > { %v466_v35 = vshll.u32 %v1354_v21, 16  ;;  %v472_v36 = vshll.u32 %v424_v26, 16  ;;  %v454_v38 = vrot.slane %v452_v32, 7  ;;  %v477_v39 = vshrl.u32 %v1355_v24, 16  ;;  %1450 = vmatprep.subr.bf16.mxu1 %v1617_v2  ;;  %v243_v1 = vld [vmem:[%s1707_s22 + $0x10] sm:$0xf] }
  0x27   : > { %v480_v40 = vshll.u32 %v1355_v24, 16  ;;  %v460_v41 = vrot.slane %v458_v33, 7  ;;  %v465_v42 = vrot.slane %v463_v34, 6  ;;  %v486_v44 = vshll.u32 %v432_v27, 16 }
  0x28   : > { %v468_v43 = vrot.slane %v466_v35, 7  ;;  %v1552_v45 = vld.sshfl [vmem:[%s1693_s7 + $0x28] sm:$0xf pattern:$0x76325410]  ;;  %v455_v46 = vor.u32 %v454_v38, %v451_v31  ;;  %v474_v47 = vrot.slane %v472_v36, 7 }
  0x29   : > { %v479_v48 = vrot.slane %v477_v39, 6  ;;  %v482_v49 = vrot.slane %v480_v40, 7  ;;  %v1553_v50 = vld.sshfl [vmem:[%s1693_s7 + $0x30] sm:$0xf pattern:$0x76325410] }
  0x2a   : > { %v469_v52 = vor.u32 %v468_v43, %v465_v42  ;;  %v491_v53 = vshrl.u32 %v1356_v25, 16  ;;  %v494_v54 = vshll.u32 %v1356_v25, 16  ;;  %v500_v55 = vshll.u32 %v440_v30, 16 }
  0x2b   : > { %v456_v57 = vrot.slane %v455_v46, 2  ;;  %v483_v58 = vor.u32 %v482_v49, %v479_v48  ;;  %v488_v60 = vrot.slane %v486_v44, 7  ;;  %v837_v6 = vsel %vm279_vm1, %v244_v56, 0 }
  0x2c   : > { %v470_v59 = vrot.slane %v469_v52, 2  ;;  %v493_v61 = vrot.slane %v491_v53, 6  ;;  %v496_v62 = vrot.slane %v494_v54, 7  ;;  %v502_v5 = vrot.slane %v500_v55, 7 }
  0x2d   : > { %v461_v63 = vsel %vm1750_vm10, %v456_v57, %v460_v41  ;;  %v484_v0 = vrot.slane %v483_v58, 2  ;;  %v1764_v7 = vld.sshfl [vmem:[%s1693_s7 + $0x3c] sm:$0xf pattern:$0x76325410]  ;;  %v595_v9 = vcombine.low %v1552_v45, %v1553_v50  ;;  %v675_v13 = vsel %vm279_vm1, %v243_v1, 0 }
  0x2e   : > { %v1760_v3 = vsel %vm1750_vm10, %v470_v59, %v474_v47  ;;  %v497_v4 = vor.u32 %v496_v62, %v493_v61  ;;  %v1372_v10 = vld.sshfl [vmem:[%s1693_s7 + $0x28] sm:$0x13 pattern:$0x76325410]  ;;  %v245_v58 = vld [vmem:[%s1707_s22 + $0x18] sm:$0xf] }
  0x2f   : > { %v504_v8 = vcombine.low %v461_v63, %v1760_v3  ;;  %v1770_v11 = vsel %vm1750_vm10, %v484_v0, %v488_v60  ;;  %v1373_v14 = vld.sshfl [vmem:[%s1693_s7 + $0x2c] sm:$0x13 pattern:$0x76325410]  ;;  %v735_v15 = vcombine.high %v1372_v10, %v1372_v10  ;;  %1441 = vmatmul.mubr.msk.bf16.vlgmr.msra.gmra.mxu1 %vm275_vm3, %v595_v9  ;;  %v761_v19 = vshrl.u32 %v1372_v10, 16 }
  0x30   : > { %v498_v12 = vrot.slane %v497_v4, 2  ;;  %v1374_v16 = vld.sshfl [vmem:[%s1693_s7 + $0x30] sm:$0x13 pattern:$0x76325410]  ;;  %v743_v18 = vcombine.high %v1373_v14, %v1373_v14  ;;  %v764_v20 = vshll.u32 %v1372_v10, 16  ;;  %1451 = vmatpush3.bf16.msra.mxu1 %v837_v6  ;;  %1452 = vmatprep.mubr.msk.bf16.mxu1 %vm1618_vm2, %v1617_v2 }
  0x31   : > { %v1375_v22 = vld.sshfl [vmem:[%s1693_s7 + $0x34] sm:$0x13 pattern:$0x76325410]  ;;  %v751_v23 = vcombine.high %v1374_v16, %v1374_v16  ;;  %v770_v24 = vshll.u32 %v735_v15, 16  ;;  %v512_v26 = vrot.slane %v504_v8, %v1725_v17  ;;  %v763_v27 = vrot.slane %v761_v19, 6  ;;  %1462 = vmatprep.subr.bf16.mxu1 %v1617_v2 }
  0x32   : > { %v1778_v21 = vsel %vm1750_vm10, %v498_v12, %v502_v5  ;;  %v766_v28 = vrot.slane %v764_v20, 7  ;;  %v759_v29 = vcombine.high %v1375_v22, %v1375_v22  ;;  %v775_v30 = vshrl.u32 %v1373_v14, 16  ;;  %v1555_v34 = vld.sshfl [vmem:[%s1693_s7 + $0x44] sm:$0xf pattern:$0x76325410] }
  0x33   : > { %v505_v25 = vcombine.low %v1770_v11, %v1778_v21  ;;  %v778_v31 = vshll.u32 %v1373_v14, 16  ;;  %v784_v32 = vshll.u32 %v743_v18, 16  ;;  %v789_v36 = vshrl.u32 %v1374_v16, 16  ;;  %v246_v20 = vld [vmem:[%s1707_s22 + $0x1c] sm:$0xf] }
  0x34   : > { %v767_v35 = vor.u32 %v766_v28, %v763_v27  ;;  %v792_v37 = vshll.u32 %v1374_v16, 16  ;;  %v772_v38 = vrot.slane %v770_v24, 7  ;;  %v777_v39 = vrot.slane %v775_v30, 6  ;;  %v247_v27 = vld [vmem:[%s1707_s22 + $0x20] sm:$0xf] }
  0x35   : > { %v519_v33 = vrot.slane %v505_v25, %v1725_v17  ;;  %v780_v40 = vrot.slane %v778_v31, 7  ;;  %v798_v41 = vshll.u32 %v751_v23, 16  ;;  %v791_v44 = vrot.slane %v789_v36, 6 }
  0x36   : > { %v768_v43 = vrot.slane %v767_v35, 2  ;;  %v794_v45 = vrot.slane %v792_v37, 7  ;;  %v786_v47 = vrot.slane %v784_v32, 7  ;;  %v803_v48 = vshrl.u32 %v1375_v22, 16 }
  0x37   : > { %v520_v42 = vcombine.low %v512_v26, %v519_v33  ;;  %v781_v46 = vor.u32 %v780_v40, %v777_v39  ;;  %v806_v49 = vshll.u32 %v1375_v22, 16  ;;  %v800_v52 = vrot.slane %v798_v41, 7  ;;  %v1394_v63 = vld.sshfl [vmem:[%s1693_s7 + $0x10] sm:$0x13 pattern:$0x76325410] }
  0x38   : > { %v795_v50 = vor.u32 %v794_v45, %v791_v44  ;;  %v812_v53 = vshll.u32 %v759_v29, 16  ;;  %v773_v54 = vsel %vm1750_vm10, %v768_v43, %v772_v38  ;;  %v805_v56 = vrot.slane %v803_v48, 6  ;;  %v1556_v5 = vld.sshfl [vmem:[%s1693_s7 + $0x4] sm:$0xf pattern:$0x76325410] }
  0x39   : > { %1435 = vmatmul.mubr.msk.bf16.vlgmr.msra.gmra.mxu0 %vm275_vm3, %v520_v42  ;;  %v782_v55 = vrot.slane %v781_v46, 2  ;;  %v808_v57 = vrot.slane %v806_v49, 7  ;;  %v670_v0 = vcombine.low %v1764_v7, %v1555_v34  ;;  %v1557_v6 = vld.sshfl [vmem:[%s1693_s7 + $0xc] sm:$0xf pattern:$0x76325410]  ;;  %v1071_v9 = vcombine.high %v1394_v63, %v1394_v63 }
  0x3a   : > { %1445 = vmatpush3.bf16.msra.mxu0 %v675_v13  ;;  %1446 = vmatprep.mubr.msk.bf16.mxu0 %vm1618_vm2, %v1617_v2  ;;  %v796_v59 = vrot.slane %v795_v50, 2  ;;  %v814_v62 = vrot.slane %v812_v53, 7  ;;  %v1115_v10 = vshrl.u32 %v1394_v63, 16  ;;  %v1118_v12 = vshll.u32 %v1394_v63, 16  ;;  %v248_v46 = vld [vmem:[#allocation2] sm:$0xff]  ;;  %v249_v49 = vld [vmem:[#allocation2 + $0x8] sm:$0xff] }
  0x3b   : > { %1456 = vmatprep.subr.bf16.mxu0 %v1617_v2  ;;  %v787_v60 = vsel %vm1750_vm10, %v782_v55, %v786_v47  ;;  %v809_v61 = vor.u32 %v808_v57, %v805_v56  ;;  %v912_v13 = vsel %vm279_vm1, %v245_v58, 0  ;;  %v1124_v16 = vshll.u32 %v1071_v9, 16  ;;  %v1558_v25 = vld.sshfl [vmem:[%s1693_s7 + $0x18] sm:$0xf pattern:$0x76325410] }
  0x3c   : > { %v801_v1 = vsel %vm1750_vm10, %v796_v59, %v800_v52  ;;  %v816_v4 = vcombine.low %v773_v54, %v787_v60  ;;  %v1117_v7 = vrot.slane %v1115_v10, 6  ;;  %v1120_v15 = vrot.slane %v1118_v12, 7  ;;  %v1559_v26 = vld.sshfl [vmem:[%s1693_s7 + $0x20] sm:$0xf pattern:$0x76325410] }
  0x3d   : > { %v810_v8 = vrot.slane %v809_v61, 2  ;;  %v1126_v23 = vrot.slane %v1124_v16, 7  ;;  %v987_v30 = vsel %vm279_vm1, %v246_v20, 0  ;;  %v907_v31 = vcombine.low %v1556_v5, %v1557_v6 }
  0x3e   : > { %v824_v19 = vrot.slane %v816_v4, %v1725_v17  ;;  %v1121_v22 = vor.u32 %v1120_v15, %v1117_v7  ;;  %v1128_v32 = vcombine.low %v1760_v3, %v1770_v11  ;;  %v1149_v34 = vsel %vm279_vm1, %v247_v27, 0 }
  0x3f   : > { %v815_v14 = vsel %vm1750_vm10, %v810_v8, %v814_v62  ;;  %v982_v51 = vcombine.low %v1558_v25, %v1559_v26 }
  0x40   : > { %v817_v18 = vcombine.low %v801_v1, %v815_v14  ;;  %v1122_v28 = vrot.slane %v1121_v22, 2  ;;  %v1136_v36 = vrot.slane %v1128_v32, %v1725_v17 }
  0x41   : > { %1447 = vmatmul.mubr.msk.bf16.vlgmr.msra.gmra.mxu0 %vm275_vm3, %v670_v0 }
  0x42   : > { %1457 = vmatpush3.bf16.msra.mxu0 %v912_v13  ;;  %1458 = vmatprep.mubr.msk.bf16.mxu0 %vm1618_vm2, %v1617_v2  ;;  %v831_v24 = vrot.slane %v817_v18, %v1725_v17  ;;  %v1127_v33 = vsel %vm1750_vm10, %v1122_v28, %v1126_v23 }
  0x43   : > { %1468 = vmatprep.subr.bf16.mxu0 %v1617_v2  ;;  %v1129_v35 = vcombine.low %v1778_v21, %v1127_v33 }
  0x44   : > { %v832_v29 = vcombine.low %v824_v19, %v831_v24 }
  0x45   : > { %v1143_v37 = vrot.slane %v1129_v35, %v1725_v17 }
  0x46   : > { %1453 = vmatmul.mubr.msk.bf16.vlgmr.msra.gmra.mxu1 %vm275_vm3, %v832_v29 }
  0x47   : > { %1463 = vmatpush3.bf16.msra.mxu1 %v987_v30  ;;  %1464 = vmatprep.mubr.msk.bf16.mxu1 %vm1618_vm2, %v1617_v2  ;;  %v1144_v3 = vcombine.low %v1136_v36, %v1143_v37 }
  0x49   : > { %1459 = vmatmul.mubr.msk.bf16.vlgmr.msra.gmra.mxu0 %vm275_vm3, %v907_v31 }
  0x4a   : > { %1469 = vmatpush3.bf16.msra.mxu0 %v1149_v34  ;;  %1470 = vmatprep.mubr.msk.bf16.mxu0 %vm1618_vm2, %v1617_v2 }
  0x4e   : > { %1465 = vmatmul.mubr.msk.bf16.vlgmr.msra.gmra.mxu1 %vm275_vm3, %v982_v51 }
  0x51   : > { %1471 = vmatmul.mubr.msk.bf16.vlgmr.msra.gmra.mxu0 %vm275_vm3, %v1144_v3 }
  0xe2   : > { %v317_v11 = vpop.f32.mrf.mxu0 }
  0xe3   : > { %v392_v21 = vpop.f32.mrf.mxu1  ;;  %v324_v48 = vadd.f32 %v317_v11, %v248_v46 }
  0xe4   : > { %v1424_v38 = vpop.f32.mrf.mxu0 }
  0xe5   : > { %v1430_v39 = vpop.f32.mrf.mxu1  ;;  %v399_v53 = vadd.f32 %v392_v21, %v324_v48 }
  0xe6   : > { %v320_v40 = vpop.f32.mrf.mxu0 }
  0xe7   : > { %v395_v41 = vpop.f32.mrf.mxu1  ;;  %v325_v54 = vadd.f32 %v320_v40, %v249_v49 }
  0xe8   : > { %v1425_v42 = vpop.f32.mrf.mxu0 }
  0xe9   : > { %v1431_v43 = vpop.f32.mrf.mxu1  ;;  %v400_v58 = vadd.f32 %v395_v41, %v325_v54 }
  0xef   : > { %v636_v44 = vpop.f32.mrf.mxu1 }
  0xf1   : > { %v1442_v17 = vpop.f32.mrf.mxu1 }
  0xf3   : > { %v639_v45 = vpop.f32.mrf.mxu1 }
  0xf5   : > { %v1443_v47 = vpop.f32.mrf.mxu1 }
  0xf9   : > { %v561_v2 = vpop.f32.mrf.mxu0 }
  0xfa   : > { %v568_v56 = vadd.f32 %v561_v2, %v399_v53 }
  0xfb   : > { %v1436_v50 = vpop.f32.mrf.mxu0 }
  0xfc   : > { %v643_v60 = vadd.f32 %v636_v44, %v568_v56 }
  0xfd   : > { %v564_v52 = vpop.f32.mrf.mxu0 }
  0xfe   : > { %v569_v61 = vadd.f32 %v564_v52, %v400_v58 }
  0xff   : > { %v1437_v55 = vpop.f32.mrf.mxu0 }
 0x100   : > { %v644_v4 = vadd.f32 %v639_v45, %v569_v61 }
 0x101   : > { %v711_v57 = vpop.f32.mrf.mxu0 }
 0x102   : > { %v718_v63 = vadd.f32 %v711_v57, %v643_v60 }
 0x103   : > { %v1448_v59 = vpop.f32.mrf.mxu0 }
 0x105   : > { %v714_v62 = vpop.f32.mrf.mxu0 }
 0x106   : > { %v873_v0 = vpop.f32.mrf.mxu1  ;;  %v719_v9 = vadd.f32 %v714_v62, %v644_v4 }
 0x107   : > { %v1449_v1 = vpop.f32.mrf.mxu0  ;;  %v880_v8 = vadd.f32 %v873_v0, %v718_v63 }
 0x108   : > { %v1454_v5 = vpop.f32.mrf.mxu1 }
 0x109   : > { %v948_v6 = vpop.f32.mrf.mxu0 }
 0x10a   : > { %v876_v10 = vpop.f32.mrf.mxu1  ;;  %v955_v13 = vadd.f32 %v948_v6, %v880_v8 }
 0x10b   : > { %v1460_v12 = vpop.f32.mrf.mxu0  ;;  %v881_v15 = vadd.f32 %v876_v10, %v719_v9 }
 0x10c   : > { %v1455_v14 = vpop.f32.mrf.mxu1 }
 0x10d   : > { %v951_v7 = vpop.f32.mrf.mxu0 }
 0x10e   : > { %v1023_v16 = vpop.f32.mrf.mxu1  ;;  %v956_v20 = vadd.f32 %v951_v7, %v881_v15 }
 0x10f   : > { %v1461_v18 = vpop.f32.mrf.mxu0  ;;  %v1030_v19 = vadd.f32 %v1023_v16, %v955_v13 }
 0x110   : > { %v1466_v22 = vpop.f32.mrf.mxu1 }
 0x111   : > { %v1185_v23 = vpop.f32.mrf.mxu0 }
 0x112   : > { %v1192_v24 = vadd.f32 %v1185_v23, %v1030_v19  ;;  %v1026_v25 = vpop.f32.mrf.mxu1 }
 0x113   : > { %v1472_v26 = vpop.f32.mrf.mxu0  ;;  %v1031_v27 = vadd.f32 %v1026_v25, %v956_v20  ;;  %1197 = sbr.rel (%p1396_p10) target bundleno = 281 (0x119), region = 40 }
 0x114   : > { %v1467_v28 = vpop.f32.mrf.mxu1 }
 0x115   : > { %v1188_v29 = vpop.f32.mrf.mxu0 }
 0x116   : > { %v1193_v30 = vadd.f32 %v1188_v29, %v1031_v27 }
 0x117   : > { %v1473_v31 = vpop.f32.mrf.mxu0 }
 0x118   : > { %1198 = vst.msk [vmem:[#allocation2] sm:$0xff] %vm275_vm3, %v1192_v24  ;;  %1199 = vst.msk [vmem:[#allocation2 + $0x8] sm:$0xff] %vm275_vm3, %v1193_v30 }
 0x119 PF: > { %p1397_p11 = scmp.ne.s32.totalorder %s1590_s12, 2 }
 0x11b   : > { %1203 = sbr.rel (%p1397_p11) target bundleno = 298 (0x12a), region = 44 }
 0x120   : > { %v1398_v32 = vld [vmem:[%s1868_s2] ss:$0 sm:$0xff]  ;;  %vm1225_vm11 = vcmask 58368  }
 0x121   : > { %v1211_v33 = vadd.f32 %v1398_v32, %v1192_v24  ;;  %v1212_v34 = vadd.f32 %v1398_v32, %v1193_v30 }
 0x123   : > { %v1213_v35 = vmax.f32 %v1211_v33, 0.0  ;;  %v1214_v36 = vmax.f32 %v1212_v34, 0.0 }
 0x125   : > { %v1221_v37 = vpack.c.bf16 %v1213_v35, %v1213_v35  ;;  %v1217_v51 = vcombine.high %v1213_v35, %v1213_v35  ;;  %v1223_v3 = vpack.c.bf16 %v1214_v36, %v1214_v36  ;;  %v1218_v11 = vcombine.high %v1214_v36, %v1214_v36 }
 0x127   : > { %1226 = vst.msk [vmem:[%s1698_s10] sm:$0x3] %vm1225_vm11, %v1221_v37  ;;  %v1222_v21 = vpack.c.bf16 %v1217_v51, %v1217_v51  ;;  %1228 = vst.msk [vmem:[%s1698_s10 + $0x4] sm:$0x3] %vm1225_vm11, %v1223_v3  ;;  %v1224_v38 = vpack.c.bf16 %v1218_v11, %v1218_v11 }
 0x129   : > { %1227 = vst.msk [vmem:[%s1698_s10 + $0x2] sm:$0x3] %vm1225_vm11, %v1222_v21  ;;  %1229 = vst.msk [vmem:[%s1698_s10 + $0x6] sm:$0x3] %vm1225_vm11, %v1224_v38 }
 0x12a PF: > { %s13_s18 = sadd.s32 1, %s1614_s18   ;;  %s1874_s12 = smov %s1602_s15 }
 0x12b   : > { %p10_p12 = scmp.ge.s32.totalorder %s13_s18, 26   ;;  %s1875_s13 = smov %s1606_s16 }
 0x12c   : > { %s1876_s14 = smov %s1610_s17  ;;  %s1877_s15 = smov %s1881_s19 }
 0x12d   : > { %s1878_s16 = smov %s1885_s20  ;;  %s1879_s17 = smov %s1889_s21 }
 0x12e   :  { %12 = sbr.rel (!%p10_p12) target bundleno = 4 (0x4), region = 80 }

// kernel: _lambda_.24
= control target key start
LH: loop header
LB: loop body
LE: loop exit
PB: predicated region body
PF: predicated region fallthrough
CT: control target
= control target key end

     0   :  { %s612_s15 = smov 0   ;;  %s661_s0 = inlined_call_operand.vmem [shape: bf16[128,8], index: 0, kind: input, shape index: {}]   ;;  %s662_s1 = inlined_call_operand.vmem [shape: bf16[8,32], index: 1, kind: input, shape index: {}]   ;;  %s663_s2 = inlined_call_operand.vmem [shape: f32[1,32], index: 2, kind: input, shape index: {}]   ;;  %s664_s3 = inlined_call_operand.vmem [shape: bf16[128,32], index: 3, kind: input, shape index: {}]   ;;  %s665_s4 = inlined_call_operand.vmem [shape: bf16[128,32], index: 4, kind: output, shape index: {}]  }
   0x1 LB: > { %s491_s16 = sadd.s32 4294967295, %s585_s15   ;;  %p495_p0 = scmp.ge.s32.totalorder %s585_s15, 1  ;;  %s585_s15 = sphi %s612_s15, %s14_s15  }
   0x2   : > { %p174_p1 = scmp.lt.s32.totalorder %s585_s15, 3 }
   0x4   : > { %p175_p2 = pnand %p495_p0, %p174_p1 }
   0x5   : > { %s496_s19 = sshll.u32 (!%p175_p2), %s491_s16, 3 }
   0x6   : > { %178 = sbr.rel (%p175_p2) target bundleno = 227 (0xe3), region = 36  ;;  %p206_p3 = scmp.lt.s32.totalorder (!%p175_p2), %s496_s19, 15 }
   0xb   : > { %v232_v0 = vld [vmem:[%s662_s1] sm:$0xf]  ;;  %vm273_vm0 = vcmask 1043456   ;;  %s667_s19 = smov (!%p206_p3, %s496_s19), 15  ;;  %vm260_vm1 = vcmask 64512   ;;  %vm414_vm2 = vcmask 257024  }
   0xc   : > { %565 = vmatprep.subr.msk.bf16.mxu0 %vm273_vm0, %v232_v0  ;;  %566 = vmatprep.subr.msk.bf16.mxu1 %vm273_vm0, %v232_v0  ;;  %v275_v1 = vsel %vm273_vm0, %v232_v0, 0  ;;  %s623_s20 = sshll.u32 %s667_s19, 2  ;;  %v502_v6 = vld [vmem:[%s663_s2] ss:$0 sm:$0xff] }
   0xd   : > { %554 = vmatpush3.bf16.msra.mxu0 %v275_v1  ;;  %564 = vmatpush3.bf16.msra.mxu1 %v275_v1  ;;  %s209_s23 = scalar_lea.vmem %s661_s0, %s623_s20  ;;  %s215_s26 = scalar_lea.vmem %s664_s3, %s623_s20 }
   0xe   : > { %v575_v2 = vld [vmem:[%s209_s23] sm:$0xff]   ;;  %v576_v3 = vld [vmem:[%s209_s23 + $0x10] sm:$0xff]   ;;  %v577_v4 = vld [vmem:[%s209_s23 + $0x8] sm:$0xff]   ;;  %s640_s5 = scalar_lea.vmem %s665_s4, %s623_s20 }
   0xf   : > { %555 = vmatprep.mubr.msk.bf16.mxu0 %vm260_vm1, %v575_v2  ;;  %559 = vmatprep.mubr.msk.bf16.mxu1 %vm260_vm1, %v576_v3  ;;  %v578_v5 = vld [vmem:[%s209_s23 + $0x18] sm:$0xff]   ;;  %v545_v7 = vld [vmem:[%s215_s26 + $0x8] sm:$0xff]   ;;  %v530_v9 = vld [vmem:[%s215_s26] sm:$0xff]  }
  0x10   : > { %556 = vmatmul.mubr.msk.bf16.vlgmr.msra.gmra.mxu0 %vm260_vm1, %v577_v4  ;;  %560 = vmatmul.mubr.msk.bf16.vlgmr.msra.gmra.mxu1 %vm260_vm1, %v578_v5  ;;  %v547_v8 = vld [vmem:[%s215_s26 + $0x18] sm:$0xff]   ;;  %v546_v11 = vld [vmem:[%s215_s26 + $0x10] sm:$0xff]   ;;  %v535_v13 = vunpack.c.l.bf16 %v545_v7  ;;  %v531_v18 = vunpack.c.l.bf16 %v530_v9  ;;  %v536_v23 = vunpack.c.h.bf16 %v545_v7  ;;  %v532_v32 = vunpack.c.h.bf16 %v530_v9 }
  0x11   : > { %v543_v16 = vunpack.c.l.bf16 %v547_v8  ;;  %v539_v22 = vunpack.c.l.bf16 %v546_v11  ;;  %v544_v27 = vunpack.c.h.bf16 %v547_v8  ;;  %v540_v37 = vunpack.c.h.bf16 %v546_v11 }
  0xd0   : > { %v557_v10 = vpop.f32.mrf.mxu0  ;;  %v561_v14 = vpop.f32.mrf.mxu1 }
  0xd1   : > { %v320_v12 = vadd.f32 %v557_v10, %v502_v6  ;;  %v336_v15 = vadd.f32 %v561_v14, %v502_v6 }
  0xd2   : > { %v311_v17 = vpop.f32.mrf.mxu0  ;;  %v327_v21 = vpop.f32.mrf.mxu1 }
  0xd3   : > { %v344_v19 = vmax.f32 %v320_v12, 0.0  ;;  %v312_v20 = vadd.f32 %v502_v6, %v311_v17  ;;  %v348_v24 = vmax.f32 %v336_v15, 0.0  ;;  %v328_v25 = vadd.f32 %v502_v6, %v327_v21 }
  0xd4   : > { %v558_v26 = vpop.f32.mrf.mxu0  ;;  %v562_v31 = vpop.f32.mrf.mxu1 }
  0xd5   : > { %v368_v28 = vadd.f32 %v535_v13, %v344_v19  ;;  %v342_v29 = vmax.f32 %v312_v20, 0.0  ;;  %v323_v30 = vadd.f32 %v558_v26, %v502_v6  ;;  %v372_v33 = vadd.f32 %v543_v16, %v348_v24 }
  0xd6   : > { %v346_v34 = vmax.f32 %v328_v25, 0.0  ;;  %v339_v35 = vadd.f32 %v562_v31, %v502_v6  ;;  %v314_v36 = vpop.f32.mrf.mxu0  ;;  %v330_v42 = vpop.f32.mrf.mxu1 }
  0xd7   : > { %v376_v38 = vmax.f32 %v368_v28, 0.0  ;;  %v366_v39 = vadd.f32 %v531_v18, %v342_v29  ;;  %v345_v40 = vmax.f32 %v323_v30, 0.0  ;;  %v315_v41 = vadd.f32 %v502_v6, %v314_v36 }
  0xd8   : > { %v380_v43 = vmax.f32 %v372_v33, 0.0  ;;  %v370_v44 = vadd.f32 %v539_v22, %v346_v34  ;;  %v349_v45 = vmax.f32 %v339_v35, 0.0  ;;  %v331_v46 = vadd.f32 %v502_v6, %v330_v42 }
  0xd9   : > { %v523_v47 = vpack.c.bf16 %v376_v38, %v376_v38  ;;  %v374_v48 = vmax.f32 %v366_v39, 0.0  ;;  %v369_v49 = vadd.f32 %v536_v23, %v345_v40  ;;  %v343_v50 = vmax.f32 %v315_v41, 0.0 }
  0xda   : > { %v527_v51 = vpack.c.bf16 %v380_v43, %v380_v43  ;;  %v378_v52 = vmax.f32 %v370_v44, 0.0  ;;  %v373_v53 = vadd.f32 %v544_v27, %v349_v45  ;;  %v347_v54 = vmax.f32 %v331_v46, 0.0 }
  0xdb   : > { %417 = vst.msk [vmem:[%s640_s5 + $0x8] sm:$0xf] %vm414_vm2, %v523_v47  ;;  %v521_v55 = vpack.c.bf16 %v374_v48, %v374_v48  ;;  %v377_v56 = vmax.f32 %v369_v49, 0.0  ;;  %v367_v57 = vadd.f32 %v532_v32, %v343_v50 }
  0xdc   : > { %421 = vst.msk [vmem:[%s640_s5 + $0x18] sm:$0xf] %vm414_vm2, %v527_v51  ;;  %v525_v58 = vpack.c.bf16 %v378_v52, %v378_v52  ;;  %v381_v59 = vmax.f32 %v373_v53, 0.0  ;;  %v371_v60 = vadd.f32 %v540_v37, %v347_v54 }
  0xdd   : > { %415 = vst.msk [vmem:[%s640_s5] sm:$0xf] %vm414_vm2, %v521_v55  ;;  %v524_v61 = vpack.c.bf16 %v377_v56, %v377_v56  ;;  %v375_v62 = vmax.f32 %v367_v57, 0.0 }
  0xde   : > { %419 = vst.msk [vmem:[%s640_s5 + $0x10] sm:$0xf] %vm414_vm2, %v525_v58  ;;  %v528_v63 = vpack.c.bf16 %v381_v59, %v381_v59  ;;  %v379_v0 = vmax.f32 %v371_v60, 0.0 }
  0xdf   : > { %418 = vst.msk [vmem:[%s640_s5 + $0xc] sm:$0xf] %vm414_vm2, %v524_v61  ;;  %v522_v1 = vpack.c.bf16 %v375_v62, %v375_v62 }
  0xe0   : > { %422 = vst.msk [vmem:[%s640_s5 + $0x1c] sm:$0xf] %vm414_vm2, %v528_v63  ;;  %v526_v2 = vpack.c.bf16 %v379_v0, %v379_v0 }
  0xe1   : > { %416 = vst.msk [vmem:[%s640_s5 + $0x4] sm:$0xf] %vm414_vm2, %v522_v1 }
  0xe2   : > { %420 = vst.msk [vmem:[%s640_s5 + $0x14] sm:$0xf] %vm414_vm2, %v526_v2 }
  0xe3 PF: > { %s14_s15 = sadd.s32 1, %s585_s15  }
  0xe4   : > { %p11_p4 = scmp.ge.s32.totalorder %s14_s15, 4  }
  0xe6   :  { %13 = sbr.rel (!%p11_p4) target bundleno = 1 (0x1), region = 69 }

// kernel: _lambda_.25
= control target key start
LH: loop header
LB: loop body
LE: loop exit
PB: predicated region body
PF: predicated region fallthrough
CT: control target
= control target key end

     0   :  { %6 = vsyncpa [#allocation4], 0  ;;  %s564_s0 = inlined_call_operand.vmem [shape: bf16[2,64,32], index: 0, kind: input, shape index: {}]   ;;  %s565_s1 = inlined_call_operand.hbm [shape: f32[2,1,32], index: 1, kind: output, shape index: {}]  }
   0x1   :  { %8 = vsyncpa [#allocation4 + $0x1], 0  ;;  %s454_s6 = smov 0   ;;  %s456_s7 = smov 0  }
   0x2   :  { %s458_s8 = smov 0   ;;  %s460_s9 = smov 0  }
   0x3   :  { %s462_s10 = smov 0   ;;  %s464_s11 = smov 0  }
   0x4 LB: > { %s278_s12 = sadd.s32 4294967295, %s440_s11   ;;  %s279_s13 = sadd.s32 4294967294, %s440_s11   ;;  %s440_s11 = sphi %s464_s11, %s14_s11   ;;  %s436_s10 = sphi %s462_s10, %s572_s10   ;;  %s432_s9 = sphi %s460_s9, %s571_s9   ;;  %s428_s8 = sphi %s458_s8, %s570_s8   ;;  %s424_s7 = sphi %s456_s7, %s569_s7   ;;  %s420_s6 = sphi %s454_s6, %s568_s6  }
   0x5   : > { %s26_s14 = sadd.s32 1, %s436_s10  ;;  %s61_s15 = sadd.s32 1, %s428_s8 }
   0x6   : > { %p28_p0 = scmp.ge.s32.totalorder %s26_s14, 2  ;;  %p71_p1 = scmp.ne.s32.totalorder %s428_s8, %s424_s7 }
   0x7   : > { %p72_p2 = scmp.eq.s32.totalorder %s278_s12, 1  ;;  %p77_p3 = scmp.ne.s32.totalorder %s424_s7, %s420_s6 }
   0x8   : > { %s574_s14 = smov (%p28_p0, %s26_s14), 0  ;;  %p78_p5 = scmp.eq.s32.totalorder %s279_s13, 1 }
   0x9   : > { %p494_p4 = por %p72_p2, %p71_p1  ;;  %s58_s17 = ssub.s32 %s436_s10, %s574_s14 }
   0xa   : > { %p282_p6 = scmp.ge.s32.totalorder %s440_s11, 1  ;;  %p59_p7 = scmp.eq.s32.totalorder %s58_s17, 0 }
   0xb   : > { %p501_p8 = por %p78_p5, %p77_p3  ;;  %p109_p9 = scmp.lt.s32.totalorder %s440_s11, 3 }
   0xc   : > { %s507_s19 = scalar_select %p59_p7, %s428_s8, %s61_s15  }
   0xd   : > { %p110_p10 = pnand %p282_p6, %p109_p9 }
   0xe   : > { %p133_p11 = scmp.lt.s32.totalorder (!%p110_p10), %s432_s9, 1  ;;  %s130_s25 = sand.u32 (!%p110_p10), 1, %s424_s7  }
   0xf   : > { %113 = sbr.rel (%p110_p10) target bundleno = 79 (0x4f), region = 24  ;;  %s131_s26 = scalar_lea.vmem (!%p110_p10), [#allocation3], %s130_s25 }
  0x10   : > { %s209_s27 = sshll.u32 (!%p110_p10), %s131_s26, 4  ;;  %s285_s28 = sshll.u32 (!%p110_p10), %s432_s9, 4  ;;  %s210_s27 = int_to_ptr.vmem [resolvable:$true] %s209_s27 }
  0x11   : > { %s207_s2 = scalar_lea.hbm (!%p110_p10), %s565_s1, %s285_s28  ;;  %s197_s3 = scalar_lea.sflag (!%p110_p10), [#allocation4], %s130_s25 }
  0x12   : > { %s364_s4 = scalar_lea.vmem (!%p110_p10), %s210_s27, 16  ;;  %s443_s5 = smov (!%p110_p10), [#allocation3]  }
  0x13   : > { %p365_p12 = scmp.ne.s32.totalorder (!%p110_p10), %s210_s27, %s364_s4  ;;  %s368_s12 = sshll.u32 (!%p110_p10), %s443_s5, 4  ;;  %s369_s12 = int_to_ptr.vmem [resolvable:$false] %s368_s12 }
  0x14   : > { %vm146_vm0 = vcmask 253952   ;;  %v442_v0 = vmov 0.0   ;;  %s134_s20 = scalar_select %p133_p11, %s432_s9, 1  ;;  %vm165_vm1 = vcmask 261120  }
  0x15   : > { %147 = vst.msk [vmem:[#allocation2] sm:$0x1] %vm146_vm0, %v442_v0  ;;  %p366_p13 = pnand %p365_p12, %p494_p4  ;;  %s370_s13 = scalar_lea.vmem %s369_s12, 32 }
  0x16   : > { %s288_s21 = sshll.u32 %s134_s20, 5  ;;  %p371_p1 = scmp.lt.s32.totalorder %s210_s27, %s369_s12 }
  0x17   : > { %s140_s24 = scalar_lea.vmem %s564_s0, %s288_s21  ;;  %p367_p0 = pneg %p366_p13 }
  0x18   : > { %v290_v1 = vld [vmem:[%s140_s24] sm:$0xff]   ;;  %v305_v2 = vld [vmem:[%s140_s24 + $0x8] sm:$0xff]   ;;  %v306_v3 = vld [vmem:[%s140_s24 + $0x10] sm:$0xff]   ;;  %p372_p2 = scmp.lt.s32.totalorder %s370_s13, %s364_s4 }
  0x19   : > { %v291_v4 = vunpack.c.l.bf16 %v290_v1  ;;  %v292_v5 = vunpack.c.h.bf16 %v290_v1  ;;  %v295_v6 = vunpack.c.l.bf16 %v305_v2  ;;  %v296_v7 = vunpack.c.h.bf16 %v305_v2  ;;  %v307_v12 = vld [vmem:[%s140_s24 + $0x18] sm:$0xff]  }
  0x1a   : > { %v299_v8 = vunpack.c.l.bf16 %v306_v3  ;;  %v300_v14 = vunpack.c.h.bf16 %v306_v3  ;;  %v303_v17 = vunpack.c.l.bf16 %v307_v12  ;;  %v304_v20 = vunpack.c.h.bf16 %v307_v12  ;;  %p373_p3 = por %p372_p2, %p371_p1 }
  0x1b   : > { %v166_v9 = vsel %vm165_vm1, %v291_v4, 0.0  ;;  %v167_v10 = vsel %vm165_vm1, %v292_v5, 0.0  ;;  %v169_v11 = vsel %vm165_vm1, %v295_v6, 0.0  ;;  %v171_v15 = vsel %vm165_vm1, %v296_v7, 0.0 }
  0x1c   : > { %v168_v13 = vadd.f32 %v167_v10, %v166_v9  ;;  %v173_v18 = vsel %vm165_vm1, %v299_v8, 0.0  ;;  %v175_v21 = vsel %vm165_vm1, %v300_v14, 0.0  ;;  %v177_v23 = vsel %vm165_vm1, %v303_v17, 0.0  ;;  %v148_v33 = vld [vmem:[#allocation2] sm:$0x1]  ;;  %p374_p5 = pnand %p373_p3, %p367_p0 }
  0x1d   : > { %v179_v25 = vsel %vm165_vm1, %v304_v20, 0.0 }
  0x1e   : > { %v170_v16 = vadd.f32 %v169_v11, %v168_v13 }
  0x20   : > { %v172_v19 = vadd.f32 %v171_v15, %v170_v16 }
  0x22   : > { %v174_v22 = vadd.f32 %v173_v18, %v172_v19 }
  0x24   : > { %v176_v24 = vadd.f32 %v175_v21, %v174_v22 }
  0x26   : > { %v178_v26 = vadd.f32 %v177_v23, %v176_v24 }
  0x28   : > { %v180_v27 = vadd.f32 %v179_v25, %v178_v26 }
  0x2a   : > { %v181_v28 = vrot.slane %v180_v27, 4 }
  0x2c   : > { %v182_v29 = vadd.f32 %v181_v28, %v180_v27 }
  0x2e   : > { %v183_v30 = vrot.slane %v182_v29, 2 }
  0x30   : > { %v184_v31 = vadd.f32 %v183_v30, %v182_v29 }
  0x32   : > { %v185_v32 = vrot.slane %v184_v31, 1 }
  0x34   : > { %v186_v34 = vadd.f32 %v185_v32, %v184_v31 }
  0x36   : > { %v187_v35 = vadd.f32 %v186_v34, %v148_v33 }
  0x38   : > { %189 = vst.msk [vmem:[#allocation2] sm:$0x1] %vm146_vm0, %v187_v35 }
  0x3f   : > { %v193_v36 = vld [vmem:[#allocation2] sm:$0x1] }
  0x40   : > { %v194_v37 = vmul.f32 0.015625, %v193_v36 }
  0x42   : > { %195 = vst.msk [vmem:[%s131_s26] sm:$0x1] %vm146_vm0, %v194_v37 }
  0x43   : > { %377 = shalt.err (!%p374_p5)
}
  0x44   : > { %s378_s9 = scalar_lea.hbm %s207_s2, 16  ;;  %s382_s20 = scalar_lea.hbm %s565_s1, 32 }
  0x45   : > { %p379_p6 = scmp.ne.s32.totalorder %s207_s2, %s378_s9  ;;  %p383_p10 = scmp.lt.s32.totalorder %s207_s2, %s565_s1 }
  0x46   : > { %p384_p11 = scmp.lt.s32.totalorder %s382_s20, %s378_s9 }
  0x47   : > { %p380_p7 = pnand %p379_p6, %p494_p4 }
  0x48   : > { %p385_p12 = por %p384_p11, %p383_p10 }
  0x49   : > { %p381_p9 = pneg %p380_p7 }
  0x4b   : > { %p386_p13 = pnand %p385_p12, %p381_p9 }
  0x4d   : > { %389 = shalt.err (!%p386_p13)
}
  0x4e   : > { %308 = dma.vmem_to_hbm [thread:$0]  (%p494_p4), %s210_s27, 16, %s207_s2, %s197_s3  }
  0x4f PF: > { %p314_p0 = scmp.ge.s32.totalorder %s440_s11, 2  ;;  %s221_s23 = sand.u32 1, %s420_s6  }
  0x50   : > { %s222_s24 = scalar_lea.sflag [#allocation4], %s221_s23 }
  0x51   : > { %p311_p1 = pnand %p314_p0, %p501_p8 }
  0x53   : > { %p312_p2 = pneg %p311_p1 }
  0x55   : > { %415 = dma.done.wait (%p312_p2), %s222_s24, 16  }
  0x56   : > { %417 = vsyncadd (%p312_p2), %s222_s24, 4294967280  ;;  %s14_s11 = sadd.s32 1, %s440_s11   ;;  %s568_s6 = smov %s424_s7 }
  0x57   : > { %p11_p3 = scmp.ge.s32.totalorder %s14_s11, 4   ;;  %s569_s7 = smov %s428_s8 }
  0x58   : > { %s570_s8 = smov %s507_s19  ;;  %s571_s9 = smov %s436_s10 }
  0x59   : > { %s572_s10 = smov %s574_s14  ;;  %13 = sbr.rel (!%p11_p3) target bundleno = 4 (0x4), region = 67 }
  0x5e   :  { %226 = vsyncpa [#allocation4], 1 }
  0x5f   :  { %228 = vsyncpa [#allocation4 + $0x1], 1 }

</bundles_post_ra>
